<compile_context>
chip_gen: v7x
topology: tpu7x:2x2x1
jax: 0.10.0
libtpu: 0.0.40
codegen_flags: <defaults>
</compile_context>

<pallas_src>
import jax
import jax.numpy as jnp
from jax.experimental import pallas as pl
from jax.experimental.pallas import tpu as pltpu

# Keep each proto input buffer (32 * tn * 4 B) at <= 4 MiB so the
# double-buffered proto block stays ~8 MiB: inside every generation's scoped
# VMEM default and far below v7x's 64 MiB physical VMEM, while still being
# large enough to sit on the HBM roofline.
_TN_CAP = 32768


def _mask_kernel(mask_ref, proto_ref, out_ref):
    # mask_ref : (box, 32)  f32   (grid-invariant, index_map -> (0, 0))
    # proto_ref: (32, TN)   f32   (one lane tile of the flattened proto map)
    # out_ref  : (box, TN)  uint8
    feat = jnp.dot(mask_ref[...], proto_ref[...].astype(jnp.float32),
                   preferred_element_type=jnp.float32)          # MXU
    scaled = feat * 255.0                                        # reference op order
    out_ref[...] = jnp.clip(scaled, 0.0, 255.0).astype(jnp.uint8)


def _min_grid_steps():
    """Generation-aware minimum number of grid steps.

    v7x has 2 TensorCores sharing the 'parallel' axis: give each core >=2
    steps so its input DMA / writeback pipelines.  v5e / v6e are single-core:
    the fewest steps wins (each step costs ~0.35 us of fixed overhead)."""
    try:
        kind = jax.devices()[0].device_kind.lower()
    except Exception:  # pragma: no cover - defensive, e.g. interpret mode
        kind = ""
    if "v7" in kind:
        return 4
    return 1


def _pick_tn(hw, min_steps):
    """Largest lane tile (multiple of 128, divisor of hw) such that the grid
    has >= min_steps steps and the proto buffer stays <= _TN_CAP lanes."""
    if hw % 128 != 0:
        raise ValueError(f"H*W={hw} must be a multiple of 128")
    n128 = hw // 128
    steps = max(1, min_steps)
    while steps <= n128:
        if n128 % steps == 0 and (hw // steps) <= _TN_CAP:
            return hw // steps
        steps += 1
    return 128  # fallback: lane-sized tiles


def model_forward(mask_info, output1, rect=None, m_confThreshold=None, *,
                  tn=None, protos_dtype=None):
    """mask_info: (1, box, 32) f32; output1: (1, 32, H, W) f32 (NCHW).
    rect / m_confThreshold are accepted for signature parity but unused
    (exactly as in the PyTorch forward).

    protos_dtype: optionally feed the proto tensor in bf16 to halve the
    dominant HBM read (~1.9x kernel speedup); off by default to preserve f32
    semantics of the reference."""
    del rect, m_confThreshold
    _, box, k = mask_info.shape
    _, c, h, w = output1.shape
    assert c == k == 32, (c, k)
    hw = h * w
    if tn is None:
        tn = _pick_tn(hw, _min_grid_steps())
    assert hw % tn == 0 and tn % 128 == 0

    mask2d = mask_info[0].astype(jnp.float32)     # (box, 32)
    protos = output1[0].reshape(c, hw)            # (32, H*W) == output1[0].view(32, -1)
    if protos_dtype is not None:
        protos = protos.astype(protos_dtype)

    grid = hw // tn

    # Explicit VMEM budget sized to the actual (double-buffered) blocks,
    # never below a safe 32 MiB floor.
    proto_bytes = k * tn * protos.dtype.itemsize
    vmem_bytes = 2 * (proto_bytes + box * k * 4 + box * tn)
    vmem_limit = max(vmem_bytes + (4 << 20), 32 << 20)

    cost = pl.CostEstimate(
        flops=2 * box * k * hw,
        transcendentals=0,
        bytes_accessed=k * hw * protos.dtype.itemsize + box * k * 4 + box * hw,
    )

    out2d = pl.pallas_call(
        _mask_kernel,
        out_shape=jax.ShapeDtypeStruct((box, hw), jnp.uint8),
        grid_spec=pltpu.PrefetchScalarGridSpec(
            num_scalar_prefetch=0,
            grid=(grid,),
            in_specs=[
                pl.BlockSpec((box, k), lambda j: (0, 0)),   # grid-invariant mask
                pl.BlockSpec((k, tn), lambda j: (0, j)),    # lane tile of protos
            ],
            out_specs=pl.BlockSpec((box, tn), lambda j: (0, j)),
        ),
        compiler_params=pltpu.CompilerParams(
            dimension_semantics=("parallel",),
            vmem_limit_bytes=vmem_limit),
        cost_estimate=cost,
    )(mask2d, protos)

    return out2d[None]                            # (1, box, H*W) uint8


if __name__ == "__main__":
    key = jax.random.PRNGKey(0)
    k0, k1, k2, k3 = jax.random.split(key, 4)

    box_size = 8
    H = W = 160

    mask_info = jax.random.uniform(k0, (1, box_size, 32), dtype=jnp.float32)
    output1 = jax.random.uniform(k1, (1, 32, H, W), dtype=jnp.float32)
    rect = jax.random.uniform(k2, (1, 6), dtype=jnp.float32)
    m_confThreshold = jax.random.uniform(k3, (1, 1), dtype=jnp.float32)

    out = model_forward(mask_info, output1, rect, m_confThreshold)
    out = jax.block_until_ready(out)

    # Pure-JAX reference (matmul -> *255 -> saturate -> truncate).
    ref = jnp.clip(
        jnp.matmul(mask_info[0], output1[0].reshape(32, -1)) * 255.0, 0.0, 255.0
    ).astype(jnp.uint8)[None]

    assert out.shape == (1, box_size, H * W) and out.dtype == jnp.uint8
    # Allow at most a 1-count mismatch from MXU f32 rounding differences at
    # uint8 truncation boundaries (exact for these inputs in practice).
    diff = jnp.abs(out.astype(jnp.int32) - ref.astype(jnp.int32))
    assert int(jnp.max(diff)) <= 1

    print("KERNEL_OK")
</pallas_src>

<mosaic_0001>
module attributes {stable_mosaic.version = 11 : i64} {
  func.func @_mask_kernel(%arg0: i32, %arg1: memref<8x32xf32, #tpu.memory_space<vmem>>, %arg2: memref<32x25600xf32, #tpu.memory_space<vmem>>, %arg3: memref<8x25600xi8, #tpu.memory_space<vmem>>) attributes {dimension_semantics = [#tpu.dimension_semantics<parallel>], iteration_bounds = array<i64: 1>, scalar_prefetch = 0 : i64, scratch_operands = 0 : i64, tpu.core_type = #tpu.core_type<tc>, window_params = [{pipeline_mode = #tpu.pipeline_mode<synchronous>, transform_indices = @transform_0, window_bounds = array<i64: 8, 32>}, {transform_indices = @transform_1, window_bounds = array<i64: 32, 25600>}, {transform_indices = @transform_2, window_bounds = array<i64: 8, 25600>}]} {
    %c0 = arith.constant 0 : index
    %c0_0 = arith.constant 0 : index
    %0 = vector.load %arg1[%c0, %c0_0] : memref<8x32xf32, #tpu.memory_space<vmem>>, vector<8x32xf32>
    %c0_1 = arith.constant 0 : index
    %c0_2 = arith.constant 0 : index
    %1 = vector.load %arg2[%c0_1, %c0_2] : memref<32x25600xf32, #tpu.memory_space<vmem>>, vector<32x25600xf32>
    %cst = arith.constant dense<0.000000e+00> : vector<8x25600xf32>
    %2 = tpu.matmul %0, %1, %cst {dimension_numbers = #tpu.dot_dimension_numbers<[1], [0], [0], [1], [0, 0, 1, 1], [], []>} : vector<8x32xf32>, vector<32x25600xf32>, vector<8x25600xf32> -> vector<8x25600xf32>
    %cst_3 = arith.constant 2.550000e+02 : f32
    %3 = vector.broadcast %cst_3 : f32 to vector<8x25600xf32>
    %4 = arith.mulf %2, %3 : vector<8x25600xf32>
    %cst_4 = arith.constant 0.000000e+00 : f32
    %cst_5 = arith.constant 2.550000e+02 : f32
    %5 = vector.broadcast %cst_4 : f32 to vector<8x25600xf32>
    %6 = arith.maximumf %5, %4 : vector<8x25600xf32>
    %7 = vector.broadcast %cst_5 : f32 to vector<8x25600xf32>
    %8 = arith.minimumf %7, %6 : vector<8x25600xf32>
    %9 = arith.fptoui %8 : vector<8x25600xf32> to vector<8x25600xi8>
    %c0_6 = arith.constant 0 : index
    %c0_7 = arith.constant 0 : index
    %10 = vector.load %arg3[%c0_6, %c0_7] : memref<8x25600xi8, #tpu.memory_space<vmem>>, vector<8x25600xi8>
    tpu.vector_store %arg3[%c0_6, %c0_7], %9 {strides = array<i32>} : memref<8x25600xi8, #tpu.memory_space<vmem>>, vector<8x25600xi8>,
    return
  }
  func.func @transform_0(%arg0: i32) -> (i32, i32) {
    %c0_i32 = arith.constant 0 : i32
    %c0_i32_0 = arith.constant 0 : i32
    %c0_i32_1 = arith.constant 0 : i32
    return %c0_i32, %c0_i32_0 : i32, i32
  }
  func.func @transform_1(%arg0: i32) -> (i32, i32) {
    %c0_i32 = arith.constant 0 : i32
    %c0_i32_0 = arith.constant 0 : i32
    return %c0_i32, %arg0 : i32, i32
  }
  func.func @transform_2(%arg0: i32) -> (i32, i32) {
    %c0_i32 = arith.constant 0 : i32
    %c0_i32_0 = arith.constant 0 : i32
    return %c0_i32, %arg0 : i32, i32
  }
}

</mosaic_0001>

<bundles_post_ra>
// kernel: tpu_custom_call.1
= control target key start
LH: loop header
LB: loop body
LE: loop exit
PB: predicated region body
PF: predicated region fallthrough
CT: control target
= control target key end

     0   :  { %7 = vsyncpa [#allocation3], 0  ;;  %s13422_s0 = inlined_call_operand.hbm [shape: f32[8,32], index: 0, kind: input, shape index: {}]   ;;  %s13423_s1 = inlined_call_operand.hbm [shape: f32[32,25600], index: 1, kind: input, shape index: {}]   ;;  %s13424_s2 = inlined_call_operand.hbm [shape: u8[8,25600], index: 2, kind: output, shape index: {}]  }
   0x1   :  { %8 = vsyncpa [#allocation6], 0 }
   0x2   :  { %9 = vsyncpa [#allocation4], 0  ;;  %s11341_s9 = smov [#allocation2]   ;;  %s11342_s11 = smov [#allocation5]  }
   0x3   :  { %s16_s10 = sshll.u32 %s11341_s9, 4  ;;  %s25_s12 = sshll.u32 %s11342_s11, 4  ;;  %s17_s10 = int_to_ptr.vmem [resolvable:$true] %s16_s10  ;;  %s11362_s12 = int_to_ptr.vmem [resolvable:$true] %s25_s12 }
   0x4   :  { %s11269_s15 = scalar_lea.hbm %s13422_s0, 128 }
   0x5   :  { %p11270_p0 = scmp.ne.s32.totalorder %s13422_s0, %s11269_s15  ;;  %p11273_p1 = scmp.lt.u32.totalorder %s11269_s15, %s13422_s0 }
   0x7   :  { %p11275_p2 = pnand %p11273_p1, %p11270_p0 }
   0x9   :  { %11278 = shalt.err (!%p11275_p2)
}
   0xa   :  { %s11279_s20 = scalar_lea.vmem %s17_s10, 128  ;;  %p11284_p4 = scmp.lt.s32.totalorder %s17_s10, %s17_s10 }
   0xb   :  { %p11280_p3 = scmp.ne.s32.totalorder %s17_s10, %s11279_s20  ;;  %p11285_p5 = scmp.lt.s32.totalorder %s11279_s20, %s11279_s20 }
   0xd   :  { %p11286_p6 = por %p11285_p5, %p11284_p4 }
   0xf   :  { %p11287_p7 = pnand %p11286_p6, %p11280_p3 }
  0x11   :  { %11290 = shalt.err (!%p11287_p7)
}
  0x12   :  { %19 = dma.hbm_to_vmem [thread:$0]  %s13422_s0, 128, %s17_s10, [#allocation3]  }
  0x13   :  { %s11291_s25 = scalar_lea.hbm %s13423_s1, 102400 }
  0x14   :  { %p11292_p8 = scmp.ne.s32.totalorder %s13423_s1, %s11291_s25  ;;  %p11295_p9 = scmp.lt.u32.totalorder %s11291_s25, %s13423_s1 }
  0x16   :  { %p11297_p10 = pnand %p11295_p9, %p11292_p8 }
  0x18   :  { %11300 = shalt.err (!%p11297_p10)
}
  0x19   :  { %s11301_s30 = scalar_lea.vmem %s11362_s12, 102400  ;;  %p11306_p12 = scmp.lt.s32.totalorder %s11362_s12, %s11362_s12 }
  0x1a   :  { %p11302_p11 = scmp.ne.s32.totalorder %s11362_s12, %s11301_s30  ;;  %p11307_p13 = scmp.lt.s32.totalorder %s11301_s30, %s11301_s30 }
  0x1c   :  { %p11308_p0 = por %p11307_p13, %p11306_p12 }
  0x1e   :  { %p11309_p1 = pnand %p11308_p0, %p11302_p11 }
  0x20   :  { %11312 = shalt.err (!%p11309_p1)
}
  0x21   :  { %s11343_s0 = smov 25600   ;;  %s11344_s3 = smov 1600  }
  0x22   :  { %31 = dma.hbm_to_vmem [thread:$0]  %s13423_s1, 102400, %s11362_s12, [#allocation6], %s11343_s0, %s11343_s0, %s11344_s3  }
  0x23   :  { %11335 = dma.done.wait [#allocation3], 128  }
  0x24   :  { %11336 = vsyncadd [#allocation3], 4294967168 }
  0x25   :  { %11337 = dma.done.wait [#allocation6], 102400  }
  0x26   :  { %11338 = vsyncadd [#allocation6], 4294864896  ;;  %v13425_v0 = vmov 0.0   ;;  %v40_v1 = vld [vmem:[#allocation5 + $0x8] sm:$0xff]  ;;  %v42_v3 = vld [vmem:[#allocation5 + $0x18] sm:$0xff]  ;;  %vm839_vm0 = vcmask 261120  }
  0x27   :  { %907 = vmatprep.mubr.f32.mxu0 %v13425_v0  ;;  %978 = vmatprep.mubr.f32.mxu1 %v13425_v0  ;;  %v240_v2 = vld [vmem:[#allocation5 + $0x648] sm:$0xff]  ;;  %v242_v5 = vld [vmem:[#allocation5 + $0x658] sm:$0xff]  ;;  %v39_v6 = vld [vmem:[#allocation5] sm:$0xff]  ;;  %s11346_s1 = smov [#allocation7]  }
  0x28   :  { %v10459_v4 = vpack.c.bf16 %v240_v2, %v40_v1  ;;  %v239_v7 = vld [vmem:[#allocation5 + $0x640] sm:$0xff]  ;;  %v10467_v8 = vpack.c.bf16 %v242_v5, %v42_v3  ;;  %v41_v10 = vld [vmem:[#allocation5 + $0x10] sm:$0xff]  ;;  %v440_v12 = vld [vmem:[#allocation5 + $0xc88] sm:$0xff]  ;;  %s10349_s6 = sshll.u32 %s11346_s1, 4  ;;  %s10350_s6 = int_to_ptr.vmem [resolvable:$true] %s10349_s6 }
  0x29   :  { %v10461_v9 = vpack.c.bf16 %v239_v7, %v39_v6  ;;  %v241_v11 = vld [vmem:[#allocation5 + $0x650] sm:$0xff]  ;;  %v640_v14 = vld [vmem:[#allocation5 + $0x12c8] sm:$0xff]  ;;  %v442_v15 = vld [vmem:[#allocation5 + $0xc98] sm:$0xff]  ;;  %s11313_s7 = scalar_lea.vmem %s10350_s6, 6400  ;;  %p11318_p3 = scmp.lt.s32.totalorder %s10350_s6, %s10350_s6 }
  0x2a   :  { %10460 = vmatprep.subr.bf16.mxu0 %v10459_v4  ;;  %v10469_v13 = vpack.c.bf16 %v241_v11, %v41_v10  ;;  %v642_v16 = vld [vmem:[#allocation5 + $0x12d8] sm:$0xff]  ;;  %10468 = vmatprep.subr.bf16.mxu1 %v10467_v8  ;;  %v10463_v17 = vpack.c.bf16 %v640_v14, %v440_v12  ;;  %v439_v19 = vld [vmem:[#allocation5 + $0xc80] sm:$0xff]  ;;  %v441_v21 = vld [vmem:[#allocation5 + $0xc90] sm:$0xff]  ;;  %p11314_p2 = scmp.ne.s32.totalorder %s10350_s6, %s11313_s7  ;;  %p11319_p4 = scmp.lt.s32.totalorder %s11313_s7, %s11313_s7 }
  0x2b   :  { %10462 = vmatpush1.bf16.msra.mxu0 %v10461_v9  ;;  %v10471_v18 = vpack.c.bf16 %v642_v16, %v442_v15  ;;  %v639_v20 = vld [vmem:[#allocation5 + $0x12c0] sm:$0xff]  ;;  %v641_v23 = vld [vmem:[#allocation5 + $0x12d0] sm:$0xff]  ;;  %v44_v24 = vld [vmem:[#allocation5 + $0x28] sm:$0xff] }
  0x2c   :  { %10470 = vmatpush1.bf16.msra.mxu1 %v10469_v13  ;;  %v10465_v22 = vpack.c.bf16 %v639_v20, %v439_v19  ;;  %10464 = vmatprep.subr.bf16.mxu0 %v10463_v17  ;;  %v10473_v25 = vpack.c.bf16 %v641_v23, %v441_v21  ;;  %v11395_v26 = vld [vmem:[#allocation2] sm:$0xff]  ;;  %v244_v27 = vld [vmem:[#allocation5 + $0x668] sm:$0xff]  ;;  %v43_v32 = vld [vmem:[#allocation5 + $0x20] sm:$0xff]  ;;  %p11320_p5 = por %p11319_p4, %p11318_p3 }
  0x2d   :  { %10472 = vmatprep.subr.bf16.mxu1 %v10471_v18  ;;  %v46_v28 = vld [vmem:[#allocation5 + $0x38] sm:$0xff]  ;;  %v10475_v30 = vpack.c.bf16 %v244_v27, %v44_v24  ;;  %v243_v33 = vld [vmem:[#allocation5 + $0x660] sm:$0xff]  ;;  %v45_v34 = vld [vmem:[#allocation5 + $0x30] sm:$0xff] }
  0x2e   :  { %v246_v29 = vld [vmem:[#allocation5 + $0x678] sm:$0xff]  ;;  %v10477_v35 = vpack.c.bf16 %v243_v33, %v43_v32  ;;  %v245_v36 = vld [vmem:[#allocation5 + $0x670] sm:$0xff]  ;;  %v444_v37 = vld [vmem:[#allocation5 + $0xca8] sm:$0xff]  ;;  %p11321_p6 = pnand %p11320_p5, %p11314_p2 }
  0x2f   :  { %v10483_v31 = vpack.c.bf16 %v246_v29, %v46_v28  ;;  %10466 = vmatpush1.bf16.msra.mxu0 %v10465_v22  ;;  %v644_v38 = vld [vmem:[#allocation5 + $0x12e8] sm:$0xff]  ;;  %v10485_v39 = vpack.c.bf16 %v245_v36, %v45_v34  ;;  %v446_v41 = vld [vmem:[#allocation5 + $0xcb8] sm:$0xff]  ;;  %v443_v43 = vld [vmem:[#allocation5 + $0xca0] sm:$0xff] }
  0x30   :  { %10474 = vmatpush1.bf16.msra.mxu1 %v10473_v25  ;;  %10476 = vmatprep.subr.bf16.mxu0 %v10475_v30  ;;  %v10479_v40 = vpack.c.bf16 %v644_v38, %v444_v37  ;;  %v646_v42 = vld [vmem:[#allocation5 + $0x12f8] sm:$0xff]  ;;  %v643_v45 = vld [vmem:[#allocation5 + $0x12e0] sm:$0xff]  ;;  %v445_v46 = vld [vmem:[#allocation5 + $0xcb0] sm:$0xff] }
  0x31   :  { %10484 = vmatprep.subr.bf16.mxu1 %v10483_v31  ;;  %v10487_v44 = vpack.c.bf16 %v646_v42, %v446_v41  ;;  %v645_v47 = vld [vmem:[#allocation5 + $0x12f0] sm:$0xff]  ;;  %v48_v48 = vld [vmem:[#allocation5 + $0x48] sm:$0xff]  ;;  %v50_v50 = vld [vmem:[#allocation5 + $0x58] sm:$0xff]  ;;  %v10481_v51 = vpack.c.bf16 %v643_v45, %v443_v43 }
  0x32   :  { %10359 = vmatmul.mubr.msk.f32.vlgmr.msra.gmra.mrb[0].mxu0 %vm839_vm0, %v11395_v26  ;;  %v248_v49 = vld [vmem:[#allocation5 + $0x688] sm:$0xff]  ;;  %v250_v52 = vld [vmem:[#allocation5 + $0x698] sm:$0xff]  ;;  %v10489_v53 = vpack.c.bf16 %v645_v47, %v445_v46  ;;  %v47_v55 = vld [vmem:[#allocation5 + $0x40] sm:$0xff] }
  0x33   :  { %10360 = vmatmul.mubr.msk.f32.vlgmr.msra.gmra.mrb[0].mxu1 %vm839_vm0, %v11395_v26  ;;  %10478 = vmatpush1.bf16.msra.mxu0 %v10477_v35  ;;  %v10491_v54 = vpack.c.bf16 %v248_v49, %v48_v48  ;;  %v247_v56 = vld [vmem:[#allocation5 + $0x680] sm:$0xff]  ;;  %v49_v57 = vld [vmem:[#allocation5 + $0x50] sm:$0xff]  ;;  %v10499_v58 = vpack.c.bf16 %v250_v52, %v50_v50  ;;  %v448_v60 = vld [vmem:[#allocation5 + $0xcc8] sm:$0xff] }
  0x34   :  { %10486 = vmatpush1.bf16.msra.mxu1 %v10485_v39  ;;  %10480 = vmatprep.subr.bf16.mxu0 %v10479_v40  ;;  %v249_v59 = vld [vmem:[#allocation5 + $0x690] sm:$0xff]  ;;  %v648_v61 = vld [vmem:[#allocation5 + $0x1308] sm:$0xff]  ;;  %v450_v62 = vld [vmem:[#allocation5 + $0xcd8] sm:$0xff]  ;;  %v10493_v1 = vpack.c.bf16 %v247_v56, %v47_v55 }
  0x35   :  { %10488 = vmatprep.subr.bf16.mxu1 %v10487_v44  ;;  %1049 = vmatprep.mubr.f32.mxu0 %v13425_v0  ;;  %v650_v63 = vld [vmem:[#allocation5 + $0x1318] sm:$0xff]  ;;  %v10501_v2 = vpack.c.bf16 %v249_v59, %v49_v57  ;;  %v10495_v3 = vpack.c.bf16 %v648_v61, %v448_v60  ;;  %v447_v4 = vld [vmem:[#allocation5 + $0xcc0] sm:$0xff]  ;;  %v449_v6 = vld [vmem:[#allocation5 + $0xcd0] sm:$0xff] }
  0x36   :  { %1120 = vmatprep.mubr.f32.mxu1 %v13425_v0  ;;  %v647_v5 = vld [vmem:[#allocation5 + $0x1300] sm:$0xff]  ;;  %v10503_v7 = vpack.c.bf16 %v650_v63, %v450_v62  ;;  %v649_v8 = vld [vmem:[#allocation5 + $0x1310] sm:$0xff]  ;;  %v52_v9 = vld [vmem:[#allocation5 + $0x68] sm:$0xff] }
  0x37   :  { %10482 = vmatpush1.bf16.msra.mxu0 %v10481_v51  ;;  %v252_v10 = vld [vmem:[#allocation5 + $0x6a8] sm:$0xff]  ;;  %v54_v11 = vld [vmem:[#allocation5 + $0x78] sm:$0xff]  ;;  %v10497_v13 = vpack.c.bf16 %v647_v5, %v447_v4  ;;  %v10505_v14 = vpack.c.bf16 %v649_v8, %v449_v6  ;;  %v51_v16 = vld [vmem:[#allocation5 + $0x60] sm:$0xff] }
  0x38   :  { %10490 = vmatpush1.bf16.msra.mxu1 %v10489_v53  ;;  %10492 = vmatprep.subr.bf16.mxu0 %v10491_v54  ;;  %v254_v12 = vld [vmem:[#allocation5 + $0x6b8] sm:$0xff]  ;;  %v10507_v15 = vpack.c.bf16 %v252_v10, %v52_v9  ;;  %v251_v17 = vld [vmem:[#allocation5 + $0x6a0] sm:$0xff]  ;;  %v53_v18 = vld [vmem:[#allocation5 + $0x70] sm:$0xff] }
  0x39   :  { %10500 = vmatprep.subr.bf16.mxu1 %v10499_v58  ;;  %v10515_v19 = vpack.c.bf16 %v254_v12, %v54_v11  ;;  %v253_v20 = vld [vmem:[#allocation5 + $0x6b0] sm:$0xff]  ;;  %v452_v21 = vld [vmem:[#allocation5 + $0xce8] sm:$0xff]  ;;  %v454_v23 = vld [vmem:[#allocation5 + $0xcf8] sm:$0xff]  ;;  %v10509_v25 = vpack.c.bf16 %v251_v17, %v51_v16 }
  0x3a   :  { %10361 = vmatmul.mubr.msk.f32.vlgmr.msra.gmra.mrb[2].mxu0 %vm839_vm0, %v11395_v26  ;;  %v652_v22 = vld [vmem:[#allocation5 + $0x1328] sm:$0xff]  ;;  %v654_v24 = vld [vmem:[#allocation5 + $0x1338] sm:$0xff]  ;;  %v10517_v27 = vpack.c.bf16 %v253_v20, %v53_v18  ;;  %v451_v29 = vld [vmem:[#allocation5 + $0xce0] sm:$0xff] }
  0x3b   :  { %10362 = vmatmul.mubr.msk.f32.vlgmr.msra.gmra.mrb[2].mxu1 %vm839_vm0, %v11395_v26  ;;  %10494 = vmatpush1.bf16.msra.mxu0 %v10493_v1  ;;  %v10511_v28 = vpack.c.bf16 %v652_v22, %v452_v21  ;;  %v651_v30 = vld [vmem:[#allocation5 + $0x1320] sm:$0xff]  ;;  %v453_v31 = vld [vmem:[#allocation5 + $0xcf0] sm:$0xff]  ;;  %v10519_v32 = vpack.c.bf16 %v654_v24, %v454_v23  ;;  %v56_v34 = vld [vmem:[#allocation5 + $0x88] sm:$0xff] }
  0x3c   :  { %10502 = vmatpush1.bf16.msra.mxu1 %v10501_v2  ;;  %10496 = vmatprep.subr.bf16.mxu0 %v10495_v3  ;;  %v653_v33 = vld [vmem:[#allocation5 + $0x1330] sm:$0xff]  ;;  %v256_v35 = vld [vmem:[#allocation5 + $0x6c8] sm:$0xff]  ;;  %v58_v36 = vld [vmem:[#allocation5 + $0x98] sm:$0xff]  ;;  %v10513_v38 = vpack.c.bf16 %v651_v30, %v451_v29 }
  0x3d   :  { %10504 = vmatprep.subr.bf16.mxu1 %v10503_v7  ;;  %1191 = vmatprep.mubr.f32.mxu0 %v13425_v0  ;;  %v258_v37 = vld [vmem:[#allocation5 + $0x6d8] sm:$0xff]  ;;  %v10521_v39 = vpack.c.bf16 %v653_v33, %v453_v31  ;;  %v10523_v40 = vpack.c.bf16 %v256_v35, %v56_v34  ;;  %v55_v41 = vld [vmem:[#allocation5 + $0x80] sm:$0xff]  ;;  %v57_v43 = vld [vmem:[#allocation5 + $0x90] sm:$0xff] }
  0x3e   :  { %1262 = vmatprep.mubr.f32.mxu1 %v13425_v0  ;;  %v255_v42 = vld [vmem:[#allocation5 + $0x6c0] sm:$0xff]  ;;  %v10531_v44 = vpack.c.bf16 %v258_v37, %v58_v36  ;;  %v257_v45 = vld [vmem:[#allocation5 + $0x6d0] sm:$0xff]  ;;  %v456_v46 = vld [vmem:[#allocation5 + $0xd08] sm:$0xff] }
  0x3f   :  { %10498 = vmatpush1.bf16.msra.mxu0 %v10497_v13  ;;  %v656_v47 = vld [vmem:[#allocation5 + $0x1348] sm:$0xff]  ;;  %v458_v48 = vld [vmem:[#allocation5 + $0xd18] sm:$0xff]  ;;  %v10525_v50 = vpack.c.bf16 %v255_v42, %v55_v41  ;;  %v10533_v51 = vpack.c.bf16 %v257_v45, %v57_v43  ;;  %v455_v53 = vld [vmem:[#allocation5 + $0xd00] sm:$0xff] }
  0x40   :  { %10506 = vmatpush1.bf16.msra.mxu1 %v10505_v14  ;;  %10508 = vmatprep.subr.bf16.mxu0 %v10507_v15  ;;  %v658_v49 = vld [vmem:[#allocation5 + $0x1358] sm:$0xff]  ;;  %v10527_v52 = vpack.c.bf16 %v656_v47, %v456_v46  ;;  %v655_v54 = vld [vmem:[#allocation5 + $0x1340] sm:$0xff]  ;;  %v457_v55 = vld [vmem:[#allocation5 + $0xd10] sm:$0xff] }
  0x41   :  { %10516 = vmatprep.subr.bf16.mxu1 %v10515_v19  ;;  %v10535_v56 = vpack.c.bf16 %v658_v49, %v458_v48  ;;  %v657_v57 = vld [vmem:[#allocation5 + $0x1350] sm:$0xff]  ;;  %v60_v58 = vld [vmem:[#allocation5 + $0xa8] sm:$0xff]  ;;  %v62_v60 = vld [vmem:[#allocation5 + $0xb8] sm:$0xff]  ;;  %v10529_v62 = vpack.c.bf16 %v655_v54, %v455_v53 }
  0x42   :  { %10363 = vmatmul.mubr.msk.f32.vlgmr.msra.gmra.mrb[4].mxu0 %vm839_vm0, %v11395_v26  ;;  %v260_v59 = vld [vmem:[#allocation5 + $0x6e8] sm:$0xff]  ;;  %v262_v61 = vld [vmem:[#allocation5 + $0x6f8] sm:$0xff]  ;;  %v10537_v63 = vpack.c.bf16 %v657_v57, %v457_v55  ;;  %v59_v2 = vld [vmem:[#allocation5 + $0xa0] sm:$0xff] }
  0x43   :  { %10364 = vmatmul.mubr.msk.f32.vlgmr.msra.gmra.mrb[4].mxu1 %vm839_vm0, %v11395_v26  ;;  %10510 = vmatpush1.bf16.msra.mxu0 %v10509_v25  ;;  %v10539_v1 = vpack.c.bf16 %v260_v59, %v60_v58  ;;  %v259_v3 = vld [vmem:[#allocation5 + $0x6e0] sm:$0xff]  ;;  %v61_v4 = vld [vmem:[#allocation5 + $0xb0] sm:$0xff]  ;;  %v10547_v5 = vpack.c.bf16 %v262_v61, %v62_v60  ;;  %v460_v7 = vld [vmem:[#allocation5 + $0xd28] sm:$0xff] }
  0x44   :  { %10518 = vmatpush1.bf16.msra.mxu1 %v10517_v27  ;;  %10512 = vmatprep.subr.bf16.mxu0 %v10511_v28  ;;  %v261_v6 = vld [vmem:[#allocation5 + $0x6f0] sm:$0xff]  ;;  %v660_v8 = vld [vmem:[#allocation5 + $0x1368] sm:$0xff]  ;;  %v462_v9 = vld [vmem:[#allocation5 + $0xd38] sm:$0xff]  ;;  %v10541_v11 = vpack.c.bf16 %v259_v3, %v59_v2 }
  0x45   :  { %10520 = vmatprep.subr.bf16.mxu1 %v10519_v32  ;;  %1333 = vmatprep.mubr.f32.mxu0 %v13425_v0  ;;  %v662_v10 = vld [vmem:[#allocation5 + $0x1378] sm:$0xff]  ;;  %v10549_v12 = vpack.c.bf16 %v261_v6, %v61_v4  ;;  %v10543_v13 = vpack.c.bf16 %v660_v8, %v460_v7  ;;  %v459_v14 = vld [vmem:[#allocation5 + $0xd20] sm:$0xff]  ;;  %v461_v16 = vld [vmem:[#allocation5 + $0xd30] sm:$0xff] }
  0x46   :  { %1404 = vmatprep.mubr.f32.mxu1 %v13425_v0  ;;  %v659_v15 = vld [vmem:[#allocation5 + $0x1360] sm:$0xff]  ;;  %v10551_v17 = vpack.c.bf16 %v662_v10, %v462_v9  ;;  %v661_v18 = vld [vmem:[#allocation5 + $0x1370] sm:$0xff]  ;;  %v64_v19 = vld [vmem:[#allocation5 + $0xc8] sm:$0xff] }
  0x47   :  { %10514 = vmatpush1.bf16.msra.mxu0 %v10513_v38  ;;  %v264_v20 = vld [vmem:[#allocation5 + $0x708] sm:$0xff]  ;;  %v66_v21 = vld [vmem:[#allocation5 + $0xd8] sm:$0xff]  ;;  %v10545_v23 = vpack.c.bf16 %v659_v15, %v459_v14  ;;  %v10553_v24 = vpack.c.bf16 %v661_v18, %v461_v16  ;;  %v63_v27 = vld [vmem:[#allocation5 + $0xc0] sm:$0xff] }
  0x48   :  { %10522 = vmatpush1.bf16.msra.mxu1 %v10521_v39  ;;  %10524 = vmatprep.subr.bf16.mxu0 %v10523_v40  ;;  %v266_v22 = vld [vmem:[#allocation5 + $0x718] sm:$0xff]  ;;  %v10555_v25 = vpack.c.bf16 %v264_v20, %v64_v19  ;;  %v263_v28 = vld [vmem:[#allocation5 + $0x700] sm:$0xff]  ;;  %v65_v29 = vld [vmem:[#allocation5 + $0xd0] sm:$0xff] }
  0x49   :  { %10532 = vmatprep.subr.bf16.mxu1 %v10531_v44  ;;  %v10563_v30 = vpack.c.bf16 %v266_v22, %v66_v21  ;;  %v265_v31 = vld [vmem:[#allocation5 + $0x710] sm:$0xff]  ;;  %v464_v32 = vld [vmem:[#allocation5 + $0xd48] sm:$0xff]  ;;  %v466_v34 = vld [vmem:[#allocation5 + $0xd58] sm:$0xff]  ;;  %v10557_v36 = vpack.c.bf16 %v263_v28, %v63_v27 }
  0x4a   :  { %10365 = vmatmul.mubr.msk.f32.vlgmr.msra.gmra.mrb[6].mxu0 %vm839_vm0, %v11395_v26  ;;  %v664_v33 = vld [vmem:[#allocation5 + $0x1388] sm:$0xff]  ;;  %v666_v35 = vld [vmem:[#allocation5 + $0x1398] sm:$0xff]  ;;  %v10565_v37 = vpack.c.bf16 %v265_v31, %v65_v29  ;;  %v463_v39 = vld [vmem:[#allocation5 + $0xd40] sm:$0xff] }
  0x4b   :  { %10366 = vmatmul.mubr.msk.f32.vlgmr.msra.gmra.mrb[6].mxu1 %vm839_vm0, %v11395_v26  ;;  %10526 = vmatpush1.bf16.msra.mxu0 %v10525_v50  ;;  %v10559_v38 = vpack.c.bf16 %v664_v33, %v464_v32  ;;  %v663_v40 = vld [vmem:[#allocation5 + $0x1380] sm:$0xff]  ;;  %v465_v41 = vld [vmem:[#allocation5 + $0xd50] sm:$0xff]  ;;  %v10567_v42 = vpack.c.bf16 %v666_v35, %v466_v34  ;;  %v68_v44 = vld [vmem:[#allocation5 + $0xe8] sm:$0xff] }
  0x4c   :  { %10534 = vmatpush1.bf16.msra.mxu1 %v10533_v51  ;;  %10528 = vmatprep.subr.bf16.mxu0 %v10527_v52  ;;  %v665_v43 = vld [vmem:[#allocation5 + $0x1390] sm:$0xff]  ;;  %v268_v45 = vld [vmem:[#allocation5 + $0x728] sm:$0xff]  ;;  %v70_v46 = vld [vmem:[#allocation5 + $0xf8] sm:$0xff]  ;;  %v10561_v48 = vpack.c.bf16 %v663_v40, %v463_v39 }
  0x4d   :  { %10536 = vmatprep.subr.bf16.mxu1 %v10535_v56  ;;  %1475 = vmatprep.mubr.f32.mxu0 %v13425_v0  ;;  %v270_v47 = vld [vmem:[#allocation5 + $0x738] sm:$0xff]  ;;  %v10569_v49 = vpack.c.bf16 %v665_v43, %v465_v41  ;;  %v10571_v50 = vpack.c.bf16 %v268_v45, %v68_v44  ;;  %v67_v51 = vld [vmem:[#allocation5 + $0xe0] sm:$0xff]  ;;  %v69_v53 = vld [vmem:[#allocation5 + $0xf0] sm:$0xff] }
  0x4e   :  { %1546 = vmatprep.mubr.f32.mxu1 %v13425_v0  ;;  %v267_v52 = vld [vmem:[#allocation5 + $0x720] sm:$0xff]  ;;  %v10579_v54 = vpack.c.bf16 %v270_v47, %v70_v46  ;;  %v269_v55 = vld [vmem:[#allocation5 + $0x730] sm:$0xff]  ;;  %v468_v56 = vld [vmem:[#allocation5 + $0xd68] sm:$0xff] }
  0x4f   :  { %10530 = vmatpush1.bf16.msra.mxu0 %v10529_v62  ;;  %v668_v57 = vld [vmem:[#allocation5 + $0x13a8] sm:$0xff]  ;;  %v470_v58 = vld [vmem:[#allocation5 + $0xd78] sm:$0xff]  ;;  %v10573_v60 = vpack.c.bf16 %v267_v52, %v67_v51  ;;  %v10581_v61 = vpack.c.bf16 %v269_v55, %v69_v53  ;;  %v469_v2 = vld [vmem:[#allocation5 + $0xd70] sm:$0xff] }
  0x50   :  { %10538 = vmatpush1.bf16.msra.mxu1 %v10537_v63  ;;  %10540 = vmatprep.subr.bf16.mxu0 %v10539_v1  ;;  %v670_v59 = vld [vmem:[#allocation5 + $0x13b8] sm:$0xff]  ;;  %v10575_v62 = vpack.c.bf16 %v668_v57, %v468_v56  ;;  %v467_v63 = vld [vmem:[#allocation5 + $0xd60] sm:$0xff]  ;;  %v669_v4 = vld [vmem:[#allocation5 + $0x13b0] sm:$0xff] }
  0x51   :  { %10548 = vmatprep.subr.bf16.mxu1 %v10547_v5  ;;  %v667_v1 = vld [vmem:[#allocation5 + $0x13a0] sm:$0xff]  ;;  %v10583_v3 = vpack.c.bf16 %v670_v59, %v470_v58  ;;  %v72_v5 = vld [vmem:[#allocation5 + $0x108] sm:$0xff]  ;;  %v74_v7 = vld [vmem:[#allocation5 + $0x118] sm:$0xff]  ;;  %v10585_v10 = vpack.c.bf16 %v669_v4, %v469_v2 }
  0x52   :  { %10367 = vmatmul.mubr.msk.f32.vlgmr.msra.gmra.mrb[8].mxu0 %vm839_vm0, %v11395_v26  ;;  %v272_v6 = vld [vmem:[#allocation5 + $0x748] sm:$0xff]  ;;  %v274_v8 = vld [vmem:[#allocation5 + $0x758] sm:$0xff]  ;;  %v10577_v9 = vpack.c.bf16 %v667_v1, %v467_v63  ;;  %v73_v14 = vld [vmem:[#allocation5 + $0x110] sm:$0xff] }
  0x53   :  { %10368 = vmatmul.mubr.msk.f32.vlgmr.msra.gmra.mrb[8].mxu1 %vm839_vm0, %v11395_v26  ;;  %10542 = vmatpush1.bf16.msra.mxu0 %v10541_v11  ;;  %v10587_v11 = vpack.c.bf16 %v272_v6, %v72_v5  ;;  %v10595_v15 = vpack.c.bf16 %v274_v8, %v74_v7  ;;  %v273_v16 = vld [vmem:[#allocation5 + $0x750] sm:$0xff]  ;;  %v672_v18 = vld [vmem:[#allocation5 + $0x13c8] sm:$0xff]  ;;  %v474_v19 = vld [vmem:[#allocation5 + $0xd98] sm:$0xff] }
  0x54   :  { %10550 = vmatpush1.bf16.msra.mxu1 %v10549_v12  ;;  %10544 = vmatprep.subr.bf16.mxu0 %v10543_v13  ;;  %v71_v12 = vld [vmem:[#allocation5 + $0x100] sm:$0xff]  ;;  %v674_v20 = vld [vmem:[#allocation5 + $0x13d8] sm:$0xff]  ;;  %v10597_v22 = vpack.c.bf16 %v273_v16, %v73_v14  ;;  %v473_v27 = vld [vmem:[#allocation5 + $0xd90] sm:$0xff] }
  0x55   :  { %10552 = vmatprep.subr.bf16.mxu1 %v10551_v17  ;;  %1617 = vmatprep.mubr.f32.mxu0 %v13425_v0  ;;  %v271_v13 = vld [vmem:[#allocation5 + $0x740] sm:$0xff]  ;;  %v472_v17 = vld [vmem:[#allocation5 + $0xd88] sm:$0xff]  ;;  %v10599_v28 = vpack.c.bf16 %v674_v20, %v474_v19  ;;  %v673_v29 = vld [vmem:[#allocation5 + $0x13d0] sm:$0xff] }
  0x56   :  { %1688 = vmatprep.mubr.f32.mxu1 %v13425_v0  ;;  %v10589_v21 = vpack.c.bf16 %v271_v13, %v71_v12  ;;  %v276_v31 = vld [vmem:[#allocation5 + $0x768] sm:$0xff]  ;;  %v78_v32 = vld [vmem:[#allocation5 + $0x138] sm:$0xff]  ;;  %v10601_v35 = vpack.c.bf16 %v673_v29, %v473_v27  ;;  %v77_v39 = vld [vmem:[#allocation5 + $0x130] sm:$0xff] }
  0x57   :  { %10546 = vmatpush1.bf16.msra.mxu0 %v10545_v23  ;;  %v10591_v23 = vpack.c.bf16 %v672_v18, %v472_v17  ;;  %v278_v33 = vld [vmem:[#allocation5 + $0x778] sm:$0xff]  ;;  %v277_v41 = vld [vmem:[#allocation5 + $0x770] sm:$0xff]  ;;  %v676_v43 = vld [vmem:[#allocation5 + $0x13e8] sm:$0xff] }
  0x58   :  { %10554 = vmatpush1.bf16.msra.mxu1 %v10553_v24  ;;  %10556 = vmatprep.subr.bf16.mxu0 %v10555_v25  ;;  %v471_v24 = vld [vmem:[#allocation5 + $0xd80] sm:$0xff]  ;;  %v10611_v40 = vpack.c.bf16 %v278_v33, %v78_v32  ;;  %v478_v44 = vld [vmem:[#allocation5 + $0xdb8] sm:$0xff]  ;;  %v10613_v47 = vpack.c.bf16 %v277_v41, %v77_v39  ;;  %v477_v51 = vld [vmem:[#allocation5 + $0xdb0] sm:$0xff] }
  0x59   :  { %10564 = vmatprep.subr.bf16.mxu1 %v10563_v30  ;;  %v671_v25 = vld [vmem:[#allocation5 + $0x13c0] sm:$0xff]  ;;  %v76_v30 = vld [vmem:[#allocation5 + $0x128] sm:$0xff]  ;;  %v678_v45 = vld [vmem:[#allocation5 + $0x13f8] sm:$0xff] }
  0x5a   :  { %10369 = vmatmul.mubr.msk.f32.vlgmr.msra.gmra.mrb[10].mxu0 %vm839_vm0, %v11395_v26  ;;  %v10593_v34 = vpack.c.bf16 %v671_v25, %v471_v24  ;;  %v10615_v52 = vpack.c.bf16 %v678_v45, %v478_v44  ;;  %v677_v53 = vld [vmem:[#allocation5 + $0x13f0] sm:$0xff]  ;;  %v280_v55 = vld [vmem:[#allocation5 + $0x788] sm:$0xff]  ;;  %v82_v56 = vld [vmem:[#allocation5 + $0x158] sm:$0xff] }
  0x5b   :  { %10370 = vmatmul.mubr.msk.f32.vlgmr.msra.gmra.mrb[10].mxu1 %vm839_vm0, %v11395_v26  ;;  %10558 = vmatpush1.bf16.msra.mxu0 %v10557_v36  ;;  %v10603_v36 = vpack.c.bf16 %v276_v31, %v76_v30  ;;  %v282_v57 = vld [vmem:[#allocation5 + $0x798] sm:$0xff]  ;;  %v10617_v59 = vpack.c.bf16 %v677_v53, %v477_v51  ;;  %v81_v63 = vld [vmem:[#allocation5 + $0x150] sm:$0xff]  ;;  %v680_v4 = vld [vmem:[#allocation5 + $0x1408] sm:$0xff] }
  0x5c   :  { %10566 = vmatpush1.bf16.msra.mxu1 %v10565_v37  ;;  %10560 = vmatprep.subr.bf16.mxu0 %v10559_v38  ;;  %v75_v37 = vld [vmem:[#allocation5 + $0x120] sm:$0xff]  ;;  %v10627_v1 = vpack.c.bf16 %v282_v57, %v82_v56  ;;  %v281_v2 = vld [vmem:[#allocation5 + $0x790] sm:$0xff]  ;;  %v482_v5 = vld [vmem:[#allocation5 + $0xdd8] sm:$0xff] }
  0x5d   :  { %10568 = vmatprep.subr.bf16.mxu1 %v10567_v42  ;;  %1759 = vmatprep.mubr.f32.mxu0 %v13425_v0  ;;  %v275_v38 = vld [vmem:[#allocation5 + $0x760] sm:$0xff]  ;;  %v476_v42 = vld [vmem:[#allocation5 + $0xda8] sm:$0xff]  ;;  %v682_v6 = vld [vmem:[#allocation5 + $0x1418] sm:$0xff]  ;;  %v10629_v8 = vpack.c.bf16 %v281_v2, %v81_v63 }
  0x5e   :  { %1830 = vmatprep.mubr.f32.mxu1 %v13425_v0  ;;  %v10605_v46 = vpack.c.bf16 %v275_v38, %v75_v37  ;;  %v481_v12 = vld [vmem:[#allocation5 + $0xdd0] sm:$0xff]  ;;  %v10631_v13 = vpack.c.bf16 %v682_v6, %v482_v5  ;;  %v284_v16 = vld [vmem:[#allocation5 + $0x7a8] sm:$0xff]  ;;  %v86_v17 = vld [vmem:[#allocation5 + $0x178] sm:$0xff] }
  0x5f   :  { %10562 = vmatpush1.bf16.msra.mxu0 %v10561_v48  ;;  %v10607_v48 = vpack.c.bf16 %v676_v43, %v476_v42  ;;  %v681_v14 = vld [vmem:[#allocation5 + $0x1410] sm:$0xff]  ;;  %v286_v18 = vld [vmem:[#allocation5 + $0x7b8] sm:$0xff]  ;;  %v684_v29 = vld [vmem:[#allocation5 + $0x1428] sm:$0xff] }
  0x60   :  { %10570 = vmatpush1.bf16.msra.mxu1 %v10569_v49  ;;  %10572 = vmatprep.subr.bf16.mxu0 %v10571_v50  ;;  %v475_v49 = vld [vmem:[#allocation5 + $0xda0] sm:$0xff]  ;;  %v10633_v20 = vpack.c.bf16 %v681_v14, %v481_v12  ;;  %v85_v24 = vld [vmem:[#allocation5 + $0x170] sm:$0xff]  ;;  %v10643_v25 = vpack.c.bf16 %v286_v18, %v86_v17  ;;  %v486_v30 = vld [vmem:[#allocation5 + $0xdf8] sm:$0xff] }
  0x61   :  { %10580 = vmatprep.subr.bf16.mxu1 %v10579_v54  ;;  %v675_v50 = vld [vmem:[#allocation5 + $0x13e0] sm:$0xff]  ;;  %v80_v54 = vld [vmem:[#allocation5 + $0x148] sm:$0xff]  ;;  %v285_v27 = vld [vmem:[#allocation5 + $0x7b0] sm:$0xff] }
  0x62   :  { %10371 = vmatmul.mubr.msk.f32.vlgmr.msra.gmra.mrb[12].mxu0 %vm839_vm0, %v11395_v26  ;;  %v10609_v58 = vpack.c.bf16 %v675_v50, %v475_v49  ;;  %v686_v31 = vld [vmem:[#allocation5 + $0x1438] sm:$0xff]  ;;  %v10645_v33 = vpack.c.bf16 %v285_v27, %v85_v24  ;;  %v485_v37 = vld [vmem:[#allocation5 + $0xdf0] sm:$0xff]  ;;  %v288_v41 = vld [vmem:[#allocation5 + $0x7c8] sm:$0xff] }
  0x63   :  { %10372 = vmatmul.mubr.msk.f32.vlgmr.msra.gmra.mrb[12].mxu1 %vm839_vm0, %v11395_v26  ;;  %10574 = vmatpush1.bf16.msra.mxu0 %v10573_v60  ;;  %v10619_v60 = vpack.c.bf16 %v280_v55, %v80_v54  ;;  %v10647_v38 = vpack.c.bf16 %v686_v31, %v486_v30  ;;  %v685_v39 = vld [vmem:[#allocation5 + $0x1430] sm:$0xff]  ;;  %v90_v42 = vld [vmem:[#allocation5 + $0x198] sm:$0xff]  ;;  %v688_v53 = vld [vmem:[#allocation5 + $0x1448] sm:$0xff] }
  0x64   :  { %10582 = vmatpush1.bf16.msra.mxu1 %v10581_v61  ;;  %10576 = vmatprep.subr.bf16.mxu0 %v10575_v62  ;;  %v79_v61 = vld [vmem:[#allocation5 + $0x140] sm:$0xff]  ;;  %v290_v43 = vld [vmem:[#allocation5 + $0x7d8] sm:$0xff]  ;;  %v10649_v45 = vpack.c.bf16 %v685_v39, %v485_v37  ;;  %v89_v49 = vld [vmem:[#allocation5 + $0x190] sm:$0xff] }
  0x65   :  { %10584 = vmatprep.subr.bf16.mxu1 %v10583_v3  ;;  %1901 = vmatprep.mubr.f32.mxu0 %v13425_v0  ;;  %v279_v62 = vld [vmem:[#allocation5 + $0x780] sm:$0xff]  ;;  %v480_v3 = vld [vmem:[#allocation5 + $0xdc8] sm:$0xff]  ;;  %v10659_v50 = vpack.c.bf16 %v290_v43, %v90_v42  ;;  %v289_v51 = vld [vmem:[#allocation5 + $0x7d0] sm:$0xff] }
  0x66   :  { %1972 = vmatprep.mubr.f32.mxu1 %v13425_v0  ;;  %v10621_v7 = vpack.c.bf16 %v279_v62, %v79_v61  ;;  %v490_v54 = vld [vmem:[#allocation5 + $0xe18] sm:$0xff]  ;;  %v10661_v57 = vpack.c.bf16 %v289_v51, %v89_v49  ;;  %v489_v61 = vld [vmem:[#allocation5 + $0xe10] sm:$0xff]  ;;  %v292_v2 = vld [vmem:[#allocation5 + $0x7e8] sm:$0xff] }
  0x67   :  { %10578 = vmatpush1.bf16.msra.mxu0 %v10577_v9  ;;  %v10623_v9 = vpack.c.bf16 %v680_v4, %v480_v3  ;;  %v690_v55 = vld [vmem:[#allocation5 + $0x1458] sm:$0xff]  ;;  %v689_v63 = vld [vmem:[#allocation5 + $0x1450] sm:$0xff]  ;;  %v692_v14 = vld [vmem:[#allocation5 + $0x1468] sm:$0xff] }
  0x68   :  { %10586 = vmatpush1.bf16.msra.mxu1 %v10585_v10  ;;  %10588 = vmatprep.subr.bf16.mxu0 %v10587_v11  ;;  %v479_v10 = vld [vmem:[#allocation5 + $0xdc0] sm:$0xff]  ;;  %v10663_v62 = vpack.c.bf16 %v690_v55, %v490_v54  ;;  %v94_v3 = vld [vmem:[#allocation5 + $0x1b8] sm:$0xff]  ;;  %v10665_v6 = vpack.c.bf16 %v689_v63, %v489_v61  ;;  %v293_v12 = vld [vmem:[#allocation5 + $0x7f0] sm:$0xff] }
  0x69   :  { %10596 = vmatprep.subr.bf16.mxu1 %v10595_v15  ;;  %v679_v11 = vld [vmem:[#allocation5 + $0x1400] sm:$0xff]  ;;  %v84_v15 = vld [vmem:[#allocation5 + $0x168] sm:$0xff]  ;;  %v294_v4 = vld [vmem:[#allocation5 + $0x7f8] sm:$0xff] }
  0x6a   :  { %10373 = vmatmul.mubr.msk.f32.vlgmr.msra.gmra.mrb[14].mxu0 %vm839_vm0, %v11395_v26  ;;  %v10625_v19 = vpack.c.bf16 %v679_v11, %v479_v10  ;;  %v93_v10 = vld [vmem:[#allocation5 + $0x1b0] sm:$0xff]  ;;  %v10675_v11 = vpack.c.bf16 %v294_v4, %v94_v3  ;;  %v296_v27 = vld [vmem:[#allocation5 + $0x808] sm:$0xff] }
  0x6b   :  { %10374 = vmatmul.mubr.msk.f32.vlgmr.msra.gmra.mrb[14].mxu1 %vm839_vm0, %v11395_v26  ;;  %10590 = vmatpush1.bf16.msra.mxu0 %v10589_v21  ;;  %v10635_v21 = vpack.c.bf16 %v284_v16, %v84_v15  ;;  %v494_v15 = vld [vmem:[#allocation5 + $0xe38] sm:$0xff]  ;;  %v10677_v18 = vpack.c.bf16 %v293_v12, %v93_v10  ;;  %v693_v24 = vld [vmem:[#allocation5 + $0x1470] sm:$0xff]  ;;  %v696_v39 = vld [vmem:[#allocation5 + $0x1488] sm:$0xff] }
  0x6c   :  { %10598 = vmatpush1.bf16.msra.mxu1 %v10597_v22  ;;  %10592 = vmatprep.subr.bf16.mxu0 %v10591_v23  ;;  %v83_v22 = vld [vmem:[#allocation5 + $0x160] sm:$0xff]  ;;  %v694_v16 = vld [vmem:[#allocation5 + $0x1478] sm:$0xff]  ;;  %v297_v37 = vld [vmem:[#allocation5 + $0x810] sm:$0xff] }
  0x6d   :  { %10600 = vmatprep.subr.bf16.mxu1 %v10599_v28  ;;  %2043 = vmatprep.mubr.f32.mxu0 %v13425_v0  ;;  %v283_v23 = vld [vmem:[#allocation5 + $0x7a0] sm:$0xff]  ;;  %v484_v28 = vld [vmem:[#allocation5 + $0xde8] sm:$0xff]  ;;  %v697_v49 = vld [vmem:[#allocation5 + $0x1490] sm:$0xff] }
  0x6e   :  { %2114 = vmatprep.mubr.f32.mxu1 %v13425_v0  ;;  %v10637_v32 = vpack.c.bf16 %v283_v23, %v83_v22  ;;  %v493_v22 = vld [vmem:[#allocation5 + $0xe30] sm:$0xff]  ;;  %v10679_v23 = vpack.c.bf16 %v694_v16, %v494_v15  ;;  %v300_v51 = vld [vmem:[#allocation5 + $0x828] sm:$0xff]  ;;  %v11481_v12 = vld [vmem:[#allocation2] sm:$0xff] }
  0x6f   :  { %10594 = vmatpush1.bf16.msra.mxu0 %v10593_v34  ;;  %v10639_v34 = vpack.c.bf16 %v684_v29, %v484_v28  ;;  %v98_v28 = vld [vmem:[#allocation5 + $0x1d8] sm:$0xff]  ;;  %v10681_v31 = vpack.c.bf16 %v693_v24, %v493_v22  ;;  %v301_v61 = vld [vmem:[#allocation5 + $0x830] sm:$0xff]  ;;  %v700_v63 = vld [vmem:[#allocation5 + $0x14a8] sm:$0xff] }
  0x70   :  { %10602 = vmatpush1.bf16.msra.mxu1 %v10601_v35  ;;  %10604 = vmatprep.subr.bf16.mxu0 %v10603_v36  ;;  %v483_v35 = vld [vmem:[#allocation5 + $0xde0] sm:$0xff]  ;;  %v298_v29 = vld [vmem:[#allocation5 + $0x818] sm:$0xff]  ;;  %v104_v10 = vld [vmem:[#allocation5 + $0x208] sm:$0xff] }
  0x71   :  { %10612 = vmatprep.subr.bf16.mxu1 %v10611_v40  ;;  %v683_v36 = vld [vmem:[#allocation5 + $0x1420] sm:$0xff]  ;;  %v88_v40 = vld [vmem:[#allocation5 + $0x188] sm:$0xff]  ;;  %v305_v22 = vld [vmem:[#allocation5 + $0x850] sm:$0xff] }
  0x72   :  { %10375 = vmatmul.mubr.msk.f32.vlgmr.msra.gmra.mrb[16].mxu0 %vm839_vm0, %v11395_v26  ;;  %v10641_v44 = vpack.c.bf16 %v683_v36, %v483_v35  ;;  %v97_v35 = vld [vmem:[#allocation5 + $0x1d0] sm:$0xff]  ;;  %v10691_v36 = vpack.c.bf16 %v298_v29, %v98_v28  ;;  %v704_v24 = vld [vmem:[#allocation5 + $0x14c8] sm:$0xff] }
  0x73   :  { %10376 = vmatmul.mubr.msk.f32.vlgmr.msra.gmra.mrb[16].mxu1 %vm839_vm0, %v11395_v26  ;;  %10606 = vmatpush1.bf16.msra.mxu0 %v10605_v46  ;;  %v10651_v46 = vpack.c.bf16 %v288_v41, %v88_v40  ;;  %v498_v40 = vld [vmem:[#allocation5 + $0xe58] sm:$0xff]  ;;  %v10693_v43 = vpack.c.bf16 %v297_v37, %v97_v35  ;;  %v705_v35 = vld [vmem:[#allocation5 + $0x14d0] sm:$0xff]  ;;  %v308_v37 = vld [vmem:[#allocation5 + $0x868] sm:$0xff] }
  0x74   :  { %10614 = vmatpush1.bf16.msra.mxu1 %v10613_v47  ;;  %10608 = vmatprep.subr.bf16.mxu0 %v10607_v48  ;;  %v87_v47 = vld [vmem:[#allocation5 + $0x180] sm:$0xff]  ;;  %v698_v41 = vld [vmem:[#allocation5 + $0x1498] sm:$0xff] }
  0x75   :  { %10616 = vmatprep.subr.bf16.mxu1 %v10615_v52  ;;  %2185 = vmatprep.mubr.f32.mxu0 %v13425_v0  ;;  %v287_v48 = vld [vmem:[#allocation5 + $0x7c0] sm:$0xff]  ;;  %v488_v52 = vld [vmem:[#allocation5 + $0xe08] sm:$0xff] }
  0x76   :  { %2256 = vmatprep.mubr.f32.mxu1 %v13425_v0  ;;  %v10653_v56 = vpack.c.bf16 %v287_v48, %v87_v47  ;;  %v497_v47 = vld [vmem:[#allocation5 + $0xe50] sm:$0xff]  ;;  %v10695_v48 = vpack.c.bf16 %v698_v41, %v498_v40 }
  0x77   :  { %10610 = vmatpush1.bf16.msra.mxu0 %v10609_v58  ;;  %v10655_v58 = vpack.c.bf16 %v688_v53, %v488_v52  ;;  %v102_v52 = vld [vmem:[#allocation5 + $0x1f8] sm:$0xff]  ;;  %v10697_v55 = vpack.c.bf16 %v697_v49, %v497_v47  ;;  %v309_v47 = vld [vmem:[#allocation5 + $0x870] sm:$0xff]  ;;  %v708_v49 = vld [vmem:[#allocation5 + $0x14e8] sm:$0xff] }
  0x78   :  { %10618 = vmatpush1.bf16.msra.mxu1 %v10617_v59  ;;  %10620 = vmatprep.subr.bf16.mxu0 %v10619_v60  ;;  %v487_v59 = vld [vmem:[#allocation5 + $0xe00] sm:$0xff]  ;;  %v302_v53 = vld [vmem:[#allocation5 + $0x838] sm:$0xff] }
  0x79   :  { %10628 = vmatprep.subr.bf16.mxu1 %v10627_v1  ;;  %v687_v60 = vld [vmem:[#allocation5 + $0x1440] sm:$0xff]  ;;  %v92_v1 = vld [vmem:[#allocation5 + $0x1a8] sm:$0xff] }
  0x7a   :  { %10377 = vmatmul.mubr.msk.f32.vlgmr.msra.gmra.mrb[18].mxu0 %vm839_vm0, %v11395_v26  ;;  %v10657_v5 = vpack.c.bf16 %v687_v60, %v487_v59  ;;  %v101_v59 = vld [vmem:[#allocation5 + $0x1f0] sm:$0xff]  ;;  %v10707_v60 = vpack.c.bf16 %v302_v53, %v102_v52 }
  0x7b   :  { %10378 = vmatmul.mubr.msk.f32.vlgmr.msra.gmra.mrb[18].mxu1 %vm839_vm0, %v11395_v26  ;;  %10622 = vmatpush1.bf16.msra.mxu0 %v10621_v7  ;;  %v10667_v7 = vpack.c.bf16 %v292_v2, %v92_v1  ;;  %v502_v1 = vld [vmem:[#allocation5 + $0xe78] sm:$0xff]  ;;  %v10709_v3 = vpack.c.bf16 %v301_v61, %v101_v59  ;;  %v709_v59 = vld [vmem:[#allocation5 + $0x14f0] sm:$0xff]  ;;  %v312_v61 = vld [vmem:[#allocation5 + $0x888] sm:$0xff] }
  0x7c   :  { %10630 = vmatpush1.bf16.msra.mxu1 %v10629_v8  ;;  %10624 = vmatprep.subr.bf16.mxu0 %v10623_v9  ;;  %v91_v8 = vld [vmem:[#allocation5 + $0x1a0] sm:$0xff] }
  0x7d   :  { %10632 = vmatprep.subr.bf16.mxu1 %v10631_v13  ;;  %2327 = vmatprep.mubr.f32.mxu0 %v13425_v0  ;;  %v291_v9 = vld [vmem:[#allocation5 + $0x7e0] sm:$0xff]  ;;  %v492_v13 = vld [vmem:[#allocation5 + $0xe28] sm:$0xff] }
  0x7e   :  { %2398 = vmatprep.mubr.f32.mxu1 %v13425_v0  ;;  %v10669_v17 = vpack.c.bf16 %v291_v9, %v91_v8  ;;  %v701_v9 = vld [vmem:[#allocation5 + $0x14b0] sm:$0xff] }
  0x7f   :  { %10626 = vmatpush1.bf16.msra.mxu0 %v10625_v19  ;;  %v10671_v19 = vpack.c.bf16 %v692_v14, %v492_v13  ;;  %v106_v13 = vld [vmem:[#allocation5 + $0x218] sm:$0xff] }
  0x80   :  { %10634 = vmatpush1.bf16.msra.mxu1 %v10633_v20  ;;  %10636 = vmatprep.subr.bf16.mxu0 %v10635_v21  ;;  %v491_v20 = vld [vmem:[#allocation5 + $0xe20] sm:$0xff]  ;;  %v306_v14 = vld [vmem:[#allocation5 + $0x858] sm:$0xff] }
  0x81   :  { %10644 = vmatprep.subr.bf16.mxu1 %v10643_v25  ;;  %v691_v21 = vld [vmem:[#allocation5 + $0x1460] sm:$0xff]  ;;  %v96_v25 = vld [vmem:[#allocation5 + $0x1c8] sm:$0xff] }
  0x82   :  { %10379 = vmatmul.mubr.msk.f32.vlgmr.msra.gmra.mrb[20].mxu0 %vm839_vm0, %v11395_v26  ;;  %v10673_v30 = vpack.c.bf16 %v691_v21, %v491_v20  ;;  %v105_v20 = vld [vmem:[#allocation5 + $0x210] sm:$0xff]  ;;  %v10723_v21 = vpack.c.bf16 %v306_v14, %v106_v13 }
  0x83   :  { %10380 = vmatmul.mubr.msk.f32.vlgmr.msra.gmra.mrb[20].mxu1 %vm839_vm0, %v11395_v26  ;;  %10638 = vmatpush1.bf16.msra.mxu0 %v10637_v32  ;;  %v10683_v32 = vpack.c.bf16 %v296_v27, %v96_v25  ;;  %v506_v25 = vld [vmem:[#allocation5 + $0xe98] sm:$0xff]  ;;  %v10725_v29 = vpack.c.bf16 %v305_v22, %v105_v20  ;;  %v713_v20 = vld [vmem:[#allocation5 + $0x1510] sm:$0xff]  ;;  %v316_v22 = vld [vmem:[#allocation5 + $0x8a8] sm:$0xff] }
  0x84   :  { %10646 = vmatpush1.bf16.msra.mxu1 %v10645_v33  ;;  %10640 = vmatprep.subr.bf16.mxu0 %v10639_v34  ;;  %v95_v33 = vld [vmem:[#allocation5 + $0x1c0] sm:$0xff]  ;;  %v706_v27 = vld [vmem:[#allocation5 + $0x14d8] sm:$0xff] }
  0x85   :  { %10648 = vmatprep.subr.bf16.mxu1 %v10647_v38  ;;  %2469 = vmatprep.mubr.f32.mxu0 %v13425_v0  ;;  %v295_v34 = vld [vmem:[#allocation5 + $0x800] sm:$0xff]  ;;  %v496_v38 = vld [vmem:[#allocation5 + $0xe48] sm:$0xff] }
  0x86   :  { %2540 = vmatprep.mubr.f32.mxu1 %v13425_v0  ;;  %v10685_v42 = vpack.c.bf16 %v295_v34, %v95_v33  ;;  %v505_v33 = vld [vmem:[#allocation5 + $0xe90] sm:$0xff]  ;;  %v10727_v34 = vpack.c.bf16 %v706_v27, %v506_v25 }
  0x87   :  { %10642 = vmatpush1.bf16.msra.mxu0 %v10641_v44  ;;  %v10687_v44 = vpack.c.bf16 %v696_v39, %v496_v38  ;;  %v110_v38 = vld [vmem:[#allocation5 + $0x238] sm:$0xff]  ;;  %v10729_v41 = vpack.c.bf16 %v705_v35, %v505_v33  ;;  %v317_v33 = vld [vmem:[#allocation5 + $0x8b0] sm:$0xff]  ;;  %v716_v35 = vld [vmem:[#allocation5 + $0x1528] sm:$0xff] }
  0x88   :  { %10650 = vmatpush1.bf16.msra.mxu1 %v10649_v45  ;;  %10652 = vmatprep.subr.bf16.mxu0 %v10651_v46  ;;  %v495_v45 = vld [vmem:[#allocation5 + $0xe40] sm:$0xff]  ;;  %v310_v39 = vld [vmem:[#allocation5 + $0x878] sm:$0xff] }
  0x89   :  { %10660 = vmatprep.subr.bf16.mxu1 %v10659_v50  ;;  %v695_v46 = vld [vmem:[#allocation5 + $0x1480] sm:$0xff]  ;;  %v100_v50 = vld [vmem:[#allocation5 + $0x1e8] sm:$0xff] }
  0x8a   :  { %10381 = vmatmul.mubr.msk.f32.vlgmr.msra.gmra.mrb[22].mxu0 %vm839_vm0, %v11395_v26  ;;  %v10689_v54 = vpack.c.bf16 %v695_v46, %v495_v45  ;;  %v109_v45 = vld [vmem:[#allocation5 + $0x230] sm:$0xff]  ;;  %v10739_v46 = vpack.c.bf16 %v310_v39, %v110_v38 }
  0x8b   :  { %10382 = vmatmul.mubr.msk.f32.vlgmr.msra.gmra.mrb[22].mxu1 %vm839_vm0, %v11395_v26  ;;  %10654 = vmatpush1.bf16.msra.mxu0 %v10653_v56  ;;  %v10699_v56 = vpack.c.bf16 %v300_v51, %v100_v50  ;;  %v510_v50 = vld [vmem:[#allocation5 + $0xeb8] sm:$0xff]  ;;  %v10741_v53 = vpack.c.bf16 %v309_v47, %v109_v45  ;;  %v717_v45 = vld [vmem:[#allocation5 + $0x1530] sm:$0xff]  ;;  %v320_v47 = vld [vmem:[#allocation5 + $0x8c8] sm:$0xff] }
  0x8c   :  { %10662 = vmatpush1.bf16.msra.mxu1 %v10661_v57  ;;  %10656 = vmatprep.subr.bf16.mxu0 %v10655_v58  ;;  %v99_v57 = vld [vmem:[#allocation5 + $0x1e0] sm:$0xff]  ;;  %v710_v51 = vld [vmem:[#allocation5 + $0x14f8] sm:$0xff] }
  0x8d   :  { %10664 = vmatprep.subr.bf16.mxu1 %v10663_v62  ;;  %2611 = vmatprep.mubr.f32.mxu0 %v13425_v0  ;;  %v299_v58 = vld [vmem:[#allocation5 + $0x820] sm:$0xff]  ;;  %v500_v62 = vld [vmem:[#allocation5 + $0xe68] sm:$0xff] }
  0x8e   :  { %2682 = vmatprep.mubr.f32.mxu1 %v13425_v0  ;;  %v10701_v2 = vpack.c.bf16 %v299_v58, %v99_v57  ;;  %v10703_v4 = vpack.c.bf16 %v700_v63, %v500_v62  ;;  %v509_v57 = vld [vmem:[#allocation5 + $0xeb0] sm:$0xff]  ;;  %v10743_v58 = vpack.c.bf16 %v710_v51, %v510_v50  ;;  %v114_v62 = vld [vmem:[#allocation5 + $0x258] sm:$0xff] }
  0x8f   :  { %10658 = vmatpush1.bf16.msra.mxu0 %v10657_v5  ;;  %v499_v5 = vld [vmem:[#allocation5 + $0xe60] sm:$0xff]  ;;  %v314_v63 = vld [vmem:[#allocation5 + $0x898] sm:$0xff] }
  0x90   :  { %10666 = vmatpush1.bf16.msra.mxu1 %v10665_v6  ;;  %10668 = vmatprep.subr.bf16.mxu0 %v10667_v7  ;;  %v699_v6 = vld [vmem:[#allocation5 + $0x14a0] sm:$0xff]  ;;  %v501_v7 = vld [vmem:[#allocation5 + $0xe70] sm:$0xff] }
  0x91   :  { %10676 = vmatprep.subr.bf16.mxu1 %v10675_v11  ;;  %v304_v11 = vld [vmem:[#allocation5 + $0x848] sm:$0xff]  ;;  %v10705_v15 = vpack.c.bf16 %v699_v6, %v499_v5  ;;  %v10713_v16 = vpack.c.bf16 %v701_v9, %v501_v7  ;;  %v113_v5 = vld [vmem:[#allocation5 + $0x250] sm:$0xff]  ;;  %v10755_v6 = vpack.c.bf16 %v314_v63, %v114_v62 }
  0x92   :  { %10383 = vmatmul.mubr.msk.f32.vlgmr.msra.gmra.mrb[24].mxu0 %vm839_vm0, %v11395_v26  ;;  %v313_v7 = vld [vmem:[#allocation5 + $0x890] sm:$0xff]  ;;  %v712_v9 = vld [vmem:[#allocation5 + $0x1508] sm:$0xff] }
  0x93   :  { %10384 = vmatmul.mubr.msk.f32.vlgmr.msra.gmra.mrb[24].mxu1 %vm839_vm0, %v11395_v26  ;;  %10670 = vmatpush1.bf16.msra.mxu0 %v10669_v17  ;;  %v10715_v17 = vpack.c.bf16 %v304_v11, %v104_v10  ;;  %v514_v10 = vld [vmem:[#allocation5 + $0xed8] sm:$0xff]  ;;  %v10757_v14 = vpack.c.bf16 %v313_v7, %v113_v5  ;;  %v721_v5 = vld [vmem:[#allocation5 + $0x1550] sm:$0xff]  ;;  %v324_v7 = vld [vmem:[#allocation5 + $0x8e8] sm:$0xff] }
  0x94   :  { %10678 = vmatpush1.bf16.msra.mxu1 %v10677_v18  ;;  %10672 = vmatprep.subr.bf16.mxu0 %v10671_v19  ;;  %v103_v18 = vld [vmem:[#allocation5 + $0x200] sm:$0xff]  ;;  %v714_v11 = vld [vmem:[#allocation5 + $0x1518] sm:$0xff] }
  0x95   :  { %10680 = vmatprep.subr.bf16.mxu1 %v10679_v23  ;;  %2753 = vmatprep.mubr.f32.mxu0 %v13425_v0  ;;  %v303_v19 = vld [vmem:[#allocation5 + $0x840] sm:$0xff]  ;;  %v504_v23 = vld [vmem:[#allocation5 + $0xe88] sm:$0xff] }
  0x96   :  { %2824 = vmatprep.mubr.f32.mxu1 %v13425_v0  ;;  %v10717_v28 = vpack.c.bf16 %v303_v19, %v103_v18  ;;  %v513_v18 = vld [vmem:[#allocation5 + $0xed0] sm:$0xff]  ;;  %v10759_v19 = vpack.c.bf16 %v714_v11, %v514_v10 }
  0x97   :  { %10674 = vmatpush1.bf16.msra.mxu0 %v10673_v30  ;;  %v10719_v30 = vpack.c.bf16 %v704_v24, %v504_v23  ;;  %v118_v23 = vld [vmem:[#allocation5 + $0x278] sm:$0xff]  ;;  %v10761_v27 = vpack.c.bf16 %v713_v20, %v513_v18  ;;  %v325_v18 = vld [vmem:[#allocation5 + $0x8f0] sm:$0xff]  ;;  %v724_v20 = vld [vmem:[#allocation5 + $0x1568] sm:$0xff] }
  0x98   :  { %10682 = vmatpush1.bf16.msra.mxu1 %v10681_v31  ;;  %10684 = vmatprep.subr.bf16.mxu0 %v10683_v32  ;;  %v503_v31 = vld [vmem:[#allocation5 + $0xe80] sm:$0xff]  ;;  %v318_v24 = vld [vmem:[#allocation5 + $0x8b8] sm:$0xff] }
  0x99   :  { %10692 = vmatprep.subr.bf16.mxu1 %v10691_v36  ;;  %v703_v32 = vld [vmem:[#allocation5 + $0x14c0] sm:$0xff]  ;;  %v108_v36 = vld [vmem:[#allocation5 + $0x228] sm:$0xff] }
  0x9a   :  { %10385 = vmatmul.mubr.msk.f32.vlgmr.msra.gmra.mrb[26].mxu0 %vm839_vm0, %v11395_v26  ;;  %v10721_v40 = vpack.c.bf16 %v703_v32, %v503_v31  ;;  %v117_v31 = vld [vmem:[#allocation5 + $0x270] sm:$0xff]  ;;  %v10771_v32 = vpack.c.bf16 %v318_v24, %v118_v23 }
  0x9b   :  { %10386 = vmatmul.mubr.msk.f32.vlgmr.msra.gmra.mrb[26].mxu1 %vm839_vm0, %v11395_v26  ;;  %10686 = vmatpush1.bf16.msra.mxu0 %v10685_v42  ;;  %v702_v26 = vld [vmem:[#allocation5 + $0x14b8] sm:$0xff]  ;;  %v10731_v42 = vpack.c.bf16 %v308_v37, %v108_v36  ;;  %v10773_v39 = vpack.c.bf16 %v317_v33, %v117_v31  ;;  %v725_v31 = vld [vmem:[#allocation5 + $0x1570] sm:$0xff]  ;;  %v328_v33 = vld [vmem:[#allocation5 + $0x908] sm:$0xff] }
  0x9c   :  { %10694 = vmatpush1.bf16.msra.mxu1 %v10693_v43  ;;  %10688 = vmatprep.subr.bf16.mxu0 %v10687_v44  ;;  %v10711_v8 = vpack.c.bf16 %v702_v26, %v502_v1  ;;  %v107_v43 = vld [vmem:[#allocation5 + $0x220] sm:$0xff]  ;;  %v10745_v26 = vpack.c.bf16 %v709_v59, %v509_v57  ;;  %v518_v36 = vld [vmem:[#allocation5 + $0xef8] sm:$0xff]  ;;  %v321_v57 = vld [vmem:[#allocation5 + $0x8d0] sm:$0xff] }
  0x9d   :  { %10696 = vmatprep.subr.bf16.mxu1 %v10695_v48  ;;  %2895 = vmatprep.mubr.f32.mxu0 %v13425_v0  ;;  %v307_v44 = vld [vmem:[#allocation5 + $0x860] sm:$0xff]  ;;  %v508_v48 = vld [vmem:[#allocation5 + $0xea8] sm:$0xff]  ;;  %v718_v37 = vld [vmem:[#allocation5 + $0x1538] sm:$0xff] }
  0x9e   :  { %2966 = vmatprep.mubr.f32.mxu1 %v13425_v0  ;;  %v10733_v52 = vpack.c.bf16 %v307_v44, %v107_v43  ;;  %v517_v43 = vld [vmem:[#allocation5 + $0xef0] sm:$0xff]  ;;  %v10775_v44 = vpack.c.bf16 %v718_v37, %v518_v36  ;;  %v720_v59 = vld [vmem:[#allocation5 + $0x1548] sm:$0xff]  ;;  %v127_v37 = vld [vmem:[#allocation5 + $0x2c0] sm:$0xff] }
  0x9f   :  { %10690 = vmatpush1.bf16.msra.mxu0 %v10689_v54  ;;  %v10735_v54 = vpack.c.bf16 %v708_v49, %v508_v48  ;;  %v122_v48 = vld [vmem:[#allocation5 + $0x298] sm:$0xff]  ;;  %v10777_v51 = vpack.c.bf16 %v717_v45, %v517_v43  ;;  %v728_v45 = vld [vmem:[#allocation5 + $0x1588] sm:$0xff] }
  0xa0   :  { %10698 = vmatpush1.bf16.msra.mxu1 %v10697_v55  ;;  %10700 = vmatprep.subr.bf16.mxu0 %v10699_v56  ;;  %v507_v55 = vld [vmem:[#allocation5 + $0xea0] sm:$0xff]  ;;  %v322_v49 = vld [vmem:[#allocation5 + $0x8d8] sm:$0xff] }
  0xa1   :  { %10708 = vmatprep.subr.bf16.mxu1 %v10707_v60  ;;  %v707_v56 = vld [vmem:[#allocation5 + $0x14e0] sm:$0xff]  ;;  %v112_v60 = vld [vmem:[#allocation5 + $0x248] sm:$0xff] }
  0xa2   :  { %10387 = vmatmul.mubr.msk.f32.vlgmr.msra.gmra.mrb[28].mxu0 %vm839_vm0, %v11481_v12  ;;  %v10737_v1 = vpack.c.bf16 %v707_v56, %v507_v55  ;;  %v121_v55 = vld [vmem:[#allocation5 + $0x290] sm:$0xff]  ;;  %v10787_v56 = vpack.c.bf16 %v322_v49, %v122_v48  ;;  %v11525_v48 = vld [vmem:[#allocation5 + $0xf40] sm:$0xff] }
  0xa3   :  { %10388 = vmatmul.mubr.msk.f32.vlgmr.msra.gmra.mrb[28].mxu1 %vm839_vm0, %v11481_v12  ;;  %10702 = vmatpush1.bf16.msra.mxu0 %v10701_v2  ;;  %v10747_v2 = vpack.c.bf16 %v312_v61, %v112_v60  ;;  %v522_v60 = vld [vmem:[#allocation5 + $0xf18] sm:$0xff]  ;;  %v10789_v63 = vpack.c.bf16 %v321_v57, %v121_v55  ;;  %v11527_v49 = vld [vmem:[#allocation5 + $0x1580] sm:$0xff] }
  0xa4   :  { %10710 = vmatpush1.bf16.msra.mxu1 %v10709_v3  ;;  %10704 = vmatprep.subr.bf16.mxu0 %v10703_v4  ;;  %v111_v3 = vld [vmem:[#allocation5 + $0x240] sm:$0xff]  ;;  %v722_v61 = vld [vmem:[#allocation5 + $0x1558] sm:$0xff] }
  0xa5   :  { %10712 = vmatprep.subr.bf16.mxu1 %v10711_v8  ;;  %3037 = vmatprep.mubr.f32.mxu0 %v13425_v0  ;;  %v311_v4 = vld [vmem:[#allocation5 + $0x880] sm:$0xff]  ;;  %v512_v8 = vld [vmem:[#allocation5 + $0xec8] sm:$0xff]  ;;  %v11537_v57 = vld [vmem:[#allocation5 + $0x2f8] sm:$0xff] }
  0xa6   :  { %3108 = vmatprep.mubr.f32.mxu1 %v13425_v0  ;;  %v10749_v13 = vpack.c.bf16 %v311_v4, %v111_v3  ;;  %v521_v3 = vld [vmem:[#allocation5 + $0xf10] sm:$0xff]  ;;  %v10791_v4 = vpack.c.bf16 %v722_v61, %v522_v60  ;;  %v11543_v60 = vld [vmem:[#allocation5 + $0x920] sm:$0xff] }
  0xa7   :  { %10706 = vmatpush1.bf16.msra.mxu0 %v10705_v15  ;;  %v10751_v15 = vpack.c.bf16 %v712_v9, %v512_v8  ;;  %v126_v8 = vld [vmem:[#allocation5 + $0x2b8] sm:$0xff]  ;;  %v10793_v11 = vpack.c.bf16 %v721_v5, %v521_v3  ;;  %v11559_v5 = vld [vmem:[#allocation5 + $0x15a0] sm:$0xff] }
  0xa8   :  { %10714 = vmatpush1.bf16.msra.mxu1 %v10713_v16  ;;  %10716 = vmatprep.subr.bf16.mxu0 %v10715_v17  ;;  %v511_v16 = vld [vmem:[#allocation5 + $0xec0] sm:$0xff]  ;;  %v326_v9 = vld [vmem:[#allocation5 + $0x8f8] sm:$0xff] }
  0xa9   :  { %10724 = vmatprep.subr.bf16.mxu1 %v10723_v21  ;;  %v711_v17 = vld [vmem:[#allocation5 + $0x1500] sm:$0xff]  ;;  %v116_v21 = vld [vmem:[#allocation5 + $0x268] sm:$0xff]  ;;  %v11555_v3 = vld [vmem:[#allocation5 + $0x15b8] sm:$0xff] }
  0xaa   :  { %10389 = vmatmul.mubr.msk.f32.vlgmr.msra.gmra.mrb[30].mxu0 %vm839_vm0, %v11481_v12  ;;  %v10753_v25 = vpack.c.bf16 %v711_v17, %v511_v16  ;;  %v125_v16 = vld [vmem:[#allocation5 + $0x2b0] sm:$0xff]  ;;  %v10803_v17 = vpack.c.bf16 %v326_v9, %v126_v8  ;;  %v11567_v8 = vld [vmem:[#allocation5 + $0x308] sm:$0xff] }
  0xab   :  { %10390 = vmatmul.mubr.msk.f32.vlgmr.msra.gmra.mrb[30].mxu1 %vm839_vm0, %v11481_v12  ;;  %10718 = vmatpush1.bf16.msra.mxu0 %v10717_v28  ;;  %v10763_v28 = vpack.c.bf16 %v316_v22, %v116_v21  ;;  %v526_v21 = vld [vmem:[#allocation5 + $0xf38] sm:$0xff]  ;;  %v10805_v24 = vpack.c.bf16 %v325_v18, %v125_v16  ;;  %v11569_v9 = vld [vmem:[#allocation5 + $0x948] sm:$0xff]  ;;  %v11583_v16 = vld [vmem:[#allocation5 + $0x310] sm:$0xff] }
  0xac   :  { %10726 = vmatpush1.bf16.msra.mxu1 %v10725_v29  ;;  %10720 = vmatprep.subr.bf16.mxu0 %v10719_v30  ;;  %v115_v29 = vld [vmem:[#allocation5 + $0x260] sm:$0xff]  ;;  %v726_v22 = vld [vmem:[#allocation5 + $0x1578] sm:$0xff]  ;;  %v11587_v18 = vld [vmem:[#allocation5 + $0xf88] sm:$0xff] }
  0xad   :  { %10728 = vmatprep.subr.bf16.mxu1 %v10727_v34  ;;  %3179 = vmatprep.mubr.f32.mxu0 %v13425_v0  ;;  %v315_v30 = vld [vmem:[#allocation5 + $0x8a0] sm:$0xff]  ;;  %v516_v34 = vld [vmem:[#allocation5 + $0xee8] sm:$0xff]  ;;  %13701 = vst [vmem:[#allocation11_spill] sm:$0xff] %v11587_v18 }
  0xae   :  { %3250 = vmatprep.mubr.f32.mxu1 %v13425_v0  ;;  %v10765_v38 = vpack.c.bf16 %v315_v30, %v115_v29  ;;  %v525_v29 = vld [vmem:[#allocation5 + $0xf30] sm:$0xff]  ;;  %v10807_v30 = vpack.c.bf16 %v726_v22, %v526_v21  ;;  %v11593_v21 = vld [vmem:[#allocation5 + $0x15d8] sm:$0xff]  ;;  %v11707_v18 = vld [vmem:[#allocation5 + $0x368] sm:$0xff] }
  0xaf   :  { %10722 = vmatpush1.bf16.msra.mxu0 %v10721_v40  ;;  %v10767_v40 = vpack.c.bf16 %v716_v35, %v516_v34  ;;  %v130_v34 = vld [vmem:[#allocation5 + $0x2d8] sm:$0xff]  ;;  %13704 = vst [vmem:[#allocation14_spill] sm:$0xff] %v11593_v21  ;;  %v11705_v21 = vld [vmem:[#allocation5 + $0x1610] sm:$0xff]  ;;  %13736 = vst [vmem:[#allocation46_spill] sm:$0xff] %v11707_v18 }
  0xb0   :  { %10730 = vmatpush1.bf16.msra.mxu1 %v10729_v41  ;;  %10732 = vmatprep.subr.bf16.mxu0 %v10731_v42  ;;  %v515_v41 = vld [vmem:[#allocation5 + $0xee0] sm:$0xff]  ;;  %v330_v35 = vld [vmem:[#allocation5 + $0x918] sm:$0xff] }
  0xb1   :  { %10740 = vmatprep.subr.bf16.mxu1 %v10739_v46  ;;  %v715_v42 = vld [vmem:[#allocation5 + $0x1520] sm:$0xff]  ;;  %v120_v46 = vld [vmem:[#allocation5 + $0x288] sm:$0xff]  ;;  %v10819_v43 = vpack.c.bf16 %v330_v35, %v130_v34 }
  0xb2   :  { %10391 = vmatmul.mubr.msk.f32.vlgmr.msra.gmra.mrb[32].mxu0 %vm839_vm0, %v11481_v12  ;;  %v10769_v50 = vpack.c.bf16 %v715_v42, %v515_v41  ;;  %v129_v41 = vld [vmem:[#allocation5 + $0x2d0] sm:$0xff]  ;;  %v11620_v35 = vld [vmem:[#allocation5 + $0x320] sm:$0xff] }
  0xb3   :  { %10392 = vmatmul.mubr.msk.f32.vlgmr.msra.gmra.mrb[32].mxu1 %vm839_vm0, %v11481_v12  ;;  %10734 = vmatpush1.bf16.msra.mxu0 %v10733_v52  ;;  %v10779_v52 = vpack.c.bf16 %v320_v47, %v120_v46  ;;  %v329_v42 = vld [vmem:[#allocation5 + $0x910] sm:$0xff]  ;;  %v530_v46 = vld [vmem:[#allocation5 + $0xf58] sm:$0xff]  ;;  %13713 = vst [vmem:[#allocation23_spill] sm:$0xff] %v11620_v35  ;;  %v11691_v34 = vld [vmem:[#allocation5 + $0xfc0] sm:$0xff] }
  0xb4   :  { %10742 = vmatpush1.bf16.msra.mxu1 %v10741_v53  ;;  %10736 = vmatprep.subr.bf16.mxu0 %v10735_v54  ;;  %v119_v53 = vld [vmem:[#allocation5 + $0x280] sm:$0xff]  ;;  %v730_v47 = vld [vmem:[#allocation5 + $0x1598] sm:$0xff]  ;;  %v10821_v55 = vpack.c.bf16 %v329_v42, %v129_v41  ;;  %13734 = vst [vmem:[#allocation44_spill] sm:$0xff] %v11691_v34 }
  0xb5   :  { %10744 = vmatprep.subr.bf16.mxu1 %v10743_v58  ;;  %3321 = vmatprep.mubr.f32.mxu0 %v13425_v0  ;;  %v319_v54 = vld [vmem:[#allocation5 + $0x8c0] sm:$0xff]  ;;  %v520_v58 = vld [vmem:[#allocation5 + $0xf08] sm:$0xff]  ;;  %v10823_v61 = vpack.c.bf16 %v730_v47, %v530_v46  ;;  %v11632_v41 = vld [vmem:[#allocation5 + $0xfb8] sm:$0xff] }
  0xb6   :  { %3392 = vmatprep.mubr.f32.mxu1 %v13425_v0  ;;  %v10781_v62 = vpack.c.bf16 %v319_v54, %v119_v53  ;;  %v11533_v53 = vld [vmem:[#allocation5 + $0x2e8] sm:$0xff]  ;;  %13719 = vst [vmem:[#allocation29_spill] sm:$0xff] %v11632_v41  ;;  %v11634_v42 = vld [vmem:[#allocation5 + $0x15f8] sm:$0xff]  ;;  %v11645_v47 = vld [vmem:[#allocation5 + $0xfa0] sm:$0xff] }
  0xb7   :  { %10738 = vmatpush1.bf16.msra.mxu0 %v10737_v1  ;;  %v10783_v1 = vpack.c.bf16 %v720_v59, %v520_v58  ;;  %v11535_v54 = vld [vmem:[#allocation5 + $0x928] sm:$0xff]  ;;  %v11539_v58 = vld [vmem:[#allocation5 + $0x938] sm:$0xff]  ;;  %v11541_v59 = vld [vmem:[#allocation5 + $0x2e0] sm:$0xff]  ;;  %13720 = vst [vmem:[#allocation30_spill] sm:$0xff] %v11634_v42 }
  0xb8   :  { %10746 = vmatpush1.bf16.msra.mxu1 %v10745_v26  ;;  %10748 = vmatprep.subr.bf16.mxu0 %v10747_v2  ;;  %v519_v26 = vld [vmem:[#allocation5 + $0xf00] sm:$0xff]  ;;  %v11820_v41 = vld [vmem:[#allocation5 + $0x9f8] sm:$0xff] }
  0xb9   :  { %10756 = vmatprep.subr.bf16.mxu1 %v10755_v6  ;;  %v719_v2 = vld [vmem:[#allocation5 + $0x1540] sm:$0xff]  ;;  %v124_v6 = vld [vmem:[#allocation5 + $0x2a8] sm:$0xff]  ;;  %13766 = vst [vmem:[#allocation71_spill] sm:$0xff] %v11820_v41  ;;  %v11937_v34 = vld [vmem:[#allocation5 + $0xa38] sm:$0xff] }
  0xba   :  { %10393 = vmatmul.mubr.msk.f32.vlgmr.msra.gmra.mrb[34].mxu0 %vm839_vm0, %v11481_v12  ;;  %v10785_v10 = vpack.c.bf16 %v719_v2, %v519_v26  ;;  %v11551_v26 = vld [vmem:[#allocation5 + $0x15a8] sm:$0xff]  ;;  %v11553_v2 = vld [vmem:[#allocation5 + $0xf78] sm:$0xff]  ;;  %v11671_v46 = vld [vmem:[#allocation5 + $0x980] sm:$0xff]  ;;  %13802 = vst [vmem:[#allocation103_spill] sm:$0xff] %v11937_v34 }
  0xbb   :  { %10394 = vmatmul.mubr.msk.f32.vlgmr.msra.gmra.mrb[34].mxu1 %vm839_vm0, %v11481_v12  ;;  %10750 = vmatpush1.bf16.msra.mxu0 %v10749_v13  ;;  %v10795_v13 = vpack.c.bf16 %v324_v7, %v124_v6  ;;  %v11563_v6 = vld [vmem:[#allocation5 + $0xf70] sm:$0xff]  ;;  %13727 = vst [vmem:[#allocation37_spill] sm:$0xff] %v11671_v46  ;;  %v11741_v35 = vld [vmem:[#allocation5 + $0xfe0] sm:$0xff] }
  0xbc   :  { %10758 = vmatpush1.bf16.msra.mxu1 %v10757_v14  ;;  %10752 = vmatprep.subr.bf16.mxu0 %v10751_v15  ;;  %v123_v14 = vld [vmem:[#allocation5 + $0x2a0] sm:$0xff]  ;;  %v11565_v7 = vld [vmem:[#allocation5 + $0x15b0] sm:$0xff]  ;;  %13743 = vst [vmem:[#allocation53_spill] sm:$0xff] %v11741_v35 }
  0xbd   :  { %10760 = vmatprep.subr.bf16.mxu1 %v10759_v19  ;;  %3463 = vmatprep.mubr.f32.mxu0 %v13425_v0  ;;  %v323_v15 = vld [vmem:[#allocation5 + $0x8e0] sm:$0xff]  ;;  %v524_v19 = vld [vmem:[#allocation5 + $0xf28] sm:$0xff]  ;;  %v11810_v46 = vld [vmem:[#allocation5 + $0x1010] sm:$0xff] }
  0xbe   :  { %3534 = vmatprep.mubr.f32.mxu1 %v13425_v0  ;;  %v10797_v23 = vpack.c.bf16 %v323_v15, %v123_v14  ;;  %v11577_v14 = vld [vmem:[#allocation5 + $0x940] sm:$0xff]  ;;  %v10817_v15 = vpack.c.bf16 %v11527_v49, %v11525_v48  ;;  %v11649_v49 = vld [vmem:[#allocation5 + $0xfb0] sm:$0xff]  ;;  %13761 = vst [vmem:[#allocation66_spill] sm:$0xff] %v11810_v46  ;;  %v11958_v46 = vld [vmem:[#allocation5 + $0x1068] sm:$0xff] }
  0xbf   :  { %10754 = vmatpush1.bf16.msra.mxu0 %v10753_v25  ;;  %v10799_v25 = vpack.c.bf16 %v724_v20, %v524_v19  ;;  %v11589_v19 = vld [vmem:[#allocation5 + $0x15c8] sm:$0xff]  ;;  %v11591_v20 = vld [vmem:[#allocation5 + $0xf98] sm:$0xff]  ;;  %v11647_v48 = vld [vmem:[#allocation5 + $0x15e0] sm:$0xff]  ;;  %13721 = vst [vmem:[#allocation31_spill] sm:$0xff] %v11649_v49 }
  0xc0   :  { %10762 = vmatpush1.bf16.msra.mxu1 %v10761_v27  ;;  %10764 = vmatprep.subr.bf16.mxu0 %v10763_v28  ;;  %v523_v27 = vld [vmem:[#allocation5 + $0xf20] sm:$0xff]  ;;  %13702 = vst [vmem:[#allocation12_spill] sm:$0xff] %v11589_v19  ;;  %13703 = vst [vmem:[#allocation13_spill] sm:$0xff] %v11591_v20  ;;  %v11703_v20 = vld [vmem:[#allocation5 + $0xfd0] sm:$0xff] }
  0xc1   :  { %10772 = vmatprep.subr.bf16.mxu1 %v10771_v32  ;;  %v723_v28 = vld [vmem:[#allocation5 + $0x1560] sm:$0xff]  ;;  %v128_v32 = vld [vmem:[#allocation5 + $0x2c8] sm:$0xff]  ;;  %v11784_v49 = vld [vmem:[#allocation5 + $0x390] sm:$0xff]  ;;  %13808 = vst [vmem:[#allocation108_spill] sm:$0xff] %v11958_v46 }
  0xc2   :  { %10395 = vmatmul.mubr.msk.f32.vlgmr.msra.gmra.mrb[36].mxu0 %vm839_vm0, %v11481_v12  ;;  %v10801_v36 = vpack.c.bf16 %v723_v28, %v523_v27  ;;  %v11603_v27 = vld [vmem:[#allocation5 + $0xf90] sm:$0xff]  ;;  %v11709_v19 = vld [vmem:[#allocation5 + $0x9a8] sm:$0xff]  ;;  %13751 = vst [vmem:[#allocation58_spill] sm:$0xff] %v11784_v49  ;;  %v11858_v18 = vld [vmem:[#allocation5 + $0x1020] sm:$0xff] }
  0xc3   :  { %10396 = vmatmul.mubr.msk.f32.vlgmr.msra.gmra.mrb[36].mxu1 %vm839_vm0, %v11481_v12  ;;  %10766 = vmatpush1.bf16.msra.mxu0 %v10765_v38  ;;  %v10809_v38 = vpack.c.bf16 %v725_v31, %v525_v29  ;;  %13707 = vst [vmem:[#allocation17_spill] sm:$0xff] %v11603_v27  ;;  %v11605_v28 = vld [vmem:[#allocation5 + $0x15d0] sm:$0xff]  ;;  %v11607_v29 = vld [vmem:[#allocation5 + $0x328] sm:$0xff]  ;;  %v11611_v31 = vld [vmem:[#allocation5 + $0x338] sm:$0xff] }
  0xc4   :  { %10774 = vmatpush1.bf16.msra.mxu1 %v10773_v39  ;;  %10768 = vmatprep.subr.bf16.mxu0 %v10767_v40  ;;  %v10811_v39 = vpack.c.bf16 %v328_v33, %v128_v32  ;;  %v327_v40 = vld [vmem:[#allocation5 + $0x900] sm:$0xff]  ;;  %13708 = vst [vmem:[#allocation18_spill] sm:$0xff] %v11605_v28  ;;  %13709 = vst [vmem:[#allocation19_spill] sm:$0xff] %v11607_v29  ;;  %v11613_v32 = vld [vmem:[#allocation5 + $0x978] sm:$0xff]  ;;  %v10835_v33 = vpack.c.bf16 %v11539_v58, %v11537_v57 }
  0xc5   :  { %10776 = vmatprep.subr.bf16.mxu1 %v10775_v44  ;;  %3605 = vmatprep.mubr.f32.mxu0 %v13425_v0  ;;  %v528_v44 = vld [vmem:[#allocation5 + $0xf48] sm:$0xff]  ;;  %13711 = vst [vmem:[#allocation21_spill] sm:$0xff] %v11611_v31  ;;  %13712 = vst [vmem:[#allocation22_spill] sm:$0xff] %v11613_v32  ;;  %v11665_v57 = vld [vmem:[#allocation5 + $0x358] sm:$0xff]  ;;  %v13745_v32 = vpack.c.bf16 %v11543_v60, %v11541_v59  ;;  %v13758_v31 = vmov 0.0  }
  0xc6   :  { %3676 = vmatprep.mubr.f32.mxu1 %v13425_v0  ;;  %13724 = vst [vmem:[#allocation34_spill] sm:$0xff] %v11665_v57  ;;  %v11667_v58 = vld [vmem:[#allocation5 + $0x998] sm:$0xff]  ;;  %v11729_v29 = vld [vmem:[#allocation5 + $0x370] sm:$0xff]  ;;  %v11733_v27 = vld [vmem:[#allocation5 + $0xfe8] sm:$0xff] }
  0xc7   :  { %10770 = vmatpush1.bf16.msra.mxu0 %v10769_v50  ;;  %v10813_v50 = vpack.c.bf16 %v327_v40, %v127_v37  ;;  %v11624_v37 = vld [vmem:[#allocation5 + $0x330] sm:$0xff]  ;;  %v11630_v40 = vld [vmem:[#allocation5 + $0x15e8] sm:$0xff]  ;;  %13725 = vst [vmem:[#allocation35_spill] sm:$0xff] %v11667_v58  ;;  %v11766_v59 = vld [vmem:[#allocation5 + $0x9d8] sm:$0xff] }
  0xc8   :  { %10778 = vmatpush1.bf16.msra.mxu1 %v10777_v51  ;;  %10780 = vmatprep.subr.bf16.mxu0 %v10779_v52  ;;  %v11529_v51 = vld [vmem:[#allocation5 + $0xf50] sm:$0xff]  ;;  %13715 = vst [vmem:[#allocation25_spill] sm:$0xff] %v11624_v37  ;;  %13718 = vst [vmem:[#allocation28_spill] sm:$0xff] %v11630_v40  ;;  %v11735_v28 = vld [vmem:[#allocation5 + $0x1628] sm:$0xff] }
  0xc9   :  { %10788 = vmatprep.subr.bf16.mxu1 %v10787_v56  ;;  %v11531_v52 = vld [vmem:[#allocation5 + $0x1590] sm:$0xff]  ;;  %v10815_v56 = vpack.c.bf16 %v728_v45, %v528_v44  ;;  %v11685_v45 = vld [vmem:[#allocation5 + $0x1608] sm:$0xff]  ;;  %v11687_v44 = vld [vmem:[#allocation5 + $0xfd8] sm:$0xff]  ;;  %13747 = vst [vmem:[#allocation56_spill] sm:$0xff] %v11766_v59 }
  0xca   :  { %10397 = vmatmul.mubr.msk.f32.vlgmr.msra.gmra.mrb[38].mxu0 %vm839_vm0, %v11481_v12  ;;  %v10825_v22 = vpack.c.bf16 %v11531_v52, %v11529_v51  ;;  %v11653_v51 = vld [vmem:[#allocation5 + $0x348] sm:$0xff]  ;;  %13731 = vst [vmem:[#allocation41_spill] sm:$0xff] %v11685_v45  ;;  %13732 = vst [vmem:[#allocation42_spill] sm:$0xff] %v11687_v44  ;;  %v11758_v40 = vld [vmem:[#allocation5 + $0x1630] sm:$0xff] }
  0xcb   :  { %10398 = vmatmul.mubr.msk.f32.vlgmr.msra.gmra.mrb[38].mxu1 %vm839_vm0, %v11481_v12  ;;  %10782 = vmatpush1.bf16.msra.mxu0 %v10781_v62  ;;  %v11545_v62 = vld [vmem:[#allocation5 + $0x2f0] sm:$0xff]  ;;  %13722 = vst [vmem:[#allocation32_spill] sm:$0xff] %v11653_v51  ;;  %v11655_v52 = vld [vmem:[#allocation5 + $0x988] sm:$0xff]  ;;  %v11780_v51 = vld [vmem:[#allocation5 + $0x380] sm:$0xff] }
  0xcc   :  { %10790 = vmatpush1.bf16.msra.mxu1 %v10789_v63  ;;  %10784 = vmatprep.subr.bf16.mxu0 %v10783_v1  ;;  %v11547_v63 = vld [vmem:[#allocation5 + $0x930] sm:$0xff]  ;;  %v11549_v1 = vld [vmem:[#allocation5 + $0xf68] sm:$0xff]  ;;  %13723 = vst [vmem:[#allocation33_spill] sm:$0xff] %v11655_v52  ;;  %13750 = vst [vmem:[#allocation57_spill] sm:$0xff] %v11780_v51 }
  0xcd   :  { %10792 = vmatprep.subr.bf16.mxu1 %v10791_v4  ;;  %3747 = vmatprep.mubr.f32.mxu0 %v13425_v0  ;;  %v11557_v4 = vld [vmem:[#allocation5 + $0xf60] sm:$0xff]  ;;  %v11760_v37 = vld [vmem:[#allocation5 + $0x388] sm:$0xff]  ;;  %v13748_v60 = vpack.c.bf16 %v11547_v63, %v11545_v62  ;;  %v11786_v62 = vld [vmem:[#allocation5 + $0x9d0] sm:$0xff]  ;;  %13776 = vst [vmem:[#allocation80_spill] sm:$0xff] %v11858_v18 }
  0xce   :  { %3818 = vmatprep.mubr.f32.mxu1 %v13425_v0  ;;  %v11782_v52 = vld [vmem:[#allocation5 + $0x9c0] sm:$0xff]  ;;  %13752 = vst [vmem:[#allocation59_spill] sm:$0xff] %v11786_v62  ;;  %v11788_v63 = vld [vmem:[#allocation5 + $0x1008] sm:$0xff]  ;;  %v11812_v57 = vld [vmem:[#allocation5 + $0x1650] sm:$0xff]  ;;  %v13773_v42 = vpack.c.bf16 %v11559_v5, %v11557_v4 }
  0xcf   :  { %10786 = vmatpush1.bf16.msra.mxu0 %v10785_v10  ;;  %v11571_v10 = vld [vmem:[#allocation5 + $0x318] sm:$0xff]  ;;  %13753 = vst [vmem:[#allocation60_spill] sm:$0xff] %v11788_v63  ;;  %13762 = vst [vmem:[#allocation67_spill] sm:$0xff] %v11812_v57  ;;  %v11831_v44 = vld [vmem:[#allocation5 + $0x3a0] sm:$0xff] }
  0xd0   :  { %10794 = vmatpush1.bf16.msra.mxu1 %v10793_v11  ;;  %10796 = vmatprep.subr.bf16.mxu0 %v10795_v13  ;;  %v11573_v11 = vld [vmem:[#allocation5 + $0x958] sm:$0xff]  ;;  %v11575_v13 = vld [vmem:[#allocation5 + $0x300] sm:$0xff]  ;;  %13767 = vst [vmem:[#allocation72_spill] sm:$0xff] %v11831_v44  ;;  %v11837_v45 = vld [vmem:[#allocation5 + $0x9f0] sm:$0xff] }
  0xd1   :  { %10804 = vmatprep.subr.bf16.mxu1 %v10803_v17  ;;  %v11585_v17 = vld [vmem:[#allocation5 + $0x950] sm:$0xff]  ;;  %13770 = vst [vmem:[#allocation75_spill] sm:$0xff] %v11837_v45  ;;  %v11839_v58 = vld [vmem:[#allocation5 + $0x1028] sm:$0xff]  ;;  %v11860_v4 = vld [vmem:[#allocation5 + $0x1660] sm:$0xff] }
  0xd2   :  { %10399 = vmatmul.mubr.msk.f32.vlgmr.msra.gmra.mrb[40].mxu0 %vm839_vm0, %v11481_v12  ;;  %13771 = vst [vmem:[#allocation76_spill] sm:$0xff] %v11839_v58  ;;  %13777 = vst [vmem:[#allocation81_spill] sm:$0xff] %v11860_v4  ;;  %v11862_v5 = vld [vmem:[#allocation5 + $0x1030] sm:$0xff]  ;;  %v11905_v59 = vld [vmem:[#allocation5 + $0x1048] sm:$0xff] }
  0xd3   :  { %10400 = vmatmul.mubr.msk.f32.vlgmr.msra.gmra.mrb[40].mxu1 %vm839_vm0, %v11481_v12  ;;  %10798 = vmatpush1.bf16.msra.mxu0 %v10797_v23  ;;  %v10827_v23 = vpack.c.bf16 %v11535_v54, %v11533_v53  ;;  %v11675_v53 = vld [vmem:[#allocation5 + $0x990] sm:$0xff]  ;;  %v11743_v54 = vld [vmem:[#allocation5 + $0x1620] sm:$0xff]  ;;  %13778 = vst [vmem:[#allocation82_spill] sm:$0xff] %v11862_v5  ;;  %13791 = vst [vmem:[#allocation92_spill] sm:$0xff] %v11905_v59 }
  0xd4   :  { %10806 = vmatpush1.bf16.msra.mxu1 %v10805_v24  ;;  %10800 = vmatprep.subr.bf16.mxu0 %v10799_v25  ;;  %v11599_v24 = vld [vmem:[#allocation5 + $0xf80] sm:$0xff]  ;;  %13729 = vst [vmem:[#allocation39_spill] sm:$0xff] %v11675_v53  ;;  %13744 = vst [vmem:[#allocation54_spill] sm:$0xff] %v11743_v54  ;;  %v11878_v54 = vld [vmem:[#allocation5 + $0x3c8] sm:$0xff] }
  0xd5   :  { %10808 = vmatprep.subr.bf16.mxu1 %v10807_v30  ;;  %3889 = vmatprep.mubr.f32.mxu0 %v13425_v0  ;;  %13705 = vst [vmem:[#allocation15_spill] sm:$0xff] %v11599_v24  ;;  %v11601_v25 = vld [vmem:[#allocation5 + $0x15c0] sm:$0xff]  ;;  %v11609_v30 = vld [vmem:[#allocation5 + $0x968] sm:$0xff]  ;;  %13782 = vst [vmem:[#allocation84_spill] sm:$0xff] %v11878_v54 }
  0xd6   :  { %3960 = vmatprep.mubr.f32.mxu1 %v13425_v0  ;;  %13706 = vst [vmem:[#allocation16_spill] sm:$0xff] %v11601_v25  ;;  %13710 = vst [vmem:[#allocation20_spill] sm:$0xff] %v11609_v30  ;;  %v11715_v24 = vld [vmem:[#allocation5 + $0x360] sm:$0xff]  ;;  %v11731_v30 = vld [vmem:[#allocation5 + $0x9b0] sm:$0xff] }
  0xd7   :  { %10802 = vmatpush1.bf16.msra.mxu0 %v10801_v36  ;;  %v11622_v36 = vld [vmem:[#allocation5 + $0x960] sm:$0xff]  ;;  %13739 = vst [vmem:[#allocation49_spill] sm:$0xff] %v11715_v24  ;;  %v11737_v25 = vld [vmem:[#allocation5 + $0xff8] sm:$0xff]  ;;  %v13781_v24 = vpack.c.bf16 %v11569_v9, %v11567_v8  ;;  %v13788_v9 = vpack.c.bf16 %v11573_v11, %v11571_v10  ;;  %v11907_v10 = vld [vmem:[#allocation5 + $0x1688] sm:$0xff] }
  0xd8   :  { %10810 = vmatpush1.bf16.msra.mxu1 %v10809_v38  ;;  %10812 = vmatprep.subr.bf16.mxu0 %v10811_v39  ;;  %13714 = vst [vmem:[#allocation24_spill] sm:$0xff] %v11622_v36  ;;  %v11626_v38 = vld [vmem:[#allocation5 + $0x970] sm:$0xff]  ;;  %v11628_v39 = vld [vmem:[#allocation5 + $0xfa8] sm:$0xff]  ;;  %13741 = vst [vmem:[#allocation51_spill] sm:$0xff] %v11737_v25 }
  0xd9   :  { %10820 = vmatprep.subr.bf16.mxu1 %v10819_v43  ;;  %13716 = vst [vmem:[#allocation26_spill] sm:$0xff] %v11626_v38  ;;  %13717 = vst [vmem:[#allocation27_spill] sm:$0xff] %v11628_v39  ;;  %v11689_v43 = vld [vmem:[#allocation5 + $0x1618] sm:$0xff]  ;;  %v11756_v39 = vld [vmem:[#allocation5 + $0xff0] sm:$0xff] }
  0xda   :  { %10401 = vmatmul.mubr.msk.f32.vlgmr.msra.gmra.mrb[42].mxu0 %vm839_vm0, %v11481_v12  ;;  %13733 = vst [vmem:[#allocation43_spill] sm:$0xff] %v11689_v43  ;;  %v11762_v38 = vld [vmem:[#allocation5 + $0x9c8] sm:$0xff]  ;;  %v11764_v36 = vld [vmem:[#allocation5 + $0x398] sm:$0xff]  ;;  %v11806_v53 = vld [vmem:[#allocation5 + $0x1000] sm:$0xff] }
  0xdb   :  { %10402 = vmatmul.mubr.msk.f32.vlgmr.msra.gmra.mrb[42].mxu1 %vm839_vm0, %v11481_v12  ;;  %10814 = vmatpush1.bf16.msra.mxu0 %v10813_v50  ;;  %v11651_v50 = vld [vmem:[#allocation5 + $0x15f0] sm:$0xff]  ;;  %13746 = vst [vmem:[#allocation55_spill] sm:$0xff] %v11764_v36  ;;  %13759 = vst [vmem:[#allocation64_spill] sm:$0xff] %v11806_v53  ;;  %v11833_v43 = vld [vmem:[#allocation5 + $0x9e0] sm:$0xff] }
  0xdc   :  { %10822 = vmatpush1.bf16.msra.mxu1 %v10821_v55  ;;  %10816 = vmatprep.subr.bf16.mxu0 %v10815_v56  ;;  %v11717_v56 = vld [vmem:[#allocation5 + $0x9a0] sm:$0xff]  ;;  %v11739_v55 = vld [vmem:[#allocation5 + $0x1638] sm:$0xff]  ;;  %13768 = vst [vmem:[#allocation73_spill] sm:$0xff] %v11833_v43  ;;  %v11880_v25 = vld [vmem:[#allocation5 + $0xa08] sm:$0xff] }
  0xdd   :  { %10824 = vmatprep.subr.bf16.mxu1 %v10823_v61  ;;  %4031 = vmatprep.mubr.f32.mxu0 %v13425_v0  ;;  %v11669_v61 = vld [vmem:[#allocation5 + $0x340] sm:$0xff]  ;;  %13740 = vst [vmem:[#allocation50_spill] sm:$0xff] %v11717_v56  ;;  %13742 = vst [vmem:[#allocation52_spill] sm:$0xff] %v11739_v55  ;;  %v11882_v55 = vld [vmem:[#allocation5 + $0x3d8] sm:$0xff] }
  0xde   :  { %4102 = vmatprep.mubr.f32.mxu1 %v13425_v0  ;;  %13726 = vst [vmem:[#allocation36_spill] sm:$0xff] %v11669_v61  ;;  %v11683_v0 = vld [vmem:[#allocation5 + $0xfc8] sm:$0xff]  ;;  %v11808_v61 = vld [vmem:[#allocation5 + $0x1640] sm:$0xff]  ;;  %13783 = vst [vmem:[#allocation85_spill] sm:$0xff] %v11880_v25 }
  0xdf   :  { %10818 = vmatpush1.bf16.msra.mxu0 %v10817_v15  ;;  %v11673_v15 = vld [vmem:[#allocation5 + $0x350] sm:$0xff]  ;;  %13730 = vst [vmem:[#allocation40_spill] sm:$0xff] %v11683_v0  ;;  %13760 = vst [vmem:[#allocation65_spill] sm:$0xff] %v11808_v61  ;;  %v11888_v8 = vld [vmem:[#allocation5 + $0xa00] sm:$0xff] }
  0xe0   :  { %13728 = vst [vmem:[#allocation38_spill] sm:$0xff] %v11673_v15  ;;  %10826 = vmatpush1.bf16.msra.mxu1 %v10825_v22  ;;  %10828 = vmatprep.subr.bf16.mxu0 %v10827_v23  ;;  %v11693_v22 = vld [vmem:[#allocation5 + $0x1600] sm:$0xff]  ;;  %v11713_v23 = vld [vmem:[#allocation5 + $0x9b8] sm:$0xff]  ;;  %v11835_v0 = vld [vmem:[#allocation5 + $0x3b0] sm:$0xff] }
  0xe1   :  { %13735 = vst [vmem:[#allocation45_spill] sm:$0xff] %v11693_v22  ;;  %10836 = vmatprep.subr.bf16.mxu1 %v10835_v33  ;;  %v11711_v33 = vld [vmem:[#allocation5 + $0x378] sm:$0xff]  ;;  %13738 = vst [vmem:[#allocation48_spill] sm:$0xff] %v11713_v23  ;;  %v11841_v15 = vld [vmem:[#allocation5 + $0x1668] sm:$0xff]  ;;  %v13780_v22 = vpack.c.bf16 %v11565_v7, %v11563_v6 }
  0xe2   :  { %13737 = vst [vmem:[#allocation47_spill] sm:$0xff] %v11711_v33  ;;  %10403 = vmatmul.mubr.msk.f32.vlgmr.msra.gmra.mrb[44].mxu0 %vm839_vm0, %v11481_v12  ;;  %13769 = vst [vmem:[#allocation74_spill] sm:$0xff] %v11835_v0  ;;  %v11854_v33 = vld [vmem:[#allocation5 + $0x1038] sm:$0xff]  ;;  %v11886_v7 = vld [vmem:[#allocation5 + $0x3c0] sm:$0xff] }
  0xe3   :  { %10404 = vmatmul.mubr.msk.f32.vlgmr.msra.gmra.mrb[44].mxu1 %vm839_vm0, %v11481_v12  ;;  %10830 = vmatpush1.bf16.msra.mxu0 %v13745_v32  ;;  %v13749_v32 = vpack.c.bf16 %v11551_v26, %v11549_v1  ;;  %v11790_v1 = vld [vmem:[#allocation5 + $0x1648] sm:$0xff]  ;;  %v11792_v26 = vld [vmem:[#allocation5 + $0x1018] sm:$0xff]  ;;  %13772 = vst [vmem:[#allocation77_spill] sm:$0xff] %v11841_v15  ;;  %13774 = vst [vmem:[#allocation78_spill] sm:$0xff] %v11854_v33 }
  0xe4   :  { %10838 = vmatpush1.bf16.msra.mxu1 %v13748_v60  ;;  %13754 = vst [vmem:[#allocation61_spill] sm:$0xff] %v11790_v1  ;;  %13755 = vst [vmem:[#allocation62_spill] sm:$0xff] %v11792_v26  ;;  %v11794_v60 = vld [vmem:[#allocation5 + $0x1658] sm:$0xff]  ;;  %4173 = vmatprep.mubr.f32.mxu0 %v13758_v31  ;;  %v11901_v56 = vld [vmem:[#allocation5 + $0x3d0] sm:$0xff] }
  0xe5   :  { %10832 = vmatprep.subr.bf16.mxu0 %v13749_v32  ;;  %13756 = vst [vmem:[#allocation63_spill] sm:$0xff] %v11794_v60  ;;  %v13757_v32 = vpack.c.bf16 %v11555_v3, %v11553_v2  ;;  %v11814_v2 = vld [vmem:[#allocation5 + $0x3a8] sm:$0xff]  ;;  %4244 = vmatprep.mubr.f32.mxu1 %v13758_v31  ;;  %v11856_v23 = vld [vmem:[#allocation5 + $0x1678] sm:$0xff]  ;;  %13784 = vst [vmem:[#allocation86_spill] sm:$0xff] %v11882_v55  ;;  %v13805_v60 = vpack.c.bf16 %v11577_v14, %v11575_v13 }
  0xe6   :  { %13763 = vst [vmem:[#allocation68_spill] sm:$0xff] %v11814_v2  ;;  %v11816_v3 = vld [vmem:[#allocation5 + $0x9e8] sm:$0xff]  ;;  %13775 = vst [vmem:[#allocation79_spill] sm:$0xff] %v11856_v23  ;;  %v11884_v6 = vld [vmem:[#allocation5 + $0xa18] sm:$0xff]  ;;  %v13812_v14 = vpack.c.bf16 %v11585_v17, %v11583_v16 }
  0xe7   :  { %10840 = vmatprep.subr.bf16.mxu1 %v13757_v32  ;;  %13764 = vst [vmem:[#allocation69_spill] sm:$0xff] %v11816_v3  ;;  %v11818_v32 = vld [vmem:[#allocation5 + $0x3b8] sm:$0xff]  ;;  %10834 = vmatpush1.bf16.msra.mxu0 %v13773_v42  ;;  %v11864_v42 = vld [vmem:[#allocation5 + $0x1670] sm:$0xff]  ;;  %13785 = vst [vmem:[#allocation87_spill] sm:$0xff] %v11884_v6 }
  0xe8   :  { %13765 = vst [vmem:[#allocation70_spill] sm:$0xff] %v11818_v32  ;;  %13779 = vst [vmem:[#allocation83_spill] sm:$0xff] %v11864_v42  ;;  %10842 = vmatpush1.bf16.msra.mxu1 %v13780_v22  ;;  %10844 = vmatprep.subr.bf16.mxu0 %v13781_v24  ;;  %v11903_v36 = vld [vmem:[#allocation5 + $0xa10] sm:$0xff]  ;;  %v11909_v11 = vld [vmem:[#allocation5 + $0x1058] sm:$0xff] }
  0xe9   :  { %13786 = vst [vmem:[#allocation88_spill] sm:$0xff] %v11886_v7  ;;  %13787 = vst [vmem:[#allocation89_spill] sm:$0xff] %v11888_v8  ;;  %10852 = vmatprep.subr.bf16.mxu1 %v13788_v9  ;;  %v11911_v9 = vld [vmem:[#allocation5 + $0x1698] sm:$0xff]  ;;  %v11913_v24 = vld [vmem:[#allocation5 + $0x1040] sm:$0xff] }
  0xea   :  { %13789 = vst [vmem:[#allocation90_spill] sm:$0xff] %v11901_v56  ;;  %13790 = vst [vmem:[#allocation91_spill] sm:$0xff] %v11903_v36  ;;  %v11915_v22 = vld [vmem:[#allocation5 + $0x1680] sm:$0xff]  ;;  %10405 = vmatmul.mubr.msk.f32.vlgmr.msra.gmra.mrb[46].mxu0 %vm839_vm0, %v11481_v12  ;;  %v11927_v63 = vld [vmem:[#allocation5 + $0x1050] sm:$0xff] }
  0xeb   :  { %13792 = vst [vmem:[#allocation93_spill] sm:$0xff] %v11907_v10  ;;  %13793 = vst [vmem:[#allocation94_spill] sm:$0xff] %v11909_v11  ;;  %v11929_v1 = vld [vmem:[#allocation5 + $0x1690] sm:$0xff]  ;;  %v11931_v49 = vld [vmem:[#allocation5 + $0x3e8] sm:$0xff]  ;;  %10406 = vmatmul.mubr.msk.f32.vlgmr.msra.gmra.mrb[46].mxu1 %vm839_vm0, %v11481_v12  ;;  %10846 = vmatpush1.bf16.msra.mxu0 %v13805_v60 }
  0xec   :  { %13794 = vst [vmem:[#allocation95_spill] sm:$0xff] %v11911_v9  ;;  %13795 = vst [vmem:[#allocation96_spill] sm:$0xff] %v11913_v24  ;;  %v11933_v62 = vld [vmem:[#allocation5 + $0xa28] sm:$0xff]  ;;  %v11935_v51 = vld [vmem:[#allocation5 + $0x3f8] sm:$0xff]  ;;  %10854 = vmatpush1.bf16.msra.mxu1 %v13812_v14  ;;  %4315 = vmatprep.mubr.f32.mxu0 %v13758_v31 }
  0xed   :  { %13796 = vst [vmem:[#allocation97_spill] sm:$0xff] %v11915_v22  ;;  %13797 = vst [vmem:[#allocation98_spill] sm:$0xff] %v11927_v63  ;;  %v11939_v53 = vld [vmem:[#allocation5 + $0x3e0] sm:$0xff]  ;;  %v11954_v2 = vld [vmem:[#allocation5 + $0x3f0] sm:$0xff]  ;;  %4386 = vmatprep.mubr.f32.mxu1 %v13758_v31 }
  0xee   :  { %13798 = vst [vmem:[#allocation99_spill] sm:$0xff] %v11929_v1  ;;  %13799 = vst [vmem:[#allocation100_spill] sm:$0xff] %v11931_v49  ;;  %v11941_v35 = vld [vmem:[#allocation5 + $0xa20] sm:$0xff]  ;;  %v11956_v3 = vld [vmem:[#allocation5 + $0xa30] sm:$0xff] }
  0xef   :  { %13800 = vst [vmem:[#allocation101_spill] sm:$0xff] %v11933_v62  ;;  %13801 = vst [vmem:[#allocation102_spill] sm:$0xff] %v11935_v51  ;;  %v11960_v12 = vld [vmem:[#allocation5 + $0x16a8] sm:$0xff]  ;;  %v11962_v57 = vld [vmem:[#allocation5 + $0x1078] sm:$0xff] }
  0xf0   :  { %13803 = vst [vmem:[#allocation104_spill] sm:$0xff] %v11939_v53  ;;  %13804 = vst [vmem:[#allocation105_spill] sm:$0xff] %v11941_v35  ;;  %v11964_v13 = vld [vmem:[#allocation5 + $0x16b8] sm:$0xff]  ;;  %v13814_v32 = vld [vmem:[#allocation11_spill] sm:$0xff] }
  0xf1   :  { %13806 = vst [vmem:[#allocation106_spill] sm:$0xff] %v11954_v2  ;;  %13807 = vst [vmem:[#allocation107_spill] sm:$0xff] %v11956_v3  ;;  %v13813_v60 = vld [vmem:[#allocation12_spill] sm:$0xff]  ;;  %v11978_v0 = vld [vmem:[#allocation5 + $0x1060] sm:$0xff] }
  0xf2   :  { %13809 = vst [vmem:[#allocation109_spill] sm:$0xff] %v11960_v12  ;;  %13810 = vst [vmem:[#allocation110_spill] sm:$0xff] %v11962_v57  ;;  %v13815_v26 = vpack.c.bf16 %v13813_v60, %v13814_v32  ;;  %v11980_v45 = vld [vmem:[#allocation5 + $0x16a0] sm:$0xff]  ;;  %v11982_v44 = vld [vmem:[#allocation5 + $0x1070] sm:$0xff] }
  0xf3   :  { %13811 = vst [vmem:[#allocation111_spill] sm:$0xff] %v11964_v13  ;;  %13816 = vst [vmem:[#allocation12_spill] sm:$0xff] %v11978_v0  ;;  %v11984_v16 = vld [vmem:[#allocation5 + $0x16b0] sm:$0xff]  ;;  %v11986_v17 = vld [vmem:[#allocation5 + $0x408] sm:$0xff] }
  0xf4   :  { %10848 = vmatprep.subr.bf16.mxu0 %v13815_v26  ;;  %13817 = vst [vmem:[#allocation11_spill] sm:$0xff] %v11980_v45  ;;  %13818 = vst [vmem:[#allocation112_spill] sm:$0xff] %v11982_v44  ;;  %v11988_v26 = vld [vmem:[#allocation5 + $0xa48] sm:$0xff]  ;;  %v11990_v32 = vld [vmem:[#allocation5 + $0x418] sm:$0xff] }
  0xf5   :  { %13819 = vst [vmem:[#allocation113_spill] sm:$0xff] %v11984_v16  ;;  %13820 = vst [vmem:[#allocation114_spill] sm:$0xff] %v11986_v17  ;;  %v11992_v14 = vld [vmem:[#allocation5 + $0xa58] sm:$0xff]  ;;  %v13824_v60 = vld [vmem:[#allocation14_spill] sm:$0xff] }
  0xf6   :  { %13821 = vst [vmem:[#allocation115_spill] sm:$0xff] %v11988_v26  ;;  %13822 = vst [vmem:[#allocation116_spill] sm:$0xff] %v11990_v32  ;;  %v13825_v58 = vld [vmem:[#allocation13_spill] sm:$0xff]  ;;  %v12008_v33 = vld [vmem:[#allocation5 + $0x410] sm:$0xff] }
  0xf7   :  { %13823 = vst [vmem:[#allocation117_spill] sm:$0xff] %v11992_v14  ;;  %v13826_v41 = vpack.c.bf16 %v13824_v60, %v13825_v58  ;;  %v12004_v18 = vld [vmem:[#allocation5 + $0x400] sm:$0xff]  ;;  %13829 = vst [vmem:[#allocation118_spill] sm:$0xff] %v12008_v33  ;;  %v12010_v23 = vld [vmem:[#allocation5 + $0xa50] sm:$0xff] }
  0xf8   :  { %13827 = vst [vmem:[#allocation14_spill] sm:$0xff] %v12004_v18  ;;  %v12006_v4 = vld [vmem:[#allocation5 + $0xa40] sm:$0xff]  ;;  %13830 = vst [vmem:[#allocation119_spill] sm:$0xff] %v12010_v23  ;;  %v12014_v58 = vld [vmem:[#allocation5 + $0x16c8] sm:$0xff] }
  0xf9   :  { %10856 = vmatprep.subr.bf16.mxu1 %v13826_v41  ;;  %13828 = vst [vmem:[#allocation13_spill] sm:$0xff] %v12006_v4  ;;  %v12012_v41 = vld [vmem:[#allocation5 + $0x1088] sm:$0xff]  ;;  %13832 = vst [vmem:[#allocation121_spill] sm:$0xff] %v12014_v58  ;;  %v12016_v60 = vld [vmem:[#allocation5 + $0x1098] sm:$0xff] }
  0xfa   :  { %13831 = vst [vmem:[#allocation120_spill] sm:$0xff] %v12012_v41  ;;  %13833 = vst [vmem:[#allocation122_spill] sm:$0xff] %v12016_v60  ;;  %v12018_v15 = vld [vmem:[#allocation5 + $0x16d8] sm:$0xff]  ;;  %v12029_v55 = vld [vmem:[#allocation5 + $0x1080] sm:$0xff] }
  0xfb   :  { %13834 = vst [vmem:[#allocation123_spill] sm:$0xff] %v12018_v15  ;;  %13835 = vst [vmem:[#allocation124_spill] sm:$0xff] %v12029_v55  ;;  %v12031_v6 = vld [vmem:[#allocation5 + $0x16c0] sm:$0xff]  ;;  %v12033_v54 = vld [vmem:[#allocation5 + $0x1090] sm:$0xff] }
  0xfc   :  { %13836 = vst [vmem:[#allocation125_spill] sm:$0xff] %v12031_v6  ;;  %13837 = vst [vmem:[#allocation126_spill] sm:$0xff] %v12033_v54  ;;  %v12035_v25 = vld [vmem:[#allocation5 + $0x16d0] sm:$0xff]  ;;  %v12037_v43 = vld [vmem:[#allocation5 + $0x428] sm:$0xff] }
  0xfd   :  { %13838 = vst [vmem:[#allocation127_spill] sm:$0xff] %v12035_v25  ;;  %13839 = vst [vmem:[#allocation128_spill] sm:$0xff] %v12037_v43  ;;  %v12039_v42 = vld [vmem:[#allocation5 + $0xa68] sm:$0xff]  ;;  %v13841_v56 = vld [vmem:[#allocation16_spill] sm:$0xff] }
  0xfe   :  { %13840 = vst [vmem:[#allocation129_spill] sm:$0xff] %v12039_v42  ;;  %v13842_v5 = vld [vmem:[#allocation15_spill] sm:$0xff]  ;;  %v12052_v11 = vld [vmem:[#allocation5 + $0x438] sm:$0xff]  ;;  %v12056_v10 = vld [vmem:[#allocation5 + $0x420] sm:$0xff] }
  0xff   :  { %v13843_v59 = vpack.c.bf16 %v13841_v56, %v13842_v5  ;;  %13844 = vst [vmem:[#allocation16_spill] sm:$0xff] %v12052_v11  ;;  %v12054_v9 = vld [vmem:[#allocation5 + $0xa78] sm:$0xff]  ;;  %13846 = vst [vmem:[#allocation130_spill] sm:$0xff] %v12056_v10  ;;  %v12058_v56 = vld [vmem:[#allocation5 + $0xa60] sm:$0xff] }
 0x100   :  { %13845 = vst [vmem:[#allocation15_spill] sm:$0xff] %v12054_v9  ;;  %13847 = vst [vmem:[#allocation131_spill] sm:$0xff] %v12058_v56  ;;  %v12062_v5 = vld [vmem:[#allocation5 + $0xa70] sm:$0xff]  ;;  %v13850_v7 = vld [vmem:[#allocation18_spill] sm:$0xff] }
 0x101   :  { %10850 = vmatpush1.bf16.msra.mxu0 %v13843_v59  ;;  %v12060_v59 = vld [vmem:[#allocation5 + $0x430] sm:$0xff]  ;;  %13849 = vst [vmem:[#allocation133_spill] sm:$0xff] %v12062_v5  ;;  %v13851_v8 = vld [vmem:[#allocation17_spill] sm:$0xff]  ;;  %v13853_v24 = vld [vmem:[#allocation20_spill] sm:$0xff] }
 0x102   :  { %13848 = vst [vmem:[#allocation132_spill] sm:$0xff] %v12060_v59  ;;  %v13852_v49 = vpack.c.bf16 %v13850_v7, %v13851_v8  ;;  %v13854_v51 = vld [vmem:[#allocation19_spill] sm:$0xff]  ;;  %v12076_v62 = vld [vmem:[#allocation5 + $0x10a8] sm:$0xff]  ;;  %v12080_v1 = vld [vmem:[#allocation5 + $0x10b8] sm:$0xff]  ;;  %v13918_v59 = vpack.c.bf16 %v11647_v48, %v11645_v47 }
 0x103   :  { %v13855_v34 = vpack.c.bf16 %v13853_v24, %v13854_v51  ;;  %13856 = vst [vmem:[#allocation18_spill] sm:$0xff] %v12076_v62  ;;  %v12078_v63 = vld [vmem:[#allocation5 + $0x16e8] sm:$0xff]  ;;  %13858 = vst [vmem:[#allocation20_spill] sm:$0xff] %v12080_v1  ;;  %v12084_v7 = vld [vmem:[#allocation5 + $0x10a0] sm:$0xff] }
 0x104   :  { %10858 = vmatpush1.bf16.msra.mxu1 %v13852_v49  ;;  %13857 = vst [vmem:[#allocation17_spill] sm:$0xff] %v12078_v63  ;;  %v12082_v49 = vld [vmem:[#allocation5 + $0x16f8] sm:$0xff]  ;;  %13860 = vst [vmem:[#allocation134_spill] sm:$0xff] %v12084_v7  ;;  %v13862_v51 = vld [vmem:[#allocation22_spill] sm:$0xff] }
 0x105   :  { %10860 = vmatprep.subr.bf16.mxu0 %v13855_v34  ;;  %13859 = vst [vmem:[#allocation19_spill] sm:$0xff] %v12082_v49  ;;  %v12086_v34 = vld [vmem:[#allocation5 + $0x16e0] sm:$0xff]  ;;  %v12099_v13 = vld [vmem:[#allocation5 + $0x10b0] sm:$0xff]  ;;  %v12103_v12 = vld [vmem:[#allocation5 + $0x448] sm:$0xff] }
 0x106   :  { %13861 = vst [vmem:[#allocation135_spill] sm:$0xff] %v12086_v34  ;;  %v13863_v8 = vld [vmem:[#allocation21_spill] sm:$0xff]  ;;  %v12101_v46 = vld [vmem:[#allocation5 + $0x16f0] sm:$0xff]  ;;  %13865 = vst [vmem:[#allocation22_spill] sm:$0xff] %v12103_v12 }
 0x107   :  { %v13864_v24 = vpack.c.bf16 %v13862_v51, %v13863_v8  ;;  %v12105_v51 = vld [vmem:[#allocation5 + $0xa88] sm:$0xff]  ;;  %v12107_v8 = vld [vmem:[#allocation5 + $0x458] sm:$0xff]  ;;  %v12111_v53 = vld [vmem:[#allocation5 + $0x440] sm:$0xff] }
 0x108   :  { %13866 = vst [vmem:[#allocation21_spill] sm:$0xff] %v12107_v8  ;;  %13868 = vst [vmem:[#allocation137_spill] sm:$0xff] %v12111_v53  ;;  %v12113_v35 = vld [vmem:[#allocation5 + $0xa80] sm:$0xff]  ;;  %v12115_v22 = vld [vmem:[#allocation2] sm:$0xff] }
 0x109   :  { %10868 = vmatprep.subr.bf16.mxu1 %v13864_v24  ;;  %v12109_v24 = vld [vmem:[#allocation5 + $0xa98] sm:$0xff]  ;;  %13869 = vst [vmem:[#allocation138_spill] sm:$0xff] %v12113_v35  ;;  %10407 = vmatmul.mubr.msk.f32.vlgmr.msra.gmra.mrb[48].mxu0 %vm839_vm0, %v12115_v22  ;;  %v12127_v26 = vld [vmem:[#allocation5 + $0x450] sm:$0xff]  ;;  %v12131_v16 = vld [vmem:[#allocation5 + $0x10c8] sm:$0xff] }
 0x10a   :  { %13867 = vst [vmem:[#allocation136_spill] sm:$0xff] %v12109_v24  ;;  %13870 = vst [vmem:[#allocation139_spill] sm:$0xff] %v12127_v26  ;;  %v12129_v44 = vld [vmem:[#allocation5 + $0xa90] sm:$0xff]  ;;  %v12133_v0 = vld [vmem:[#allocation5 + $0x1708] sm:$0xff]  ;;  %10408 = vmatmul.mubr.msk.f32.vlgmr.msra.gmra.mrb[48].mxu1 %vm839_vm0, %v12115_v22  ;;  %4457 = vmatprep.mubr.f32.mxu0 %v13758_v31 }
 0x10b   :  { %13871 = vst [vmem:[#allocation140_spill] sm:$0xff] %v12129_v44  ;;  %13872 = vst [vmem:[#allocation141_spill] sm:$0xff] %v12131_v16  ;;  %v12135_v45 = vld [vmem:[#allocation5 + $0x10d8] sm:$0xff]  ;;  %v12139_v18 = vld [vmem:[#allocation5 + $0x10c0] sm:$0xff]  ;;  %4528 = vmatprep.mubr.f32.mxu1 %v13758_v31 }
 0x10c   :  { %13873 = vst [vmem:[#allocation142_spill] sm:$0xff] %v12133_v0  ;;  %13874 = vst [vmem:[#allocation143_spill] sm:$0xff] %v12135_v45  ;;  %v12137_v57 = vld [vmem:[#allocation5 + $0x1718] sm:$0xff]  ;;  %v12141_v32 = vld [vmem:[#allocation5 + $0x1700] sm:$0xff] }
 0x10d   :  { %13875 = vst [vmem:[#allocation144_spill] sm:$0xff] %v12137_v57  ;;  %13876 = vst [vmem:[#allocation145_spill] sm:$0xff] %v12139_v18  ;;  %v13878_v17 = vld [vmem:[#allocation24_spill] sm:$0xff]  ;;  %v13879_v14 = vld [vmem:[#allocation23_spill] sm:$0xff] }
 0x10e   :  { %13877 = vst [vmem:[#allocation146_spill] sm:$0xff] %v12141_v32  ;;  %v13880_v60 = vpack.c.bf16 %v13878_v17, %v13879_v14  ;;  %v12154_v33 = vld [vmem:[#allocation5 + $0x10d0] sm:$0xff]  ;;  %v12158_v4 = vld [vmem:[#allocation5 + $0x468] sm:$0xff]  ;;  %v12162_v3 = vld [vmem:[#allocation5 + $0x478] sm:$0xff] }
 0x10f   :  { %13881 = vst [vmem:[#allocation24_spill] sm:$0xff] %v12154_v33  ;;  %v12156_v23 = vld [vmem:[#allocation5 + $0x1710] sm:$0xff]  ;;  %13883 = vst [vmem:[#allocation147_spill] sm:$0xff] %v12158_v4  ;;  %v12160_v2 = vld [vmem:[#allocation5 + $0xaa8] sm:$0xff] }
 0x110   :  { %10862 = vmatpush1.bf16.msra.mxu0 %v13880_v60  ;;  %13882 = vst [vmem:[#allocation23_spill] sm:$0xff] %v12156_v23  ;;  %13884 = vst [vmem:[#allocation148_spill] sm:$0xff] %v12160_v2  ;;  %v12164_v17 = vld [vmem:[#allocation5 + $0xab8] sm:$0xff]  ;;  %v13887_v14 = vld [vmem:[#allocation26_spill] sm:$0xff] }
 0x111   :  { %13885 = vst [vmem:[#allocation149_spill] sm:$0xff] %v12162_v3  ;;  %13886 = vst [vmem:[#allocation150_spill] sm:$0xff] %v12164_v17  ;;  %v13888_v60 = vld [vmem:[#allocation25_spill] sm:$0xff]  ;;  %v13890_v41 = vld [vmem:[#allocation28_spill] sm:$0xff] }
 0x112   :  { %v13889_v15 = vpack.c.bf16 %v13887_v14, %v13888_v60  ;;  %v13891_v54 = vld [vmem:[#allocation27_spill] sm:$0xff]  ;;  %v12178_v55 = vld [vmem:[#allocation5 + $0x460] sm:$0xff]  ;;  %v12186_v14 = vld [vmem:[#allocation5 + $0x10e8] sm:$0xff] }
 0x113   :  { %v13892_v25 = vpack.c.bf16 %v13890_v41, %v13891_v54  ;;  %13893 = vst [vmem:[#allocation26_spill] sm:$0xff] %v12178_v55  ;;  %v12180_v6 = vld [vmem:[#allocation5 + $0xaa0] sm:$0xff]  ;;  %v12182_v36 = vld [vmem:[#allocation5 + $0x470] sm:$0xff]  ;;  %13897 = vst [vmem:[#allocation151_spill] sm:$0xff] %v12186_v14 }
 0x114   :  { %10870 = vmatpush1.bf16.msra.mxu1 %v13889_v15  ;;  %13894 = vst [vmem:[#allocation25_spill] sm:$0xff] %v12180_v6  ;;  %13895 = vst [vmem:[#allocation28_spill] sm:$0xff] %v12182_v36  ;;  %v12184_v15 = vld [vmem:[#allocation5 + $0xab0] sm:$0xff]  ;;  %v12190_v54 = vld [vmem:[#allocation5 + $0x10f8] sm:$0xff] }
 0x115   :  { %10864 = vmatprep.subr.bf16.mxu0 %v13892_v25  ;;  %13896 = vst [vmem:[#allocation27_spill] sm:$0xff] %v12184_v15  ;;  %v12188_v25 = vld [vmem:[#allocation5 + $0x1728] sm:$0xff]  ;;  %13899 = vst [vmem:[#allocation153_spill] sm:$0xff] %v12190_v54  ;;  %v12192_v41 = vld [vmem:[#allocation5 + $0x1738] sm:$0xff] }
 0x116   :  { %13898 = vst [vmem:[#allocation152_spill] sm:$0xff] %v12188_v25  ;;  %13900 = vst [vmem:[#allocation154_spill] sm:$0xff] %v12192_v41  ;;  %v13901_v60 = vld [vmem:[#allocation30_spill] sm:$0xff]  ;;  %v13902_v43 = vld [vmem:[#allocation29_spill] sm:$0xff]  ;;  %10866 = vmatpush1.bf16.msra.mxu0 %v13918_v59 }
 0x117   :  { %v13903_v58 = vpack.c.bf16 %v13901_v60, %v13902_v43  ;;  %v12204_v10 = vld [vmem:[#allocation5 + $0x10e0] sm:$0xff]  ;;  %v12208_v11 = vld [vmem:[#allocation5 + $0x10f0] sm:$0xff]  ;;  %v12212_v43 = vld [vmem:[#allocation5 + $0x488] sm:$0xff] }
 0x118   :  { %13904 = vst [vmem:[#allocation30_spill] sm:$0xff] %v12204_v10  ;;  %v12206_v56 = vld [vmem:[#allocation5 + $0x1720] sm:$0xff]  ;;  %13906 = vst [vmem:[#allocation155_spill] sm:$0xff] %v12208_v11  ;;  %v12210_v9 = vld [vmem:[#allocation5 + $0x1730] sm:$0xff] }
 0x119   :  { %10872 = vmatprep.subr.bf16.mxu1 %v13903_v58  ;;  %13905 = vst [vmem:[#allocation29_spill] sm:$0xff] %v12206_v56  ;;  %13907 = vst [vmem:[#allocation156_spill] sm:$0xff] %v12210_v9  ;;  %v12214_v58 = vld [vmem:[#allocation5 + $0xac8] sm:$0xff]  ;;  %v12216_v60 = vld [vmem:[#allocation5 + $0x498] sm:$0xff]  ;;  %10409 = vmatmul.mubr.msk.f32.vlgmr.msra.gmra.mrb[50].mxu0 %vm839_vm0, %v12115_v22 }
 0x11a   :  { %13908 = vst [vmem:[#allocation157_spill] sm:$0xff] %v12212_v43  ;;  %13909 = vst [vmem:[#allocation158_spill] sm:$0xff] %v12214_v58  ;;  %v12218_v42 = vld [vmem:[#allocation5 + $0xad8] sm:$0xff]  ;;  %v12229_v1 = vld [vmem:[#allocation5 + $0x480] sm:$0xff]  ;;  %4599 = vmatprep.mubr.f32.mxu0 %v13758_v31 }
 0x11b   :  { %13910 = vst [vmem:[#allocation159_spill] sm:$0xff] %v12216_v60  ;;  %13911 = vst [vmem:[#allocation160_spill] sm:$0xff] %v12218_v42  ;;  %v12231_v49 = vld [vmem:[#allocation5 + $0xac0] sm:$0xff]  ;;  %v12233_v62 = vld [vmem:[#allocation5 + $0x490] sm:$0xff] }
 0x11c   :  { %13912 = vst [vmem:[#allocation161_spill] sm:$0xff] %v12229_v1  ;;  %13913 = vst [vmem:[#allocation162_spill] sm:$0xff] %v12231_v49  ;;  %v12235_v63 = vld [vmem:[#allocation5 + $0xad0] sm:$0xff]  ;;  %v12237_v61 = vld [vmem:[#allocation5 + $0x1108] sm:$0xff] }
 0x11d   :  { %13914 = vst [vmem:[#allocation163_spill] sm:$0xff] %v12233_v62  ;;  %13915 = vst [vmem:[#allocation164_spill] sm:$0xff] %v12235_v63  ;;  %v12239_v5 = vld [vmem:[#allocation5 + $0x1748] sm:$0xff]  ;;  %v12252_v8 = vld [vmem:[#allocation5 + $0x1118] sm:$0xff] }
 0x11e   :  { %13916 = vst [vmem:[#allocation165_spill] sm:$0xff] %v12237_v61  ;;  %13917 = vst [vmem:[#allocation166_spill] sm:$0xff] %v12239_v5  ;;  %v12254_v24 = vld [vmem:[#allocation5 + $0x1758] sm:$0xff]  ;;  %v12256_v12 = vld [vmem:[#allocation5 + $0x1100] sm:$0xff] }
 0x11f   :  { %13919 = vst [vmem:[#allocation167_spill] sm:$0xff] %v12252_v8  ;;  %13920 = vst [vmem:[#allocation168_spill] sm:$0xff] %v12254_v24  ;;  %v12258_v47 = vld [vmem:[#allocation5 + $0x1740] sm:$0xff]  ;;  %v12260_v48 = vld [vmem:[#allocation5 + $0x1110] sm:$0xff] }
 0x120   :  { %13921 = vst [vmem:[#allocation169_spill] sm:$0xff] %v12256_v12  ;;  %13922 = vst [vmem:[#allocation170_spill] sm:$0xff] %v12258_v47  ;;  %v12262_v59 = vld [vmem:[#allocation5 + $0x1750] sm:$0xff]  ;;  %v13927_v53 = vld [vmem:[#allocation33_spill] sm:$0xff] }
 0x121   :  { %13923 = vst [vmem:[#allocation171_spill] sm:$0xff] %v12260_v48  ;;  %13924 = vst [vmem:[#allocation172_spill] sm:$0xff] %v12262_v59  ;;  %v13925_v34 = vld [vmem:[#allocation31_spill] sm:$0xff]  ;;  %v13928_v45 = vld [vmem:[#allocation32_spill] sm:$0xff] }
 0x122   :  { %v13926_v7 = vpack.c.bf16 %v11651_v50, %v13925_v34  ;;  %v13929_v57 = vpack.c.bf16 %v13927_v53, %v13928_v45  ;;  %v12276_v16 = vld [vmem:[#allocation5 + $0x4a8] sm:$0xff]  ;;  %v12280_v26 = vld [vmem:[#allocation5 + $0x4b8] sm:$0xff]  ;;  %v12286_v45 = vld [vmem:[#allocation5 + $0xae0] sm:$0xff] }
 0x123   :  { %13930 = vst [vmem:[#allocation31_spill] sm:$0xff] %v12276_v16  ;;  %v12278_v0 = vld [vmem:[#allocation5 + $0xae8] sm:$0xff]  ;;  %13932 = vst [vmem:[#allocation32_spill] sm:$0xff] %v12280_v26  ;;  %v12282_v50 = vld [vmem:[#allocation5 + $0xaf8] sm:$0xff] }
 0x124   :  { %10874 = vmatpush1.bf16.msra.mxu1 %v13926_v7  ;;  %10876 = vmatprep.subr.bf16.mxu0 %v13929_v57  ;;  %13931 = vst [vmem:[#allocation33_spill] sm:$0xff] %v12278_v0  ;;  %13933 = vst [vmem:[#allocation173_spill] sm:$0xff] %v12282_v50  ;;  %v12284_v7 = vld [vmem:[#allocation5 + $0x4a0] sm:$0xff]  ;;  %v13936_v53 = vld [vmem:[#allocation35_spill] sm:$0xff] }
 0x125   :  { %13934 = vst [vmem:[#allocation174_spill] sm:$0xff] %v12284_v7  ;;  %13935 = vst [vmem:[#allocation175_spill] sm:$0xff] %v12286_v45  ;;  %v13937_v57 = vld [vmem:[#allocation34_spill] sm:$0xff]  ;;  %v12299_v17 = vld [vmem:[#allocation5 + $0x4b0] sm:$0xff]  ;;  %v13979_v45 = vpack.c.bf16 %v11705_v21, %v11703_v20 }
 0x126   :  { %v13938_v34 = vpack.c.bf16 %v13936_v53, %v13937_v57  ;;  %13939 = vst [vmem:[#allocation35_spill] sm:$0xff] %v12299_v17  ;;  %v12301_v4 = vld [vmem:[#allocation5 + $0xaf0] sm:$0xff]  ;;  %v12303_v2 = vld [vmem:[#allocation5 + $0x1128] sm:$0xff]  ;;  %v12307_v57 = vld [vmem:[#allocation5 + $0x1138] sm:$0xff] }
 0x127   :  { %13940 = vst [vmem:[#allocation34_spill] sm:$0xff] %v12303_v2  ;;  %v12305_v53 = vld [vmem:[#allocation5 + $0x1768] sm:$0xff]  ;;  %13942 = vst [vmem:[#allocation177_spill] sm:$0xff] %v12307_v57  ;;  %v12311_v18 = vld [vmem:[#allocation5 + $0x1120] sm:$0xff]  ;;  %10410 = vmatmul.mubr.msk.f32.vlgmr.msra.gmra.mrb[50].mxu1 %vm839_vm0, %v12115_v22 }
 0x128   :  { %10884 = vmatprep.subr.bf16.mxu1 %v13938_v34  ;;  %13941 = vst [vmem:[#allocation176_spill] sm:$0xff] %v12305_v53  ;;  %v12309_v34 = vld [vmem:[#allocation5 + $0x1778] sm:$0xff]  ;;  %13944 = vst [vmem:[#allocation179_spill] sm:$0xff] %v12311_v18  ;;  %v12313_v32 = vld [vmem:[#allocation5 + $0x1760] sm:$0xff]  ;;  %4670 = vmatprep.mubr.f32.mxu1 %v13758_v31 }
 0x129   :  { %13943 = vst [vmem:[#allocation178_spill] sm:$0xff] %v12309_v34  ;;  %13945 = vst [vmem:[#allocation180_spill] sm:$0xff] %v12313_v32  ;;  %v12325_v14 = vld [vmem:[#allocation5 + $0x1130] sm:$0xff]  ;;  %v12329_v36 = vld [vmem:[#allocation5 + $0x4c8] sm:$0xff] }
 0x12a   :  { %v12327_v25 = vld [vmem:[#allocation5 + $0x1770] sm:$0xff]  ;;  %13946 = vst [vmem:[#allocation181_spill] sm:$0xff] %v12329_v36  ;;  %v12331_v15 = vld [vmem:[#allocation5 + $0xb08] sm:$0xff]  ;;  %v12333_v55 = vld [vmem:[#allocation5 + $0x4d8] sm:$0xff] }
 0x12b   :  { %13947 = vst [vmem:[#allocation182_spill] sm:$0xff] %v12333_v55  ;;  %v12335_v3 = vld [vmem:[#allocation5 + $0xb18] sm:$0xff]  ;;  %v12337_v10 = vld [vmem:[#allocation5 + $0x4c0] sm:$0xff]  ;;  %v12352_v11 = vld [vmem:[#allocation5 + $0x4d0] sm:$0xff] }
 0x12c   :  { %13948 = vst [vmem:[#allocation183_spill] sm:$0xff] %v12335_v3  ;;  %13949 = vst [vmem:[#allocation184_spill] sm:$0xff] %v12337_v10  ;;  %v12339_v35 = vld [vmem:[#allocation5 + $0xb00] sm:$0xff]  ;;  %v13952_v54 = vld [vmem:[#allocation36_spill] sm:$0xff] }
 0x12d   :  { %13950 = vst [vmem:[#allocation185_spill] sm:$0xff] %v12339_v35  ;;  %v13951_v41 = vld [vmem:[#allocation37_spill] sm:$0xff]  ;;  %v12354_v9 = vld [vmem:[#allocation5 + $0xb10] sm:$0xff]  ;;  %v12356_v56 = vld [vmem:[#allocation5 + $0x1148] sm:$0xff] }
 0x12e   :  { %v13953_v60 = vpack.c.bf16 %v13951_v41, %v13952_v54  ;;  %13954 = vst [vmem:[#allocation37_spill] sm:$0xff] %v12356_v56  ;;  %v12358_v6 = vld [vmem:[#allocation5 + $0x1788] sm:$0xff]  ;;  %v12360_v33 = vld [vmem:[#allocation5 + $0x1158] sm:$0xff]  ;;  %v13957_v41 = vld [vmem:[#allocation39_spill] sm:$0xff] }
 0x12f   :  { %13955 = vst [vmem:[#allocation36_spill] sm:$0xff] %v12360_v33  ;;  %v12362_v54 = vld [vmem:[#allocation5 + $0x1798] sm:$0xff]  ;;  %v13960_v43 = vld [vmem:[#allocation41_spill] sm:$0xff]  ;;  %v12380_v23 = vld [vmem:[#allocation5 + $0x1150] sm:$0xff] }
 0x130   :  { %10878 = vmatpush1.bf16.msra.mxu0 %v13953_v60  ;;  %13956 = vst [vmem:[#allocation186_spill] sm:$0xff] %v12362_v54  ;;  %v13958_v60 = vld [vmem:[#allocation38_spill] sm:$0xff]  ;;  %v13961_v62 = vld [vmem:[#allocation40_spill] sm:$0xff]  ;;  %v12376_v1 = vld [vmem:[#allocation5 + $0x1140] sm:$0xff] }
 0x131   :  { %v13959_v42 = vpack.c.bf16 %v13957_v41, %v13958_v60  ;;  %v13962_v63 = vpack.c.bf16 %v13960_v43, %v13961_v62  ;;  %v12378_v49 = vld [vmem:[#allocation5 + $0x1780] sm:$0xff]  ;;  %v12384_v41 = vld [vmem:[#allocation5 + $0x4e8] sm:$0xff]  ;;  %v12390_v43 = vld [vmem:[#allocation5 + $0xb38] sm:$0xff] }
 0x132   :  { %v12386_v62 = vld [vmem:[#allocation5 + $0xb28] sm:$0xff]  ;;  %v13964_v60 = vld [vmem:[#allocation43_spill] sm:$0xff]  ;;  %v12402_v12 = vld [vmem:[#allocation5 + $0x4e0] sm:$0xff] }
 0x133   :  { %10886 = vmatpush1.bf16.msra.mxu1 %v13959_v42  ;;  %10880 = vmatprep.subr.bf16.mxu0 %v13962_v63  ;;  %v12382_v42 = vld [vmem:[#allocation5 + $0x1790] sm:$0xff]  ;;  %v12388_v63 = vld [vmem:[#allocation5 + $0x4f8] sm:$0xff]  ;;  %v13965_v61 = vld [vmem:[#allocation42_spill] sm:$0xff]  ;;  %13967 = vst [vmem:[#allocation38_spill] sm:$0xff] %v12402_v12 }
 0x134   :  { %13963 = vst [vmem:[#allocation39_spill] sm:$0xff] %v12388_v63  ;;  %v13966_v58 = vpack.c.bf16 %v13964_v60, %v13965_v61  ;;  %v12404_v47 = vld [vmem:[#allocation5 + $0xb20] sm:$0xff]  ;;  %v12406_v8 = vld [vmem:[#allocation5 + $0x4f0] sm:$0xff]  ;;  %v12410_v61 = vld [vmem:[#allocation5 + $0x1168] sm:$0xff] }
 0x135   :  { %v12408_v24 = vld [vmem:[#allocation5 + $0xb30] sm:$0xff]  ;;  %13968 = vst [vmem:[#allocation41_spill] sm:$0xff] %v12410_v61  ;;  %v12414_v60 = vld [vmem:[#allocation5 + $0x1178] sm:$0xff]  ;;  %v12427_v26 = vld [vmem:[#allocation5 + $0x1160] sm:$0xff] }
 0x136   :  { %10888 = vmatprep.subr.bf16.mxu1 %v13966_v58  ;;  %v12412_v58 = vld [vmem:[#allocation5 + $0x17a8] sm:$0xff]  ;;  %13970 = vst [vmem:[#allocation43_spill] sm:$0xff] %v12414_v60  ;;  %v12416_v5 = vld [vmem:[#allocation5 + $0x17b8] sm:$0xff]  ;;  %v12429_v50 = vld [vmem:[#allocation5 + $0x17a0] sm:$0xff] }
 0x137   :  { %13969 = vst [vmem:[#allocation40_spill] sm:$0xff] %v12412_v58  ;;  %13971 = vst [vmem:[#allocation42_spill] sm:$0xff] %v12416_v5  ;;  %v12431_v16 = vld [vmem:[#allocation5 + $0x1170] sm:$0xff]  ;;  %v12435_v44 = vld [vmem:[#allocation5 + $0x508] sm:$0xff]  ;;  %10890 = vmatpush1.bf16.msra.mxu1 %v13979_v45  ;;  %v13998_v58 = vpack.c.bf16 %v11731_v30, %v11729_v29  ;;  %v909_v29 = vpop.f32.mrb[0].mxu0 }
 0x138   :  { %v12433_v0 = vld [vmem:[#allocation5 + $0x17b0] sm:$0xff]  ;;  %13972 = vst [vmem:[#allocation187_spill] sm:$0xff] %v12435_v44  ;;  %v12437_v59 = vld [vmem:[#allocation5 + $0xb48] sm:$0xff]  ;;  %v13973_v17 = vld [vmem:[#allocation45_spill] sm:$0xff] }
 0x139   :  { %v13974_v48 = vld [vmem:[#allocation44_spill] sm:$0xff]  ;;  %v12454_v53 = vld [vmem:[#allocation5 + $0x500] sm:$0xff]  ;;  %v13980_v18 = vld [vmem:[#allocation46_spill] sm:$0xff] }
 0x13a   :  { %v13975_v2 = vpack.c.bf16 %v13973_v17, %v13974_v48  ;;  %v12450_v57 = vld [vmem:[#allocation5 + $0x518] sm:$0xff]  ;;  %13976 = vst [vmem:[#allocation45_spill] sm:$0xff] %v12454_v53  ;;  %v12456_v17 = vld [vmem:[#allocation5 + $0xb40] sm:$0xff]  ;;  %v12460_v48 = vld [vmem:[#allocation5 + $0xb50] sm:$0xff]  ;;  %v13981_v7 = vpack.c.bf16 %v11709_v19, %v13980_v18  ;;  %10412 = vmatmul.mubr.msk.f32.vlgmr.msra.gmra.mrb[52].mxu1 %vm839_vm0, %v12115_v22 }
 0x13b   :  { %v12452_v34 = vld [vmem:[#allocation5 + $0xb58] sm:$0xff]  ;;  %13978 = vst [vmem:[#allocation188_spill] sm:$0xff] %v12460_v48  ;;  %v12474_v55 = vld [vmem:[#allocation5 + $0x1188] sm:$0xff]  ;;  %v12482_v21 = vld [vmem:[#allocation5 + $0x1180] sm:$0xff]  ;;  %v7943_v48 = vmul.f32 255.0, %v909_v29  ;;  %4812 = vmatprep.mubr.f32.mxu1 %v13758_v31 }
 0x13c   :  { %10882 = vmatpush1.bf16.msra.mxu0 %v13975_v2  ;;  %v12458_v2 = vld [vmem:[#allocation5 + $0x510] sm:$0xff]  ;;  %13982 = vst [vmem:[#allocation46_spill] sm:$0xff] %v12474_v55  ;;  %v12476_v3 = vld [vmem:[#allocation5 + $0x17c8] sm:$0xff]  ;;  %v12478_v36 = vld [vmem:[#allocation5 + $0x1198] sm:$0xff] }
 0x13d   :  { %13977 = vst [vmem:[#allocation44_spill] sm:$0xff] %v12458_v2  ;;  %10892 = vmatprep.subr.bf16.mxu0 %v13981_v7  ;;  %13983 = vst [vmem:[#allocation189_spill] sm:$0xff] %v12476_v3  ;;  %v12480_v20 = vld [vmem:[#allocation5 + $0x17d8] sm:$0xff]  ;;  %v13988_v19 = vld [vmem:[#allocation47_spill] sm:$0xff] }
 0x13e   :  { %13984 = vst [vmem:[#allocation190_spill] sm:$0xff] %v12478_v36  ;;  %13985 = vst [vmem:[#allocation191_spill] sm:$0xff] %v12480_v20  ;;  %v13987_v18 = vld [vmem:[#allocation48_spill] sm:$0xff]  ;;  %v12495_v33 = vld [vmem:[#allocation5 + $0x17c0] sm:$0xff] }
 0x13f   :  { %13986 = vst [vmem:[#allocation192_spill] sm:$0xff] %v12482_v21  ;;  %v13989_v7 = vpack.c.bf16 %v13987_v18, %v13988_v19  ;;  %13990 = vst [vmem:[#allocation48_spill] sm:$0xff] %v12495_v33  ;;  %v12497_v54 = vld [vmem:[#allocation5 + $0x1190] sm:$0xff]  ;;  %10411 = vmatmul.mubr.msk.f32.vlgmr.msra.gmra.mrb[52].mxu0 %vm839_vm0, %v12115_v22  ;;  %v12511_v10 = vld [vmem:[#allocation5 + $0x528] sm:$0xff] }
 0x140   :  { %v12499_v56 = vld [vmem:[#allocation5 + $0x17d0] sm:$0xff]  ;;  %13991 = vst [vmem:[#allocation47_spill] sm:$0xff] %v12511_v10  ;;  %v12513_v35 = vld [vmem:[#allocation5 + $0xb68] sm:$0xff]  ;;  %v12515_v45 = vld [vmem:[#allocation5 + $0x538] sm:$0xff]  ;;  %4741 = vmatprep.mubr.f32.mxu0 %v13758_v31  ;;  %v8143_v10 = vmax.f32 %v7943_v48, 0.0 }
 0x141   :  { %10900 = vmatprep.subr.bf16.mxu1 %v13989_v7  ;;  %13992 = vst [vmem:[#allocation193_spill] sm:$0xff] %v12515_v45  ;;  %v13993_v63 = vld [vmem:[#allocation50_spill] sm:$0xff]  ;;  %v13994_v18 = vld [vmem:[#allocation49_spill] sm:$0xff]  ;;  %v12528_v60 = vld [vmem:[#allocation5 + $0xb78] sm:$0xff] }
 0x142   :  { %v13995_v12 = vpack.c.bf16 %v13993_v63, %v13994_v18  ;;  %13996 = vst [vmem:[#allocation50_spill] sm:$0xff] %v12528_v60  ;;  %v12530_v5 = vld [vmem:[#allocation5 + $0x520] sm:$0xff]  ;;  %10902 = vmatpush1.bf16.msra.mxu1 %v13998_v58  ;;  %v12546_v7 = vld [vmem:[#allocation5 + $0x530] sm:$0xff]  ;;  %v12550_v44 = vld [vmem:[#allocation5 + $0x11a8] sm:$0xff] }
 0x143   :  { %13997 = vst [vmem:[#allocation49_spill] sm:$0xff] %v12530_v5  ;;  %v12532_v61 = vld [vmem:[#allocation5 + $0xb60] sm:$0xff]  ;;  %14000 = vst [vmem:[#allocation194_spill] sm:$0xff] %v12546_v7  ;;  %v12548_v19 = vld [vmem:[#allocation5 + $0xb70] sm:$0xff] }
 0x144   :  { %10894 = vmatpush1.bf16.msra.mxu0 %v13995_v12  ;;  %v13999_v12 = vpack.c.bf16 %v11735_v28, %v11733_v27  ;;  %14001 = vst [vmem:[#allocation195_spill] sm:$0xff] %v12548_v19  ;;  %14002 = vst [vmem:[#allocation196_spill] sm:$0xff] %v12550_v44  ;;  %v14003_v30 = vld [vmem:[#allocation52_spill] sm:$0xff]  ;;  %v14004_v58 = vld [vmem:[#allocation51_spill] sm:$0xff] }
 0x145   :  { %v14005_v27 = vpack.c.bf16 %v14003_v30, %v14004_v58  ;;  %v12562_v18 = vld [vmem:[#allocation5 + $0x17e8] sm:$0xff]  ;;  %v12564_v63 = vld [vmem:[#allocation5 + $0x11b8] sm:$0xff]  ;;  %v980_v30 = vpop.f32.mrb[0].mxu1  ;;  %v911_v58 = vpop.f32.mrb[1].mxu0  ;;  %v12575_v28 = vld [vmem:[#allocation5 + $0x11a0] sm:$0xff] }
 0x146   :  { %10896 = vmatprep.subr.bf16.mxu0 %v13999_v12  ;;  %14006 = vst [vmem:[#allocation52_spill] sm:$0xff] %v12562_v18  ;;  %14007 = vst [vmem:[#allocation51_spill] sm:$0xff] %v12564_v63  ;;  %v12566_v2 = vld [vmem:[#allocation5 + $0x17f8] sm:$0xff]  ;;  %v12577_v21 = vld [vmem:[#allocation5 + $0x17e0] sm:$0xff]  ;;  %v7945_v29 = vmul.f32 255.0, %v980_v30  ;;  %v7944_v36 = vmul.f32 255.0, %v911_v58  ;;  %v14018_v58 = vpack.c.bf16 %v11758_v40, %v11756_v39 }
 0x147   :  { %10904 = vmatprep.subr.bf16.mxu1 %v14005_v27  ;;  %14008 = vst [vmem:[#allocation197_spill] sm:$0xff] %v12566_v2  ;;  %14009 = vst [vmem:[#allocation198_spill] sm:$0xff] %v12575_v28  ;;  %v12579_v33 = vld [vmem:[#allocation5 + $0x11b0] sm:$0xff]  ;;  %v982_v20 = vpop.f32.mrb[1].mxu1  ;;  %v14012_v55 = vld [vmem:[#allocation54_spill] sm:$0xff]  ;;  %v8343_v63 = vmin.f32 %v8143_v10, 255.0 }
 0x148   :  { %14010 = vst [vmem:[#allocation199_spill] sm:$0xff] %v12577_v21  ;;  %14011 = vst [vmem:[#allocation200_spill] sm:$0xff] %v12579_v33  ;;  %v14013_v3 = vld [vmem:[#allocation53_spill] sm:$0xff]  ;;  %v12588_v32 = vld [vmem:[#allocation5 + $0x17f0] sm:$0xff]  ;;  %v7946_v30 = vmul.f32 255.0, %v982_v20  ;;  %10906 = vmatpush1.bf16.msra.mxu1 %v14018_v58  ;;  %v8145_v20 = vmax.f32 %v7945_v29, 0.0 }
 0x149   :  { %v14014_v53 = vpack.c.bf16 %v14012_v55, %v14013_v3  ;;  %14015 = vst [vmem:[#allocation54_spill] sm:$0xff] %v12588_v32  ;;  %v12590_v45 = vld [vmem:[#allocation5 + $0x548] sm:$0xff]  ;;  %v14019_v55 = vpack.c.bf16 %v11762_v38, %v11760_v37  ;;  %v12604_v12 = vld [vmem:[#allocation5 + $0x558] sm:$0xff]  ;;  %v12608_v48 = vld [vmem:[#allocation5 + $0x540] sm:$0xff]  ;;  %v8144_v7 = vmax.f32 %v7944_v36, 0.0 }
 0x14a   :  { %14016 = vst [vmem:[#allocation53_spill] sm:$0xff] %v12590_v45  ;;  %v12592_v60 = vld [vmem:[#allocation5 + $0xb88] sm:$0xff]  ;;  %14020 = vst [vmem:[#allocation202_spill] sm:$0xff] %v12604_v12  ;;  %v12606_v27 = vld [vmem:[#allocation5 + $0xb98] sm:$0xff]  ;;  %v8146_v2 = vmax.f32 %v7946_v30, 0.0  ;;  %v8345_v38 = vmin.f32 %v8145_v20, 255.0 }
 0x14b   :  { %10898 = vmatpush1.bf16.msra.mxu0 %v14014_v53  ;;  %14017 = vst [vmem:[#allocation201_spill] sm:$0xff] %v12592_v60  ;;  %14021 = vst [vmem:[#allocation203_spill] sm:$0xff] %v12606_v27  ;;  %v14023_v39 = vld [vmem:[#allocation56_spill] sm:$0xff]  ;;  %v14024_v40 = vld [vmem:[#allocation55_spill] sm:$0xff]  ;;  %v8344_v37 = vmin.f32 %v8144_v7, 255.0  ;;  %10414 = vmatmul.mubr.msk.f32.vlgmr.msra.gmra.mrb[54].mxu1 %vm839_vm0, %v12115_v22  ;;  %v8543_v7 = vtrunc.f32 %v8343_v63 }
 0x14c   :  { %10908 = vmatprep.subr.bf16.mxu0 %v14019_v55  ;;  %14022 = vst [vmem:[#allocation204_spill] sm:$0xff] %v12608_v48  ;;  %v14025_v58 = vpack.c.bf16 %v14023_v39, %v14024_v40  ;;  %v12617_v55 = vld [vmem:[#allocation5 + $0xb80] sm:$0xff]  ;;  %v12619_v53 = vld [vmem:[#allocation5 + $0x550] sm:$0xff]  ;;  %v12629_v39 = vld [vmem:[#allocation5 + $0x11c8] sm:$0xff]  ;;  %v8346_v20 = vmin.f32 %v8146_v2, 255.0  ;;  %v8545_v2 = vtrunc.f32 %v8345_v38  ;;  %v1122_v38 = vpop.f32.mrb[2].mxu1  ;;  %4954 = vmatprep.mubr.f32.mxu1 %v13758_v31 }
 0x14d   :  { %14026 = vst [vmem:[#allocation56_spill] sm:$0xff] %v12617_v55  ;;  %14027 = vst [vmem:[#allocation55_spill] sm:$0xff] %v12619_v53  ;;  %v12621_v3 = vld [vmem:[#allocation5 + $0xb90] sm:$0xff]  ;;  %v12631_v40 = vld [vmem:[#allocation5 + $0x1808] sm:$0xff]  ;;  %v8544_v48 = vtrunc.f32 %v8344_v37  ;;  %v8743_v29 = vpack.c.f32.eXmY %v8543_v7, %v8543_v7, 56 }
 0x14e   :  { %10916 = vmatprep.subr.bf16.mxu1 %v14025_v58  ;;  %14028 = vst [vmem:[#allocation205_spill] sm:$0xff] %v12621_v3  ;;  %10413 = vmatmul.mubr.msk.f32.vlgmr.msra.gmra.mrb[54].mxu0 %vm839_vm0, %v12115_v22  ;;  %14029 = vst [vmem:[#allocation206_spill] sm:$0xff] %v12629_v39  ;;  %v12633_v58 = vld [vmem:[#allocation5 + $0x11d8] sm:$0xff]  ;;  %v14032_v10 = vld [vmem:[#allocation57_spill] sm:$0xff]  ;;  %v8546_v36 = vtrunc.f32 %v8346_v20 }
 0x14f   :  { %14030 = vst [vmem:[#allocation207_spill] sm:$0xff] %v12631_v40  ;;  %14031 = vst [vmem:[#allocation208_spill] sm:$0xff] %v12633_v58  ;;  %v14033_v30 = vpack.c.bf16 %v11782_v52, %v14032_v10  ;;  %v12644_v12 = vld [vmem:[#allocation5 + $0x1818] sm:$0xff]  ;;  %v12646_v27 = vld [vmem:[#allocation5 + $0x11c0] sm:$0xff]  ;;  %4883 = vmatprep.mubr.f32.mxu0 %v13758_v31 }
 0x150   :  { %14034 = vst [vmem:[#allocation57_spill] sm:$0xff] %v12644_v12  ;;  %14035 = vst [vmem:[#allocation209_spill] sm:$0xff] %v12646_v27  ;;  %v12648_v45 = vld [vmem:[#allocation5 + $0x1800] sm:$0xff]  ;;  %v14037_v60 = vld [vmem:[#allocation59_spill] sm:$0xff]  ;;  %v7949_v12 = vmul.f32 255.0, %v1122_v38  ;;  %v8761_v7 = vpack.c.f32.eXmY %v8546_v36, %v8546_v36, 56 }
 0x151   :  { %10910 = vmatpush1.bf16.msra.mxu0 %v14033_v30  ;;  %14036 = vst [vmem:[#allocation210_spill] sm:$0xff] %v12648_v45  ;;  %v14038_v33 = vld [vmem:[#allocation58_spill] sm:$0xff]  ;;  %v14040_v52 = vld [vmem:[#allocation61_spill] sm:$0xff]  ;;  %v14041_v10 = vld [vmem:[#allocation60_spill] sm:$0xff] }
 0x152   :  { %v14039_v32 = vpack.c.bf16 %v14037_v60, %v14038_v33  ;;  %v14042_v30 = vpack.c.bf16 %v14040_v52, %v14041_v10  ;;  %v12660_v53 = vld [vmem:[#allocation5 + $0x11d0] sm:$0xff]  ;;  %v12664_v63 = vld [vmem:[#allocation5 + $0x568] sm:$0xff]  ;;  %v1051_v33 = vpop.f32.mrb[2].mxu0  ;;  %v1124_v52 = vpop.f32.mrb[3].mxu1  ;;  %v14050_v27 = vld [vmem:[#allocation65_spill] sm:$0xff]  ;;  %v8149_v38 = vmax.f32 %v7949_v12, 0.0 }
 0x153   :  { %14043 = vst [vmem:[#allocation59_spill] sm:$0xff] %v12660_v53  ;;  %v12662_v3 = vld [vmem:[#allocation5 + $0x1810] sm:$0xff]  ;;  %14045 = vst [vmem:[#allocation61_spill] sm:$0xff] %v12664_v63  ;;  %v14047_v60 = vld [vmem:[#allocation62_spill] sm:$0xff]  ;;  %v7947_v58 = vmul.f32 255.0, %v1051_v33  ;;  %v1053_v37 = vpop.f32.mrb[3].mxu0  ;;  %v8747_v53 = vpack.c.b8 %v8743_v29, %v8743_v29 }
 0x154   :  { %10918 = vmatpush1.bf16.msra.mxu1 %v14039_v32  ;;  %10912 = vmatprep.subr.bf16.mxu0 %v14042_v30  ;;  %14044 = vst [vmem:[#allocation58_spill] sm:$0xff] %v12662_v3  ;;  %v14046_v32 = vld [vmem:[#allocation63_spill] sm:$0xff]  ;;  %v12674_v30 = vld [vmem:[#allocation5 + $0xba8] sm:$0xff]  ;;  %v7948_v39 = vmul.f32 255.0, %v1053_v37  ;;  %v14051_v45 = vld [vmem:[#allocation64_spill] sm:$0xff]  ;;  %v7950_v33 = vmul.f32 255.0, %v1124_v52 }
 0x155   :  { %v14048_v55 = vpack.c.bf16 %v14046_v32, %v14047_v60  ;;  %14049 = vst [vmem:[#allocation60_spill] sm:$0xff] %v12674_v30  ;;  %v8755_v32 = vpack.c.f32.eXmY %v8545_v2, %v8545_v2, 56  ;;  %v8749_v60 = vpack.c.f32.eXmY %v8544_v48, %v8544_v48, 56  ;;  %v14052_v10 = vpack.c.bf16 %v14050_v27, %v14051_v45  ;;  %v14053_v3 = vld [vmem:[#allocation67_spill] sm:$0xff]  ;;  %v14054_v40 = vld [vmem:[#allocation66_spill] sm:$0xff]  ;;  %v14056_v21 = vld [vmem:[#allocation69_spill] sm:$0xff] }
 0x156   :  { %v8147_v20 = vmax.f32 %v7947_v58, 0.0  ;;  %v14055_v28 = vpack.c.bf16 %v14053_v3, %v14054_v40  ;;  %v14057_v44 = vld [vmem:[#allocation68_spill] sm:$0xff]  ;;  %v8148_v37 = vmax.f32 %v7948_v39, 0.0  ;;  %v14059_v63 = vld [vmem:[#allocation71_spill] sm:$0xff]  ;;  %v14060_v30 = vld [vmem:[#allocation70_spill] sm:$0xff]  ;;  %v9943_v29 = vunpack.c.0.s8 %v8747_v53  ;;  %v1193_v19 = vpop.f32.mrb[4].mxu0 }
 0x157   :  { %10920 = vmatprep.subr.bf16.mxu1 %v14048_v55  ;;  %10914 = vmatpush1.bf16.msra.mxu0 %v14052_v10  ;;  %v14058_v55 = vpack.c.bf16 %v14056_v21, %v14057_v44  ;;  %v8759_v48 = vpack.c.b8 %v8755_v32, %v8755_v32  ;;  %v8753_v2 = vpack.c.b8 %v8749_v60, %v8749_v60  ;;  %v12691_v27 = vld [vmem:[#allocation5 + $0x578] sm:$0xff]  ;;  %v12697_v44 = vld [vmem:[#allocation5 + $0x560] sm:$0xff]  ;;  %v8349_v40 = vmin.f32 %v8149_v38, 255.0  ;;  %v14069_v60 = vld [vmem:[#allocation75_spill] sm:$0xff] }
 0x158   :  { %10922 = vmatpush1.bf16.msra.mxu1 %v14055_v28  ;;  %v14061_v45 = vpack.c.bf16 %v14059_v63, %v14060_v30  ;;  %14062 = vst [vmem:[#allocation63_spill] sm:$0xff] %v12691_v27  ;;  %v12693_v36 = vld [vmem:[#allocation5 + $0xbb8] sm:$0xff]  ;;  %v8765_v58 = vpack.c.b8 %v8761_v7, %v8761_v7  ;;  %v8347_v3 = vmin.f32 %v8147_v20, 255.0  ;;  %v8150_v28 = vmax.f32 %v7950_v33, 0.0  ;;  %14064 = vst [vmem:[#allocation65_spill] sm:$0xff] %v12697_v44  ;;  %v12699_v21 = vld [vmem:[#allocation5 + $0xba0] sm:$0xff] }
 0x159   :  { %10924 = vmatprep.subr.bf16.mxu0 %v14058_v55  ;;  %14063 = vst [vmem:[#allocation62_spill] sm:$0xff] %v12693_v36  ;;  %14065 = vst [vmem:[#allocation64_spill] sm:$0xff] %v12699_v21  ;;  %v9945_v12 = vunpack.c.0.s8 %v8759_v48  ;;  %v9944_v39 = vunpack.c.0.s8 %v8753_v2  ;;  %v8348_v63 = vmin.f32 %v8148_v37, 255.0  ;;  %v14066_v52 = vld [vmem:[#allocation73_spill] sm:$0xff]  ;;  %v14067_v10 = vld [vmem:[#allocation72_spill] sm:$0xff]  ;;  %v8549_v37 = vtrunc.f32 %v8349_v40 }
 0x15a   :  { %10932 = vmatprep.subr.bf16.mxu1 %v14061_v45  ;;  %10415 = vmatmul.mubr.msk.f32.vlgmr.msra.gmra.mrb[56].mxu0 %vm839_vm0, %v12115_v22  ;;  %v14068_v53 = vpack.c.bf16 %v14066_v52, %v14067_v10  ;;  %v9946_v30 = vunpack.c.0.s8 %v8765_v58  ;;  %v8547_v55 = vtrunc.f32 %v8347_v3  ;;  %v8350_v32 = vmin.f32 %v8150_v28, 255.0  ;;  %v14070_v7 = vld [vmem:[#allocation74_spill] sm:$0xff]  ;;  %v14072_v33 = vld [vmem:[#allocation77_spill] sm:$0xff]  ;;  %v14073_v45 = vld [vmem:[#allocation76_spill] sm:$0xff] }
 0x15b   :  { %10416 = vmatmul.mubr.msk.f32.vlgmr.msra.gmra.mrb[56].mxu1 %vm839_vm0, %v12115_v22  ;;  %v14071_v20 = vpack.c.bf16 %v14069_v60, %v14070_v7  ;;  %v14074_v48 = vpack.c.bf16 %v14072_v33, %v14073_v45  ;;  %v10143_v38 = vpack.c.b16 %v9944_v39, %v9943_v29  ;;  %v8548_v18 = vtrunc.f32 %v8348_v63  ;;  %v14075_v52 = vld [vmem:[#allocation79_spill] sm:$0xff]  ;;  %v14076_v10 = vld [vmem:[#allocation78_spill] sm:$0xff]  ;;  %5025 = vmatprep.mubr.f32.mxu0 %v13758_v31  ;;  %v1195_v33 = vpop.f32.mrb[5].mxu0  ;;  %v14085_v44 = vld [vmem:[#allocation84_spill] sm:$0xff] }
 0x15c   :  { %10926 = vmatpush1.bf16.msra.mxu0 %v14068_v53  ;;  %v14077_v58 = vpack.c.bf16 %v14075_v52, %v14076_v10  ;;  %v10144_v28 = vpack.c.b16 %v9946_v30, %v9945_v12  ;;  %v8767_v53 = vpack.c.f32.eXmY %v8547_v55, %v8547_v55, 56  ;;  %v8550_v60 = vtrunc.f32 %v8350_v32  ;;  %5096 = vmatprep.mubr.f32.mxu1 %v13758_v31  ;;  %v14079_v52 = vld [vmem:[#allocation80_spill] sm:$0xff]  ;;  %v14081_v30 = vld [vmem:[#allocation83_spill] sm:$0xff]  ;;  %v14082_v55 = vld [vmem:[#allocation82_spill] sm:$0xff] }
 0x15d   :  { %10934 = vmatpush1.bf16.msra.mxu1 %v14071_v20  ;;  %10928 = vmatprep.subr.bf16.mxu0 %v14074_v48  ;;  %v7951_v7 = vmul.f32 255.0, %v1193_v19  ;;  %v1264_v20 = vpop.f32.mrb[4].mxu1  ;;  %v8779_v29 = vpack.c.f32.eXmY %v8549_v37, %v8549_v37, 56  ;;  %v8773_v39 = vpack.c.f32.eXmY %v8548_v18, %v8548_v18, 56  ;;  %v7952_v63 = vmul.f32 255.0, %v1195_v33  ;;  %v14078_v48 = vld [vmem:[#allocation81_spill] sm:$0xff] }
 0x15e   :  { %10936 = vmatprep.subr.bf16.mxu1 %v14077_v58  ;;  %v7953_v40 = vmul.f32 255.0, %v1264_v20  ;;  %v1266_v45 = vpop.f32.mrb[5].mxu1  ;;  %v14080_v10 = vpack.c.bf16 %v14078_v48, %v14079_v52  ;;  %v10145_v58 = vpack.c.b8 %v10144_v28, %v10143_v38  ;;  %v8771_v2 = vpack.c.b8 %v8767_v53, %v8767_v53  ;;  %v14084_v32 = vld [vmem:[#allocation85_spill] sm:$0xff]  ;;  %v14087_v27 = vld [vmem:[#allocation87_spill] sm:$0xff]  ;;  %v14088_v36 = vld [vmem:[#allocation86_spill] sm:$0xff] }
 0x15f   :  { %v8785_v3 = vpack.c.f32.eXmY %v8550_v60, %v8550_v60, 56  ;;  %v8151_v12 = vmax.f32 %v7951_v7, 0.0  ;;  %v14083_v19 = vpack.c.bf16 %v14081_v30, %v14082_v55  ;;  %v14086_v21 = vpack.c.bf16 %v14084_v32, %v14085_v44  ;;  %v12733_v38 = vld [vmem:[#allocation5 + $0x570] sm:$0xff]  ;;  %v12739_v44 = vld [vmem:[#allocation5 + $0x11e8] sm:$0xff]  ;;  %v14100_v55 = vld [vmem:[#allocation93_spill] sm:$0xff] }
 0x160   :  { %10930 = vmatpush1.bf16.msra.mxu0 %v14080_v10  ;;  %v8783_v18 = vpack.c.b8 %v8779_v29, %v8779_v29  ;;  %v8777_v37 = vpack.c.b8 %v8773_v39, %v8773_v39  ;;  %v8153_v20 = vmax.f32 %v7953_v40, 0.0  ;;  %v8152_v33 = vmax.f32 %v7952_v63, 0.0  ;;  %14090 = vst [vmem:[#allocation67_spill] sm:$0xff] %v12733_v38  ;;  %v12735_v28 = vld [vmem:[#allocation5 + $0xbb0] sm:$0xff]  ;;  %10293 = vst [vmem:[#allocation7] sm:$0xff] %v10145_v58  ;;  %v14094_v40 = vld [vmem:[#allocation89_spill] sm:$0xff] }
 0x161   :  { %10938 = vmatpush1.bf16.msra.mxu1 %v14083_v19  ;;  %10940 = vmatprep.subr.bf16.mxu0 %v14086_v21  ;;  %v14089_v48 = vpack.c.bf16 %v14087_v27, %v14088_v36  ;;  %14091 = vst [vmem:[#allocation66_spill] sm:$0xff] %v12735_v28  ;;  %v9947_v53 = vunpack.c.0.s8 %v8771_v2  ;;  %v8789_v60 = vpack.c.b8 %v8785_v3, %v8785_v3  ;;  %v8351_v7 = vmin.f32 %v8151_v12, 255.0  ;;  %v12741_v21 = vld [vmem:[#allocation5 + $0x1828] sm:$0xff]  ;;  %v14095_v63 = vld [vmem:[#allocation88_spill] sm:$0xff]  ;;  %v14097_v58 = vld [vmem:[#allocation91_spill] sm:$0xff] }
 0x162   :  { %v7954_v52 = vmul.f32 255.0, %v1266_v45  ;;  %14092 = vst [vmem:[#allocation69_spill] sm:$0xff] %v12739_v44  ;;  %14093 = vst [vmem:[#allocation68_spill] sm:$0xff] %v12741_v21  ;;  %v9949_v29 = vunpack.c.0.s8 %v8783_v18  ;;  %v9948_v39 = vunpack.c.0.s8 %v8777_v37  ;;  %v8353_v27 = vmin.f32 %v8153_v20, 255.0  ;;  %v14098_v12 = vld [vmem:[#allocation90_spill] sm:$0xff]  ;;  %v14101_v19 = vld [vmem:[#allocation92_spill] sm:$0xff] }
 0x163   :  { %10948 = vmatprep.subr.bf16.mxu1 %v14089_v48  ;;  %10417 = vmatmul.mubr.msk.f32.vlgmr.msra.gmra.mrb[58].mxu0 %vm839_vm0, %v12115_v22  ;;  %v8352_v36 = vmin.f32 %v8152_v33, 255.0  ;;  %v14096_v2 = vpack.c.bf16 %v14094_v40, %v14095_v63  ;;  %v9950_v3 = vunpack.c.0.s8 %v8789_v60  ;;  %v8551_v45 = vtrunc.f32 %v8351_v7  ;;  %v1335_v48 = vpop.f32.mrb[6].mxu0  ;;  %v14103_v40 = vld [vmem:[#allocation95_spill] sm:$0xff]  ;;  %v14104_v63 = vld [vmem:[#allocation94_spill] sm:$0xff]  ;;  %v14113_v44 = vld [vmem:[#allocation100_spill] sm:$0xff] }
 0x164   :  { %10418 = vmatmul.mubr.msk.f32.vlgmr.msra.gmra.mrb[58].mxu1 %vm839_vm0, %v12115_v22  ;;  %v8154_v10 = vmax.f32 %v7954_v52, 0.0  ;;  %v14099_v30 = vpack.c.bf16 %v14097_v58, %v14098_v12  ;;  %v14102_v32 = vpack.c.bf16 %v14100_v55, %v14101_v19  ;;  %v10146_v37 = vpack.c.b16 %v9948_v39, %v9947_v53  ;;  %5167 = vmatprep.mubr.f32.mxu0 %v13758_v31  ;;  %v1337_v55 = vpop.f32.mrb[7].mxu0  ;;  %v14115_v38 = vld [vmem:[#allocation103_spill] sm:$0xff]  ;;  %v14116_v28 = vld [vmem:[#allocation102_spill] sm:$0xff]  ;;  %v14144_v5 = vld [vmem:[#allocation116_spill] sm:$0xff] }
 0x165   :  { %10942 = vmatpush1.bf16.msra.mxu0 %v14096_v2  ;;  %v8553_v20 = vtrunc.f32 %v8353_v27  ;;  %v8552_v33 = vtrunc.f32 %v8352_v36  ;;  %v14105_v60 = vpack.c.bf16 %v14103_v40, %v14104_v63  ;;  %v10147_v52 = vpack.c.b16 %v9950_v3, %v9949_v29  ;;  %5238 = vmatprep.mubr.f32.mxu1 %v13758_v31  ;;  %v14107_v40 = vld [vmem:[#allocation96_spill] sm:$0xff]  ;;  %v14109_v3 = vld [vmem:[#allocation99_spill] sm:$0xff] }
 0x166   :  { %10950 = vmatpush1.bf16.msra.mxu1 %v14099_v30  ;;  %10944 = vmatprep.subr.bf16.mxu0 %v14102_v32  ;;  %v8791_v2 = vpack.c.f32.eXmY %v8551_v45, %v8551_v45, 56  ;;  %v8354_v58 = vmin.f32 %v8154_v10, 255.0  ;;  %v7955_v12 = vmul.f32 255.0, %v1335_v48  ;;  %v1406_v30 = vpop.f32.mrb[6].mxu1  ;;  %v7956_v36 = vmul.f32 255.0, %v1337_v55  ;;  %v14106_v32 = vld [vmem:[#allocation97_spill] sm:$0xff] }
 0x167   :  { %10952 = vmatprep.subr.bf16.mxu1 %v14105_v60  ;;  %v8803_v53 = vpack.c.f32.eXmY %v8553_v20, %v8553_v20, 56  ;;  %v8797_v39 = vpack.c.f32.eXmY %v8552_v33, %v8552_v33, 56  ;;  %v7957_v27 = vmul.f32 255.0, %v1406_v30  ;;  %v1408_v19 = vpop.f32.mrb[7].mxu1  ;;  %v14108_v63 = vpack.c.bf16 %v14106_v32, %v14107_v40  ;;  %v14110_v45 = vld [vmem:[#allocation98_spill] sm:$0xff]  ;;  %v14112_v48 = vld [vmem:[#allocation101_spill] sm:$0xff] }
 0x168   :  { %v10148_v60 = vpack.c.b8 %v10147_v52, %v10146_v37  ;;  %v8795_v18 = vpack.c.b8 %v8791_v2, %v8791_v2  ;;  %v8554_v7 = vtrunc.f32 %v8354_v58  ;;  %v8155_v29 = vmax.f32 %v7955_v12, 0.0  ;;  %v12775_v37 = vld [vmem:[#allocation5 + $0x11f8] sm:$0xff] }
 0x169   :  { %10946 = vmatpush1.bf16.msra.mxu0 %v14108_v63  ;;  %v14111_v10 = vpack.c.bf16 %v14109_v3, %v14110_v45  ;;  %v14114_v21 = vpack.c.bf16 %v14112_v48, %v14113_v44  ;;  %v8807_v20 = vpack.c.b8 %v8803_v53, %v8803_v53  ;;  %v8801_v33 = vpack.c.b8 %v8797_v39, %v8797_v39  ;;  %v12777_v52 = vld [vmem:[#allocation5 + $0x1838] sm:$0xff]  ;;  %v12781_v44 = vld [vmem:[#allocation5 + $0x11e0] sm:$0xff] }
 0x16a   :  { %v8157_v30 = vmax.f32 %v7957_v27, 0.0  ;;  %v8156_v55 = vmax.f32 %v7956_v36, 0.0  ;;  %v14117_v32 = vpack.c.bf16 %v14115_v38, %v14116_v28  ;;  %14118 = vst [vmem:[#allocation71_spill] sm:$0xff] %v12775_v37  ;;  %14119 = vst [vmem:[#allocation70_spill] sm:$0xff] %v12777_v52  ;;  %v9951_v2 = vunpack.c.0.s8 %v8795_v18  ;;  %v14122_v27 = vld [vmem:[#allocation105_spill] sm:$0xff]  ;;  %v14123_v36 = vld [vmem:[#allocation104_spill] sm:$0xff] }
 0x16b   :  { %10954 = vmatpush1.bf16.msra.mxu1 %v14111_v10  ;;  %10956 = vmatprep.subr.bf16.mxu0 %v14114_v21  ;;  %10294 = vst [vmem:[#allocation7 + $0x8] sm:$0xff] %v10148_v60  ;;  %v8809_v58 = vpack.c.f32.eXmY %v8554_v7, %v8554_v7, 56  ;;  %v8355_v12 = vmin.f32 %v8155_v29, 255.0  ;;  %v7958_v40 = vmul.f32 255.0, %v1408_v19  ;;  %14120 = vst [vmem:[#allocation73_spill] sm:$0xff] %v12781_v44  ;;  %v12783_v21 = vld [vmem:[#allocation5 + $0x1820] sm:$0xff]  ;;  %v9953_v53 = vunpack.c.0.s8 %v8807_v20 }
 0x16c   :  { %10964 = vmatprep.subr.bf16.mxu1 %v14117_v32  ;;  %10419 = vmatmul.mubr.msk.f32.vlgmr.msra.gmra.mrb[60].mxu0 %vm839_vm0, %v12115_v22  ;;  %14121 = vst [vmem:[#allocation72_spill] sm:$0xff] %v12783_v21  ;;  %v9952_v39 = vunpack.c.0.s8 %v8801_v33  ;;  %v8357_v38 = vmin.f32 %v8157_v30, 255.0  ;;  %v8356_v28 = vmin.f32 %v8156_v55, 255.0  ;;  %v14124_v18 = vpack.c.bf16 %v14122_v27, %v14123_v36  ;;  %v14125_v60 = vld [vmem:[#allocation107_spill] sm:$0xff]  ;;  %v14126_v29 = vld [vmem:[#allocation106_spill] sm:$0xff]  ;;  %v14128_v45 = vld [vmem:[#allocation109_spill] sm:$0xff] }
 0x16d   :  { %v8813_v7 = vpack.c.b8 %v8809_v58, %v8809_v58  ;;  %v8555_v19 = vtrunc.f32 %v8355_v12  ;;  %v8158_v63 = vmax.f32 %v7958_v40, 0.0  ;;  %v14127_v3 = vpack.c.bf16 %v14125_v60, %v14126_v29  ;;  %v14129_v10 = vld [vmem:[#allocation108_spill] sm:$0xff]  ;;  %v1477_v32 = vpop.f32.mrb[8].mxu0  ;;  %v14131_v27 = vld [vmem:[#allocation111_spill] sm:$0xff]  ;;  %v14132_v36 = vld [vmem:[#allocation110_spill] sm:$0xff]  ;;  %5309 = vmatprep.mubr.f32.mxu0 %v13758_v31 }
 0x16e   :  { %10420 = vmatmul.mubr.msk.f32.vlgmr.msra.gmra.mrb[60].mxu1 %vm839_vm0, %v12115_v22  ;;  %10958 = vmatpush1.bf16.msra.mxu0 %v14124_v18  ;;  %v14130_v48 = vpack.c.bf16 %v14128_v45, %v14129_v10  ;;  %v10149_v33 = vpack.c.b16 %v9952_v39, %v9951_v2  ;;  %v8557_v30 = vtrunc.f32 %v8357_v38  ;;  %v8556_v55 = vtrunc.f32 %v8356_v28  ;;  %v1479_v45 = vpop.f32.mrb[9].mxu0  ;;  %v14140_v44 = vld [vmem:[#allocation115_spill] sm:$0xff]  ;;  %v14141_v21 = vld [vmem:[#allocation114_spill] sm:$0xff]  ;;  %v14143_v52 = vld [vmem:[#allocation117_spill] sm:$0xff] }
 0x16f   :  { %10966 = vmatpush1.bf16.msra.mxu1 %v14127_v3  ;;  %v14133_v58 = vpack.c.bf16 %v14131_v27, %v14132_v36  ;;  %v9954_v40 = vunpack.c.0.s8 %v8813_v7  ;;  %v8815_v18 = vpack.c.f32.eXmY %v8555_v19, %v8555_v19, 56  ;;  %v8358_v60 = vmin.f32 %v8158_v63, 255.0  ;;  %v1548_v3 = vpop.f32.mrb[8].mxu1  ;;  %5380 = vmatprep.mubr.f32.mxu1 %v13758_v31  ;;  %v14135_v27 = vld [vmem:[#allocation12_spill] sm:$0xff]  ;;  %v14137_v19 = vld [vmem:[#allocation113_spill] sm:$0xff] }
 0x170   :  { %10960 = vmatprep.subr.bf16.mxu0 %v14130_v48  ;;  %v7959_v29 = vmul.f32 255.0, %v1477_v32  ;;  %v8827_v2 = vpack.c.f32.eXmY %v8557_v30, %v8557_v30, 56  ;;  %v8821_v39 = vpack.c.f32.eXmY %v8556_v55, %v8556_v55, 56  ;;  %v7961_v38 = vmul.f32 255.0, %v1548_v3  ;;  %v1550_v10 = vpop.f32.mrb[9].mxu1  ;;  %v14134_v48 = vld [vmem:[#allocation11_spill] sm:$0xff] }
 0x171   :  { %10968 = vmatprep.subr.bf16.mxu1 %v14133_v58  ;;  %v7960_v28 = vmul.f32 255.0, %v1479_v45  ;;  %v14136_v36 = vpack.c.bf16 %v14134_v48, %v14135_v27  ;;  %v10150_v58 = vpack.c.b16 %v9954_v40, %v9953_v53  ;;  %v8819_v20 = vpack.c.b8 %v8815_v18, %v8815_v18  ;;  %v14138_v63 = vld [vmem:[#allocation112_spill] sm:$0xff]  ;;  %v12817_v53 = vld [vmem:[#allocation5 + $0x11f0] sm:$0xff] }
 0x172   :  { %v8558_v12 = vtrunc.f32 %v8358_v60  ;;  %v8159_v7 = vmax.f32 %v7959_v29, 0.0  ;;  %v14139_v32 = vpack.c.bf16 %v14137_v19, %v14138_v63  ;;  %v14142_v37 = vpack.c.bf16 %v14140_v44, %v14141_v21  ;;  %14146 = vst [vmem:[#allocation75_spill] sm:$0xff] %v12817_v53  ;;  %v12819_v40 = vld [vmem:[#allocation5 + $0x1830] sm:$0xff]  ;;  %v12825_v44 = vld [vmem:[#allocation5 + $0xbc8] sm:$0xff]  ;;  %v14155_v19 = vld [vmem:[#allocation121_spill] sm:$0xff] }
 0x173   :  { %10962 = vmatpush1.bf16.msra.mxu0 %v14136_v36  ;;  %v8831_v30 = vpack.c.b8 %v8827_v2, %v8827_v2  ;;  %v8825_v55 = vpack.c.b8 %v8821_v39, %v8821_v39  ;;  %v8161_v3 = vmax.f32 %v7961_v38, 0.0  ;;  %v8160_v45 = vmax.f32 %v7960_v28, 0.0  ;;  %14148 = vst [vmem:[#allocation77_spill] sm:$0xff] %v12825_v44  ;;  %v14150_v38 = vld [vmem:[#allocation14_spill] sm:$0xff]  ;;  %v14152_v36 = vld [vmem:[#allocation119_spill] sm:$0xff]  ;;  %v14156_v63 = vld [vmem:[#allocation120_spill] sm:$0xff] }
 0x174   :  { %10970 = vmatpush1.bf16.msra.mxu1 %v14139_v32  ;;  %10972 = vmatprep.subr.bf16.mxu0 %v14142_v37  ;;  %v14145_v48 = vpack.c.bf16 %v14143_v52, %v14144_v5  ;;  %v10151_v18 = vpack.c.b8 %v10150_v58, %v10149_v33  ;;  %v9955_v60 = vunpack.c.0.s8 %v8819_v20  ;;  %v8833_v29 = vpack.c.f32.eXmY %v8558_v12, %v8558_v12, 56  ;;  %v12823_v37 = vld [vmem:[#allocation5 + $0x588] sm:$0xff]  ;;  %v14149_v52 = vld [vmem:[#allocation13_spill] sm:$0xff]  ;;  %v14170_v44 = vld [vmem:[#allocation15_spill] sm:$0xff] }
 0x175   :  { %v8359_v27 = vmin.f32 %v8159_v7, 255.0  ;;  %14147 = vst [vmem:[#allocation74_spill] sm:$0xff] %v12823_v37  ;;  %v9957_v21 = vunpack.c.0.s8 %v8831_v30  ;;  %v9956_v2 = vunpack.c.0.s8 %v8825_v55  ;;  %v8361_v39 = vmin.f32 %v8161_v3, 255.0  ;;  %v14153_v58 = vld [vmem:[#allocation118_spill] sm:$0xff]  ;;  %v14168_v30 = vld [vmem:[#allocation128_spill] sm:$0xff] }
 0x176   :  { %10980 = vmatprep.subr.bf16.mxu1 %v14145_v48  ;;  %10421 = vmatmul.mubr.msk.f32.vlgmr.msra.gmra.mrb[62].mxu0 %vm839_vm0, %v12115_v22  ;;  %v8360_v5 = vmin.f32 %v8160_v45, 255.0  ;;  %v14151_v33 = vpack.c.bf16 %v14149_v52, %v14150_v38  ;;  %10295 = vst [vmem:[#allocation7 + $0x10] sm:$0xff] %v10151_v18  ;;  %v8837_v20 = vpack.c.b8 %v8833_v29, %v8833_v29  ;;  %v7962_v28 = vmul.f32 255.0, %v1550_v10  ;;  %v1619_v45 = vpop.f32.mrb[10].mxu0  ;;  %v14158_v48 = vld [vmem:[#allocation123_spill] sm:$0xff]  ;;  %v14159_v18 = vld [vmem:[#allocation122_spill] sm:$0xff] }
 0x177   :  { %10422 = vmatmul.mubr.msk.f32.vlgmr.msra.gmra.mrb[62].mxu1 %vm839_vm0, %v12115_v22  ;;  %v8559_v12 = vtrunc.f32 %v8359_v27  ;;  %v14154_v7 = vpack.c.bf16 %v14152_v36, %v14153_v58  ;;  %v14157_v32 = vpack.c.bf16 %v14155_v19, %v14156_v63  ;;  %v10152_v22 = vpack.c.b16 %v9956_v2, %v9955_v60  ;;  %5451 = vmatprep.mubr.f32.mxu0 %v13758_v31  ;;  %v1690_v36 = vpop.f32.mrb[10].mxu1  ;;  %v1621_v58 = vpop.f32.mrb[11].mxu0  ;;  %v14161_v19 = vld [vmem:[#allocation125_spill] sm:$0xff]  ;;  %v14162_v63 = vld [vmem:[#allocation124_spill] sm:$0xff] }
 0x178   :  { %10974 = vmatpush1.bf16.msra.mxu0 %v14151_v33  ;;  %v8561_v55 = vtrunc.f32 %v8361_v39  ;;  %v8560_v3 = vtrunc.f32 %v8360_v5  ;;  %v14160_v29 = vpack.c.bf16 %v14158_v48, %v14159_v18  ;;  %v9958_v27 = vunpack.c.0.s8 %v8837_v20  ;;  %5522 = vmatprep.mubr.f32.mxu1 %v13758_v31  ;;  %v14167_v10 = vld [vmem:[#allocation129_spill] sm:$0xff]  ;;  %v14171_v53 = vld [vmem:[#allocation16_spill] sm:$0xff] }
 0x179   :  { %10982 = vmatpush1.bf16.msra.mxu1 %v14154_v7  ;;  %10976 = vmatprep.subr.bf16.mxu0 %v14157_v32  ;;  %v8839_v52 = vpack.c.f32.eXmY %v8559_v12, %v8559_v12, 56  ;;  %v8162_v38 = vmax.f32 %v7962_v28, 0.0  ;;  %v7963_v33 = vmul.f32 255.0, %v1619_v45  ;;  %v7965_v39 = vmul.f32 255.0, %v1690_v36  ;;  %v1692_v7 = vpop.f32.mrb[11].mxu1  ;;  %v14164_v12 = vld [vmem:[#allocation127_spill] sm:$0xff] }
 0x17a   :  { %10984 = vmatprep.subr.bf16.mxu1 %v14160_v29  ;;  %v8851_v60 = vpack.c.f32.eXmY %v8561_v55, %v8561_v55, 56  ;;  %v8845_v2 = vpack.c.f32.eXmY %v8560_v3, %v8560_v3, 56  ;;  %v7964_v5 = vmul.f32 255.0, %v1621_v58  ;;  %v14163_v32 = vpack.c.bf16 %v14161_v19, %v14162_v63  ;;  %v14165_v28 = vld [vmem:[#allocation126_spill] sm:$0xff] }
 0x17b   :  { %v10153_v48 = vpack.c.b16 %v9958_v27, %v9957_v21  ;;  %v8843_v18 = vpack.c.b8 %v8839_v52, %v8839_v52  ;;  %v8362_v29 = vmin.f32 %v8162_v38, 255.0  ;;  %v8163_v20 = vmax.f32 %v7963_v33, 0.0  ;;  %v12859_v21 = vld [vmem:[#allocation5 + $0x598] sm:$0xff] }
 0x17c   :  { %10978 = vmatpush1.bf16.msra.mxu0 %v14163_v32  ;;  %v14166_v45 = vpack.c.bf16 %v14164_v12, %v14165_v28  ;;  %v14169_v37 = vpack.c.bf16 %v14167_v10, %v14168_v30  ;;  %v8855_v55 = vpack.c.b8 %v8851_v60, %v8851_v60  ;;  %v8849_v3 = vpack.c.b8 %v8845_v2, %v8845_v2  ;;  %v12861_v27 = vld [vmem:[#allocation5 + $0xbd8] sm:$0xff]  ;;  %v12871_v30 = vld [vmem:[#allocation5 + $0xbc0] sm:$0xff]  ;;  %v14176_v2 = vld [vmem:[#allocation130_spill] sm:$0xff] }
 0x17d   :  { %v8165_v36 = vmax.f32 %v7965_v39, 0.0  ;;  %v8164_v58 = vmax.f32 %v7964_v5, 0.0  ;;  %v14172_v19 = vpack.c.bf16 %v14170_v44, %v14171_v53  ;;  %v10154_v52 = vpack.c.b8 %v10153_v48, %v10152_v22  ;;  %v12865_v32 = vld [vmem:[#allocation2] sm:$0xff]  ;;  %14174 = vst [vmem:[#allocation79_spill] sm:$0xff] %v12871_v30  ;;  %v14175_v22 = vld [vmem:[#allocation131_spill] sm:$0xff]  ;;  %v14181_v28 = vld [vmem:[#allocation17_spill] sm:$0xff] }
 0x17e   :  { %10986 = vmatpush1.bf16.msra.mxu1 %v14166_v45  ;;  %10988 = vmatprep.subr.bf16.mxu0 %v14169_v37  ;;  %v12863_v38 = vunpack.c.0.s8 %v8843_v18  ;;  %v8562_v33 = vtrunc.f32 %v8362_v29  ;;  %v8363_v63 = vmin.f32 %v8163_v20, 255.0  ;;  %v12869_v37 = vld [vmem:[#allocation5 + $0x580] sm:$0xff]  ;;  %v9961_v53 = vunpack.c.0.s8 %v8855_v55  ;;  %v14179_v20 = vld [vmem:[#allocation132_spill] sm:$0xff]  ;;  %v14182_v45 = vld [vmem:[#allocation18_spill] sm:$0xff] }
 0x17f   :  { %10996 = vmatprep.subr.bf16.mxu1 %v14172_v19  ;;  %10423 = vmatmul.mubr.msk.f32.vlgmr.msra.gmra.mrb[64].mxu0 %vm839_vm0, %v12865_v32  ;;  %14173 = vst [vmem:[#allocation76_spill] sm:$0xff] %v12869_v37  ;;  %v9960_v44 = vunpack.c.0.s8 %v8849_v3  ;;  %v8365_v10 = vmin.f32 %v8165_v36, 255.0  ;;  %v8364_v60 = vmin.f32 %v8164_v58, 255.0  ;;  %v14177_v39 = vpack.c.bf16 %v14175_v22, %v14176_v2  ;;  %10296 = vst [vmem:[#allocation7 + $0x18] sm:$0xff] %v10154_v52  ;;  %v14178_v29 = vld [vmem:[#allocation133_spill] sm:$0xff]  ;;  %v1761_v22 = vpop.f32.mrb[12].mxu0 }
 0x180   :  { %v8857_v5 = vpack.c.f32.eXmY %v8562_v33, %v8562_v33, 56  ;;  %v8563_v48 = vtrunc.f32 %v8363_v63  ;;  %v7966_v18 = vmul.f32 255.0, %v1692_v7  ;;  %v14180_v12 = vpack.c.bf16 %v14178_v29, %v14179_v20  ;;  %v14184_v52 = vld [vmem:[#allocation19_spill] sm:$0xff]  ;;  %v14185_v33 = vld [vmem:[#allocation20_spill] sm:$0xff]  ;;  %5593 = vmatprep.mubr.f32.mxu0 %v13758_v31  ;;  %v14194_v30 = vld [vmem:[#allocation21_spill] sm:$0xff] }
 0x181   :  { %10424 = vmatmul.mubr.msk.f32.vlgmr.msra.gmra.mrb[64].mxu1 %vm839_vm0, %v12865_v32  ;;  %10990 = vmatpush1.bf16.msra.mxu0 %v14177_v39  ;;  %v14183_v55 = vpack.c.bf16 %v14181_v28, %v14182_v45  ;;  %v10155_v36 = vpack.c.b16 %v9960_v44, %v12863_v38  ;;  %v8565_v58 = vtrunc.f32 %v8365_v10  ;;  %v8564_v19 = vtrunc.f32 %v8364_v60  ;;  %v1763_v28 = vpop.f32.mrb[13].mxu0  ;;  %v14193_v37 = vld [vmem:[#allocation136_spill] sm:$0xff] }
 0x182   :  { %10998 = vmatpush1.bf16.msra.mxu1 %v14180_v12  ;;  %v14186_v63 = vpack.c.bf16 %v14184_v52, %v14185_v33  ;;  %v8861_v2 = vpack.c.b8 %v8857_v5, %v8857_v5  ;;  %v8863_v39 = vpack.c.f32.eXmY %v8563_v48, %v8563_v48, 56  ;;  %v8166_v29 = vmax.f32 %v7966_v18, 0.0  ;;  %v1832_v12 = vpop.f32.mrb[12].mxu1  ;;  %5664 = vmatprep.mubr.f32.mxu1 %v13758_v31  ;;  %v14188_v52 = vld [vmem:[#allocation134_spill] sm:$0xff] }
 0x183   :  { %10992 = vmatprep.subr.bf16.mxu0 %v14183_v55  ;;  %v7967_v20 = vmul.f32 255.0, %v1761_v22  ;;  %v8875_v38 = vpack.c.f32.eXmY %v8565_v58, %v8565_v58, 56  ;;  %v8869_v44 = vpack.c.f32.eXmY %v8564_v19, %v8564_v19, 56  ;;  %v7969_v10 = vmul.f32 255.0, %v1832_v12  ;;  %v1834_v45 = vpop.f32.mrb[13].mxu1  ;;  %v14187_v55 = vld [vmem:[#allocation135_spill] sm:$0xff] }
 0x184   :  { %11000 = vmatprep.subr.bf16.mxu1 %v14186_v63  ;;  %v7968_v60 = vmul.f32 255.0, %v1763_v28  ;;  %v14189_v33 = vpack.c.bf16 %v14187_v55, %v14188_v52  ;;  %v9962_v63 = vunpack.c.0.s8 %v8861_v2  ;;  %v8867_v3 = vpack.c.b8 %v8863_v39, %v8863_v39  ;;  %v14191_v18 = vld [vmem:[#allocation22_spill] sm:$0xff] }
 0x185   :  { %v8366_v7 = vmin.f32 %v8166_v29, 255.0  ;;  %v8167_v5 = vmax.f32 %v7967_v20, 0.0  ;;  %v14190_v48 = vpack.c.bf16 %v12101_v46, %v12099_v13  ;;  %v14192_v22 = vpack.c.bf16 %v12105_v51, %v14191_v18  ;;  %v12910_v46 = vld [vmem:[#allocation5 + $0x590] sm:$0xff]  ;;  %v14205_v18 = vld [vmem:[#allocation141_spill] sm:$0xff] }
 0x186   :  { %10994 = vmatpush1.bf16.msra.mxu0 %v14189_v33  ;;  %v8879_v58 = vpack.c.b8 %v8875_v38, %v8875_v38  ;;  %v8873_v19 = vpack.c.b8 %v8869_v44, %v8869_v44  ;;  %v8169_v12 = vmax.f32 %v7969_v10, 0.0  ;;  %v8168_v28 = vmax.f32 %v7968_v60, 0.0  ;;  %14196 = vst [vmem:[#allocation78_spill] sm:$0xff] %v12910_v46  ;;  %v12912_v13 = vld [vmem:[#allocation5 + $0xbd0] sm:$0xff]  ;;  %v14201_v33 = vld [vmem:[#allocation140_spill] sm:$0xff]  ;;  %v14219_v46 = vld [vmem:[#allocation150_spill] sm:$0xff] }
 0x187   :  { %11002 = vmatpush1.bf16.msra.mxu1 %v14190_v48  ;;  %11004 = vmatprep.subr.bf16.mxu0 %v14192_v22  ;;  %v14195_v55 = vpack.c.bf16 %v14193_v37, %v14194_v30  ;;  %v10156_v2 = vpack.c.b16 %v9962_v63, %v9961_v53  ;;  %v12906_v39 = vunpack.c.0.s8 %v8867_v3  ;;  %v8566_v29 = vtrunc.f32 %v8366_v7  ;;  %14197 = vst [vmem:[#allocation81_spill] sm:$0xff] %v12912_v13  ;;  %v14198_v37 = vld [vmem:[#allocation138_spill] sm:$0xff]  ;;  %v14199_v30 = vld [vmem:[#allocation137_spill] sm:$0xff]  ;;  %v14202_v63 = vld [vmem:[#allocation139_spill] sm:$0xff] }
 0x188   :  { %v8367_v20 = vmin.f32 %v8167_v5, 255.0  ;;  %v9965_v51 = vunpack.c.0.s8 %v8879_v58  ;;  %v9964_v38 = vunpack.c.0.s8 %v8873_v19  ;;  %v8369_v44 = vmin.f32 %v8169_v12, 255.0  ;;  %v14204_v48 = vld [vmem:[#allocation142_spill] sm:$0xff]  ;;  %v14220_v13 = vld [vmem:[#allocation149_spill] sm:$0xff] }
 0x189   :  { %11012 = vmatprep.subr.bf16.mxu1 %v14195_v55  ;;  %10425 = vmatmul.mubr.msk.f32.vlgmr.msra.gmra.mrb[66].mxu0 %vm839_vm0, %v12865_v32  ;;  %v8368_v10 = vmin.f32 %v8168_v28, 255.0  ;;  %v14200_v53 = vpack.c.bf16 %v14198_v37, %v14199_v30  ;;  %v10157_v3 = vpack.c.b8 %v10156_v2, %v10155_v36  ;;  %v8881_v7 = vpack.c.f32.eXmY %v8566_v29, %v8566_v29, 56  ;;  %v1903_v28 = vpop.f32.mrb[14].mxu0  ;;  %v14207_v55 = vld [vmem:[#allocation144_spill] sm:$0xff]  ;;  %v14208_v37 = vld [vmem:[#allocation143_spill] sm:$0xff] }
 0x18a   :  { %10426 = vmatmul.mubr.msk.f32.vlgmr.msra.gmra.mrb[66].mxu1 %vm839_vm0, %v12865_v32  ;;  %v8567_v60 = vtrunc.f32 %v8367_v20  ;;  %v7970_v52 = vmul.f32 255.0, %v1834_v45  ;;  %v14203_v5 = vpack.c.bf16 %v14201_v33, %v14202_v63  ;;  %v14206_v22 = vpack.c.bf16 %v14204_v48, %v14205_v18  ;;  %5735 = vmatprep.mubr.f32.mxu0 %v13758_v31  ;;  %v1905_v33 = vpop.f32.mrb[15].mxu0  ;;  %v14211_v48 = vld [vmem:[#allocation145_spill] sm:$0xff] }
 0x18b   :  { %11006 = vmatpush1.bf16.msra.mxu0 %v14200_v53  ;;  %v10158_v58 = vpack.c.b16 %v9964_v38, %v12906_v39  ;;  %v8569_v19 = vtrunc.f32 %v8369_v44  ;;  %v8568_v12 = vtrunc.f32 %v8368_v10  ;;  %v14209_v30 = vpack.c.bf16 %v14207_v55, %v14208_v37  ;;  %10297 = vst [vmem:[#allocation7 + $0x20] sm:$0xff] %v10157_v3  ;;  %v1974_v53 = vpop.f32.mrb[14].mxu1  ;;  %5806 = vmatprep.mubr.f32.mxu1 %v13758_v31  ;;  %v14216_v37 = vld [vmem:[#allocation148_spill] sm:$0xff] }
 0x18c   :  { %11014 = vmatpush1.bf16.msra.mxu1 %v14203_v5  ;;  %11008 = vmatprep.subr.bf16.mxu0 %v14206_v22  ;;  %v8885_v45 = vpack.c.b8 %v8881_v7, %v8881_v7  ;;  %v8887_v2 = vpack.c.f32.eXmY %v8567_v60, %v8567_v60, 56  ;;  %v8170_v29 = vmax.f32 %v7970_v52, 0.0  ;;  %v7971_v20 = vmul.f32 255.0, %v1903_v28  ;;  %v1976_v63 = vpop.f32.mrb[15].mxu1  ;;  %v14210_v5 = vld [vmem:[#allocation146_spill] sm:$0xff]  ;;  %v14213_v60 = vld [vmem:[#allocation23_spill] sm:$0xff] }
 0x18d   :  { %11016 = vmatprep.subr.bf16.mxu1 %v14209_v30  ;;  %v8899_v39 = vpack.c.f32.eXmY %v8569_v19, %v8569_v19, 56  ;;  %v8893_v38 = vpack.c.f32.eXmY %v8568_v12, %v8568_v12, 56  ;;  %v7973_v44 = vmul.f32 255.0, %v1974_v53  ;;  %v7972_v10 = vmul.f32 255.0, %v1905_v33  ;;  %v14214_v52 = vld [vmem:[#allocation24_spill] sm:$0xff]  ;;  %v14217_v30 = vld [vmem:[#allocation147_spill] sm:$0xff] }
 0x18e   :  { %v14212_v18 = vpack.c.bf16 %v14210_v5, %v14211_v48  ;;  %v9966_v22 = vunpack.c.0.s8 %v8885_v45  ;;  %v8891_v55 = vpack.c.b8 %v8887_v2, %v8887_v2  ;;  %v8370_v3 = vmin.f32 %v8170_v29, 255.0  ;;  %v12949_v48 = vld [vmem:[#allocation5 + $0x1208] sm:$0xff] }
 0x18f   :  { %v8171_v7 = vmax.f32 %v7971_v20, 0.0  ;;  %v14215_v28 = vpack.c.bf16 %v14213_v60, %v14214_v52  ;;  %v14218_v36 = vpack.c.bf16 %v14216_v37, %v14217_v30  ;;  %v8903_v19 = vpack.c.b8 %v8899_v39, %v8899_v39  ;;  %14222 = vst [vmem:[#allocation80_spill] sm:$0xff] %v12949_v48  ;;  %v14228_v60 = vld [vmem:[#allocation28_spill] sm:$0xff]  ;;  %v14231_v37 = vld [vmem:[#allocation151_spill] sm:$0xff] }
 0x190   :  { %11010 = vmatpush1.bf16.msra.mxu0 %v14212_v18  ;;  %v8897_v12 = vpack.c.b8 %v8893_v38, %v8893_v38  ;;  %v8173_v53 = vmax.f32 %v7973_v44, 0.0  ;;  %v8172_v33 = vmax.f32 %v7972_v10, 0.0  ;;  %v14221_v5 = vpack.c.bf16 %v14219_v46, %v14220_v13  ;;  %v12951_v18 = vld [vmem:[#allocation5 + $0x1848] sm:$0xff]  ;;  %v14224_v46 = vld [vmem:[#allocation25_spill] sm:$0xff]  ;;  %v14245_v48 = vld [vmem:[#allocation160_spill] sm:$0xff] }
 0x191   :  { %11018 = vmatpush1.bf16.msra.mxu1 %v14215_v28  ;;  %11020 = vmatprep.subr.bf16.mxu0 %v14218_v36  ;;  %v10159_v45 = vpack.c.b16 %v9966_v22, %v9965_v51  ;;  %v12945_v2 = vunpack.c.0.s8 %v8891_v55  ;;  %v8570_v29 = vtrunc.f32 %v8370_v3  ;;  %v8371_v20 = vmin.f32 %v8171_v7, 255.0  ;;  %14223 = vst [vmem:[#allocation83_spill] sm:$0xff] %v12951_v18  ;;  %v14225_v13 = vld [vmem:[#allocation26_spill] sm:$0xff]  ;;  %v14227_v7 = vld [vmem:[#allocation27_spill] sm:$0xff]  ;;  %v14230_v28 = vld [vmem:[#allocation152_spill] sm:$0xff] }
 0x192   :  { %11028 = vmatprep.subr.bf16.mxu1 %v14221_v5  ;;  %v9969_v36 = vunpack.c.0.s8 %v8903_v19  ;;  %v9968_v39 = vunpack.c.0.s8 %v8897_v12  ;;  %v8373_v38 = vmin.f32 %v8173_v53, 255.0  ;;  %v8372_v44 = vmin.f32 %v8172_v33, 255.0  ;;  %v2045_v33 = vpop.f32.mrb[16].mxu0  ;;  %v14233_v5 = vld [vmem:[#allocation154_spill] sm:$0xff]  ;;  %v14246_v18 = vld [vmem:[#allocation159_spill] sm:$0xff] }
 0x193   :  { %10427 = vmatmul.mubr.msk.f32.vlgmr.msra.gmra.mrb[68].mxu0 %vm839_vm0, %v12865_v32  ;;  %v14226_v51 = vpack.c.bf16 %v14224_v46, %v14225_v13  ;;  %v10160_v10 = vpack.c.b8 %v10159_v45, %v10158_v58  ;;  %v8905_v22 = vpack.c.f32.eXmY %v8570_v29, %v8570_v29, 56  ;;  %v8571_v55 = vtrunc.f32 %v8371_v20  ;;  %v14234_v46 = vld [vmem:[#allocation153_spill] sm:$0xff] }
 0x194   :  { %10428 = vmatmul.mubr.msk.f32.vlgmr.msra.gmra.mrb[68].mxu1 %vm839_vm0, %v12865_v32  ;;  %v7974_v3 = vmul.f32 255.0, %v1976_v63  ;;  %v14229_v52 = vpack.c.bf16 %v14227_v7, %v14228_v60  ;;  %v14232_v30 = vpack.c.bf16 %v14230_v28, %v14231_v37  ;;  %v10161_v19 = vpack.c.b16 %v9968_v39, %v12945_v2  ;;  %5877 = vmatprep.mubr.f32.mxu0 %v13758_v31  ;;  %v2047_v7 = vpop.f32.mrb[17].mxu0  ;;  %v14237_v28 = vld [vmem:[#allocation30_spill] sm:$0xff] }
 0x195   :  { %11022 = vmatpush1.bf16.msra.mxu0 %v14226_v51  ;;  %v8573_v12 = vtrunc.f32 %v8373_v38  ;;  %v8572_v53 = vtrunc.f32 %v8372_v44  ;;  %v14235_v13 = vpack.c.bf16 %v14233_v5, %v14234_v46  ;;  %10298 = vst [vmem:[#allocation7 + $0x28] sm:$0xff] %v10160_v10  ;;  %v8909_v63 = vpack.c.b8 %v8905_v22, %v8905_v22  ;;  %v2116_v51 = vpop.f32.mrb[16].mxu1  ;;  %5948 = vmatprep.mubr.f32.mxu1 %v13758_v31  ;;  %v14242_v46 = vld [vmem:[#allocation158_spill] sm:$0xff] }
 0x196   :  { %11030 = vmatpush1.bf16.msra.mxu1 %v14229_v52  ;;  %11024 = vmatprep.subr.bf16.mxu0 %v14232_v30  ;;  %v8911_v45 = vpack.c.f32.eXmY %v8571_v55, %v8571_v55, 56  ;;  %v8174_v29 = vmax.f32 %v7974_v3, 0.0  ;;  %v7975_v20 = vmul.f32 255.0, %v2045_v33  ;;  %v7977_v38 = vmul.f32 255.0, %v2116_v51  ;;  %v2118_v60 = vpop.f32.mrb[17].mxu1  ;;  %v14236_v52 = vld [vmem:[#allocation29_spill] sm:$0xff] }
 0x197   :  { %11032 = vmatprep.subr.bf16.mxu1 %v14235_v13  ;;  %v8923_v2 = vpack.c.f32.eXmY %v8573_v12, %v8573_v12, 56  ;;  %v8917_v39 = vpack.c.f32.eXmY %v8572_v53, %v8572_v53, 56  ;;  %v7976_v44 = vmul.f32 255.0, %v2047_v7  ;;  %v14238_v37 = vpack.c.bf16 %v14236_v52, %v14237_v28  ;;  %v14239_v55 = vld [vmem:[#allocation156_spill] sm:$0xff]  ;;  %v14240_v3 = vld [vmem:[#allocation155_spill] sm:$0xff]  ;;  %v14243_v13 = vld [vmem:[#allocation157_spill] sm:$0xff] }
 0x198   :  { %v9970_v30 = vunpack.c.0.s8 %v8909_v63  ;;  %v8915_v5 = vpack.c.b8 %v8911_v45, %v8911_v45  ;;  %v8374_v10 = vmin.f32 %v8174_v29, 255.0  ;;  %v8175_v22 = vmax.f32 %v7975_v20, 0.0  ;;  %v12988_v28 = vld [vmem:[#allocation5 + $0x1218] sm:$0xff] }
 0x199   :  { %11026 = vmatpush1.bf16.msra.mxu0 %v14238_v37  ;;  %v14241_v33 = vpack.c.bf16 %v14239_v55, %v14240_v3  ;;  %v14244_v58 = vpack.c.bf16 %v14242_v46, %v14243_v13  ;;  %v8927_v12 = vpack.c.b8 %v8923_v2, %v8923_v2  ;;  %v8921_v53 = vpack.c.b8 %v8917_v39, %v8917_v39  ;;  %v12990_v37 = vld [vmem:[#allocation5 + $0x1858] sm:$0xff]  ;;  %v14254_v55 = vld [vmem:[#allocation163_spill] sm:$0xff]  ;;  %v14257_v46 = vld [vmem:[#allocation165_spill] sm:$0xff] }
 0x19a   :  { %v8177_v51 = vmax.f32 %v7977_v38, 0.0  ;;  %v8176_v7 = vmax.f32 %v7976_v44, 0.0  ;;  %v14247_v52 = vpack.c.bf16 %v14245_v48, %v14246_v18  ;;  %v10162_v63 = vpack.c.b16 %v9970_v30, %v9969_v36  ;;  %14248 = vst [vmem:[#allocation82_spill] sm:$0xff] %v12988_v28  ;;  %14249 = vst [vmem:[#allocation85_spill] sm:$0xff] %v12990_v37  ;;  %v14250_v48 = vld [vmem:[#allocation162_spill] sm:$0xff]  ;;  %v14251_v18 = vld [vmem:[#allocation161_spill] sm:$0xff] }
 0x19b   :  { %11034 = vmatpush1.bf16.msra.mxu1 %v14241_v33  ;;  %11036 = vmatprep.subr.bf16.mxu0 %v14244_v58  ;;  %v12984_v45 = vunpack.c.0.s8 %v8915_v5  ;;  %v8574_v29 = vtrunc.f32 %v8374_v10  ;;  %v8375_v20 = vmin.f32 %v8175_v22, 255.0  ;;  %v9973_v58 = vunpack.c.0.s8 %v8927_v12  ;;  %v14253_v22 = vld [vmem:[#allocation164_spill] sm:$0xff]  ;;  %v14256_v33 = vld [vmem:[#allocation166_spill] sm:$0xff]  ;;  %v14271_v28 = vld [vmem:[#allocation173_spill] sm:$0xff] }
 0x19c   :  { %11044 = vmatprep.subr.bf16.mxu1 %v14247_v52  ;;  %10429 = vmatmul.mubr.msk.f32.vlgmr.msra.gmra.mrb[70].mxu0 %vm839_vm0, %v12865_v32  ;;  %v9972_v2 = vunpack.c.0.s8 %v8921_v53  ;;  %v8377_v39 = vmin.f32 %v8177_v51, 255.0  ;;  %v8376_v38 = vmin.f32 %v8176_v7, 255.0  ;;  %v14252_v36 = vpack.c.bf16 %v14250_v48, %v14251_v18  ;;  %v2187_v7 = vpop.f32.mrb[18].mxu0  ;;  %v14259_v52 = vld [vmem:[#allocation168_spill] sm:$0xff]  ;;  %v14260_v48 = vld [vmem:[#allocation167_spill] sm:$0xff] }
 0x19d   :  { %v10163_v44 = vpack.c.b8 %v10162_v63, %v10161_v19  ;;  %v8929_v30 = vpack.c.f32.eXmY %v8574_v29, %v8574_v29, 56  ;;  %v8575_v5 = vtrunc.f32 %v8375_v20  ;;  %v7978_v10 = vmul.f32 255.0, %v2118_v60  ;;  %6019 = vmatprep.mubr.f32.mxu0 %v13758_v31  ;;  %v14272_v37 = vld [vmem:[#allocation32_spill] sm:$0xff] }
 0x19e   :  { %10430 = vmatmul.mubr.msk.f32.vlgmr.msra.gmra.mrb[70].mxu1 %vm839_vm0, %v12865_v32  ;;  %11038 = vmatpush1.bf16.msra.mxu0 %v14252_v36  ;;  %v14255_v3 = vpack.c.bf16 %v14253_v22, %v14254_v55  ;;  %v14258_v13 = vpack.c.bf16 %v14256_v33, %v14257_v46  ;;  %v10164_v12 = vpack.c.b16 %v9972_v2, %v12984_v45  ;;  %v8577_v53 = vtrunc.f32 %v8377_v39  ;;  %v2258_v36 = vpop.f32.mrb[18].mxu1  ;;  %v2189_v22 = vpop.f32.mrb[19].mxu0  ;;  %v14263_v33 = vld [vmem:[#allocation169_spill] sm:$0xff] }
 0x19f   :  { %v8576_v51 = vtrunc.f32 %v8376_v38  ;;  %v14261_v18 = vpack.c.bf16 %v14259_v52, %v14260_v48  ;;  %10299 = vst [vmem:[#allocation7 + $0x30] sm:$0xff] %v10163_v44  ;;  %v8933_v60 = vpack.c.b8 %v8929_v30, %v8929_v30  ;;  %v8935_v63 = vpack.c.f32.eXmY %v8575_v5, %v8575_v5, 56  ;;  %6090 = vmatprep.mubr.f32.mxu1 %v13758_v31  ;;  %v2260_v55 = vpop.f32.mrb[19].mxu1  ;;  %v14265_v5 = vld [vmem:[#allocation172_spill] sm:$0xff]  ;;  %v14268_v48 = vld [vmem:[#allocation33_spill] sm:$0xff] }
 0x1a0   :  { %11046 = vmatpush1.bf16.msra.mxu1 %v14255_v3  ;;  %11040 = vmatprep.subr.bf16.mxu0 %v14258_v13  ;;  %v8178_v29 = vmax.f32 %v7978_v10, 0.0  ;;  %v7979_v20 = vmul.f32 255.0, %v2187_v7  ;;  %v8947_v45 = vpack.c.f32.eXmY %v8577_v53, %v8577_v53, 56  ;;  %v7981_v39 = vmul.f32 255.0, %v2258_v36  ;;  %v14262_v3 = vld [vmem:[#allocation170_spill] sm:$0xff]  ;;  %v14266_v10 = vld [vmem:[#allocation171_spill] sm:$0xff] }
 0x1a1   :  { %11048 = vmatprep.subr.bf16.mxu1 %v14261_v18  ;;  %v8941_v2 = vpack.c.f32.eXmY %v8576_v51, %v8576_v51, 56  ;;  %v7980_v38 = vmul.f32 255.0, %v2189_v22  ;;  %v14264_v46 = vpack.c.bf16 %v14262_v3, %v14263_v33  ;;  %v9974_v13 = vunpack.c.0.s8 %v8933_v60  ;;  %v14269_v18 = vld [vmem:[#allocation31_spill] sm:$0xff]  ;;  %v13027_v33 = vld [vmem:[#allocation5 + $0x1200] sm:$0xff] }
 0x1a2   :  { %v8939_v52 = vpack.c.b8 %v8935_v63, %v8935_v63  ;;  %v8378_v44 = vmin.f32 %v8178_v29, 255.0  ;;  %v8179_v30 = vmax.f32 %v7979_v20, 0.0  ;;  %v14267_v7 = vpack.c.bf16 %v14265_v5, %v14266_v10  ;;  %v14279_v10 = vld [vmem:[#allocation176_spill] sm:$0xff] }
 0x1a3   :  { %11042 = vmatpush1.bf16.msra.mxu0 %v14264_v46  ;;  %v14270_v19 = vpack.c.bf16 %v14268_v48, %v14269_v18  ;;  %v8951_v53 = vpack.c.b8 %v8947_v45, %v8947_v45  ;;  %v8945_v51 = vpack.c.b8 %v8941_v2, %v8941_v2  ;;  %v8181_v36 = vmax.f32 %v7981_v39, 0.0  ;;  %v13029_v46 = vld [vmem:[#allocation5 + $0x1840] sm:$0xff] }
 0x1a4   :  { %11050 = vmatpush1.bf16.msra.mxu1 %v14267_v7  ;;  %v8180_v22 = vmax.f32 %v7980_v38, 0.0  ;;  %v14273_v3 = vpack.c.bf16 %v14271_v28, %v14272_v37  ;;  %v10165_v60 = vpack.c.b16 %v9974_v13, %v9973_v58  ;;  %v13023_v63 = vunpack.c.0.s8 %v8939_v52  ;;  %v14274_v28 = vld [vmem:[#allocation175_spill] sm:$0xff]  ;;  %v14275_v37 = vld [vmem:[#allocation174_spill] sm:$0xff] }
 0x1a5   :  { %11052 = vmatprep.subr.bf16.mxu0 %v14270_v19  ;;  %v8578_v29 = vtrunc.f32 %v8378_v44  ;;  %v8379_v20 = vmin.f32 %v8179_v30, 255.0  ;;  %v9977_v19 = vunpack.c.0.s8 %v8951_v53  ;;  %v9976_v45 = vunpack.c.0.s8 %v8945_v51  ;;  %v14277_v30 = vld [vmem:[#allocation35_spill] sm:$0xff]  ;;  %v14280_v7 = vld [vmem:[#allocation34_spill] sm:$0xff] }
 0x1a6   :  { %11060 = vmatprep.subr.bf16.mxu1 %v14273_v3  ;;  %10431 = vmatmul.mubr.msk.f32.vlgmr.msra.gmra.mrb[72].mxu0 %vm839_vm0, %v12865_v32  ;;  %v8381_v2 = vmin.f32 %v8181_v36, 255.0  ;;  %v8380_v39 = vmin.f32 %v8180_v22, 255.0  ;;  %v14276_v58 = vpack.c.bf16 %v14274_v28, %v14275_v37  ;;  %v10166_v38 = vpack.c.b8 %v10165_v60, %v10164_v12  ;;  %v2329_v36 = vpop.f32.mrb[20].mxu0  ;;  %v14282_v22 = vld [vmem:[#allocation178_spill] sm:$0xff]  ;;  %v14283_v3 = vld [vmem:[#allocation177_spill] sm:$0xff] }
 0x1a7   :  { %10432 = vmatmul.mubr.msk.f32.vlgmr.msra.gmra.mrb[72].mxu1 %vm839_vm0, %v12865_v32  ;;  %v8953_v13 = vpack.c.f32.eXmY %v8578_v29, %v8578_v29, 56  ;;  %v8579_v52 = vtrunc.f32 %v8379_v20  ;;  %v7982_v44 = vmul.f32 255.0, %v2260_v55  ;;  %v14278_v5 = vpack.c.bf16 %v12301_v4, %v14277_v30  ;;  %6161 = vmatprep.mubr.f32.mxu0 %v13758_v31  ;;  %v2400_v20 = vpop.f32.mrb[20].mxu1  ;;  %v2331_v37 = vpop.f32.mrb[21].mxu0  ;;  %v14285_v30 = vld [vmem:[#allocation180_spill] sm:$0xff] }
 0x1a8   :  { %11054 = vmatpush1.bf16.msra.mxu0 %v14276_v58  ;;  %v14281_v48 = vpack.c.bf16 %v14279_v10, %v14280_v7  ;;  %v10167_v18 = vpack.c.b16 %v9976_v45, %v13023_v63  ;;  %v8581_v53 = vtrunc.f32 %v8381_v2  ;;  %v8580_v51 = vtrunc.f32 %v8380_v39  ;;  %10300 = vst [vmem:[#allocation7 + $0x38] sm:$0xff] %v10166_v38  ;;  %6232 = vmatprep.mubr.f32.mxu1 %v13758_v31  ;;  %v2402_v58 = vpop.f32.mrb[21].mxu1 }
 0x1a9   :  { %11062 = vmatpush1.bf16.msra.mxu1 %v14278_v5  ;;  %v14284_v28 = vpack.c.bf16 %v14282_v22, %v14283_v3  ;;  %v11169_v12 = vpack.c.bf16 %v13029_v46, %v13027_v33  ;;  %v8957_v4 = vpack.c.b8 %v8953_v13, %v8953_v13  ;;  %v8959_v55 = vpack.c.f32.eXmY %v8579_v52, %v8579_v52, 56  ;;  %v14286_v5 = vld [vmem:[#allocation179_spill] sm:$0xff] }
 0x1aa   :  { %11056 = vmatprep.subr.bf16.mxu0 %v14281_v48  ;;  %v8182_v60 = vmax.f32 %v7982_v44, 0.0  ;;  %v7983_v29 = vmul.f32 255.0, %v2329_v36  ;;  %v8971_v63 = vpack.c.f32.eXmY %v8581_v53, %v8581_v53, 56  ;;  %v8965_v45 = vpack.c.f32.eXmY %v8580_v51, %v8580_v51, 56  ;;  %v14289_v44 = vld [vmem:[#allocation181_spill] sm:$0xff] }
 0x1ab   :  { %11064 = vmatprep.subr.bf16.mxu1 %v14284_v28  ;;  %v7985_v2 = vmul.f32 255.0, %v2400_v20  ;;  %v7984_v39 = vmul.f32 255.0, %v2331_v37  ;;  %v14287_v10 = vpack.c.bf16 %v14285_v30, %v14286_v5  ;;  %v9978_v7 = vunpack.c.0.s8 %v8957_v4  ;;  %v14291_v28 = vld [vmem:[#allocation183_spill] sm:$0xff]  ;;  %v14292_v20 = vld [vmem:[#allocation182_spill] sm:$0xff] }
 0x1ac   :  { %v8963_v48 = vpack.c.b8 %v8959_v55, %v8959_v55  ;;  %v8382_v38 = vmin.f32 %v8182_v60, 255.0  ;;  %v8183_v13 = vmax.f32 %v7983_v29, 0.0  ;;  %v14288_v52 = vpack.c.bf16 %v12327_v25, %v12325_v14  ;;  %v13066_v14 = vld [vmem:[#allocation5 + $0x1210] sm:$0xff] }
 0x1ad   :  { %11058 = vmatpush1.bf16.msra.mxu0 %v14287_v10  ;;  %v14290_v36 = vpack.c.bf16 %v12331_v15, %v14289_v44  ;;  %v8975_v53 = vpack.c.b8 %v8971_v63, %v8971_v63  ;;  %v8969_v51 = vpack.c.b8 %v8965_v45, %v8965_v45  ;;  %v8185_v22 = vmax.f32 %v7985_v2, 0.0  ;;  %v13068_v15 = vld [vmem:[#allocation5 + $0x1850] sm:$0xff] }
 0x1ae   :  { %11066 = vmatpush1.bf16.msra.mxu1 %v14288_v52  ;;  %v8184_v3 = vmax.f32 %v7984_v39, 0.0  ;;  %v14293_v37 = vpack.c.bf16 %v14291_v28, %v14292_v20  ;;  %v10168_v4 = vpack.c.b16 %v9978_v7, %v9977_v19  ;;  %v13062_v55 = vunpack.c.0.s8 %v8963_v48  ;;  %v14294_v39 = vld [vmem:[#allocation185_spill] sm:$0xff]  ;;  %v14295_v19 = vld [vmem:[#allocation184_spill] sm:$0xff]  ;;  %v2542_v20 = vpop.f32.mrb[22].mxu1 }
 0x1af   :  { %11068 = vmatprep.subr.bf16.mxu0 %v14290_v36  ;;  %v8582_v60 = vtrunc.f32 %v8382_v38  ;;  %v8383_v29 = vmin.f32 %v8183_v13, 255.0  ;;  %v9981_v25 = vunpack.c.0.s8 %v8975_v53  ;;  %v9980_v63 = vunpack.c.0.s8 %v8969_v51  ;;  %v14298_v13 = vld [vmem:[#allocation37_spill] sm:$0xff]  ;;  %v2471_v51 = vpop.f32.mrb[22].mxu0 }
 0x1b0   :  { %11076 = vmatprep.subr.bf16.mxu1 %v14293_v37  ;;  %10433 = vmatmul.mubr.msk.f32.vlgmr.msra.gmra.mrb[74].mxu0 %vm839_vm0, %v12865_v32  ;;  %v8385_v45 = vmin.f32 %v8185_v22, 255.0  ;;  %v8384_v2 = vmin.f32 %v8184_v3, 255.0  ;;  %v14296_v30 = vpack.c.bf16 %v14294_v39, %v14295_v19  ;;  %v10169_v5 = vpack.c.b8 %v10168_v4, %v10167_v18  ;;  %v14300_v22 = vld [vmem:[#allocation186_spill] sm:$0xff]  ;;  %v14301_v3 = vld [vmem:[#allocation36_spill] sm:$0xff]  ;;  %v2473_v37 = vpop.f32.mrb[23].mxu0 }
 0x1b1   :  { %10434 = vmatmul.mubr.msk.f32.vlgmr.msra.gmra.mrb[74].mxu1 %vm839_vm0, %v12865_v32  ;;  %v8977_v10 = vpack.c.f32.eXmY %v8582_v60, %v8582_v60, 56  ;;  %v8583_v7 = vtrunc.f32 %v8383_v29  ;;  %v7986_v48 = vmul.f32 255.0, %v2402_v58  ;;  %v14297_v38 = vpack.c.bf16 %v12354_v9, %v12352_v11  ;;  %6303 = vmatprep.mubr.f32.mxu0 %v13758_v31 }
 0x1b2   :  { %11070 = vmatpush1.bf16.msra.mxu0 %v14296_v30  ;;  %v14299_v52 = vpack.c.bf16 %v12358_v6, %v14298_v13  ;;  %v10170_v44 = vpack.c.b16 %v9980_v63, %v13062_v55  ;;  %v8585_v36 = vtrunc.f32 %v8385_v45  ;;  %v8584_v53 = vtrunc.f32 %v8384_v2  ;;  %10301 = vst [vmem:[#allocation7 + $0x40] sm:$0xff] %v10169_v5  ;;  %6374 = vmatprep.mubr.f32.mxu1 %v13758_v31  ;;  %v2544_v63 = vpop.f32.mrb[23].mxu1 }
 0x1b3   :  { %11078 = vmatpush1.bf16.msra.mxu1 %v14297_v38  ;;  %v14302_v28 = vpack.c.bf16 %v14300_v22, %v14301_v3  ;;  %v11177_v18 = vpack.c.bf16 %v13068_v15, %v13066_v14  ;;  %v8981_v11 = vpack.c.b8 %v8977_v10, %v8977_v10  ;;  %v8983_v9 = vpack.c.f32.eXmY %v8583_v7, %v8583_v7, 56  ;;  %v619_v14 = vld [vmem:[#allocation5 + $0x1220] sm:$0xff] }
 0x1b4   :  { %11072 = vmatprep.subr.bf16.mxu0 %v14299_v52  ;;  %v8186_v58 = vmax.f32 %v7986_v48, 0.0  ;;  %v7987_v6 = vmul.f32 255.0, %v2471_v51  ;;  %v8995_v4 = vpack.c.f32.eXmY %v8585_v36, %v8585_v36, 56  ;;  %v8989_v55 = vpack.c.f32.eXmY %v8584_v53, %v8584_v53, 56  ;;  %v14306_v52 = vld [vmem:[#allocation39_spill] sm:$0xff]  ;;  %v819_v15 = vld [vmem:[#allocation5 + $0x1860] sm:$0xff] }
 0x1b5   :  { %11080 = vmatprep.subr.bf16.mxu1 %v14302_v28  ;;  %v7989_v60 = vmul.f32 255.0, %v2542_v20  ;;  %v7988_v29 = vmul.f32 255.0, %v2473_v37  ;;  %v14303_v45 = vpack.c.bf16 %v12378_v49, %v12376_v1  ;;  %v9982_v2 = vunpack.c.0.s8 %v8981_v11  ;;  %v14311_v20 = vld [vmem:[#allocation40_spill] sm:$0xff]  ;;  %v14312_v37 = vld [vmem:[#allocation41_spill] sm:$0xff] }
 0x1b6   :  { %v8987_v39 = vpack.c.b8 %v8983_v9, %v8983_v9  ;;  %v8386_v19 = vmin.f32 %v8186_v58, 255.0  ;;  %v8187_v30 = vmax.f32 %v7987_v6, 0.0  ;;  %v14304_v5 = vpack.c.bf16 %v12382_v42, %v12380_v23  ;;  %v13105_v23 = vld [vmem:[#allocation5 + $0x5a8] sm:$0xff] }
 0x1b7   :  { %11074 = vmatpush1.bf16.msra.mxu0 %v14303_v45  ;;  %v14305_v10 = vpack.c.bf16 %v12386_v62, %v12384_v41  ;;  %v8999_v7 = vpack.c.b8 %v8995_v4, %v8995_v4  ;;  %v8993_v48 = vpack.c.b8 %v8989_v55, %v8989_v55  ;;  %v8189_v38 = vmax.f32 %v7989_v60, 0.0  ;;  %v13107_v42 = vld [vmem:[#allocation5 + $0xbe8] sm:$0xff]  ;;  %v2613_v45 = vpop.f32.mrb[24].mxu0 }
 0x1b8   :  { %11082 = vmatpush1.bf16.msra.mxu1 %v14304_v5  ;;  %v8188_v13 = vmax.f32 %v7988_v29, 0.0  ;;  %v14307_v1 = vpack.c.bf16 %v12390_v43, %v14306_v52  ;;  %v10171_v49 = vpack.c.b16 %v9982_v2, %v9981_v25  ;;  %v13101_v36 = vunpack.c.0.s8 %v8987_v39  ;;  %v14308_v43 = vld [vmem:[#allocation38_spill] sm:$0xff]  ;;  %v2615_v5 = vpop.f32.mrb[25].mxu0 }
 0x1b9   :  { %11084 = vmatprep.subr.bf16.mxu0 %v14305_v10  ;;  %v8586_v53 = vtrunc.f32 %v8386_v19  ;;  %v8387_v51 = vmin.f32 %v8187_v30, 255.0  ;;  %v9985_v41 = vunpack.c.0.s8 %v8999_v7  ;;  %v9984_v62 = vunpack.c.0.s8 %v8993_v48  ;;  %v14314_v2 = vld [vmem:[#allocation42_spill] sm:$0xff]  ;;  %v2684_v30 = vpop.f32.mrb[24].mxu1 }
 0x1ba   :  { %11092 = vmatprep.subr.bf16.mxu1 %v14307_v1  ;;  %10435 = vmatmul.mubr.msk.f32.vlgmr.msra.gmra.mrb[76].mxu0 %vm839_vm0, %v12865_v32  ;;  %v8389_v22 = vmin.f32 %v8189_v38, 255.0  ;;  %v8388_v3 = vmin.f32 %v8188_v13, 255.0  ;;  %v14309_v25 = vpack.c.bf16 %v12404_v47, %v14308_v43  ;;  %v10172_v28 = vpack.c.b8 %v10171_v49, %v10170_v44  ;;  %v14315_v47 = vld [vmem:[#allocation43_spill] sm:$0xff]  ;;  %v2686_v13 = vpop.f32.mrb[25].mxu1 }
 0x1bb   :  { %10436 = vmatmul.mubr.msk.f32.vlgmr.msra.gmra.mrb[76].mxu1 %vm839_vm0, %v12865_v32  ;;  %v9001_v11 = vpack.c.f32.eXmY %v8586_v53, %v8586_v53, 56  ;;  %v8587_v9 = vtrunc.f32 %v8387_v51  ;;  %v7990_v58 = vmul.f32 255.0, %v2544_v63  ;;  %v14310_v6 = vpack.c.bf16 %v12408_v24, %v12406_v8  ;;  %6445 = vmatprep.mubr.f32.mxu0 %v13758_v31 }
 0x1bc   :  { %11086 = vmatpush1.bf16.msra.mxu0 %v14309_v25  ;;  %v14313_v4 = vpack.c.bf16 %v14311_v20, %v14312_v37  ;;  %v10173_v55 = vpack.c.b16 %v9984_v62, %v13101_v36  ;;  %v8589_v60 = vtrunc.f32 %v8389_v22  ;;  %v8588_v29 = vtrunc.f32 %v8388_v3  ;;  %10302 = vst [vmem:[#allocation7 + $0x48] sm:$0xff] %v10172_v28  ;;  %6516 = vmatprep.mubr.f32.mxu1 %v13758_v31  ;;  %v14319_v62 = vld [vmem:[#allocation187_spill] sm:$0xff] }
 0x1bd   :  { %11094 = vmatpush1.bf16.msra.mxu1 %v14310_v6  ;;  %v14316_v39 = vpack.c.bf16 %v14314_v2, %v14315_v47  ;;  %v11179_v44 = vpack.c.bf16 %v13107_v42, %v13105_v23  ;;  %v9005_v8 = vpack.c.b8 %v9001_v11, %v9001_v11  ;;  %v9007_v24 = vpack.c.f32.eXmY %v8587_v9, %v8587_v9, 56  ;;  %v14325_v2 = vld [vmem:[#allocation44_spill] sm:$0xff] }
 0x1be   :  { %11088 = vmatprep.subr.bf16.mxu0 %v14313_v4  ;;  %v8190_v63 = vmax.f32 %v7990_v58, 0.0  ;;  %v7991_v19 = vmul.f32 255.0, %v2613_v45  ;;  %v9019_v10 = vpack.c.f32.eXmY %v8589_v60, %v8589_v60, 56  ;;  %v9013_v7 = vpack.c.f32.eXmY %v8588_v29, %v8588_v29, 56  ;;  %v14324_v45 = vld [vmem:[#allocation188_spill] sm:$0xff] }
 0x1bf   :  { %11096 = vmatprep.subr.bf16.mxu1 %v14316_v39  ;;  %v7993_v48 = vmul.f32 255.0, %v2684_v30  ;;  %v7992_v38 = vmul.f32 255.0, %v2615_v5  ;;  %v14317_v52 = vpack.c.bf16 %v12429_v50, %v12427_v26  ;;  %v9986_v1 = vunpack.c.0.s8 %v9005_v8  ;;  %v14327_v39 = vld [vmem:[#allocation189_spill] sm:$0xff]  ;;  %v14328_v8 = vld [vmem:[#allocation46_spill] sm:$0xff]  ;;  %v2755_v5 = vpop.f32.mrb[26].mxu0 }
 0x1c0   :  { %v9011_v49 = vpack.c.b8 %v9007_v24, %v9007_v24  ;;  %v8390_v36 = vmin.f32 %v8190_v63, 255.0  ;;  %v8191_v53 = vmax.f32 %v7991_v19, 0.0  ;;  %v14318_v51 = vpack.c.bf16 %v12433_v0, %v12431_v16  ;;  %v13144_v0 = vld [vmem:[#allocation5 + $0x5b8] sm:$0xff] }
 0x1c1   :  { %11090 = vmatpush1.bf16.msra.mxu0 %v14317_v52  ;;  %v14320_v22 = vpack.c.bf16 %v12437_v59, %v14319_v62  ;;  %v9023_v3 = vpack.c.b8 %v9019_v10, %v9019_v10  ;;  %v9017_v43 = vpack.c.b8 %v9013_v7, %v9013_v7  ;;  %v8193_v25 = vmax.f32 %v7993_v48, 0.0  ;;  %v13146_v16 = vld [vmem:[#allocation5 + $0xbf8] sm:$0xff]  ;;  %v14330_v10 = vld [vmem:[#allocation191_spill] sm:$0xff] }
 0x1c2   :  { %11098 = vmatpush1.bf16.msra.mxu1 %v14318_v51  ;;  %v8192_v28 = vmax.f32 %v7992_v38, 0.0  ;;  %v14321_v26 = vpack.c.bf16 %v12452_v34, %v12450_v57  ;;  %v10174_v50 = vpack.c.b16 %v9986_v1, %v9985_v41  ;;  %v13140_v11 = vunpack.c.0.s8 %v9011_v49  ;;  %v14322_v57 = vld [vmem:[#allocation45_spill] sm:$0xff]  ;;  %v2826_v1 = vpop.f32.mrb[26].mxu1  ;;  %v2757_v49 = vpop.f32.mrb[27].mxu0 }
 0x1c3   :  { %11100 = vmatprep.subr.bf16.mxu0 %v14320_v22  ;;  %v8590_v9 = vtrunc.f32 %v8390_v36  ;;  %v8391_v58 = vmin.f32 %v8191_v53, 255.0  ;;  %v9989_v59 = vunpack.c.0.s8 %v9023_v3  ;;  %v9988_v6 = vunpack.c.0.s8 %v9017_v43  ;;  %v2828_v22 = vpop.f32.mrb[27].mxu1  ;;  %v14333_v3 = vld [vmem:[#allocation48_spill] sm:$0xff] }
 0x1c4   :  { %11108 = vmatprep.subr.bf16.mxu1 %v14321_v26  ;;  %10437 = vmatmul.mubr.msk.f32.vlgmr.msra.gmra.mrb[78].mxu0 %vm839_vm0, %v12865_v32  ;;  %v8393_v20 = vmin.f32 %v8193_v25, 255.0  ;;  %v8392_v37 = vmin.f32 %v8192_v28, 255.0  ;;  %v14323_v34 = vpack.c.bf16 %v12456_v17, %v14322_v57  ;;  %v10175_v41 = vpack.c.b8 %v10174_v50, %v10173_v55  ;;  %v14331_v17 = vld [vmem:[#allocation190_spill] sm:$0xff]  ;;  %v14334_v43 = vld [vmem:[#allocation192_spill] sm:$0xff] }
 0x1c5   :  { %10438 = vmatmul.mubr.msk.f32.vlgmr.msra.gmra.mrb[78].mxu1 %vm839_vm0, %v12865_v32  ;;  %v9025_v4 = vpack.c.f32.eXmY %v8590_v9, %v8590_v9, 56  ;;  %v8591_v60 = vtrunc.f32 %v8391_v58  ;;  %v7994_v29 = vmul.f32 255.0, %v2686_v13  ;;  %v14326_v47 = vpack.c.bf16 %v14324_v45, %v14325_v2  ;;  %6587 = vmatprep.mubr.f32.mxu0 %v13758_v31  ;;  %v14337_v58 = vld [vmem:[#allocation47_spill] sm:$0xff] }
 0x1c6   :  { %11102 = vmatpush1.bf16.msra.mxu0 %v14323_v34  ;;  %v14329_v24 = vpack.c.bf16 %v14327_v39, %v14328_v8  ;;  %v10176_v63 = vpack.c.b16 %v9988_v6, %v13140_v11  ;;  %v8593_v19 = vtrunc.f32 %v8393_v20  ;;  %v8592_v30 = vtrunc.f32 %v8392_v37  ;;  %10303 = vst [vmem:[#allocation7 + $0x50] sm:$0xff] %v10175_v41  ;;  %6658 = vmatprep.mubr.f32.mxu1 %v13758_v31  ;;  %v14339_v41 = vld [vmem:[#allocation50_spill] sm:$0xff] }
 0x1c7   :  { %11110 = vmatpush1.bf16.msra.mxu1 %v14326_v47  ;;  %v14332_v7 = vpack.c.bf16 %v14330_v10, %v14331_v17  ;;  %v11187_v55 = vpack.c.bf16 %v13146_v16, %v13144_v0  ;;  %v9029_v48 = vpack.c.b8 %v9025_v4, %v9025_v4  ;;  %v9031_v38 = vpack.c.f32.eXmY %v8591_v60, %v8591_v60, 56  ;;  %v14340_v4 = vld [vmem:[#allocation193_spill] sm:$0xff] }
 0x1c8   :  { %11104 = vmatprep.subr.bf16.mxu0 %v14329_v24  ;;  %v8194_v13 = vmax.f32 %v7994_v29, 0.0  ;;  %v7995_v52 = vmul.f32 255.0, %v2755_v5  ;;  %v9043_v36 = vpack.c.f32.eXmY %v8593_v19, %v8593_v19, 56  ;;  %v9037_v53 = vpack.c.f32.eXmY %v8592_v30, %v8592_v30, 56 }
 0x1c9   :  { %11112 = vmatprep.subr.bf16.mxu1 %v14332_v7  ;;  %v7997_v51 = vmul.f32 255.0, %v2826_v1  ;;  %v7996_v62 = vmul.f32 255.0, %v2757_v49  ;;  %v14335_v25 = vpack.c.bf16 %v14333_v3, %v14334_v43  ;;  %v9990_v28 = vunpack.c.0.s8 %v9029_v48  ;;  %v14344_v7 = vld [vmem:[#allocation195_spill] sm:$0xff]  ;;  %v14345_v48 = vld [vmem:[#allocation194_spill] sm:$0xff] }
 0x1ca   :  { %v9035_v26 = vpack.c.b8 %v9031_v38, %v9031_v38  ;;  %v8394_v50 = vmin.f32 %v8194_v13, 255.0  ;;  %v8195_v11 = vmax.f32 %v7995_v52, 0.0  ;;  %v14336_v9 = vpack.c.bf16 %v12499_v56, %v12497_v54  ;;  %v13183_v56 = vld [vmem:[#allocation5 + $0x5a0] sm:$0xff]  ;;  %v14347_v13 = vld [vmem:[#allocation52_spill] sm:$0xff] }
 0x1cb   :  { %11106 = vmatpush1.bf16.msra.mxu0 %v14335_v25  ;;  %v14338_v6 = vpack.c.bf16 %v12513_v35, %v14337_v58  ;;  %v9047_v20 = vpack.c.b8 %v9043_v36, %v9043_v36  ;;  %v9041_v37 = vpack.c.b8 %v9037_v53, %v9037_v53  ;;  %v8197_v57 = vmax.f32 %v7997_v51, 0.0  ;;  %v13185_v35 = vld [vmem:[#allocation5 + $0xbe0] sm:$0xff]  ;;  %v14348_v52 = vld [vmem:[#allocation196_spill] sm:$0xff]  ;;  %v2897_v51 = vpop.f32.mrb[28].mxu0 }
 0x1cc   :  { %11114 = vmatpush1.bf16.msra.mxu1 %v14336_v9  ;;  %v8196_v34 = vmax.f32 %v7996_v62, 0.0  ;;  %v14341_v60 = vpack.c.bf16 %v14339_v41, %v14340_v4  ;;  %v10177_v29 = vpack.c.b16 %v9990_v28, %v9989_v59  ;;  %v13179_v45 = vunpack.c.0.s8 %v9035_v26  ;;  %v14342_v59 = vld [vmem:[#allocation49_spill] sm:$0xff]  ;;  %v2968_v26 = vpop.f32.mrb[28].mxu1 }
 0x1cd   :  { %11116 = vmatprep.subr.bf16.mxu0 %v14338_v6  ;;  %v8594_v2 = vtrunc.f32 %v8394_v50  ;;  %v8395_v47 = vmin.f32 %v8195_v11, 255.0  ;;  %v9993_v54 = vunpack.c.0.s8 %v9047_v20  ;;  %v9992_v39 = vunpack.c.0.s8 %v9041_v37  ;;  %v14350_v62 = vld [vmem:[#allocation197_spill] sm:$0xff]  ;;  %v2899_v50 = vpop.f32.mrb[29].mxu0  ;;  %v2970_v20 = vpop.f32.mrb[29].mxu1  ;;  %v14353_v37 = vld [vmem:[#allocation199_spill] sm:$0xff] }
 0x1ce   :  { %11124 = vmatprep.subr.bf16.mxu1 %v14341_v60  ;;  %10439 = vmatmul.mubr.msk.f32.vlgmr.msra.gmra.mrb[80].mxu0 %vm839_vm0, %v12865_v32  ;;  %v8397_v8 = vmin.f32 %v8197_v57, 255.0  ;;  %v8396_v24 = vmin.f32 %v8196_v34, 255.0  ;;  %v14343_v19 = vpack.c.bf16 %v12532_v61, %v14342_v59  ;;  %v10178_v30 = vpack.c.b8 %v10177_v29, %v10176_v63  ;;  %v14351_v61 = vld [vmem:[#allocation51_spill] sm:$0xff]  ;;  %v14354_v57 = vld [vmem:[#allocation198_spill] sm:$0xff] }
 0x1cf   :  { %10440 = vmatmul.mubr.msk.f32.vlgmr.msra.gmra.mrb[80].mxu1 %vm839_vm0, %v12865_v32  ;;  %v9049_v5 = vpack.c.f32.eXmY %v8594_v2, %v8594_v2, 56  ;;  %v8595_v10 = vtrunc.f32 %v8395_v47  ;;  %v7998_v17 = vmul.f32 255.0, %v2828_v22  ;;  %v14346_v38 = vpack.c.bf16 %v14344_v7, %v14345_v48  ;;  %6729 = vmatprep.mubr.f32.mxu0 %v13758_v31  ;;  %v14357_v2 = vld [vmem:[#allocation200_spill] sm:$0xff] }
 0x1d0   :  { %11118 = vmatpush1.bf16.msra.mxu0 %v14343_v19  ;;  %v14349_v1 = vpack.c.bf16 %v14347_v13, %v14348_v52  ;;  %v10179_v49 = vpack.c.b16 %v9992_v39, %v13179_v45  ;;  %v8597_v36 = vtrunc.f32 %v8397_v8  ;;  %v8596_v53 = vtrunc.f32 %v8396_v24  ;;  %10304 = vst [vmem:[#allocation7 + $0x58] sm:$0xff] %v10178_v30  ;;  %6800 = vmatprep.mubr.f32.mxu1 %v13758_v31  ;;  %v14356_v45 = vld [vmem:[#allocation54_spill] sm:$0xff]  ;;  %v14359_v39 = vld [vmem:[#allocation201_spill] sm:$0xff] }
 0x1d1   :  { %11126 = vmatpush1.bf16.msra.mxu1 %v14346_v38  ;;  %v14352_v3 = vpack.c.bf16 %v14350_v62, %v14351_v61  ;;  %v11181_v63 = vpack.c.bf16 %v13185_v35, %v13183_v56  ;;  %v9053_v22 = vpack.c.b8 %v9049_v5, %v9049_v5  ;;  %v9055_v43 = vpack.c.f32.eXmY %v8595_v10, %v8595_v10, 56  ;;  %v14360_v8 = vld [vmem:[#allocation53_spill] sm:$0xff]  ;;  %v14362_v10 = vld [vmem:[#allocation203_spill] sm:$0xff] }
 0x1d2   :  { %11120 = vmatprep.subr.bf16.mxu0 %v14349_v1  ;;  %v8198_v25 = vmax.f32 %v7998_v17, 0.0  ;;  %v7999_v28 = vmul.f32 255.0, %v2897_v51  ;;  %v9067_v11 = vpack.c.f32.eXmY %v8597_v36, %v8597_v36, 56  ;;  %v9061_v9 = vpack.c.f32.eXmY %v8596_v53, %v8596_v53, 56  ;;  %v14363_v17 = vld [vmem:[#allocation202_spill] sm:$0xff]  ;;  %v13222_v1 = vld [vmem:[#allocation5 + $0x5b0] sm:$0xff] }
 0x1d3   :  { %11128 = vmatprep.subr.bf16.mxu1 %v14352_v3  ;;  %v8001_v58 = vmul.f32 255.0, %v2968_v26  ;;  %v8000_v6 = vmul.f32 255.0, %v2899_v50  ;;  %v14355_v34 = vpack.c.bf16 %v14353_v37, %v14354_v57  ;;  %v9994_v41 = vunpack.c.0.s8 %v9053_v22  ;;  %v13224_v36 = vld [vmem:[#allocation5 + $0xbf0] sm:$0xff]  ;;  %v14365_v3 = vld [vmem:[#allocation56_spill] sm:$0xff]  ;;  %v14368_v50 = vld [vmem:[#allocation205_spill] sm:$0xff] }
 0x1d4   :  { %v9059_v4 = vpack.c.b8 %v9055_v43, %v9055_v43  ;;  %v8398_v60 = vmin.f32 %v8198_v25, 255.0  ;;  %v8199_v29 = vmax.f32 %v7999_v28, 0.0  ;;  %v14358_v47 = vpack.c.bf16 %v14356_v45, %v14357_v2 }
 0x1d5   :  { %11122 = vmatpush1.bf16.msra.mxu0 %v14355_v34  ;;  %v14361_v24 = vpack.c.bf16 %v14359_v39, %v14360_v8  ;;  %v9071_v59 = vpack.c.b8 %v9067_v11, %v9067_v11  ;;  %v9065_v19 = vpack.c.b8 %v9061_v9, %v9061_v9  ;;  %v8201_v30 = vmax.f32 %v8001_v58, 0.0  ;;  %v14369_v11 = vld [vmem:[#allocation55_spill] sm:$0xff]  ;;  %v3110_v8 = vpop.f32.mrb[30].mxu1 }
 0x1d6   :  { %11130 = vmatpush1.bf16.msra.mxu1 %v14358_v47  ;;  %v8200_v5 = vmax.f32 %v8000_v6, 0.0  ;;  %v14364_v7 = vpack.c.bf16 %v14362_v10, %v14363_v17  ;;  %v10180_v48 = vpack.c.b16 %v9994_v41, %v9993_v54  ;;  %v13218_v38 = vunpack.c.0.s8 %v9059_v4  ;;  %v14366_v54 = vld [vmem:[#allocation204_spill] sm:$0xff]  ;;  %v14371_v58 = vld [vmem:[#allocation207_spill] sm:$0xff]  ;;  %v14372_v6 = vld [vmem:[#allocation206_spill] sm:$0xff]  ;;  %v3039_v4 = vpop.f32.mrb[30].mxu0  ;;  %v3112_v10 = vpop.f32.mrb[31].mxu1 }
 0x1d7   :  { %11132 = vmatprep.subr.bf16.mxu0 %v14361_v24  ;;  %v8598_v13 = vtrunc.f32 %v8398_v60  ;;  %v8399_v52 = vmin.f32 %v8199_v29, 255.0  ;;  %v9997_v53 = vunpack.c.0.s8 %v9071_v59  ;;  %v9996_v51 = vunpack.c.0.s8 %v9065_v19  ;;  %v14374_v60 = vld [vmem:[#allocation57_spill] sm:$0xff]  ;;  %v14375_v29 = vld [vmem:[#allocation208_spill] sm:$0xff]  ;;  %v3041_v24 = vpop.f32.mrb[31].mxu0  ;;  %v14377_v17 = vld [vmem:[#allocation210_spill] sm:$0xff] }
 0x1d8   :  { %11140 = vmatprep.subr.bf16.mxu1 %v14364_v7  ;;  %10441 = vmatmul.mubr.msk.f32.vlgmr.msra.gmra.mrb[82].mxu0 %vm839_vm0, %v12865_v32  ;;  %v8401_v62 = vmin.f32 %v8201_v30, 255.0  ;;  %v8400_v61 = vmin.f32 %v8200_v5, 255.0  ;;  %v14367_v22 = vpack.c.bf16 %v14365_v3, %v14366_v54  ;;  %v10181_v43 = vpack.c.b8 %v10180_v48, %v10179_v49  ;;  %v14378_v7 = vld [vmem:[#allocation209_spill] sm:$0xff]  ;;  %v14383_v54 = vld [vmem:[#allocation60_spill] sm:$0xff] }
 0x1d9   :  { %10442 = vmatmul.mubr.msk.f32.vlgmr.msra.gmra.mrb[82].mxu1 %vm839_vm0, %v12865_v32  ;;  %v9073_v25 = vpack.c.f32.eXmY %v8598_v13, %v8598_v13, 56  ;;  %v8599_v28 = vtrunc.f32 %v8399_v52  ;;  %v8002_v26 = vmul.f32 255.0, %v2970_v20  ;;  %v14370_v9 = vpack.c.bf16 %v14368_v50, %v14369_v11  ;;  %6871 = vmatprep.mubr.f32.mxu0 %v13758_v31  ;;  %v14386_v11 = vld [vmem:[#allocation62_spill] sm:$0xff] }
 0x1da   :  { %11134 = vmatpush1.bf16.msra.mxu0 %v14367_v22  ;;  %v14373_v37 = vpack.c.bf16 %v14371_v58, %v14372_v6  ;;  %v10182_v57 = vpack.c.b16 %v9996_v51, %v13218_v38  ;;  %v8601_v34 = vtrunc.f32 %v8401_v62  ;;  %v8600_v41 = vtrunc.f32 %v8400_v61  ;;  %10305 = vst [vmem:[#allocation7 + $0x60] sm:$0xff] %v10181_v43  ;;  %6942 = vmatprep.mubr.f32.mxu1 %v13758_v31  ;;  %v14380_v62 = vld [vmem:[#allocation58_spill] sm:$0xff]  ;;  %v14381_v61 = vld [vmem:[#allocation59_spill] sm:$0xff]  ;;  %v14384_v22 = vld [vmem:[#allocation61_spill] sm:$0xff] }
 0x1db   :  { %11142 = vmatpush1.bf16.msra.mxu1 %v14370_v9  ;;  %v14376_v45 = vpack.c.bf16 %v14374_v60, %v14375_v29  ;;  %v11189_v49 = vpack.c.bf16 %v13224_v36, %v13222_v1  ;;  %v9077_v20 = vpack.c.b8 %v9073_v25, %v9073_v25  ;;  %v9079_v2 = vpack.c.f32.eXmY %v8599_v28, %v8599_v28, 56  ;;  %v14387_v9 = vld [vmem:[#allocation63_spill] sm:$0xff]  ;;  %v13263_v60 = vld [vmem:[#allocation5 + $0x1868] sm:$0xff] }
 0x1dc   :  { %11136 = vmatprep.subr.bf16.mxu0 %v14373_v37  ;;  %v8202_v47 = vmax.f32 %v8002_v26, 0.0  ;;  %v8003_v39 = vmul.f32 255.0, %v3039_v4  ;;  %v9091_v59 = vpack.c.f32.eXmY %v8601_v34, %v8601_v34, 56  ;;  %v9085_v19 = vpack.c.f32.eXmY %v8600_v41, %v8600_v41, 56  ;;  %v13261_v4 = vld [vmem:[#allocation5 + $0x1228] sm:$0xff] }
 0x1dd   :  { %11144 = vmatprep.subr.bf16.mxu1 %v14376_v45  ;;  %v8005_v30 = vmul.f32 255.0, %v3110_v8  ;;  %v8004_v5 = vmul.f32 255.0, %v3041_v24  ;;  %v14379_v48 = vpack.c.bf16 %v14377_v17, %v14378_v7  ;;  %v9998_v38 = vunpack.c.0.s8 %v9077_v20  ;;  %v14395_v7 = vld [vmem:[#allocation68_spill] sm:$0xff] }
 0x1de   :  { %v9083_v13 = vpack.c.b8 %v9079_v2, %v9079_v2  ;;  %v8402_v52 = vmin.f32 %v8202_v47, 255.0  ;;  %v8203_v51 = vmax.f32 %v8003_v39, 0.0  ;;  %v14382_v3 = vpack.c.bf16 %v14380_v62, %v14381_v61  ;;  %v13265_v47 = vld [vmem:[#allocation2] sm:$0xff]  ;;  %v14390_v39 = vld [vmem:[#allocation65_spill] sm:$0xff]  ;;  %v3181_v62 = vpop.f32.mrb[32].mxu0  ;;  %v14398_v61 = vld [vmem:[#allocation70_spill] sm:$0xff] }
 0x1df   :  { %11138 = vmatpush1.bf16.msra.mxu0 %v14379_v48  ;;  %v14385_v43 = vpack.c.bf16 %v14383_v54, %v14384_v22  ;;  %v9095_v25 = vpack.c.b8 %v9091_v59, %v9091_v59  ;;  %v9089_v28 = vpack.c.b8 %v9085_v19, %v9085_v19  ;;  %v8205_v26 = vmax.f32 %v8005_v30, 0.0  ;;  %v14392_v30 = vld [vmem:[#allocation66_spill] sm:$0xff]  ;;  %v14396_v48 = vld [vmem:[#allocation69_spill] sm:$0xff] }
 0x1e0   :  { %11146 = vmatpush1.bf16.msra.mxu1 %v14382_v3  ;;  %v8204_v50 = vmax.f32 %v8004_v5, 0.0  ;;  %v14388_v58 = vpack.c.bf16 %v14386_v11, %v14387_v9  ;;  %v10183_v6 = vpack.c.b16 %v9998_v38, %v9997_v53  ;;  %v13257_v37 = vunpack.c.0.s8 %v9083_v13  ;;  %v14389_v53 = vld [vmem:[#allocation64_spill] sm:$0xff]  ;;  %v14393_v5 = vld [vmem:[#allocation67_spill] sm:$0xff] }
 0x1e1   :  { %11148 = vmatprep.subr.bf16.mxu0 %v14385_v43  ;;  %v8602_v34 = vtrunc.f32 %v8402_v52  ;;  %v8403_v41 = vmin.f32 %v8203_v51, 255.0  ;;  %v10001_v29 = vunpack.c.0.s8 %v9095_v25  ;;  %v10000_v45 = vunpack.c.0.s8 %v9089_v28  ;;  %v14399_v3 = vld [vmem:[#allocation71_spill] sm:$0xff]  ;;  %v3252_v28 = vpop.f32.mrb[32].mxu1 }
 0x1e2   :  { %11156 = vmatprep.subr.bf16.mxu1 %v14388_v58  ;;  %10443 = vmatmul.mubr.msk.f32.vlgmr.msra.gmra.mrb[84].mxu0 %vm839_vm0, %v12865_v32  ;;  %v8405_v20 = vmin.f32 %v8205_v26, 255.0  ;;  %v8404_v2 = vmin.f32 %v8204_v50, 255.0  ;;  %v14391_v8 = vpack.c.bf16 %v14389_v53, %v14390_v39  ;;  %v10184_v24 = vpack.c.b8 %v10183_v6, %v10182_v57  ;;  %v3183_v26 = vpop.f32.mrb[33].mxu0  ;;  %v3254_v6 = vpop.f32.mrb[33].mxu1  ;;  %v14404_v39 = vld [vmem:[#allocation75_spill] sm:$0xff] }
 0x1e3   :  { %10444 = vmatmul.mubr.msk.f32.vlgmr.msra.gmra.mrb[84].mxu1 %vm839_vm0, %v13265_v47  ;;  %v9097_v59 = vpack.c.f32.eXmY %v8602_v34, %v8602_v34, 56  ;;  %v8603_v32 = vtrunc.f32 %v8403_v41  ;;  %v8006_v19 = vmul.f32 255.0, %v3112_v10  ;;  %v14394_v17 = vpack.c.bf16 %v14392_v30, %v14393_v5  ;;  %7013 = vmatprep.mubr.f32.mxu0 %v13758_v31  ;;  %v14402_v34 = vld [vmem:[#allocation73_spill] sm:$0xff] }
 0x1e4   :  { %11150 = vmatpush1.bf16.msra.mxu0 %v14391_v8  ;;  %v14397_v38 = vpack.c.bf16 %v14395_v7, %v14396_v48  ;;  %v10185_v13 = vpack.c.b16 %v10000_v45, %v13257_v37  ;;  %v8605_v52 = vtrunc.f32 %v8405_v20  ;;  %v8604_v51 = vtrunc.f32 %v8404_v2  ;;  %10306 = vst [vmem:[#allocation7 + $0x68] sm:$0xff] %v10184_v24  ;;  %7084 = vmatprep.mubr.f32.mxu1 %v13758_v31  ;;  %v14401_v37 = vld [vmem:[#allocation72_spill] sm:$0xff]  ;;  %v14406_v24 = vld [vmem:[#allocation77_spill] sm:$0xff] }
 0x1e5   :  { %11158 = vmatpush1.bf16.msra.mxu1 %v14394_v17  ;;  %v14400_v54 = vpack.c.bf16 %v14398_v61, %v14399_v3  ;;  %v11183_v57 = vpack.c.bf16 %v13263_v60, %v13261_v4  ;;  %v9101_v10 = vpack.c.b8 %v9097_v59, %v9097_v59  ;;  %v9103_v22 = vpack.c.f32.eXmY %v8603_v32, %v8603_v32, 56  ;;  %v14407_v59 = vld [vmem:[#allocation74_spill] sm:$0xff] }
 0x1e6   :  { %11152 = vmatprep.subr.bf16.mxu0 %v14397_v38  ;;  %v8206_v43 = vmax.f32 %v8006_v19, 0.0  ;;  %v8007_v25 = vmul.f32 255.0, %v3181_v62  ;;  %v9115_v50 = vpack.c.f32.eXmY %v8605_v52, %v8605_v52, 56  ;;  %v9109_v11 = vpack.c.f32.eXmY %v8604_v51, %v8604_v51, 56  ;;  %v13304_v62 = vld [vmem:[#allocation5 + $0x1878] sm:$0xff] }
 0x1e7   :  { %11160 = vmatprep.subr.bf16.mxu1 %v14400_v54  ;;  %v8009_v9 = vmul.f32 255.0, %v3252_v28  ;;  %v8008_v58 = vmul.f32 255.0, %v3183_v26  ;;  %v14403_v41 = vpack.c.bf16 %v14401_v37, %v14402_v34  ;;  %v10002_v45 = vunpack.c.0.s8 %v9101_v10  ;;  %v14413_v26 = vld [vmem:[#allocation81_spill] sm:$0xff] }
 0x1e8   :  { %v9107_v20 = vpack.c.b8 %v9103_v22, %v9103_v22  ;;  %v8406_v2 = vmin.f32 %v8206_v43, 255.0  ;;  %v8207_v53 = vmax.f32 %v8007_v25, 0.0  ;;  %v14405_v8 = vpack.c.bf16 %v12819_v40, %v14404_v39  ;;  %v13302_v40 = vld [vmem:[#allocation5 + $0x1238] sm:$0xff] }
 0x1e9   :  { %11154 = vmatpush1.bf16.msra.mxu0 %v14403_v41  ;;  %v14408_v32 = vpack.c.bf16 %v14406_v24, %v14407_v59  ;;  %v9119_v19 = vpack.c.b8 %v9115_v50, %v9115_v50  ;;  %v9113_v30 = vpack.c.b8 %v9109_v11, %v9109_v11  ;;  %v8209_v5 = vmax.f32 %v8009_v9, 0.0  ;;  %v14414_v50 = vld [vmem:[#allocation78_spill] sm:$0xff]  ;;  %v14416_v9 = vld [vmem:[#allocation83_spill] sm:$0xff] }
 0x1ea   :  { %11162 = vmatpush1.bf16.msra.mxu1 %v14405_v8  ;;  %v8208_v17 = vmax.f32 %v8008_v58, 0.0  ;;  %v14409_v7 = vpack.c.bf16 %v12861_v27, %v12859_v21  ;;  %v10186_v48 = vpack.c.b16 %v10002_v45, %v10001_v29  ;;  %v13298_v38 = vunpack.c.0.s8 %v9107_v20  ;;  %v14410_v21 = vld [vmem:[#allocation79_spill] sm:$0xff]  ;;  %v14411_v27 = vld [vmem:[#allocation76_spill] sm:$0xff]  ;;  %v3323_v20 = vpop.f32.mrb[34].mxu0 }
 0x1eb   :  { %11164 = vmatprep.subr.bf16.mxu0 %v14408_v32  ;;  %v8606_v52 = vtrunc.f32 %v8406_v2  ;;  %v8407_v51 = vmin.f32 %v8207_v53, 255.0  ;;  %v10005_v61 = vunpack.c.0.s8 %v9119_v19  ;;  %v10004_v3 = vunpack.c.0.s8 %v9113_v30  ;;  %v14417_v58 = vld [vmem:[#allocation80_spill] sm:$0xff]  ;;  %v14419_v2 = vld [vmem:[#allocation85_spill] sm:$0xff]  ;;  %v14420_v53 = vld [vmem:[#allocation82_spill] sm:$0xff]  ;;  %v3394_v32 = vpop.f32.mrb[34].mxu1  ;;  %v3325_v19 = vpop.f32.mrb[35].mxu0 }
 0x1ec   :  { %11172 = vmatprep.subr.bf16.mxu1 %v14409_v7  ;;  %10445 = vmatmul.mubr.msk.f32.vlgmr.msra.gmra.mrb[86].mxu0 %vm839_vm0, %v13265_v47  ;;  %v8409_v54 = vmin.f32 %v8209_v5, 255.0  ;;  %v8408_v10 = vmin.f32 %v8208_v17, 255.0  ;;  %v14412_v29 = vpack.c.bf16 %v14410_v21, %v14411_v27  ;;  %v10187_v22 = vpack.c.b8 %v10186_v48, %v10185_v13  ;;  %v3396_v48 = vpop.f32.mrb[35].mxu1 }
 0x1ed   :  { %10446 = vmatmul.mubr.msk.f32.vlgmr.msra.gmra.mrb[86].mxu1 %vm839_vm0, %v13265_v47  ;;  %v9121_v43 = vpack.c.f32.eXmY %v8606_v52, %v8606_v52, 56  ;;  %v8607_v25 = vtrunc.f32 %v8407_v51  ;;  %v8010_v28 = vmul.f32 255.0, %v3254_v6  ;;  %v14415_v11 = vpack.c.bf16 %v14413_v26, %v14414_v50  ;;  %7155 = vmatprep.mubr.f32.mxu0 %v13758_v31  ;;  %v3536_v1 = vpop.f32.mrb[36].mxu1 }
 0x1ee   :  { %11166 = vmatpush1.bf16.msra.mxu0 %v14412_v29  ;;  %v14418_v37 = vpack.c.bf16 %v14416_v9, %v14417_v58  ;;  %v10188_v34 = vpack.c.b16 %v10004_v3, %v13298_v38  ;;  %v8609_v41 = vtrunc.f32 %v8409_v54  ;;  %v8608_v45 = vtrunc.f32 %v8408_v10  ;;  %10307 = vst [vmem:[#allocation7 + $0x70] sm:$0xff] %v10187_v22  ;;  %7226 = vmatprep.mubr.f32.mxu1 %v13758_v31  ;;  %v3538_v26 = vpop.f32.mrb[37].mxu1 }
 0x1ef   :  { %11174 = vmatpush1.bf16.msra.mxu1 %v14415_v11  ;;  %v14421_v39 = vpack.c.bf16 %v14419_v2, %v14420_v53  ;;  %v11191_v13 = vpack.c.bf16 %v13304_v62, %v13302_v40  ;;  %v9125_v6 = vpack.c.b8 %v9121_v43, %v9121_v43  ;;  %v9127_v8 = vpack.c.f32.eXmY %v8607_v25, %v8607_v25, 56  ;;  %v3465_v43 = vpop.f32.mrb[36].mxu0 }
 0x1f0   :  { %11168 = vmatprep.subr.bf16.mxu0 %v14418_v37  ;;  %v8210_v24 = vmax.f32 %v8010_v28, 0.0  ;;  %v8011_v59 = vmul.f32 255.0, %v3323_v20  ;;  %v9139_v30 = vpack.c.f32.eXmY %v8609_v41, %v8609_v41, 56  ;;  %v9133_v5 = vpack.c.f32.eXmY %v8608_v45, %v8608_v45, 56  ;;  %v3467_v36 = vpop.f32.mrb[37].mxu0 }
 0x1f1   :  { %11176 = vmatprep.subr.bf16.mxu1 %v14421_v39  ;;  %v8013_v17 = vmul.f32 255.0, %v3394_v32  ;;  %v8012_v7 = vmul.f32 255.0, %v3325_v19  ;;  %v10006_v38 = vunpack.c.0.s8 %v9125_v6  ;;  %v9131_v52 = vpack.c.b8 %v9127_v8, %v9127_v8  ;;  %v821_v6 = vld [vmem:[#allocation5 + $0x1870] sm:$0xff]  ;;  %v224_v19 = vld [vmem:[#allocation5 + $0x5c8] sm:$0xff] }
 0x1f2   :  { %11170 = vmatpush1.bf16.msra.mxu0 %v11169_v12  ;;  %v8410_v51 = vmin.f32 %v8210_v24, 255.0  ;;  %v8211_v40 = vmax.f32 %v8011_v59, 0.0  ;;  %v9143_v62 = vpack.c.b8 %v9139_v30, %v9139_v30  ;;  %v9137_v3 = vpack.c.b8 %v9133_v5, %v9133_v5  ;;  %v424_v30 = vld [vmem:[#allocation5 + $0xc08] sm:$0xff]  ;;  %v226_v5 = vld [vmem:[#allocation5 + $0x5d8] sm:$0xff] }
 0x1f3   :  { %11178 = vmatpush1.bf16.msra.mxu1 %v11177_v18  ;;  %11180 = vmatprep.subr.bf16.mxu0 %v11179_v44  ;;  %v8213_v54 = vmax.f32 %v8013_v17, 0.0  ;;  %v8212_v10 = vmax.f32 %v8012_v7, 0.0  ;;  %v10189_v33 = vpack.c.b16 %v10006_v38, %v10005_v61  ;;  %v13337_v46 = vunpack.c.0.s8 %v9131_v52  ;;  %v426_v52 = vld [vmem:[#allocation5 + $0xc18] sm:$0xff] }
 0x1f4   :  { %11188 = vmatprep.subr.bf16.mxu1 %v11187_v55  ;;  %v8610_v12 = vtrunc.f32 %v8410_v51  ;;  %v8411_v21 = vmin.f32 %v8211_v40, 255.0  ;;  %v10009_v18 = vunpack.c.0.s8 %v9143_v62  ;;  %v10008_v23 = vunpack.c.0.s8 %v9137_v3  ;;  %v223_v51 = vld [vmem:[#allocation5 + $0x5c0] sm:$0xff] }
 0x1f5   :  { %10447 = vmatmul.mubr.msk.f32.vlgmr.msra.gmra.mrb[88].mxu0 %vm839_vm0, %v13265_v47  ;;  %v8413_v42 = vmin.f32 %v8213_v54, 255.0  ;;  %v8412_v44 = vmin.f32 %v8212_v10, 255.0  ;;  %v10190_v0 = vpack.c.b8 %v10189_v33, %v10188_v34  ;;  %v8014_v61 = vmul.f32 255.0, %v3396_v48  ;;  %v423_v40 = vld [vmem:[#allocation5 + $0xc00] sm:$0xff]  ;;  %v225_v33 = vld [vmem:[#allocation5 + $0x5d0] sm:$0xff] }
 0x1f6   :  { %10448 = vmatmul.mubr.msk.f32.vlgmr.msra.gmra.mrb[88].mxu1 %vm839_vm0, %v13265_v47  ;;  %11182 = vmatpush1.bf16.msra.mxu0 %v11181_v63  ;;  %v9145_v16 = vpack.c.f32.eXmY %v8610_v12, %v8610_v12, 56  ;;  %v8611_v55 = vtrunc.f32 %v8411_v21  ;;  %v10191_v27 = vpack.c.b16 %v10008_v23, %v13337_v46  ;;  %v11185_v56 = vpack.c.bf16 %v819_v15, %v619_v14  ;;  %v425_v46 = vld [vmem:[#allocation5 + $0xc10] sm:$0xff]  ;;  %v3607_v12 = vpop.f32.mrb[38].mxu0  ;;  %v3678_v23 = vpop.f32.mrb[38].mxu1 }
 0x1f7   :  { %11190 = vmatpush1.bf16.msra.mxu1 %v11189_v49  ;;  %11184 = vmatprep.subr.bf16.mxu0 %v11183_v57  ;;  %v8613_v29 = vtrunc.f32 %v8413_v42  ;;  %v8612_v22 = vtrunc.f32 %v8412_v44  ;;  %10308 = vst [vmem:[#allocation7 + $0x78] sm:$0xff] %v10190_v0  ;;  %v8214_v25 = vmax.f32 %v8014_v61, 0.0  ;;  %v8015_v28 = vmul.f32 255.0, %v3465_v43  ;;  %v3609_v42 = vpop.f32.mrb[39].mxu0  ;;  %v3680_v61 = vpop.f32.mrb[39].mxu1 }
 0x1f8   :  { %11192 = vmatprep.subr.bf16.mxu1 %v11191_v13  ;;  %7297 = vmatprep.mubr.f32.mxu0 %v13758_v31  ;;  %v9149_v35 = vpack.c.b8 %v9145_v16, %v9145_v16  ;;  %v9151_v63 = vpack.c.f32.eXmY %v8611_v55, %v8611_v55, 56  ;;  %v8017_v60 = vmul.f32 255.0, %v3536_v1  ;;  %v8016_v57 = vmul.f32 255.0, %v3467_v36  ;;  %v621_v13 = vld [vmem:[#allocation5 + $0x1230] sm:$0xff] }
 0x1f9   :  { %7368 = vmatprep.mubr.f32.mxu1 %v13758_v31  ;;  %v9163_v49 = vpack.c.f32.eXmY %v8613_v29, %v8613_v29, 56  ;;  %v9157_v4 = vpack.c.f32.eXmY %v8612_v22, %v8612_v22, 56  ;;  %v8414_v9 = vmin.f32 %v8214_v25, 255.0  ;;  %v8215_v58 = vmax.f32 %v8015_v28, 0.0 }
 0x1fa   :  { %11186 = vmatpush1.bf16.msra.mxu0 %v11185_v56  ;;  %v10010_v50 = vunpack.c.0.s8 %v9149_v35  ;;  %v9155_v11 = vpack.c.b8 %v9151_v63, %v9151_v63  ;;  %v8217_v41 = vmax.f32 %v8017_v60, 0.0  ;;  %v8216_v45 = vmax.f32 %v8016_v57, 0.0  ;;  %v824_v60 = vld [vmem:[#allocation5 + $0x1888] sm:$0xff] }
 0x1fb   :  { %v9167_v37 = vpack.c.b8 %v9163_v49, %v9163_v49  ;;  %v9161_v34 = vpack.c.b8 %v9157_v4, %v9157_v4  ;;  %v8614_v53 = vtrunc.f32 %v8414_v9  ;;  %v8415_v39 = vmin.f32 %v8215_v58, 255.0  ;;  %v624_v4 = vld [vmem:[#allocation5 + $0x1248] sm:$0xff]  ;;  %v626_v9 = vld [vmem:[#allocation5 + $0x1258] sm:$0xff] }
 0x1fc   :  { %v10192_v20 = vpack.c.b16 %v10010_v50, %v10009_v18  ;;  %v13355_v2 = vunpack.c.0.s8 %v9155_v11  ;;  %v8417_v59 = vmin.f32 %v8217_v41, 255.0  ;;  %v8416_v32 = vmin.f32 %v8216_v45, 255.0  ;;  %v826_v58 = vld [vmem:[#allocation5 + $0x1898] sm:$0xff] }
 0x1fd   :  { %10449 = vmatmul.mubr.msk.f32.vlgmr.msra.gmra.mrb[90].mxu0 %vm839_vm0, %v13265_v47  ;;  %v13359_v8 = vunpack.c.0.s8 %v9167_v37  ;;  %v10012_v24 = vunpack.c.0.s8 %v9161_v34  ;;  %v9169_v7 = vpack.c.f32.eXmY %v8614_v53, %v8614_v53, 56  ;;  %v8615_v48 = vtrunc.f32 %v8415_v39  ;;  %v623_v37 = vld [vmem:[#allocation5 + $0x1240] sm:$0xff]  ;;  %v625_v53 = vld [vmem:[#allocation5 + $0x1250] sm:$0xff] }
 0x1fe   :  { %7439 = vmatprep.mubr.f32.mxu0 %v13758_v31  ;;  %v10193_v17 = vpack.c.b8 %v10192_v20, %v10191_v27  ;;  %v8018_v38 = vmul.f32 255.0, %v3538_v26  ;;  %v8617_v3 = vtrunc.f32 %v8417_v59  ;;  %v8616_v54 = vtrunc.f32 %v8416_v32  ;;  %v825_v39 = vld [vmem:[#allocation5 + $0x1890] sm:$0xff]  ;;  %v228_v59 = vld [vmem:[#allocation5 + $0x5e8] sm:$0xff] }
 0x1ff   :  { %v10194_v62 = vpack.c.b16 %v10012_v24, %v13355_v2  ;;  %v11193_v10 = vpack.c.bf16 %v821_v6, %v621_v13  ;;  %v9173_v21 = vpack.c.b8 %v9169_v7, %v9169_v7  ;;  %v9175_v14 = vpack.c.f32.eXmY %v8615_v48, %v8615_v48, 56  ;;  %v823_v2 = vld [vmem:[#allocation5 + $0x1880] sm:$0xff]  ;;  %v428_v32 = vld [vmem:[#allocation5 + $0xc28] sm:$0xff]  ;;  %v230_v48 = vld [vmem:[#allocation5 + $0x5f8] sm:$0xff] }
 0x200   :  { %10309 = vst [vmem:[#allocation7 + $0x80] sm:$0xff] %v10193_v17  ;;  %v8218_v15 = vmax.f32 %v8018_v38, 0.0  ;;  %v11195_v18 = vpack.c.bf16 %v424_v30, %v224_v19  ;;  %v9187_v44 = vpack.c.f32.eXmY %v8617_v3, %v8617_v3, 56  ;;  %v9181_v0 = vpack.c.f32.eXmY %v8616_v54, %v8616_v54, 56  ;;  %v3749_v19 = vpop.f32.mrb[40].mxu0  ;;  %v430_v38 = vld [vmem:[#allocation5 + $0xc38] sm:$0xff] }
 0x201   :  { %11194 = vmatpush1.bf16.msra.mxu1 %v11193_v10  ;;  %v11203_v16 = vpack.c.bf16 %v426_v52, %v226_v5  ;;  %v11197_v55 = vpack.c.bf16 %v423_v40, %v223_v51  ;;  %v10014_v27 = vunpack.c.0.s8 %v9173_v21  ;;  %v9179_v29 = vpack.c.b8 %v9175_v14, %v9175_v14  ;;  %v3820_v52 = vpop.f32.mrb[40].mxu1  ;;  %v3751_v51 = vpop.f32.mrb[41].mxu0  ;;  %v227_v10 = vld [vmem:[#allocation5 + $0x5e0] sm:$0xff] }
 0x202   :  { %v8418_v22 = vmin.f32 %v8218_v15, 255.0  ;;  %11196 = vmatprep.subr.bf16.mxu0 %v11195_v18  ;;  %v11205_v43 = vpack.c.bf16 %v425_v46, %v225_v33  ;;  %v9191_v56 = vpack.c.b8 %v9187_v44, %v9187_v44  ;;  %v9185_v35 = vpack.c.b8 %v9181_v0, %v9181_v0  ;;  %v427_v33 = vld [vmem:[#allocation5 + $0xc20] sm:$0xff]  ;;  %v3822_v46 = vpop.f32.mrb[41].mxu1  ;;  %v229_v18 = vld [vmem:[#allocation5 + $0x5f0] sm:$0xff] }
 0x203   :  { %11204 = vmatprep.subr.bf16.mxu1 %v11203_v16  ;;  %11198 = vmatpush1.bf16.msra.mxu0 %v11197_v55  ;;  %v8019_v63 = vmul.f32 255.0, %v3607_v12  ;;  %v8021_v25 = vmul.f32 255.0, %v3678_v23  ;;  %v10195_v28 = vpack.c.b16 %v10014_v27, %v13359_v8  ;;  %v13364_v1 = vunpack.c.0.s8 %v9179_v29  ;;  %v429_v23 = vld [vmem:[#allocation5 + $0xc30] sm:$0xff] }
 0x204   :  { %v8618_v36 = vtrunc.f32 %v8418_v22  ;;  %10450 = vmatmul.mubr.msk.f32.vlgmr.msra.gmra.mrb[90].mxu1 %vm839_vm0, %v13265_v47  ;;  %v8020_v49 = vmul.f32 255.0, %v3609_v42  ;;  %v13368_v57 = vunpack.c.0.s8 %v9191_v56  ;;  %v13370_v26 = vunpack.c.0.s8 %v9185_v35 }
 0x205   :  { %11206 = vmatpush1.bf16.msra.mxu1 %v11205_v43  ;;  %v8219_v50 = vmax.f32 %v8019_v63, 0.0  ;;  %v8221_v11 = vmax.f32 %v8021_v25, 0.0  ;;  %7510 = vmatprep.mubr.f32.mxu1 %v13758_v31  ;;  %v10196_v34 = vpack.c.b8 %v10195_v28, %v10194_v62  ;;  %v8022_v20 = vmul.f32 255.0, %v3680_v61  ;;  %v628_v63 = vld [vmem:[#allocation5 + $0x1268] sm:$0xff] }
 0x206   :  { %v9193_v41 = vpack.c.f32.eXmY %v8618_v36, %v8618_v36, 56  ;;  %v8220_v45 = vmax.f32 %v8020_v49, 0.0  ;;  %v10197_v13 = vpack.c.b16 %v13370_v26, %v13364_v1  ;;  %v11199_v24 = vpack.c.bf16 %v824_v60, %v624_v4  ;;  %v828_v49 = vld [vmem:[#allocation5 + $0x18a8] sm:$0xff]  ;;  %v630_v4 = vld [vmem:[#allocation5 + $0x1278] sm:$0xff] }
 0x207   :  { %v8419_v6 = vmin.f32 %v8219_v50, 255.0  ;;  %v8421_v8 = vmin.f32 %v8221_v11, 255.0  ;;  %10310 = vst [vmem:[#allocation7 + $0x88] sm:$0xff] %v10196_v34  ;;  %v8222_v17 = vmax.f32 %v8022_v20, 0.0  ;;  %v11207_v7 = vpack.c.bf16 %v826_v58, %v626_v9  ;;  %v830_v60 = vld [vmem:[#allocation5 + $0x18b8] sm:$0xff]  ;;  %v627_v9 = vld [vmem:[#allocation5 + $0x1260] sm:$0xff] }
 0x208   :  { %v9197_v30 = vpack.c.b8 %v9193_v41, %v9193_v41  ;;  %v8420_v5 = vmin.f32 %v8220_v45, 255.0  ;;  %11200 = vmatprep.subr.bf16.mxu0 %v11199_v24  ;;  %v11201_v3 = vpack.c.bf16 %v823_v2, %v623_v37  ;;  %v11209_v54 = vpack.c.bf16 %v825_v39, %v625_v53  ;;  %v827_v58 = vld [vmem:[#allocation5 + $0x18a0] sm:$0xff]  ;;  %v3891_v37 = vpop.f32.mrb[42].mxu0  ;;  %v629_v2 = vld [vmem:[#allocation5 + $0x1270] sm:$0xff]  ;;  %v3962_v39 = vpop.f32.mrb[42].mxu1 }
 0x209   :  { %v8619_v40 = vtrunc.f32 %v8419_v6  ;;  %v8621_v62 = vtrunc.f32 %v8421_v8  ;;  %v8422_v14 = vmin.f32 %v8222_v17, 255.0  ;;  %11208 = vmatprep.subr.bf16.mxu1 %v11207_v7  ;;  %v11211_v15 = vpack.c.bf16 %v428_v32, %v228_v59  ;;  %v829_v53 = vld [vmem:[#allocation5 + $0x18b0] sm:$0xff]  ;;  %v232_v32 = vld [vmem:[#allocation5 + $0x608] sm:$0xff] }
 0x20a   :  { %v10018_v12 = vunpack.c.0.s8 %v9197_v30  ;;  %v8620_v21 = vtrunc.f32 %v8420_v5  ;;  %11202 = vmatpush1.bf16.msra.mxu0 %v11201_v3  ;;  %11210 = vmatpush1.bf16.msra.mxu1 %v11209_v54  ;;  %v11219_v0 = vpack.c.bf16 %v430_v38, %v230_v48  ;;  %v8023_v16 = vmul.f32 255.0, %v3749_v19  ;;  %v432_v19 = vld [vmem:[#allocation5 + $0xc48] sm:$0xff]  ;;  %v234_v30 = vld [vmem:[#allocation5 + $0x618] sm:$0xff]  ;;  %v3964_v5 = vpop.f32.mrb[43].mxu1 }
 0x20b   :  { %v9199_v42 = vpack.c.f32.eXmY %v8619_v40, %v8619_v40, 56  ;;  %v9211_v44 = vpack.c.f32.eXmY %v8621_v62, %v8621_v62, 56  ;;  %v8622_v27 = vtrunc.f32 %v8422_v14  ;;  %11212 = vmatprep.subr.bf16.mxu0 %v11211_v15  ;;  %v11213_v29 = vpack.c.bf16 %v427_v33, %v227_v10  ;;  %v431_v40 = vld [vmem:[#allocation5 + $0xc40] sm:$0xff]  ;;  %v233_v33 = vld [vmem:[#allocation5 + $0x610] sm:$0xff] }
 0x20c   :  { %v10198_v55 = vpack.c.b16 %v10018_v12, %v13368_v57  ;;  %v9205_v61 = vpack.c.f32.eXmY %v8620_v21, %v8620_v21, 56  ;;  %11220 = vmatprep.subr.bf16.mxu1 %v11219_v0  ;;  %v11221_v56 = vpack.c.bf16 %v429_v23, %v229_v18  ;;  %v8223_v35 = vmax.f32 %v8023_v16, 0.0 }
 0x20d   :  { %v9203_v22 = vpack.c.b8 %v9199_v42, %v9199_v42  ;;  %v9215_v43 = vpack.c.b8 %v9211_v44, %v9211_v44  ;;  %v9217_v1 = vpack.c.f32.eXmY %v8622_v27, %v8622_v27, 56  ;;  %10451 = vmatmul.mubr.msk.f32.vlgmr.msra.gmra.mrb[92].mxu0 %vm839_vm0, %v13265_v47  ;;  %10452 = vmatmul.mubr.msk.f32.vlgmr.msra.gmra.mrb[92].mxu1 %vm839_vm0, %v13265_v47  ;;  %v8025_v36 = vmul.f32 255.0, %v3820_v52  ;;  %v434_v52 = vld [vmem:[#allocation5 + $0xc58] sm:$0xff]  ;;  %v632_v27 = vld [vmem:[#allocation5 + $0x1288] sm:$0xff] }
 0x20e   :  { %v10199_v25 = vpack.c.b8 %v10198_v55, %v10197_v13  ;;  %v9209_v28 = vpack.c.b8 %v9205_v61, %v9205_v61  ;;  %11214 = vmatpush1.bf16.msra.mxu0 %v11213_v29  ;;  %11222 = vmatpush1.bf16.msra.mxu1 %v11221_v56  ;;  %v8423_v50 = vmin.f32 %v8223_v35, 255.0  ;;  %v8024_v11 = vmul.f32 255.0, %v3751_v51  ;;  %v3893_v13 = vpop.f32.mrb[43].mxu0  ;;  %v231_v51 = vld [vmem:[#allocation5 + $0x600] sm:$0xff]  ;;  %v832_v29 = vld [vmem:[#allocation5 + $0x18c8] sm:$0xff] }
 0x20f   :  { %v10019_v57 = vunpack.c.0.s8 %v9203_v22  ;;  %v10021_v26 = vunpack.c.0.s8 %v9215_v43  ;;  %v9221_v41 = vpack.c.b8 %v9217_v1, %v9217_v1  ;;  %v8225_v45 = vmax.f32 %v8025_v36, 0.0  ;;  %7581 = vmatprep.mubr.f32.mxu0 %v13758_v31  ;;  %7652 = vmatprep.mubr.f32.mxu1 %v13758_v31 }
 0x210   :  { %10311 = vst [vmem:[#allocation7 + $0x90] sm:$0xff] %v10199_v25  ;;  %v10020_v34 = vunpack.c.0.s8 %v9209_v28  ;;  %v8026_v20 = vmul.f32 255.0, %v3822_v46  ;;  %v8623_v6 = vtrunc.f32 %v8423_v50  ;;  %v8224_v8 = vmax.f32 %v8024_v11, 0.0  ;;  %v433_v46 = vld [vmem:[#allocation5 + $0xc50] sm:$0xff]  ;;  %v13384_v25 = vpop.f32.mrb[44].mxu0 }
 0x211   :  { %v11215_v24 = vpack.c.bf16 %v828_v49, %v628_v63  ;;  %v11223_v59 = vpack.c.bf16 %v830_v60, %v630_v4  ;;  %v10022_v7 = vunpack.c.0.s8 %v9221_v41  ;;  %v8425_v48 = vmin.f32 %v8225_v45, 255.0  ;;  %v634_v63 = vld [vmem:[#allocation5 + $0x1298] sm:$0xff]  ;;  %v13390_v60 = vpop.f32.mrb[44].mxu1 }
 0x212   :  { %v10200_v17 = vpack.c.b16 %v10020_v34, %v10019_v57  ;;  %v8226_v38 = vmax.f32 %v8026_v20, 0.0  ;;  %v9223_v62 = vpack.c.f32.eXmY %v8623_v6, %v8623_v6, 56  ;;  %v8424_v3 = vmin.f32 %v8224_v8, 255.0  ;;  %v834_v4 = vld [vmem:[#allocation5 + $0x18d8] sm:$0xff]  ;;  %v13392_v57 = vpop.f32.mrb[45].mxu0  ;;  %v4106_v34 = vpop.f32.mrb[45].mxu1 }
 0x213   :  { %11216 = vmatprep.subr.bf16.mxu0 %v11215_v24  ;;  %11224 = vmatprep.subr.bf16.mxu1 %v11223_v59  ;;  %v11217_v54 = vpack.c.bf16 %v827_v58, %v627_v9  ;;  %v11225_v10 = vpack.c.bf16 %v829_v53, %v629_v2  ;;  %v10201_v12 = vpack.c.b16 %v10022_v7, %v10021_v26  ;;  %v8625_v21 = vtrunc.f32 %v8425_v48  ;;  %v631_v58 = vld [vmem:[#allocation5 + $0x1280] sm:$0xff]  ;;  %v633_v53 = vld [vmem:[#allocation5 + $0x1290] sm:$0xff]  ;;  %v236_v59 = vld [vmem:[#allocation5 + $0x628] sm:$0xff] }
 0x214   :  { %v8426_v14 = vmin.f32 %v8226_v38, 255.0  ;;  %v11227_v15 = vpack.c.bf16 %v432_v19, %v232_v32  ;;  %v9227_v18 = vpack.c.b8 %v9223_v62, %v9223_v62  ;;  %v8624_v23 = vtrunc.f32 %v8424_v3  ;;  %v436_v32 = vld [vmem:[#allocation5 + $0xc68] sm:$0xff]  ;;  %v238_v19 = vld [vmem:[#allocation5 + $0x638] sm:$0xff]  ;;  %v235_v38 = vld [vmem:[#allocation5 + $0x620] sm:$0xff] }
 0x215   :  { %11218 = vmatpush1.bf16.msra.mxu0 %v11217_v54  ;;  %11226 = vmatpush1.bf16.msra.mxu1 %v11225_v10  ;;  %v11235_v42 = vpack.c.bf16 %v434_v52, %v234_v30  ;;  %v11229_v44 = vpack.c.bf16 %v431_v40, %v231_v51  ;;  %v10202_v0 = vpack.c.b8 %v10201_v12, %v10200_v17  ;;  %v8027_v56 = vmul.f32 255.0, %v3891_v37  ;;  %v831_v37 = vld [vmem:[#allocation5 + $0x18c0] sm:$0xff]  ;;  %v438_v48 = vld [vmem:[#allocation5 + $0xc78] sm:$0xff]  ;;  %v237_v54 = vld [vmem:[#allocation5 + $0x630] sm:$0xff] }
 0x216   :  { %v9235_v16 = vpack.c.f32.eXmY %v8625_v21, %v8625_v21, 56  ;;  %v8626_v55 = vtrunc.f32 %v8426_v14  ;;  %11228 = vmatprep.subr.bf16.mxu0 %v11227_v15  ;;  %v11237_v61 = vpack.c.bf16 %v433_v46, %v233_v33  ;;  %v13382_v22 = vunpack.c.0.s8 %v9227_v18  ;;  %v435_v52 = vld [vmem:[#allocation5 + $0xc60] sm:$0xff]  ;;  %v437_v10 = vld [vmem:[#allocation5 + $0xc70] sm:$0xff] }
 0x217   :  { %v9229_v43 = vpack.c.f32.eXmY %v8624_v23, %v8624_v23, 56  ;;  %11236 = vmatprep.subr.bf16.mxu1 %v11235_v42  ;;  %v8029_v35 = vmul.f32 255.0, %v3962_v39  ;;  %10312 = vst [vmem:[#allocation7 + $0x98] sm:$0xff] %v10202_v0  ;;  %v8028_v36 = vmul.f32 255.0, %v3893_v13  ;;  %v8030_v49 = vmul.f32 255.0, %v3964_v5  ;;  %v833_v39 = vld [vmem:[#allocation5 + $0x18d0] sm:$0xff] }
 0x218   :  { %v9239_v28 = vpack.c.b8 %v9235_v16, %v9235_v16  ;;  %v9241_v1 = vpack.c.f32.eXmY %v8626_v55, %v8626_v55, 56  ;;  %10453 = vmatmul.mubr.msk.f32.vlgmr.msra.gmra.mrb[94].mxu0 %vm839_vm0, %v13265_v47  ;;  %10454 = vmatmul.mubr.msk.f32.vlgmr.msra.gmra.mrb[94].mxu1 %vm839_vm0, %v13265_v47  ;;  %v8227_v50 = vmax.f32 %v8027_v56, 0.0  ;;  %v11231_v9 = vpack.c.bf16 %v832_v29, %v632_v27  ;;  %v4175_v42 = vpop.f32.mrb[46].mxu0 }
 0x219   :  { %v9233_v26 = vpack.c.b8 %v9229_v43, %v9229_v43  ;;  %11230 = vmatpush1.bf16.msra.mxu0 %v11229_v44  ;;  %11238 = vmatpush1.bf16.msra.mxu1 %v11237_v61  ;;  %v8229_v11 = vmax.f32 %v8029_v35, 0.0  ;;  %v8228_v20 = vmax.f32 %v8028_v36, 0.0  ;;  %v8230_v2 = vmax.f32 %v8030_v49, 0.0  ;;  %v4246_v61 = vpop.f32.mrb[46].mxu1  ;;  %v4177_v27 = vpop.f32.mrb[47].mxu0  ;;  %v636_v35 = vld [vmem:[#allocation5 + $0x12a8] sm:$0xff] }
 0x21a   :  { %v10025_v41 = vunpack.c.0.s8 %v9239_v28  ;;  %v9245_v45 = vpack.c.b8 %v9241_v1, %v9241_v1  ;;  %7723 = vmatprep.mubr.f32.mxu0 %v13758_v31  ;;  %7794 = vmatprep.mubr.f32.mxu1 %v13758_v31  ;;  %v8427_v6 = vmin.f32 %v8227_v50, 255.0  ;;  %v11239_v24 = vpack.c.bf16 %v834_v4, %v634_v63  ;;  %v4248_v63 = vpop.f32.mrb[47].mxu1  ;;  %v836_v4 = vld [vmem:[#allocation5 + $0x18e8] sm:$0xff]  ;;  %v838_v50 = vld [vmem:[#allocation5 + $0x18f8] sm:$0xff] }
 0x21b   :  { %v10024_v13 = vunpack.c.0.s8 %v9233_v26  ;;  %v8429_v8 = vmin.f32 %v8229_v11, 255.0  ;;  %11232 = vmatprep.subr.bf16.mxu0 %v11231_v9  ;;  %v8428_v5 = vmin.f32 %v8228_v20, 255.0  ;;  %v8430_v17 = vmin.f32 %v8230_v2, 255.0  ;;  %v638_v26 = vld [vmem:[#allocation5 + $0x12b8] sm:$0xff]  ;;  %v835_v2 = vld [vmem:[#allocation5 + $0x18e0] sm:$0xff] }
 0x21c   :  { %v10026_v30 = vunpack.c.0.s8 %v9245_v45  ;;  %v11233_v7 = vpack.c.bf16 %v831_v37, %v631_v58  ;;  %v8627_v40 = vtrunc.f32 %v8427_v6  ;;  %11240 = vmatprep.subr.bf16.mxu1 %v11239_v24  ;;  %v11241_v3 = vpack.c.bf16 %v833_v39, %v633_v53  ;;  %v635_v58 = vld [vmem:[#allocation5 + $0x12a0] sm:$0xff]  ;;  %v637_v53 = vld [vmem:[#allocation5 + $0x12b0] sm:$0xff] }
 0x21d   :  { %v10203_v51 = vpack.c.b16 %v10024_v13, %v13382_v22  ;;  %v8629_v62 = vtrunc.f32 %v8429_v8  ;;  %v8628_v46 = vtrunc.f32 %v8428_v5  ;;  %v8630_v12 = vtrunc.f32 %v8430_v17  ;;  %v837_v39 = vld [vmem:[#allocation5 + $0x18f0] sm:$0xff] }
 0x21e   :  { %v10204_v33 = vpack.c.b16 %v10026_v30, %v10025_v41  ;;  %11234 = vmatpush1.bf16.msra.mxu0 %v11233_v7  ;;  %v11243_v21 = vpack.c.bf16 %v436_v32, %v236_v59  ;;  %v9247_v14 = vpack.c.f32.eXmY %v8627_v40, %v8627_v40, 56  ;;  %11242 = vmatpush1.bf16.msra.mxu1 %v11241_v3  ;;  %v8031_v43 = vmul.f32 255.0, %v13384_v25  ;;  %v4317_v7 = vpop.f32.mrb[48].mxu0 }
 0x21f   :  { %v9259_v15 = vpack.c.f32.eXmY %v8629_v62, %v8629_v62, 56  ;;  %v11251_v18 = vpack.c.bf16 %v438_v48, %v238_v19  ;;  %v11245_v23 = vpack.c.bf16 %v435_v52, %v235_v38  ;;  %v9253_v0 = vpack.c.f32.eXmY %v8628_v46, %v8628_v46, 56  ;;  %v4319_v40 = vpop.f32.mrb[49].mxu0 }
 0x220   :  { %v10205_v44 = vpack.c.b8 %v10204_v33, %v10203_v51  ;;  %v9265_v16 = vpack.c.f32.eXmY %v8630_v12, %v8630_v12, 56  ;;  %11244 = vmatprep.subr.bf16.mxu0 %v11243_v21  ;;  %v11253_v55 = vpack.c.bf16 %v437_v10, %v237_v54  ;;  %v9251_v29 = vpack.c.b8 %v9247_v14, %v9247_v14 }
 0x221   :  { %v9263_v22 = vpack.c.b8 %v9259_v15, %v9259_v15  ;;  %10455 = vmatmul.mubr.msk.f32.vlgmr.msra.gmra.mrb[96].mxu0 %vm839_vm0, %v13265_v47  ;;  %11252 = vmatprep.subr.bf16.mxu1 %v11251_v18  ;;  %v8033_v56 = vmul.f32 255.0, %v13390_v60  ;;  %v9257_v28 = vpack.c.b8 %v9253_v0, %v9253_v0  ;;  %v8032_v36 = vmul.f32 255.0, %v13392_v57 }
 0x222   :  { %10313 = vst [vmem:[#allocation7 + $0xa0] sm:$0xff] %v10205_v44  ;;  %v9269_v1 = vpack.c.b8 %v9265_v16, %v9265_v16  ;;  %10456 = vmatmul.mubr.msk.f32.vlgmr.msra.gmra.mrb[96].mxu1 %vm839_vm0, %v13265_v47  ;;  %11246 = vmatpush1.bf16.msra.mxu0 %v11245_v23  ;;  %v8034_v49 = vmul.f32 255.0, %v4106_v34  ;;  %v10027_v11 = vunpack.c.0.s8 %v9251_v29  ;;  %v8231_v25 = vmax.f32 %v8031_v43, 0.0 }
 0x223   :  { %v10029_v9 = vunpack.c.0.s8 %v9263_v22  ;;  %11254 = vmatpush1.bf16.msra.mxu1 %v11253_v55  ;;  %v8233_v60 = vmax.f32 %v8033_v56, 0.0  ;;  %7865 = vmatprep.mubr.f32.mxu0 %v13758_v31  ;;  %v10028_v37 = vunpack.c.0.s8 %v9257_v28  ;;  %v8232_v45 = vmax.f32 %v8032_v36, 0.0 }
 0x224   :  { %v10030_v41 = vunpack.c.0.s8 %v9269_v1  ;;  %v8234_v20 = vmax.f32 %v8034_v49, 0.0  ;;  %7936 = vmatprep.mubr.f32.mxu1 %v13758_v31  ;;  %v8431_v57 = vmin.f32 %v8231_v25, 255.0  ;;  %v11247_v13 = vpack.c.bf16 %v836_v4, %v636_v35  ;;  %v4388_v31 = vpop.f32.mrb[48].mxu1  ;;  %v4459_v4 = vpop.f32.mrb[50].mxu0 }
 0x225   :  { %v8433_v34 = vmin.f32 %v8233_v60, 255.0  ;;  %v11255_v6 = vpack.c.bf16 %v838_v50, %v638_v26  ;;  %v10206_v8 = vpack.c.b16 %v10028_v37, %v10027_v11  ;;  %v8432_v59 = vmin.f32 %v8232_v45, 255.0  ;;  %v4390_v33 = vpop.f32.mrb[49].mxu1  ;;  %v4461_v25 = vpop.f32.mrb[51].mxu0 }
 0x226   :  { %v10207_v24 = vpack.c.b16 %v10030_v41, %v10029_v9  ;;  %v8434_v32 = vmin.f32 %v8234_v20, 255.0  ;;  %v8631_v19 = vtrunc.f32 %v8431_v57  ;;  %11248 = vmatprep.subr.bf16.mxu0 %v11247_v13  ;;  %v11249_v5 = vpack.c.bf16 %v835_v2, %v635_v58 }
 0x227   :  { %v8633_v30 = vtrunc.f32 %v8433_v34  ;;  %11256 = vmatprep.subr.bf16.mxu1 %v11255_v6  ;;  %v11257_v17 = vpack.c.bf16 %v837_v39, %v637_v53  ;;  %v8632_v38 = vtrunc.f32 %v8432_v59  ;;  %v8035_v51 = vmul.f32 255.0, %v4175_v42 }
 0x228   :  { %v10208_v48 = vpack.c.b8 %v10207_v24, %v10206_v8  ;;  %v8634_v52 = vtrunc.f32 %v8434_v32  ;;  %v9271_v62 = vpack.c.f32.eXmY %v8631_v19, %v8631_v19, 56  ;;  %11250 = vmatpush1.bf16.msra.mxu0 %v11249_v5  ;;  %v8037_v54 = vmul.f32 255.0, %v4246_v61 }
 0x229   :  { %v9283_v3 = vpack.c.f32.eXmY %v8633_v30, %v8633_v30, 56  ;;  %11258 = vmatpush1.bf16.msra.mxu1 %v11257_v17  ;;  %v8036_v10 = vmul.f32 255.0, %v4177_v27  ;;  %v9277_v46 = vpack.c.f32.eXmY %v8632_v38, %v8632_v38, 56  ;;  %v8235_v21 = vmax.f32 %v8035_v51, 0.0 }
 0x22a   :  { %10314 = vst [vmem:[#allocation7 + $0xa8] sm:$0xff] %v10208_v48  ;;  %v9289_v12 = vpack.c.f32.eXmY %v8634_v52, %v8634_v52, 56  ;;  %v8038_v14 = vmul.f32 255.0, %v4248_v63  ;;  %v9275_v15 = vpack.c.b8 %v9271_v62, %v9271_v62  ;;  %v8237_v23 = vmax.f32 %v8037_v54, 0.0 }
 0x22b   :  { %v9287_v18 = vpack.c.b8 %v9283_v3, %v9283_v3  ;;  %v8236_v44 = vmax.f32 %v8036_v10, 0.0  ;;  %v9281_v0 = vpack.c.b8 %v9277_v46, %v9277_v46  ;;  %10457 = vmatmul.mubr.msk.f32.vlgmr.msra.gmra.mrb[98].mxu0 %vm839_vm0, %v13265_v47  ;;  %v8435_v16 = vmin.f32 %v8235_v21, 255.0  ;;  %v4601_v3 = vpop.f32.mrb[52].mxu0 }
 0x22c   :  { %v9293_v42 = vpack.c.b8 %v9289_v12, %v9289_v12  ;;  %10458 = vmatmul.mubr.msk.f32.vlgmr.msra.gmra.mrb[98].mxu1 %vm839_vm0, %v13265_v47  ;;  %v8238_v55 = vmax.f32 %v8038_v14, 0.0  ;;  %v10031_v61 = vunpack.c.0.s8 %v9275_v15  ;;  %v8437_v29 = vmin.f32 %v8237_v23, 255.0  ;;  %v4530_v47 = vpop.f32.mrb[50].mxu1  ;;  %v4603_v14 = vpop.f32.mrb[53].mxu0 }
 0x22d   :  { %v10033_v27 = vunpack.c.0.s8 %v9287_v18  ;;  %v8436_v22 = vmin.f32 %v8236_v44, 255.0  ;;  %v10032_v43 = vunpack.c.0.s8 %v9281_v0  ;;  %v8635_v35 = vtrunc.f32 %v8435_v16  ;;  %v4532_v45 = vpop.f32.mrb[51].mxu1 }
 0x22e   :  { %v10034_v56 = vunpack.c.0.s8 %v9293_v42  ;;  %v8438_v63 = vmin.f32 %v8238_v55, 255.0  ;;  %v8637_v28 = vtrunc.f32 %v8437_v29  ;;  %v8039_v36 = vmul.f32 255.0, %v4317_v7  ;;  %v4672_v21 = vpop.f32.mrb[52].mxu1 }
 0x22f   :  { %v8636_v1 = vtrunc.f32 %v8436_v22  ;;  %v8041_v49 = vmul.f32 255.0, %v4388_v31  ;;  %v10209_v26 = vpack.c.b16 %v10032_v43, %v10031_v61  ;;  %v9295_v11 = vpack.c.f32.eXmY %v8635_v35, %v8635_v35, 56  ;;  %v4674_v44 = vpop.f32.mrb[53].mxu1 }
 0x230   :  { %v10210_v50 = vpack.c.b16 %v10034_v56, %v10033_v27  ;;  %v8638_v9 = vtrunc.f32 %v8438_v63  ;;  %v9307_v60 = vpack.c.f32.eXmY %v8637_v28, %v8637_v28, 56  ;;  %v8239_v37 = vmax.f32 %v8039_v36, 0.0 }
 0x231   :  { %v9301_v58 = vpack.c.f32.eXmY %v8636_v1, %v8636_v1, 56  ;;  %v8241_v41 = vmax.f32 %v8041_v49, 0.0  ;;  %v9299_v2 = vpack.c.b8 %v9295_v11, %v9295_v11  ;;  %v8040_v39 = vmul.f32 255.0, %v4319_v40 }
 0x232   :  { %v10211_v20 = vpack.c.b8 %v10210_v50, %v10209_v26  ;;  %v9313_v53 = vpack.c.f32.eXmY %v8638_v9, %v8638_v9, 56  ;;  %v9311_v57 = vpack.c.b8 %v9307_v60, %v9307_v60  ;;  %v8439_v13 = vmin.f32 %v8239_v37, 255.0 }
 0x233   :  { %v9305_v34 = vpack.c.b8 %v9301_v58, %v9301_v58  ;;  %v8441_v6 = vmin.f32 %v8241_v41, 255.0  ;;  %v10035_v8 = vunpack.c.0.s8 %v9299_v2  ;;  %v8240_v59 = vmax.f32 %v8040_v39, 0.0  ;;  %v4743_v58 = vpop.f32.mrb[54].mxu0 }
 0x234   :  { %10315 = vst [vmem:[#allocation7 + $0xb0] sm:$0xff] %v10211_v20  ;;  %v9317_v24 = vpack.c.b8 %v9313_v53, %v9313_v53  ;;  %v8042_v32 = vmul.f32 255.0, %v4390_v33  ;;  %v10037_v19 = vunpack.c.0.s8 %v9311_v57  ;;  %v8639_v5 = vtrunc.f32 %v8439_v13  ;;  %v4814_v53 = vpop.f32.mrb[54].mxu1  ;;  %v4745_v39 = vpop.f32.mrb[55].mxu0 }
 0x235   :  { %v10036_v30 = vunpack.c.0.s8 %v9305_v34  ;;  %v8641_v17 = vtrunc.f32 %v8441_v6  ;;  %v8440_v48 = vmin.f32 %v8240_v59, 255.0  ;;  %v8043_v52 = vmul.f32 255.0, %v4459_v4  ;;  %v4816_v6 = vpop.f32.mrb[55].mxu1 }
 0x236   :  { %v10038_v7 = vunpack.c.0.s8 %v9317_v24  ;;  %v8242_v38 = vmax.f32 %v8042_v32, 0.0  ;;  %v9319_v31 = vpack.c.f32.eXmY %v8639_v5, %v8639_v5, 56  ;;  %v8045_v62 = vmul.f32 255.0, %v4530_v47 }
 0x237   :  { %v10212_v51 = vpack.c.b16 %v10036_v30, %v10035_v8  ;;  %v9331_v40 = vpack.c.f32.eXmY %v8641_v17, %v8641_v17, 56  ;;  %v8640_v10 = vtrunc.f32 %v8440_v48  ;;  %v8243_v12 = vmax.f32 %v8043_v52, 0.0 }
 0x238   :  { %v10213_v54 = vpack.c.b16 %v10038_v7, %v10037_v19  ;;  %v8442_v46 = vmin.f32 %v8242_v38, 255.0  ;;  %v9323_v33 = vpack.c.b8 %v9319_v31, %v9319_v31  ;;  %v8245_v18 = vmax.f32 %v8045_v62, 0.0 }
 0x239   :  { %v9335_v15 = vpack.c.b8 %v9331_v40, %v9331_v40  ;;  %v8044_v23 = vmul.f32 255.0, %v4461_v25  ;;  %v9325_v42 = vpack.c.f32.eXmY %v8640_v10, %v8640_v10, 56  ;;  %v8443_v55 = vmin.f32 %v8243_v12, 255.0 }
 0x23a   :  { %v10214_v0 = vpack.c.b8 %v10213_v54, %v10212_v51  ;;  %v8642_v16 = vtrunc.f32 %v8442_v46  ;;  %v10039_v61 = vunpack.c.0.s8 %v9323_v33  ;;  %v8445_v29 = vmin.f32 %v8245_v18, 255.0 }
 0x23b   :  { %v10041_v27 = vunpack.c.0.s8 %v9335_v15  ;;  %v8244_v22 = vmax.f32 %v8044_v23, 0.0  ;;  %v9329_v43 = vpack.c.b8 %v9325_v42, %v9325_v42  ;;  %v8643_v35 = vtrunc.f32 %v8443_v55  ;;  %v4885_v15 = vpop.f32.mrb[56].mxu0 }
 0x23c   :  { %10316 = vst [vmem:[#allocation7 + $0xb8] sm:$0xff] %v10214_v0  ;;  %v9337_v56 = vpack.c.f32.eXmY %v8642_v16, %v8642_v16, 56  ;;  %v8046_v63 = vmul.f32 255.0, %v4532_v45  ;;  %v8645_v28 = vtrunc.f32 %v8445_v29  ;;  %v8047_v36 = vmul.f32 255.0, %v4601_v3  ;;  %v4956_v16 = vpop.f32.mrb[56].mxu1 }
 0x23d   :  { %v8444_v1 = vmin.f32 %v8244_v22, 255.0  ;;  %v8049_v49 = vmul.f32 255.0, %v4672_v21  ;;  %v10040_v4 = vunpack.c.0.s8 %v9329_v43  ;;  %v9343_v50 = vpack.c.f32.eXmY %v8643_v35, %v8643_v35, 56  ;;  %v4958_v22 = vpop.f32.mrb[57].mxu1 }
 0x23e   :  { %v9341_v26 = vpack.c.b8 %v9337_v56, %v9337_v56  ;;  %v8246_v11 = vmax.f32 %v8046_v63, 0.0  ;;  %v9355_v9 = vpack.c.f32.eXmY %v8645_v28, %v8645_v28, 56  ;;  %v8247_v25 = vmax.f32 %v8047_v36, 0.0 }
 0x23f   :  { %v8644_v47 = vtrunc.f32 %v8444_v1  ;;  %v8249_v60 = vmax.f32 %v8049_v49, 0.0  ;;  %v10215_v37 = vpack.c.b16 %v10040_v4, %v10039_v61  ;;  %v9347_v20 = vpack.c.b8 %v9343_v50, %v9343_v50 }
 0x240   :  { %v10042_v41 = vunpack.c.0.s8 %v9341_v26  ;;  %v8446_v2 = vmin.f32 %v8246_v11, 255.0  ;;  %v9359_v45 = vpack.c.b8 %v9355_v9, %v9355_v9  ;;  %v8447_v34 = vmin.f32 %v8247_v25, 255.0 }
 0x241   :  { %v9349_v57 = vpack.c.f32.eXmY %v8644_v47, %v8644_v47, 56  ;;  %v8449_v13 = vmin.f32 %v8249_v60, 255.0  ;;  %v10043_v24 = vunpack.c.0.s8 %v9347_v20  ;;  %v8048_v32 = vmul.f32 255.0, %v4603_v14 }
 0x242   :  { %v10216_v8 = vpack.c.b16 %v10042_v41, %v10041_v27  ;;  %v8646_v59 = vtrunc.f32 %v8446_v2  ;;  %v10045_v19 = vunpack.c.0.s8 %v9359_v45  ;;  %v8647_v5 = vtrunc.f32 %v8447_v34 }
 0x243   :  { %v9353_v30 = vpack.c.b8 %v9349_v57, %v9349_v57  ;;  %v8649_v17 = vtrunc.f32 %v8449_v13  ;;  %v8248_v38 = vmax.f32 %v8048_v32, 0.0  ;;  %v8050_v52 = vmul.f32 255.0, %v4674_v44  ;;  %v4887_v44 = vpop.f32.mrb[57].mxu0 }
 0x244   :  { %v10217_v7 = vpack.c.b8 %v10216_v8, %v10215_v37  ;;  %v9361_v48 = vpack.c.f32.eXmY %v8646_v59, %v8646_v59, 56  ;;  %v9367_v31 = vpack.c.f32.eXmY %v8647_v5, %v8647_v5, 56  ;;  %v8051_v62 = vmul.f32 255.0, %v4743_v58  ;;  %v5027_v57 = vpop.f32.mrb[58].mxu0 }
 0x245   :  { %v10044_v51 = vunpack.c.0.s8 %v9353_v30  ;;  %v9379_v40 = vpack.c.f32.eXmY %v8649_v17, %v8649_v17, 56  ;;  %v8448_v54 = vmin.f32 %v8248_v38, 255.0  ;;  %v8250_v10 = vmax.f32 %v8050_v52, 0.0  ;;  %v5029_v59 = vpop.f32.mrb[59].mxu0 }
 0x246   :  { %10317 = vst [vmem:[#allocation7 + $0xc0] sm:$0xff] %v10217_v7  ;;  %v9365_v3 = vpack.c.b8 %v9361_v48, %v9361_v48  ;;  %v8053_v46 = vmul.f32 255.0, %v4814_v53  ;;  %v9371_v21 = vpack.c.b8 %v9367_v31, %v9367_v31  ;;  %v8251_v33 = vmax.f32 %v8051_v62, 0.0 }
 0x247   :  { %v10218_v12 = vpack.c.b16 %v10044_v51, %v10043_v24  ;;  %v9383_v14 = vpack.c.b8 %v9379_v40, %v9379_v40  ;;  %v8648_v23 = vtrunc.f32 %v8448_v54  ;;  %v8450_v0 = vmin.f32 %v8250_v10, 255.0  ;;  %v5098_v24 = vpop.f32.mrb[58].mxu1 }
 0x248   :  { %v10046_v18 = vunpack.c.0.s8 %v9365_v3  ;;  %v8253_v42 = vmax.f32 %v8053_v46, 0.0  ;;  %v10047_v55 = vunpack.c.0.s8 %v9371_v21  ;;  %v8451_v27 = vmin.f32 %v8251_v33, 255.0  ;;  %v5100_v17 = vpop.f32.mrb[59].mxu1 }
 0x249   :  { %v10049_v61 = vunpack.c.0.s8 %v9383_v14  ;;  %v8052_v29 = vmul.f32 255.0, %v4745_v39  ;;  %v9373_v56 = vpack.c.f32.eXmY %v8648_v23, %v8648_v23, 56  ;;  %v8650_v35 = vtrunc.f32 %v8450_v0 }
 0x24a   :  { %v10219_v43 = vpack.c.b16 %v10046_v18, %v10045_v19  ;;  %v8453_v63 = vmin.f32 %v8253_v42, 255.0  ;;  %v8651_v28 = vtrunc.f32 %v8451_v27  ;;  %v8054_v36 = vmul.f32 255.0, %v4816_v6 }
 0x24b   :  { %v8252_v1 = vmax.f32 %v8052_v29, 0.0  ;;  %v8055_v49 = vmul.f32 255.0, %v4885_v15  ;;  %v9377_v26 = vpack.c.b8 %v9373_v56, %v9373_v56  ;;  %v9385_v50 = vpack.c.f32.eXmY %v8650_v35, %v8650_v35, 56  ;;  %v5240_v56 = vpop.f32.mrb[60].mxu1 }
 0x24c   :  { %v10220_v4 = vpack.c.b8 %v10219_v43, %v10218_v12  ;;  %v8653_v11 = vtrunc.f32 %v8453_v63  ;;  %v9391_v9 = vpack.c.f32.eXmY %v8651_v28, %v8651_v28, 56  ;;  %v8254_v25 = vmax.f32 %v8054_v36, 0.0 }
 0x24d   :  { %v8452_v47 = vmin.f32 %v8252_v1, 255.0  ;;  %v8255_v60 = vmax.f32 %v8055_v49, 0.0  ;;  %v10048_v58 = vunpack.c.0.s8 %v9377_v26  ;;  %v9389_v37 = vpack.c.b8 %v9385_v50, %v9385_v50  ;;  %v5242_v49 = vpop.f32.mrb[61].mxu1 }
 0x24e   :  { %10318 = vst [vmem:[#allocation7 + $0xc8] sm:$0xff] %v10220_v4  ;;  %v9403_v41 = vpack.c.f32.eXmY %v8653_v11, %v8653_v11, 56  ;;  %v8057_v20 = vmul.f32 255.0, %v4956_v16  ;;  %v9395_v2 = vpack.c.b8 %v9391_v9, %v9391_v9  ;;  %v8454_v39 = vmin.f32 %v8254_v25, 255.0 }
 0x24f   :  { %v8652_v53 = vtrunc.f32 %v8452_v47  ;;  %v8455_v45 = vmin.f32 %v8255_v60, 255.0  ;;  %v10221_v34 = vpack.c.b16 %v10048_v58, %v10047_v55  ;;  %v10050_v13 = vunpack.c.0.s8 %v9389_v37 }
 0x250   :  { %v9407_v6 = vpack.c.b8 %v9403_v41, %v9403_v41  ;;  %v8257_v8 = vmax.f32 %v8057_v20, 0.0  ;;  %v10051_v32 = vunpack.c.0.s8 %v9395_v2  ;;  %v8654_v30 = vtrunc.f32 %v8454_v39 }
 0x251   :  { %v9397_v19 = vpack.c.f32.eXmY %v8652_v53, %v8652_v53, 56  ;;  %v8655_v5 = vtrunc.f32 %v8455_v45  ;;  %v10222_v7 = vpack.c.b16 %v10050_v13, %v10049_v61  ;;  %v8056_v52 = vmul.f32 255.0, %v4887_v44  ;;  %v5169_v61 = vpop.f32.mrb[60].mxu0 }
 0x252   :  { %v10053_v48 = vunpack.c.0.s8 %v9407_v6  ;;  %v8457_v38 = vmin.f32 %v8257_v8, 255.0  ;;  %v9409_v31 = vpack.c.f32.eXmY %v8654_v30, %v8654_v30, 56  ;;  %v8058_v62 = vmul.f32 255.0, %v4958_v22  ;;  %v5171_v35 = vpop.f32.mrb[61].mxu0 }
 0x253   :  { %v9401_v51 = vpack.c.b8 %v9397_v19, %v9397_v19  ;;  %v9415_v40 = vpack.c.f32.eXmY %v8655_v5, %v8655_v5, 56  ;;  %v10223_v3 = vpack.c.b8 %v10222_v7, %v10221_v34  ;;  %v8256_v10 = vmax.f32 %v8056_v52, 0.0  ;;  %v5311_v19 = vpop.f32.mrb[62].mxu0 }
 0x254   :  { %v8657_v54 = vtrunc.f32 %v8457_v38  ;;  %v8059_v46 = vmul.f32 255.0, %v5027_v57  ;;  %v9413_v21 = vpack.c.b8 %v9409_v31, %v9409_v31  ;;  %v8258_v33 = vmax.f32 %v8058_v62, 0.0  ;;  %v5313_v38 = vpop.f32.mrb[63].mxu0 }
 0x255   :  { %v10052_v12 = vunpack.c.0.s8 %v9401_v51  ;;  %v9419_v14 = vpack.c.b8 %v9415_v40, %v9415_v40  ;;  %10319 = vst [vmem:[#allocation7 + $0xd0] sm:$0xff] %v10223_v3  ;;  %v8456_v18 = vmin.f32 %v8256_v10, 255.0  ;;  %v8061_v0 = vmul.f32 255.0, %v5098_v24 }
 0x256   :  { %v9427_v15 = vpack.c.f32.eXmY %v8657_v54, %v8657_v54, 56  ;;  %v8259_v23 = vmax.f32 %v8059_v46, 0.0  ;;  %v10054_v16 = vunpack.c.0.s8 %v9413_v21  ;;  %v8458_v55 = vmin.f32 %v8258_v33, 255.0 }
 0x257   :  { %v10224_v42 = vpack.c.b16 %v10052_v12, %v10051_v32  ;;  %v10055_v44 = vunpack.c.0.s8 %v9419_v14  ;;  %v8656_v29 = vtrunc.f32 %v8456_v18  ;;  %v8261_v43 = vmax.f32 %v8061_v0, 0.0 }
 0x258   :  { %v9431_v27 = vpack.c.b8 %v9427_v15, %v9427_v15  ;;  %v8459_v22 = vmin.f32 %v8259_v23, 255.0  ;;  %v10225_v63 = vpack.c.b16 %v10054_v16, %v10053_v48  ;;  %v8658_v28 = vtrunc.f32 %v8458_v55  ;;  %v5382_v48 = vpop.f32.mrb[62].mxu1 }
 0x259   :  { %v8060_v1 = vmul.f32 255.0, %v5029_v59  ;;  %v8062_v36 = vmul.f32 255.0, %v5100_v17  ;;  %v9421_v26 = vpack.c.f32.eXmY %v8656_v29, %v8656_v29, 56  ;;  %v8461_v11 = vmin.f32 %v8261_v43, 255.0  ;;  %v5384_v62 = vpop.f32.mrb[63].mxu1 }
 0x25a   :  { %v10057_v4 = vunpack.c.0.s8 %v9431_v27  ;;  %v8659_v50 = vtrunc.f32 %v8459_v22  ;;  %v10226_v9 = vpack.c.b8 %v10225_v63, %v10224_v42  ;;  %v9433_v47 = vpack.c.f32.eXmY %v8658_v28, %v8658_v28, 56  ;;  %v5453_v28 = vpop.f32.mrb[64].mxu0 }
 0x25b   :  { %v8260_v25 = vmax.f32 %v8060_v1, 0.0  ;;  %v8262_v60 = vmax.f32 %v8062_v36, 0.0  ;;  %v9425_v58 = vpack.c.b8 %v9421_v26, %v9421_v26  ;;  %v8661_v41 = vtrunc.f32 %v8461_v11  ;;  %v5524_v26 = vpop.f32.mrb[64].mxu1 }
 0x25c   :  { %v9439_v37 = vpack.c.f32.eXmY %v8659_v50, %v8659_v50, 56  ;;  %v8063_v20 = vmul.f32 255.0, %v5169_v61  ;;  %10320 = vst [vmem:[#allocation7 + $0xd8] sm:$0xff] %v10226_v9  ;;  %v9437_v2 = vpack.c.b8 %v9433_v47, %v9433_v47  ;;  %v8065_v45 = vmul.f32 255.0, %v5240_v56  ;;  %v5455_v50 = vpop.f32.mrb[65].mxu0 }
 0x25d   :  { %v8460_v53 = vmin.f32 %v8260_v25, 255.0  ;;  %v8462_v39 = vmin.f32 %v8262_v60, 255.0  ;;  %v10056_v57 = vunpack.c.0.s8 %v9425_v58  ;;  %v9451_v13 = vpack.c.f32.eXmY %v8661_v41, %v8661_v41, 56  ;;  %v5526_v60 = vpop.f32.mrb[65].mxu1 }
 0x25e   :  { %v9443_v34 = vpack.c.b8 %v9439_v37, %v9439_v37  ;;  %v8263_v6 = vmax.f32 %v8063_v20, 0.0  ;;  %v10058_v8 = vunpack.c.0.s8 %v9437_v2  ;;  %v8265_v32 = vmax.f32 %v8065_v45, 0.0 }
 0x25f   :  { %v8660_v24 = vtrunc.f32 %v8460_v53  ;;  %v8662_v59 = vtrunc.f32 %v8462_v39  ;;  %v10227_v30 = vpack.c.b16 %v10056_v57, %v10055_v44  ;;  %v9455_v17 = vpack.c.b8 %v9451_v13, %v9451_v13 }
 0x260   :  { %v10059_v5 = vunpack.c.0.s8 %v9443_v34  ;;  %v8463_v7 = vmin.f32 %v8263_v6, 255.0  ;;  %v10228_v52 = vpack.c.b16 %v10058_v8, %v10057_v4  ;;  %v8465_v40 = vmin.f32 %v8265_v32, 255.0 }
 0x261   :  { %v9445_v51 = vpack.c.f32.eXmY %v8660_v24, %v8660_v24, 56  ;;  %v9457_v31 = vpack.c.f32.eXmY %v8662_v59, %v8662_v59, 56  ;;  %v10061_v3 = vunpack.c.0.s8 %v9455_v17  ;;  %v8064_v10 = vmul.f32 255.0, %v5171_v35 }
 0x262   :  { %v8663_v54 = vtrunc.f32 %v8463_v7  ;;  %v8066_v46 = vmul.f32 255.0, %v5242_v49  ;;  %v10229_v12 = vpack.c.b8 %v10228_v52, %v10227_v30  ;;  %v8665_v33 = vtrunc.f32 %v8465_v40 }
 0x263   :  { %v9449_v21 = vpack.c.b8 %v9445_v51, %v9445_v51  ;;  %v9461_v14 = vpack.c.b8 %v9457_v31, %v9457_v31  ;;  %v8264_v18 = vmax.f32 %v8064_v10, 0.0  ;;  %v8067_v0 = vmul.f32 255.0, %v5311_v19  ;;  %v5595_v51 = vpop.f32.mrb[66].mxu0 }
 0x264   :  { %v9463_v15 = vpack.c.f32.eXmY %v8663_v54, %v8663_v54, 56  ;;  %v8266_v23 = vmax.f32 %v8066_v46, 0.0  ;;  %10321 = vst [vmem:[#allocation7 + $0xe0] sm:$0xff] %v10229_v12  ;;  %v9475_v44 = vpack.c.f32.eXmY %v8665_v33, %v8665_v33, 56  ;;  %v8069_v55 = vmul.f32 255.0, %v5382_v48  ;;  %v5666_v54 = vpop.f32.mrb[66].mxu1 }
 0x265   :  { %v10060_v42 = vunpack.c.0.s8 %v9449_v21  ;;  %v10062_v16 = vunpack.c.0.s8 %v9461_v14  ;;  %v8464_v27 = vmin.f32 %v8264_v18, 255.0  ;;  %v8267_v22 = vmax.f32 %v8067_v0, 0.0  ;;  %v5597_v10 = vpop.f32.mrb[67].mxu0  ;;  %v5668_v33 = vpop.f32.mrb[67].mxu1 }
 0x266   :  { %v9467_v61 = vpack.c.b8 %v9463_v15, %v9463_v15  ;;  %v8466_v29 = vmin.f32 %v8266_v23, 255.0  ;;  %v9479_v35 = vpack.c.b8 %v9475_v44, %v9475_v44  ;;  %v8269_v63 = vmax.f32 %v8069_v55, 0.0 }
 0x267   :  { %v10230_v43 = vpack.c.b16 %v10060_v42, %v10059_v5  ;;  %v10231_v56 = vpack.c.b16 %v10062_v16, %v10061_v3  ;;  %v8664_v36 = vtrunc.f32 %v8464_v27  ;;  %v8467_v4 = vmin.f32 %v8267_v22, 255.0 }
 0x268   :  { %v10063_v1 = vunpack.c.0.s8 %v9467_v61  ;;  %v8666_v49 = vtrunc.f32 %v8466_v29  ;;  %v10065_v9 = vunpack.c.0.s8 %v9479_v35  ;;  %v8469_v47 = vmin.f32 %v8269_v63, 255.0 }
 0x269   :  { %v10232_v11 = vpack.c.b8 %v10231_v56, %v10230_v43  ;;  %v8068_v25 = vmul.f32 255.0, %v5313_v38  ;;  %v9469_v58 = vpack.c.f32.eXmY %v8664_v36, %v8664_v36, 56  ;;  %v8667_v41 = vtrunc.f32 %v8467_v4 }
 0x26a   :  { %v9481_v37 = vpack.c.f32.eXmY %v8666_v49, %v8666_v49, 56  ;;  %v8070_v20 = vmul.f32 255.0, %v5384_v62  ;;  %v8669_v2 = vtrunc.f32 %v8469_v47  ;;  %v8071_v39 = vmul.f32 255.0, %v5453_v28 }
 0x26b   :  { %10322 = vst [vmem:[#allocation7 + $0xe8] sm:$0xff] %v10232_v11  ;;  %v8268_v53 = vmax.f32 %v8068_v25, 0.0  ;;  %v8073_v45 = vmul.f32 255.0, %v5524_v26  ;;  %v9473_v57 = vpack.c.b8 %v9469_v58, %v9469_v58  ;;  %v9487_v13 = vpack.c.f32.eXmY %v8667_v41, %v8667_v41, 56 }
 0x26c   :  { %v9485_v34 = vpack.c.b8 %v9481_v37, %v9481_v37  ;;  %v8270_v6 = vmax.f32 %v8070_v20, 0.0  ;;  %v9499_v8 = vpack.c.f32.eXmY %v8669_v2, %v8669_v2, 56  ;;  %v8271_v59 = vmax.f32 %v8071_v39, 0.0  ;;  %v5808_v37 = vpop.f32.mrb[68].mxu1 }
 0x26d   :  { %v8468_v24 = vmin.f32 %v8268_v53, 255.0  ;;  %v8273_v32 = vmax.f32 %v8073_v45, 0.0  ;;  %v10064_v19 = vunpack.c.0.s8 %v9473_v57  ;;  %v9491_v5 = vpack.c.b8 %v9487_v13, %v9487_v13  ;;  %v5810_v45 = vpop.f32.mrb[69].mxu1 }
 0x26e   :  { %v10066_v30 = vunpack.c.0.s8 %v9485_v34  ;;  %v8470_v17 = vmin.f32 %v8270_v6, 255.0  ;;  %v9503_v7 = vpack.c.b8 %v9499_v8, %v9499_v8  ;;  %v8471_v38 = vmin.f32 %v8271_v59, 255.0 }
 0x26f   :  { %v8668_v48 = vtrunc.f32 %v8468_v24  ;;  %v8473_v52 = vmin.f32 %v8273_v32, 255.0  ;;  %v10233_v31 = vpack.c.b16 %v10064_v19, %v10063_v1  ;;  %v10067_v62 = vunpack.c.0.s8 %v9491_v5 }
 0x270   :  { %v10234_v40 = vpack.c.b16 %v10066_v30, %v10065_v9  ;;  %v8670_v3 = vtrunc.f32 %v8470_v17  ;;  %v10069_v46 = vunpack.c.0.s8 %v9503_v7  ;;  %v8671_v21 = vtrunc.f32 %v8471_v38  ;;  %v5737_v9 = vpop.f32.mrb[68].mxu0 }
 0x271   :  { %v9493_v12 = vpack.c.f32.eXmY %v8668_v48, %v8668_v48, 56  ;;  %v8673_v14 = vtrunc.f32 %v8473_v52  ;;  %v8072_v23 = vmul.f32 255.0, %v5455_v50  ;;  %v8074_v0 = vmul.f32 255.0, %v5526_v60  ;;  %v5739_v41 = vpop.f32.mrb[69].mxu0 }
 0x272   :  { %v10235_v15 = vpack.c.b8 %v10234_v40, %v10233_v31  ;;  %v9505_v18 = vpack.c.f32.eXmY %v8670_v3, %v8670_v3, 56  ;;  %v9511_v16 = vpack.c.f32.eXmY %v8671_v21, %v8671_v21, 56  ;;  %v8075_v55 = vmul.f32 255.0, %v5595_v51 }
 0x273   :  { %v9497_v42 = vpack.c.b8 %v9493_v12, %v9493_v12  ;;  %v9523_v44 = vpack.c.f32.eXmY %v8673_v14, %v8673_v14, 56  ;;  %v8272_v27 = vmax.f32 %v8072_v23, 0.0  ;;  %v8274_v29 = vmax.f32 %v8074_v0, 0.0  ;;  %v5879_v12 = vpop.f32.mrb[70].mxu0 }
 0x274   :  { %10323 = vst [vmem:[#allocation7 + $0xf0] sm:$0xff] %v10235_v15  ;;  %v9509_v61 = vpack.c.b8 %v9505_v18, %v9505_v18  ;;  %v8077_v22 = vmul.f32 255.0, %v5666_v54  ;;  %v9515_v56 = vpack.c.b8 %v9511_v16, %v9511_v16  ;;  %v8275_v63 = vmax.f32 %v8075_v55, 0.0  ;;  %v5950_v18 = vpop.f32.mrb[70].mxu1  ;;  %v5881_v23 = vpop.f32.mrb[71].mxu0 }
 0x275   :  { %v10068_v43 = vunpack.c.0.s8 %v9497_v42  ;;  %v9527_v35 = vpack.c.b8 %v9523_v44, %v9523_v44  ;;  %v8472_v1 = vmin.f32 %v8272_v27, 255.0  ;;  %v8474_v36 = vmin.f32 %v8274_v29, 255.0  ;;  %v5952_v55 = vpop.f32.mrb[71].mxu1 }
 0x276   :  { %v10070_v28 = vunpack.c.0.s8 %v9509_v61  ;;  %v8277_v49 = vmax.f32 %v8077_v22, 0.0  ;;  %v10071_v26 = vunpack.c.0.s8 %v9515_v56  ;;  %v8475_v11 = vmin.f32 %v8275_v63, 255.0 }
 0x277   :  { %v10236_v4 = vpack.c.b16 %v10068_v43, %v10067_v62  ;;  %v10073_v50 = vunpack.c.0.s8 %v9527_v35  ;;  %v8672_v25 = vtrunc.f32 %v8472_v1  ;;  %v8674_v60 = vtrunc.f32 %v8474_v36 }
 0x278   :  { %v10237_v47 = vpack.c.b16 %v10070_v28, %v10069_v46  ;;  %v8477_v58 = vmin.f32 %v8277_v49, 255.0  ;;  %v8675_v20 = vtrunc.f32 %v8475_v11  ;;  %v8076_v2 = vmul.f32 255.0, %v5597_v10 }
 0x279   :  { %v8078_v53 = vmul.f32 255.0, %v5668_v33  ;;  %v8079_v39 = vmul.f32 255.0, %v5737_v9  ;;  %v9517_v34 = vpack.c.f32.eXmY %v8672_v25, %v8672_v25, 56  ;;  %v9529_v13 = vpack.c.f32.eXmY %v8674_v60, %v8674_v60, 56 }
 0x27a   :  { %v10238_v57 = vpack.c.b8 %v10237_v47, %v10236_v4  ;;  %v8677_v6 = vtrunc.f32 %v8477_v58  ;;  %v9535_v8 = vpack.c.f32.eXmY %v8675_v20, %v8675_v20, 56  ;;  %v8276_v24 = vmax.f32 %v8076_v2, 0.0  ;;  %v6021_v2 = vpop.f32.mrb[72].mxu0 }
 0x27b   :  { %v8278_v59 = vmax.f32 %v8078_v53, 0.0  ;;  %v8279_v32 = vmax.f32 %v8079_v39, 0.0  ;;  %v9521_v19 = vpack.c.b8 %v9517_v34, %v9517_v34  ;;  %v9533_v30 = vpack.c.b8 %v9529_v13, %v9529_v13  ;;  %v6092_v34 = vpop.f32.mrb[72].mxu1  ;;  %v6023_v13 = vpop.f32.mrb[73].mxu0 }
 0x27c   :  { %10324 = vst [vmem:[#allocation7 + $0xf8] sm:$0xff] %v10238_v57  ;;  %v9547_v5 = vpack.c.f32.eXmY %v8677_v6, %v8677_v6, 56  ;;  %v8081_v17 = vmul.f32 255.0, %v5808_v37  ;;  %v9539_v7 = vpack.c.b8 %v9535_v8, %v9535_v8  ;;  %v8476_v48 = vmin.f32 %v8276_v24, 255.0 }
 0x27d   :  { %v8478_v38 = vmin.f32 %v8278_v59, 255.0  ;;  %v8479_v52 = vmin.f32 %v8279_v32, 255.0  ;;  %v10072_v51 = vunpack.c.0.s8 %v9521_v19  ;;  %v10074_v31 = vunpack.c.0.s8 %v9533_v30  ;;  %v6094_v32 = vpop.f32.mrb[73].mxu1 }
 0x27e   :  { %v9551_v40 = vpack.c.b8 %v9547_v5, %v9547_v5  ;;  %v8281_v62 = vmax.f32 %v8081_v17, 0.0  ;;  %v10075_v3 = vunpack.c.0.s8 %v9539_v7  ;;  %v8676_v54 = vtrunc.f32 %v8476_v48 }
 0x27f   :  { %v8678_v10 = vtrunc.f32 %v8478_v38  ;;  %v8679_v46 = vtrunc.f32 %v8479_v52  ;;  %v10239_v21 = vpack.c.b16 %v10072_v51, %v10071_v26  ;;  %v10240_v14 = vpack.c.b16 %v10074_v31, %v10073_v50 }
 0x280   :  { %v10077_v33 = vunpack.c.0.s8 %v9551_v40  ;;  %v8481_v15 = vmin.f32 %v8281_v62, 255.0  ;;  %v9541_v0 = vpack.c.f32.eXmY %v8676_v54, %v8676_v54, 56  ;;  %v8080_v16 = vmul.f32 255.0, %v5739_v41 }
 0x281   :  { %v9553_v42 = vpack.c.f32.eXmY %v8678_v10, %v8678_v10, 56  ;;  %v8082_v44 = vmul.f32 255.0, %v5810_v45  ;;  %v10241_v61 = vpack.c.b8 %v10240_v14, %v10239_v21  ;;  %v9559_v27 = vpack.c.f32.eXmY %v8679_v46, %v8679_v46, 56 }
 0x282   :  { %v8681_v29 = vtrunc.f32 %v8481_v15  ;;  %v8083_v22 = vmul.f32 255.0, %v5879_v12  ;;  %v9545_v43 = vpack.c.b8 %v9541_v0, %v9541_v0  ;;  %v8280_v35 = vmax.f32 %v8080_v16, 0.0 }
 0x283   :  { %v9557_v56 = vpack.c.b8 %v9553_v42, %v9553_v42  ;;  %v8282_v63 = vmax.f32 %v8082_v44, 0.0  ;;  %10325 = vst [vmem:[#allocation7 + $0x100] sm:$0xff] %v10241_v61  ;;  %v9563_v28 = vpack.c.b8 %v9559_v27, %v9559_v27  ;;  %v8085_v49 = vmul.f32 255.0, %v5950_v18  ;;  %v6163_v42 = vpop.f32.mrb[74].mxu0 }
 0x284   :  { %v9571_v1 = vpack.c.f32.eXmY %v8681_v29, %v8681_v29, 56  ;;  %v8283_v36 = vmax.f32 %v8083_v22, 0.0  ;;  %v10076_v4 = vunpack.c.0.s8 %v9545_v43  ;;  %v8480_v50 = vmin.f32 %v8280_v35, 255.0  ;;  %v6234_v27 = vpop.f32.mrb[74].mxu1  ;;  %v6165_v29 = vpop.f32.mrb[75].mxu0 }
 0x285   :  { %v10078_v26 = vunpack.c.0.s8 %v9557_v56  ;;  %v8482_v11 = vmin.f32 %v8282_v63, 255.0  ;;  %v10079_v9 = vunpack.c.0.s8 %v9563_v28  ;;  %v8285_v60 = vmax.f32 %v8085_v49, 0.0  ;;  %v6236_v63 = vpop.f32.mrb[75].mxu1 }
 0x286   :  { %v9575_v47 = vpack.c.b8 %v9571_v1, %v9571_v1  ;;  %v8483_v25 = vmin.f32 %v8283_v36, 255.0  ;;  %v10242_v58 = vpack.c.b16 %v10076_v4, %v10075_v3  ;;  %v8680_v41 = vtrunc.f32 %v8480_v50 }
 0x287   :  { %v10243_v37 = vpack.c.b16 %v10078_v26, %v10077_v33  ;;  %v8682_v20 = vtrunc.f32 %v8482_v11  ;;  %v8485_v45 = vmin.f32 %v8285_v60, 255.0  ;;  %v8084_v57 = vmul.f32 255.0, %v5881_v23 }
 0x288   :  { %v10081_v53 = vunpack.c.0.s8 %v9575_v47  ;;  %v8683_v39 = vtrunc.f32 %v8483_v25  ;;  %v9565_v8 = vpack.c.f32.eXmY %v8680_v41, %v8680_v41, 56  ;;  %v8086_v59 = vmul.f32 255.0, %v5952_v55 }
 0x289   :  { %v10244_v6 = vpack.c.b8 %v10243_v37, %v10242_v58  ;;  %v9577_v24 = vpack.c.f32.eXmY %v8682_v20, %v8682_v20, 56  ;;  %v8685_v30 = vtrunc.f32 %v8485_v45  ;;  %v8284_v5 = vmax.f32 %v8084_v57, 0.0 }
 0x28a   :  { %v9583_v19 = vpack.c.f32.eXmY %v8683_v39, %v8683_v39, 56  ;;  %v8087_v17 = vmul.f32 255.0, %v6021_v2  ;;  %v9569_v7 = vpack.c.b8 %v9565_v8, %v9565_v8  ;;  %v8286_v38 = vmax.f32 %v8086_v59, 0.0 }
 0x28b   :  { %10326 = vst [vmem:[#allocation7 + $0x108] sm:$0xff] %v10244_v6  ;;  %v9581_v48 = vpack.c.b8 %v9577_v24, %v9577_v24  ;;  %v8089_v52 = vmul.f32 255.0, %v6092_v34  ;;  %v9595_v31 = vpack.c.f32.eXmY %v8685_v30, %v8685_v30, 56  ;;  %v8484_v40 = vmin.f32 %v8284_v5, 255.0 }
 0x28c   :  { %v9587_v51 = vpack.c.b8 %v9583_v19, %v9583_v19  ;;  %v8287_v62 = vmax.f32 %v8087_v17, 0.0  ;;  %v10080_v3 = vunpack.c.0.s8 %v9569_v7  ;;  %v8486_v10 = vmin.f32 %v8286_v38, 255.0 }
 0x28d   :  { %v10082_v54 = vunpack.c.0.s8 %v9581_v48  ;;  %v8289_v46 = vmax.f32 %v8089_v52, 0.0  ;;  %v9599_v21 = vpack.c.b8 %v9595_v31, %v9595_v31  ;;  %v8684_v14 = vtrunc.f32 %v8484_v40  ;;  %v6305_v8 = vpop.f32.mrb[76].mxu0 }
 0x28e   :  { %v10083_v12 = vunpack.c.0.s8 %v9587_v51  ;;  %v8487_v33 = vmin.f32 %v8287_v62, 255.0  ;;  %v10245_v15 = vpack.c.b16 %v10080_v3, %v10079_v9  ;;  %v8686_v23 = vtrunc.f32 %v8486_v10  ;;  %v6376_v30 = vpop.f32.mrb[76].mxu1  ;;  %v6307_v5 = vpop.f32.mrb[77].mxu0 }
 0x28f   :  { %v10246_v18 = vpack.c.b16 %v10082_v54, %v10081_v53  ;;  %v8489_v0 = vmin.f32 %v8289_v46, 255.0  ;;  %v10085_v16 = vunpack.c.0.s8 %v9599_v21  ;;  %v9589_v44 = vpack.c.f32.eXmY %v8684_v14, %v8684_v14, 56  ;;  %v6378_v52 = vpop.f32.mrb[77].mxu1 }
 0x290   :  { %v8687_v55 = vtrunc.f32 %v8487_v33  ;;  %v8088_v61 = vmul.f32 255.0, %v6023_v13  ;;  %v9601_v43 = vpack.c.f32.eXmY %v8686_v23, %v8686_v23, 56  ;;  %v8090_v35 = vmul.f32 255.0, %v6094_v32 }
 0x291   :  { %v10247_v22 = vpack.c.b8 %v10246_v18, %v10245_v15  ;;  %v8689_v56 = vtrunc.f32 %v8489_v0  ;;  %v9593_v28 = vpack.c.b8 %v9589_v44, %v9589_v44  ;;  %v8091_v49 = vmul.f32 255.0, %v6163_v42 }
 0x292   :  { %v9607_v1 = vpack.c.f32.eXmY %v8687_v55, %v8687_v55, 56  ;;  %v8288_v36 = vmax.f32 %v8088_v61, 0.0  ;;  %v9605_v4 = vpack.c.b8 %v9601_v43, %v9601_v43  ;;  %v8290_v50 = vmax.f32 %v8090_v35, 0.0 }
 0x293   :  { %10327 = vst [vmem:[#allocation7 + $0x110] sm:$0xff] %v10247_v22  ;;  %v9619_v26 = vpack.c.f32.eXmY %v8689_v56, %v8689_v56, 56  ;;  %v8093_v11 = vmul.f32 255.0, %v6234_v27  ;;  %v10084_v9 = vunpack.c.0.s8 %v9593_v28  ;;  %v8291_v60 = vmax.f32 %v8091_v49, 0.0 }
 0x294   :  { %v9611_v47 = vpack.c.b8 %v9607_v1, %v9607_v1  ;;  %v8488_v25 = vmin.f32 %v8288_v36, 255.0  ;;  %v10086_v58 = vunpack.c.0.s8 %v9605_v4  ;;  %v8490_v41 = vmin.f32 %v8290_v50, 255.0 }
 0x295   :  { %v9623_v37 = vpack.c.b8 %v9619_v26, %v9619_v26  ;;  %v8293_v20 = vmax.f32 %v8093_v11, 0.0  ;;  %v10248_v2 = vpack.c.b16 %v10084_v9, %v10083_v12  ;;  %v8491_v45 = vmin.f32 %v8291_v60, 255.0 }
 0x296   :  { %v10087_v53 = vunpack.c.0.s8 %v9611_v47  ;;  %v8688_v39 = vtrunc.f32 %v8488_v25  ;;  %v10249_v57 = vpack.c.b16 %v10086_v58, %v10085_v16  ;;  %v8690_v13 = vtrunc.f32 %v8490_v41 }
 0x297   :  { %v10089_v34 = vunpack.c.0.s8 %v9623_v37  ;;  %v8493_v6 = vmin.f32 %v8293_v20, 255.0  ;;  %v8691_v59 = vtrunc.f32 %v8491_v45  ;;  %v8092_v32 = vmul.f32 255.0, %v6165_v29  ;;  %v6447_v43 = vpop.f32.mrb[78].mxu0 }
 0x298   :  { %v9613_v24 = vpack.c.f32.eXmY %v8688_v39, %v8688_v39, 56  ;;  %v8094_v19 = vmul.f32 255.0, %v6236_v63  ;;  %v10250_v17 = vpack.c.b8 %v10249_v57, %v10248_v2  ;;  %v9625_v7 = vpack.c.f32.eXmY %v8690_v13, %v8690_v13, 56  ;;  %v6518_v1 = vpop.f32.mrb[78].mxu1  ;;  %v6449_v36 = vpop.f32.mrb[79].mxu0 }
 0x299   :  { %v8693_v48 = vtrunc.f32 %v8493_v6  ;;  %v8095_v38 = vmul.f32 255.0, %v6305_v8  ;;  %v9631_v31 = vpack.c.f32.eXmY %v8691_v59, %v8691_v59, 56  ;;  %v8292_v40 = vmax.f32 %v8092_v32, 0.0  ;;  %v6520_v11 = vpop.f32.mrb[79].mxu1 }
 0x29a   :  { %v9617_v51 = vpack.c.b8 %v9613_v24, %v9613_v24  ;;  %v8294_v62 = vmax.f32 %v8094_v19, 0.0  ;;  %10328 = vst [vmem:[#allocation7 + $0x118] sm:$0xff] %v10250_v17  ;;  %v9629_v3 = vpack.c.b8 %v9625_v7, %v9625_v7  ;;  %v8097_v46 = vmul.f32 255.0, %v6376_v30 }
 0x29b   :  { %v9643_v54 = vpack.c.f32.eXmY %v8693_v48, %v8693_v48, 56  ;;  %v8295_v10 = vmax.f32 %v8095_v38, 0.0  ;;  %v9635_v21 = vpack.c.b8 %v9631_v31, %v9631_v31  ;;  %v8492_v14 = vmin.f32 %v8292_v40, 255.0 }
 0x29c   :  { %v10088_v12 = vunpack.c.0.s8 %v9617_v51  ;;  %v8494_v33 = vmin.f32 %v8294_v62, 255.0  ;;  %v10090_v15 = vunpack.c.0.s8 %v9629_v3  ;;  %v8297_v0 = vmax.f32 %v8097_v46, 0.0 }
 0x29d   :  { %v9647_v18 = vpack.c.b8 %v9643_v54, %v9643_v54  ;;  %v8495_v23 = vmin.f32 %v8295_v10, 255.0  ;;  %v10091_v16 = vunpack.c.0.s8 %v9635_v21  ;;  %v8692_v44 = vtrunc.f32 %v8492_v14 }
 0x29e   :  { %v10251_v42 = vpack.c.b16 %v10088_v12, %v10087_v53  ;;  %v8694_v55 = vtrunc.f32 %v8494_v33  ;;  %v10252_v61 = vpack.c.b16 %v10090_v15, %v10089_v34  ;;  %v8497_v22 = vmin.f32 %v8297_v0, 255.0 }
 0x29f   :  { %v10093_v27 = vunpack.c.0.s8 %v9647_v18  ;;  %v8695_v29 = vtrunc.f32 %v8495_v23  ;;  %v9637_v56 = vpack.c.f32.eXmY %v8692_v44, %v8692_v44, 56  ;;  %v8096_v63 = vmul.f32 255.0, %v6307_v5 }
 0x2a0   :  { %v9649_v35 = vpack.c.f32.eXmY %v8694_v55, %v8694_v55, 56  ;;  %v8098_v28 = vmul.f32 255.0, %v6378_v52  ;;  %v10253_v49 = vpack.c.b8 %v10252_v61, %v10251_v42  ;;  %v8697_v26 = vtrunc.f32 %v8497_v22 }
 0x2a1   :  { %v9655_v4 = vpack.c.f32.eXmY %v8695_v29, %v8695_v29, 56  ;;  %v8099_v50 = vmul.f32 255.0, %v6447_v43  ;;  %v9641_v9 = vpack.c.b8 %v9637_v56, %v9637_v56  ;;  %v8296_v25 = vmax.f32 %v8096_v63, 0.0  ;;  %v6589_v7 = vpop.f32.mrb[80].mxu0 }
 0x2a2   :  { %v9653_v47 = vpack.c.b8 %v9649_v35, %v9649_v35  ;;  %v8298_v60 = vmax.f32 %v8098_v28, 0.0  ;;  %10329 = vst [vmem:[#allocation7 + $0x120] sm:$0xff] %v10253_v49  ;;  %v9667_v37 = vpack.c.f32.eXmY %v8697_v26, %v8697_v26, 56  ;;  %v8101_v20 = vmul.f32 255.0, %v6518_v1  ;;  %v6660_v31 = vpop.f32.mrb[80].mxu1  ;;  %v6591_v40 = vpop.f32.mrb[81].mxu0 }
 0x2a3   :  { %v9659_v58 = vpack.c.b8 %v9655_v4, %v9655_v4  ;;  %v8299_v41 = vmax.f32 %v8099_v50, 0.0  ;;  %v10092_v2 = vunpack.c.0.s8 %v9641_v9  ;;  %v8496_v39 = vmin.f32 %v8296_v25, 255.0  ;;  %v6662_v46 = vpop.f32.mrb[81].mxu1 }
 0x2a4   :  { %v10094_v53 = vunpack.c.0.s8 %v9653_v47  ;;  %v8498_v45 = vmin.f32 %v8298_v60, 255.0  ;;  %v9671_v34 = vpack.c.b8 %v9667_v37, %v9667_v37  ;;  %v8301_v6 = vmax.f32 %v8101_v20, 0.0 }
 0x2a5   :  { %v10095_v57 = vunpack.c.0.s8 %v9659_v58  ;;  %v8499_v13 = vmin.f32 %v8299_v41, 255.0  ;;  %v10254_v8 = vpack.c.b16 %v10092_v2, %v10091_v16  ;;  %v8696_v59 = vtrunc.f32 %v8496_v39 }
 0x2a6   :  { %v10255_v24 = vpack.c.b16 %v10094_v53, %v10093_v27  ;;  %v8698_v32 = vtrunc.f32 %v8498_v45  ;;  %v10097_v19 = vunpack.c.0.s8 %v9671_v34  ;;  %v8501_v5 = vmin.f32 %v8301_v6, 255.0 }
 0x2a7   :  { %v8699_v30 = vtrunc.f32 %v8499_v13  ;;  %v8100_v17 = vmul.f32 255.0, %v6449_v36  ;;  %v9661_v38 = vpack.c.f32.eXmY %v8696_v59, %v8696_v59, 56  ;;  %v8102_v51 = vmul.f32 255.0, %v6520_v11 }
 0x2a8   :  { %v10256_v48 = vpack.c.b8 %v10255_v24, %v10254_v8  ;;  %v9673_v52 = vpack.c.f32.eXmY %v8698_v32, %v8698_v32, 56  ;;  %v8701_v3 = vtrunc.f32 %v8501_v5  ;;  %v8103_v10 = vmul.f32 255.0, %v6589_v7 }
 0x2a9   :  { %v9679_v62 = vpack.c.f32.eXmY %v8699_v30, %v8699_v30, 56  ;;  %v8300_v54 = vmax.f32 %v8100_v17, 0.0  ;;  %v9665_v12 = vpack.c.b8 %v9661_v38, %v9661_v38  ;;  %v8302_v14 = vmax.f32 %v8102_v51, 0.0 }
 0x2aa   :  { %10330 = vst [vmem:[#allocation7 + $0x128] sm:$0xff] %v10256_v48  ;;  %v9677_v21 = vpack.c.b8 %v9673_v52, %v9673_v52  ;;  %v8105_v33 = vmul.f32 255.0, %v6660_v31  ;;  %v9691_v18 = vpack.c.f32.eXmY %v8701_v3, %v8701_v3, 56  ;;  %v8303_v0 = vmax.f32 %v8103_v10, 0.0 }
 0x2ab   :  { %v9683_v15 = vpack.c.b8 %v9679_v62, %v9679_v62  ;;  %v8500_v23 = vmin.f32 %v8300_v54, 255.0  ;;  %v10096_v42 = vunpack.c.0.s8 %v9665_v12  ;;  %v8502_v44 = vmin.f32 %v8302_v14, 255.0  ;;  %v6731_v4 = vpop.f32.mrb[82].mxu0 }
 0x2ac   :  { %v10098_v16 = vunpack.c.0.s8 %v9677_v21  ;;  %v8305_v55 = vmax.f32 %v8105_v33, 0.0  ;;  %v9695_v27 = vpack.c.b8 %v9691_v18, %v9691_v18  ;;  %v8503_v22 = vmin.f32 %v8303_v0, 255.0  ;;  %v6802_v47 = vpop.f32.mrb[82].mxu1  ;;  %v6733_v25 = vpop.f32.mrb[83].mxu0 }
 0x2ad   :  { %v10099_v61 = vunpack.c.0.s8 %v9683_v15  ;;  %v8700_v29 = vtrunc.f32 %v8500_v23  ;;  %v10257_v43 = vpack.c.b16 %v10096_v42, %v10095_v57  ;;  %v8702_v35 = vtrunc.f32 %v8502_v44  ;;  %v6804_v20 = vpop.f32.mrb[83].mxu1 }
 0x2ae   :  { %v10258_v56 = vpack.c.b16 %v10098_v16, %v10097_v19  ;;  %v8505_v63 = vmin.f32 %v8305_v55, 255.0  ;;  %v10101_v28 = vunpack.c.0.s8 %v9695_v27  ;;  %v8703_v36 = vtrunc.f32 %v8503_v22 }
 0x2af   :  { %v9685_v1 = vpack.c.f32.eXmY %v8700_v29, %v8700_v29, 56  ;;  %v8104_v49 = vmul.f32 255.0, %v6591_v40  ;;  %v9697_v50 = vpack.c.f32.eXmY %v8702_v35, %v8702_v35, 56  ;;  %v8106_v9 = vmul.f32 255.0, %v6662_v46 }
 0x2b0   :  { %v10259_v26 = vpack.c.b8 %v10258_v56, %v10257_v43  ;;  %v8705_v11 = vtrunc.f32 %v8505_v63  ;;  %v9703_v58 = vpack.c.f32.eXmY %v8703_v36, %v8703_v36, 56  ;;  %v8107_v41 = vmul.f32 255.0, %v6731_v4 }
 0x2b1   :  { %v9689_v60 = vpack.c.b8 %v9685_v1, %v9685_v1  ;;  %v8304_v37 = vmax.f32 %v8104_v49, 0.0  ;;  %v9701_v2 = vpack.c.b8 %v9697_v50, %v9697_v50  ;;  %v8306_v39 = vmax.f32 %v8106_v9, 0.0 }
 0x2b2   :  { %10331 = vst [vmem:[#allocation7 + $0x130] sm:$0xff] %v10259_v26  ;;  %v9715_v53 = vpack.c.f32.eXmY %v8705_v11, %v8705_v11, 56  ;;  %v8109_v45 = vmul.f32 255.0, %v6802_v47  ;;  %v9707_v34 = vpack.c.b8 %v9703_v58, %v9703_v58  ;;  %v8307_v6 = vmax.f32 %v8107_v41, 0.0 }
 0x2b3   :  { %v10100_v57 = vunpack.c.0.s8 %v9689_v60  ;;  %v8504_v13 = vmin.f32 %v8304_v37, 255.0  ;;  %v10102_v8 = vunpack.c.0.s8 %v9701_v2  ;;  %v8506_v59 = vmin.f32 %v8306_v39, 255.0 }
 0x2b4   :  { %v9719_v24 = vpack.c.b8 %v9715_v53, %v9715_v53  ;;  %v8309_v32 = vmax.f32 %v8109_v45, 0.0  ;;  %v10103_v30 = vunpack.c.0.s8 %v9707_v34  ;;  %v8507_v17 = vmin.f32 %v8307_v6, 255.0 }
 0x2b5   :  { %v10260_v19 = vpack.c.b16 %v10100_v57, %v10099_v61  ;;  %v8704_v5 = vtrunc.f32 %v8504_v13  ;;  %v10261_v7 = vpack.c.b16 %v10102_v8, %v10101_v28  ;;  %v8706_v38 = vtrunc.f32 %v8506_v59  ;;  %v6873_v3 = vpop.f32.mrb[84].mxu0 }
 0x2b6   :  { %v10105_v48 = vunpack.c.0.s8 %v9719_v24  ;;  %v8509_v52 = vmin.f32 %v8309_v32, 255.0  ;;  %v8707_v31 = vtrunc.f32 %v8507_v17  ;;  %v8108_v40 = vmul.f32 255.0, %v6733_v25  ;;  %v6944_v21 = vpop.f32.mrb[84].mxu1  ;;  %v6875_v14 = vpop.f32.mrb[85].mxu0 }
 0x2b7   :  { %v9709_v51 = vpack.c.f32.eXmY %v8704_v5, %v8704_v5, 56  ;;  %v8110_v62 = vmul.f32 255.0, %v6804_v20  ;;  %v10262_v54 = vpack.c.b8 %v10261_v7, %v10260_v19  ;;  %v9721_v10 = vpack.c.f32.eXmY %v8706_v38, %v8706_v38, 56  ;;  %v6946_v0 = vpop.f32.mrb[85].mxu1 }
 0x2b8   :  { %v8709_v46 = vtrunc.f32 %v8509_v52  ;;  %v8111_v12 = vmul.f32 255.0, %v6873_v3  ;;  %v9727_v15 = vpack.c.f32.eXmY %v8707_v31, %v8707_v31, 56  ;;  %v8308_v18 = vmax.f32 %v8108_v40, 0.0 }
 0x2b9   :  { %v9713_v33 = vpack.c.b8 %v9709_v51, %v9709_v51  ;;  %v8310_v23 = vmax.f32 %v8110_v62, 0.0  ;;  %10332 = vst [vmem:[#allocation7 + $0x138] sm:$0xff] %v10262_v54  ;;  %v9725_v42 = vpack.c.b8 %v9721_v10, %v9721_v10  ;;  %v8113_v55 = vmul.f32 255.0, %v6944_v21 }
 0x2ba   :  { %v9739_v16 = vpack.c.f32.eXmY %v8709_v46, %v8709_v46, 56  ;;  %v8311_v44 = vmax.f32 %v8111_v12, 0.0  ;;  %v9731_v27 = vpack.c.b8 %v9727_v15, %v9727_v15  ;;  %v8508_v29 = vmin.f32 %v8308_v18, 255.0 }
 0x2bb   :  { %v10104_v61 = vunpack.c.0.s8 %v9713_v33  ;;  %v8510_v22 = vmin.f32 %v8310_v23, 255.0  ;;  %v10106_v43 = vunpack.c.0.s8 %v9725_v42  ;;  %v8313_v63 = vmax.f32 %v8113_v55, 0.0 }
 0x2bc   :  { %v9743_v56 = vpack.c.b8 %v9739_v16, %v9739_v16  ;;  %v8511_v35 = vmin.f32 %v8311_v44, 255.0  ;;  %v10107_v1 = vunpack.c.0.s8 %v9731_v27  ;;  %v8708_v36 = vtrunc.f32 %v8508_v29 }
 0x2bd   :  { %v10263_v28 = vpack.c.b16 %v10104_v61, %v10103_v30  ;;  %v8710_v49 = vtrunc.f32 %v8510_v22  ;;  %v10264_v4 = vpack.c.b16 %v10106_v43, %v10105_v48  ;;  %v8513_v11 = vmin.f32 %v8313_v63, 255.0 }
 0x2be   :  { %v10109_v26 = vunpack.c.0.s8 %v9743_v56  ;;  %v8711_v50 = vtrunc.f32 %v8511_v35  ;;  %v9733_v9 = vpack.c.f32.eXmY %v8708_v36, %v8708_v36, 56  ;;  %v8112_v25 = vmul.f32 255.0, %v6875_v14 }
 0x2bf   :  { %v9745_v47 = vpack.c.f32.eXmY %v8710_v49, %v8710_v49, 56  ;;  %v8114_v60 = vmul.f32 255.0, %v6946_v0  ;;  %v7015_v58 = vpop.f32.mrb[86].mxu0  ;;  %v10265_v37 = vpack.c.b8 %v10264_v4, %v10263_v28  ;;  %v8713_v20 = vtrunc.f32 %v8513_v11 }
 0x2c0   :  { %v9751_v41 = vpack.c.f32.eXmY %v8711_v50, %v8711_v50, 56  ;;  %v8115_v2 = vmul.f32 255.0, %v7015_v58  ;;  %v7086_v53 = vpop.f32.mrb[86].mxu1  ;;  %v7017_v39 = vpop.f32.mrb[87].mxu0  ;;  %v9737_v45 = vpack.c.b8 %v9733_v9, %v9733_v9  ;;  %v8312_v34 = vmax.f32 %v8112_v25, 0.0 }
 0x2c1   :  { %v9749_v57 = vpack.c.b8 %v9745_v47, %v9745_v47  ;;  %v8314_v13 = vmax.f32 %v8114_v60, 0.0  ;;  %v7088_v6 = vpop.f32.mrb[87].mxu1  ;;  %10333 = vst [vmem:[#allocation7 + $0x140] sm:$0xff] %v10265_v37  ;;  %v9763_v24 = vpack.c.f32.eXmY %v8713_v20, %v8713_v20, 56  ;;  %v8117_v32 = vmul.f32 255.0, %v7086_v53 }
 0x2c2   :  { %v9755_v8 = vpack.c.b8 %v9751_v41, %v9751_v41  ;;  %v8315_v59 = vmax.f32 %v8115_v2, 0.0  ;;  %v10108_v19 = vunpack.c.0.s8 %v9737_v45  ;;  %v8512_v5 = vmin.f32 %v8312_v34, 255.0 }
 0x2c3   :  { %v10110_v30 = vunpack.c.0.s8 %v9749_v57  ;;  %v8514_v17 = vmin.f32 %v8314_v13, 255.0  ;;  %v9767_v48 = vpack.c.b8 %v9763_v24, %v9763_v24  ;;  %v8317_v52 = vmax.f32 %v8117_v32, 0.0 }
 0x2c4   :  { %v10111_v7 = vunpack.c.0.s8 %v9755_v8  ;;  %v8515_v38 = vmin.f32 %v8315_v59, 255.0  ;;  %v10266_v51 = vpack.c.b16 %v10108_v19, %v10107_v1  ;;  %v8712_v40 = vtrunc.f32 %v8512_v5 }
 0x2c5   :  { %v10267_v31 = vpack.c.b16 %v10110_v30, %v10109_v26  ;;  %v8714_v62 = vtrunc.f32 %v8514_v17  ;;  %v10113_v3 = vunpack.c.0.s8 %v9767_v48  ;;  %v8517_v10 = vmin.f32 %v8317_v52, 255.0 }
 0x2c6   :  { %v8715_v54 = vtrunc.f32 %v8515_v38  ;;  %v8116_v46 = vmul.f32 255.0, %v7017_v39  ;;  %v9757_v21 = vpack.c.f32.eXmY %v8712_v40, %v8712_v40, 56  ;;  %v8118_v33 = vmul.f32 255.0, %v7088_v6 }
 0x2c7   :  { %v10268_v12 = vpack.c.b8 %v10267_v31, %v10266_v51  ;;  %v9769_v14 = vpack.c.f32.eXmY %v8714_v62, %v8714_v62, 56  ;;  %v8717_v23 = vtrunc.f32 %v8517_v10 }
 0x2c8   :  { %v7157_v15 = vpop.f32.mrb[88].mxu0  ;;  %v9775_v18 = vpack.c.f32.eXmY %v8715_v54, %v8715_v54, 56  ;;  %v8316_v0 = vmax.f32 %v8116_v46, 0.0  ;;  %v9761_v55 = vpack.c.b8 %v9757_v21, %v9757_v21  ;;  %v8318_v27 = vmax.f32 %v8118_v33, 0.0 }
 0x2c9   :  { %v8119_v42 = vmul.f32 255.0, %v7157_v15  ;;  %v7228_v16 = vpop.f32.mrb[88].mxu1  ;;  %v7159_v44 = vpop.f32.mrb[89].mxu0  ;;  %10334 = vst [vmem:[#allocation7 + $0x148] sm:$0xff] %v10268_v12  ;;  %v9773_v61 = vpack.c.b8 %v9769_v14, %v9769_v14  ;;  %v9787_v56 = vpack.c.f32.eXmY %v8717_v23, %v8717_v23, 56 }
 0x2ca   :  { %v8121_v29 = vmul.f32 255.0, %v7228_v16  ;;  %v7230_v22 = vpop.f32.mrb[89].mxu1  ;;  %v9779_v43 = vpack.c.b8 %v9775_v18, %v9775_v18  ;;  %v8516_v35 = vmin.f32 %v8316_v0, 255.0  ;;  %v10112_v28 = vunpack.c.0.s8 %v9761_v55 }
 0x2cb   :  { %v8319_v63 = vmax.f32 %v8119_v42, 0.0  ;;  %v10114_v1 = vunpack.c.0.s8 %v9773_v61  ;;  %v8518_v36 = vmin.f32 %v8318_v27, 255.0  ;;  %v9791_v26 = vpack.c.b8 %v9787_v56, %v9787_v56 }
 0x2cc   :  { %v8321_v49 = vmax.f32 %v8121_v29, 0.0  ;;  %v10115_v4 = vunpack.c.0.s8 %v9779_v43  ;;  %v8716_v50 = vtrunc.f32 %v8516_v35  ;;  %v10269_v9 = vpack.c.b16 %v10112_v28, %v10111_v7 }
 0x2cd   :  { %v8519_v11 = vmin.f32 %v8319_v63, 255.0  ;;  %v10270_v47 = vpack.c.b16 %v10114_v1, %v10113_v3  ;;  %v8718_v25 = vtrunc.f32 %v8518_v36  ;;  %v10117_v58 = vunpack.c.0.s8 %v9791_v26 }
 0x2ce   :  { %v8521_v60 = vmin.f32 %v8321_v49, 255.0  ;;  %v9781_v37 = vpack.c.f32.eXmY %v8716_v50, %v8716_v50, 56  ;;  %v8120_v20 = vmul.f32 255.0, %v7159_v44  ;;  %v8122_v45 = vmul.f32 255.0, %v7230_v22 }
 0x2cf   :  { %v8719_v41 = vtrunc.f32 %v8519_v11  ;;  %v10271_v2 = vpack.c.b8 %v10270_v47, %v10269_v9  ;;  %v9793_v53 = vpack.c.f32.eXmY %v8718_v25, %v8718_v25, 56 }
 0x2d0   :  { %v8721_v39 = vtrunc.f32 %v8521_v60  ;;  %v7299_v57 = vpop.f32.mrb[90].mxu0  ;;  %v9785_v34 = vpack.c.b8 %v9781_v37, %v9781_v37  ;;  %v8320_v6 = vmax.f32 %v8120_v20, 0.0  ;;  %v8322_v19 = vmax.f32 %v8122_v45, 0.0 }
 0x2d1   :  { %v9799_v13 = vpack.c.f32.eXmY %v8719_v41, %v8719_v41, 56  ;;  %v8123_v8 = vmul.f32 255.0, %v7299_v57  ;;  %v7301_v24 = vpop.f32.mrb[91].mxu0  ;;  %10335 = vst [vmem:[#allocation7 + $0x150] sm:$0xff] %v10271_v2  ;;  %v9797_v59 = vpack.c.b8 %v9793_v53, %v9793_v53 }
 0x2d2   :  { %v9811_v32 = vpack.c.f32.eXmY %v8721_v39, %v8721_v39, 56  ;;  %v8124_v30 = vmul.f32 255.0, %v7301_v24  ;;  %v10116_v5 = vunpack.c.0.s8 %v9785_v34  ;;  %v8520_v17 = vmin.f32 %v8320_v6, 255.0 }
 0x2d3   :  { %v8323_v7 = vmax.f32 %v8123_v8, 0.0  ;;  %v10118_v48 = vunpack.c.0.s8 %v9797_v59  ;;  %v8522_v38 = vmin.f32 %v8322_v19, 255.0  ;;  %v9803_v31 = vpack.c.b8 %v9799_v13, %v9799_v13 }
 0x2d4   :  { %v8324_v52 = vmax.f32 %v8124_v30, 0.0  ;;  %v10272_v51 = vpack.c.b16 %v10116_v5, %v10115_v4  ;;  %v8720_v40 = vtrunc.f32 %v8520_v17  ;;  %v9815_v54 = vpack.c.b8 %v9811_v32, %v9811_v32 }
 0x2d5   :  { %v8523_v62 = vmin.f32 %v8323_v7, 255.0  ;;  %v10273_v3 = vpack.c.b16 %v10118_v48, %v10117_v58  ;;  %v8722_v10 = vtrunc.f32 %v8522_v38  ;;  %v10119_v23 = vunpack.c.0.s8 %v9803_v31 }
 0x2d6   :  { %v8524_v46 = vmin.f32 %v8324_v52, 255.0  ;;  %v9805_v12 = vpack.c.f32.eXmY %v8720_v40, %v8720_v40, 56  ;;  %v10121_v55 = vunpack.c.0.s8 %v9815_v54 }
 0x2d7   :  { %v8723_v21 = vtrunc.f32 %v8523_v62  ;;  %v10274_v14 = vpack.c.b8 %v10273_v3, %v10272_v51  ;;  %v9817_v33 = vpack.c.f32.eXmY %v8722_v10, %v8722_v10, 56  ;;  %v7370_v15 = vpop.f32.mrb[90].mxu1 }
 0x2d8   :  { %v8724_v18 = vtrunc.f32 %v8524_v46  ;;  %v9809_v0 = vpack.c.b8 %v9805_v12, %v9805_v12  ;;  %v8125_v16 = vmul.f32 255.0, %v7370_v15  ;;  %v7372_v44 = vpop.f32.mrb[91].mxu1 }
 0x2d9   :  { %v9823_v42 = vpack.c.f32.eXmY %v8723_v21, %v8723_v21, 56  ;;  %10336 = vst [vmem:[#allocation7 + $0x158] sm:$0xff] %v10274_v14  ;;  %v9821_v61 = vpack.c.b8 %v9817_v33, %v9817_v33  ;;  %v8126_v29 = vmul.f32 255.0, %v7372_v44 }
 0x2da   :  { %v9829_v27 = vpack.c.f32.eXmY %v8724_v18, %v8724_v18, 56  ;;  %v10120_v22 = vunpack.c.0.s8 %v9809_v0  ;;  %v8325_v56 = vmax.f32 %v8125_v16, 0.0 }
 0x2db   :  { %v9827_v43 = vpack.c.b8 %v9823_v42, %v9823_v42  ;;  %v10122_v35 = vunpack.c.0.s8 %v9821_v61  ;;  %v8326_v28 = vmax.f32 %v8126_v29, 0.0 }
 0x2dc   :  { %v9833_v63 = vpack.c.b8 %v9829_v27, %v9829_v27  ;;  %v10275_v1 = vpack.c.b16 %v10120_v22, %v10119_v23  ;;  %v8525_v49 = vmin.f32 %v8325_v56, 255.0 }
 0x2dd   :  { %v10123_v36 = vunpack.c.0.s8 %v9827_v43  ;;  %v10276_v4 = vpack.c.b16 %v10122_v35, %v10121_v55  ;;  %v8526_v50 = vmin.f32 %v8326_v28, 255.0 }
 0x2de   :  { %v10124_v26 = vunpack.c.0.s8 %v9833_v63  ;;  %v8725_v11 = vtrunc.f32 %v8525_v49 }
 0x2df   :  { %v10277_v9 = vpack.c.b8 %v10276_v4, %v10275_v1  ;;  %v8726_v25 = vtrunc.f32 %v8526_v50 }
 0x2e0   :  { %v10278_v47 = vpack.c.b16 %v10124_v26, %v10123_v36  ;;  %v9835_v60 = vpack.c.f32.eXmY %v8725_v11, %v8725_v11, 56  ;;  %v7441_v37 = vpop.f32.mrb[92].mxu0  ;;  %v7512_v41 = vpop.f32.mrb[92].mxu1 }
 0x2e1   :  { %10337 = vst [vmem:[#allocation7 + $0x160] sm:$0xff] %v10277_v9  ;;  %v9841_v58 = vpack.c.f32.eXmY %v8726_v25, %v8726_v25, 56  ;;  %v8127_v2 = vmul.f32 255.0, %v7441_v37  ;;  %v8129_v53 = vmul.f32 255.0, %v7512_v41  ;;  %v7443_v39 = vpop.f32.mrb[93].mxu0  ;;  %v7514_v45 = vpop.f32.mrb[93].mxu1 }
 0x2e2   :  { %v9839_v20 = vpack.c.b8 %v9835_v60, %v9835_v60  ;;  %v8128_v34 = vmul.f32 255.0, %v7443_v39  ;;  %v8130_v13 = vmul.f32 255.0, %v7514_v45 }
 0x2e3   :  { %v9845_v57 = vpack.c.b8 %v9841_v58, %v9841_v58  ;;  %v8327_v8 = vmax.f32 %v8127_v2, 0.0  ;;  %v8329_v24 = vmax.f32 %v8129_v53, 0.0 }
 0x2e4   :  { %v10125_v6 = vunpack.c.0.s8 %v9839_v20  ;;  %v8328_v32 = vmax.f32 %v8128_v34, 0.0  ;;  %v8330_v19 = vmax.f32 %v8130_v13, 0.0 }
 0x2e5   :  { %v10126_v59 = vunpack.c.0.s8 %v9845_v57  ;;  %v8527_v30 = vmin.f32 %v8327_v8, 255.0  ;;  %v8529_v5 = vmin.f32 %v8329_v24, 255.0 }
 0x2e6   :  { %v8528_v7 = vmin.f32 %v8328_v32, 255.0  ;;  %v8530_v48 = vmin.f32 %v8330_v19, 255.0 }
 0x2e7   :  { %v10279_v17 = vpack.c.b16 %v10126_v59, %v10125_v6  ;;  %v8727_v38 = vtrunc.f32 %v8527_v30  ;;  %v8729_v52 = vtrunc.f32 %v8529_v5 }
 0x2e8   :  { %v8728_v31 = vtrunc.f32 %v8528_v7  ;;  %v8730_v40 = vtrunc.f32 %v8530_v48 }
 0x2e9   :  { %v10280_v51 = vpack.c.b8 %v10279_v17, %v10278_v47  ;;  %v9847_v62 = vpack.c.f32.eXmY %v8727_v38, %v8727_v38, 56  ;;  %v9859_v3 = vpack.c.f32.eXmY %v8729_v52, %v8729_v52, 56 }
 0x2ea   :  { %v9853_v54 = vpack.c.f32.eXmY %v8728_v31, %v8728_v31, 56  ;;  %v9865_v10 = vpack.c.f32.eXmY %v8730_v40, %v8730_v40, 56 }
 0x2eb   :  { %10338 = vst [vmem:[#allocation7 + $0x168] sm:$0xff] %v10280_v51  ;;  %v7583_v46 = vpop.f32.mrb[94].mxu0  ;;  %v7654_v12 = vpop.f32.mrb[94].mxu1  ;;  %v9851_v21 = vpack.c.b8 %v9847_v62, %v9847_v62  ;;  %v9863_v14 = vpack.c.b8 %v9859_v3, %v9859_v3 }
 0x2ec   :  { %v8131_v33 = vmul.f32 255.0, %v7583_v46  ;;  %v8133_v15 = vmul.f32 255.0, %v7654_v12  ;;  %v7585_v18 = vpop.f32.mrb[95].mxu0  ;;  %v7656_v23 = vpop.f32.mrb[95].mxu1  ;;  %v9857_v0 = vpack.c.b8 %v9853_v54, %v9853_v54  ;;  %v9869_v42 = vpack.c.b8 %v9865_v10, %v9865_v10 }
 0x2ed   :  { %v8132_v16 = vmul.f32 255.0, %v7585_v18  ;;  %v8134_v44 = vmul.f32 255.0, %v7656_v23  ;;  %v10127_v55 = vunpack.c.0.s8 %v9851_v21  ;;  %v10129_v61 = vunpack.c.0.s8 %v9863_v14 }
 0x2ee   :  { %v8331_v27 = vmax.f32 %v8131_v33, 0.0  ;;  %v8333_v29 = vmax.f32 %v8133_v15, 0.0  ;;  %v10128_v22 = vunpack.c.0.s8 %v9857_v0  ;;  %v10130_v43 = vunpack.c.0.s8 %v9869_v42 }
 0x2ef   :  { %v8332_v56 = vmax.f32 %v8132_v16, 0.0  ;;  %v8334_v35 = vmax.f32 %v8134_v44, 0.0 }
 0x2f0   :  { %v8531_v63 = vmin.f32 %v8331_v27, 255.0  ;;  %v8533_v28 = vmin.f32 %v8333_v29, 255.0  ;;  %v10281_v1 = vpack.c.b16 %v10128_v22, %v10127_v55  ;;  %v10282_v36 = vpack.c.b16 %v10130_v43, %v10129_v61 }
 0x2f1   :  { %v8532_v49 = vmin.f32 %v8332_v56, 255.0  ;;  %v8534_v4 = vmin.f32 %v8334_v35, 255.0 }
 0x2f2   :  { %v8731_v26 = vtrunc.f32 %v8531_v63  ;;  %v8733_v50 = vtrunc.f32 %v8533_v28  ;;  %v10283_v11 = vpack.c.b8 %v10282_v36, %v10281_v1 }
 0x2f3   :  { %v8732_v9 = vtrunc.f32 %v8532_v49  ;;  %v8734_v47 = vtrunc.f32 %v8534_v4 }
 0x2f4   :  { %v9871_v25 = vpack.c.f32.eXmY %v8731_v26, %v8731_v26, 56  ;;  %v9883_v60 = vpack.c.f32.eXmY %v8733_v50, %v8733_v50, 56  ;;  %v7725_v58 = vpop.f32.mrb[96].mxu0  ;;  %10339 = vst [vmem:[#allocation7 + $0x170] sm:$0xff] %v10283_v11 }
 0x2f5   :  { %v9877_v37 = vpack.c.f32.eXmY %v8732_v9, %v8732_v9, 56  ;;  %v9889_v41 = vpack.c.f32.eXmY %v8734_v47, %v8734_v47, 56  ;;  %v8135_v20 = vmul.f32 255.0, %v7725_v58  ;;  %v7796_v2 = vpop.f32.mrb[96].mxu1  ;;  %v7727_v53 = vpop.f32.mrb[97].mxu0 }
 0x2f6   :  { %v9875_v39 = vpack.c.b8 %v9871_v25, %v9871_v25  ;;  %v9887_v45 = vpack.c.b8 %v9883_v60, %v9883_v60  ;;  %v8137_v57 = vmul.f32 255.0, %v7796_v2  ;;  %v8136_v34 = vmul.f32 255.0, %v7727_v53  ;;  %v7798_v13 = vpop.f32.mrb[97].mxu1 }
 0x2f7   :  { %v9881_v6 = vpack.c.b8 %v9877_v37, %v9877_v37  ;;  %v9893_v8 = vpack.c.b8 %v9889_v41, %v9889_v41  ;;  %v8335_v24 = vmax.f32 %v8135_v20, 0.0  ;;  %v8138_v59 = vmul.f32 255.0, %v7798_v13 }
 0x2f8   :  { %v10131_v32 = vunpack.c.0.s8 %v9875_v39  ;;  %v10133_v19 = vunpack.c.0.s8 %v9887_v45  ;;  %v8337_v30 = vmax.f32 %v8137_v57, 0.0  ;;  %v8336_v5 = vmax.f32 %v8136_v34, 0.0 }
 0x2f9   :  { %v10132_v17 = vunpack.c.0.s8 %v9881_v6  ;;  %v10134_v7 = vunpack.c.0.s8 %v9893_v8  ;;  %v8535_v48 = vmin.f32 %v8335_v24, 255.0  ;;  %v8338_v38 = vmax.f32 %v8138_v59, 0.0 }
 0x2fa   :  { %v8537_v52 = vmin.f32 %v8337_v30, 255.0  ;;  %v8536_v51 = vmin.f32 %v8336_v5, 255.0 }
 0x2fb   :  { %v10284_v31 = vpack.c.b16 %v10132_v17, %v10131_v32  ;;  %v10285_v40 = vpack.c.b16 %v10134_v7, %v10133_v19  ;;  %v8735_v62 = vtrunc.f32 %v8535_v48  ;;  %v8538_v3 = vmin.f32 %v8338_v38, 255.0 }
 0x2fc   :  { %v8737_v54 = vtrunc.f32 %v8537_v52  ;;  %v8736_v10 = vtrunc.f32 %v8536_v51 }
 0x2fd   :  { %v10286_v46 = vpack.c.b8 %v10285_v40, %v10284_v31  ;;  %v9895_v12 = vpack.c.f32.eXmY %v8735_v62, %v8735_v62, 56  ;;  %v8738_v21 = vtrunc.f32 %v8538_v3 }
 0x2fe   :  { %v9907_v14 = vpack.c.f32.eXmY %v8737_v54, %v8737_v54, 56  ;;  %v9901_v33 = vpack.c.f32.eXmY %v8736_v10, %v8736_v10, 56  ;;  %v7867_v23 = vpop.f32.mrb[98].mxu0 }
 0x2ff   :  { %10340 = vst [vmem:[#allocation7 + $0x178] sm:$0xff] %v10286_v46  ;;  %v9899_v15 = vpack.c.b8 %v9895_v12, %v9895_v12  ;;  %v9913_v18 = vpack.c.f32.eXmY %v8738_v21, %v8738_v21, 56  ;;  %v7938_v0 = vpop.f32.mrb[98].mxu1  ;;  %v8139_v44 = vmul.f32 255.0, %v7867_v23  ;;  %v7869_v61 = vpop.f32.mrb[99].mxu0 }
 0x300   :  { %v9911_v42 = vpack.c.b8 %v9907_v14, %v9907_v14  ;;  %v9905_v16 = vpack.c.b8 %v9901_v33, %v9901_v33  ;;  %v8141_v55 = vmul.f32 255.0, %v7938_v0  ;;  %v7940_v27 = vpop.f32.mrb[99].mxu1  ;;  %v8140_v43 = vmul.f32 255.0, %v7869_v61 }
 0x301   :  { %v10135_v29 = vunpack.c.0.s8 %v9899_v15  ;;  %v9917_v22 = vpack.c.b8 %v9913_v18, %v9913_v18  ;;  %v8142_v56 = vmul.f32 255.0, %v7940_v27  ;;  %v8339_v28 = vmax.f32 %v8139_v44, 0.0 }
 0x302   :  { %v10137_v35 = vunpack.c.0.s8 %v9911_v42  ;;  %v10136_v63 = vunpack.c.0.s8 %v9905_v16  ;;  %v8341_v1 = vmax.f32 %v8141_v55, 0.0  ;;  %v8340_v49 = vmax.f32 %v8140_v43, 0.0 }
 0x303   :  { %v10138_v36 = vunpack.c.0.s8 %v9917_v22  ;;  %v8342_v4 = vmax.f32 %v8142_v56, 0.0  ;;  %v8539_v50 = vmin.f32 %v8339_v28, 255.0 }
 0x304   :  { %v10287_v26 = vpack.c.b16 %v10136_v63, %v10135_v29  ;;  %v8541_v11 = vmin.f32 %v8341_v1, 255.0  ;;  %v8540_v47 = vmin.f32 %v8340_v49, 255.0 }
 0x305   :  { %v10288_v9 = vpack.c.b16 %v10138_v36, %v10137_v35  ;;  %v8542_v25 = vmin.f32 %v8342_v4, 255.0  ;;  %v8739_v60 = vtrunc.f32 %v8539_v50 }
 0x306   :  { %v8741_v58 = vtrunc.f32 %v8541_v11  ;;  %v8740_v41 = vtrunc.f32 %v8540_v47 }
 0x307   :  { %v10289_v37 = vpack.c.b8 %v10288_v9, %v10287_v26  ;;  %v8742_v20 = vtrunc.f32 %v8542_v25  ;;  %v9919_v2 = vpack.c.f32.eXmY %v8739_v60, %v8739_v60, 56 }
 0x308   :  { %v9931_v53 = vpack.c.f32.eXmY %v8741_v58, %v8741_v58, 56  ;;  %v9925_v39 = vpack.c.f32.eXmY %v8740_v41, %v8740_v41, 56 }
 0x309   :  { %10341 = vst [vmem:[#allocation7 + $0x180] sm:$0xff] %v10289_v37  ;;  %v9937_v45 = vpack.c.f32.eXmY %v8742_v20, %v8742_v20, 56  ;;  %v9923_v57 = vpack.c.b8 %v9919_v2, %v9919_v2 }
 0x30a   :  { %v9935_v34 = vpack.c.b8 %v9931_v53, %v9931_v53  ;;  %v9929_v13 = vpack.c.b8 %v9925_v39, %v9925_v39 }
 0x30b   :  { %v9941_v6 = vpack.c.b8 %v9937_v45, %v9937_v45  ;;  %v10139_v8 = vunpack.c.0.s8 %v9923_v57 }
 0x30c   :  { %v10141_v24 = vunpack.c.0.s8 %v9935_v34  ;;  %v10140_v59 = vunpack.c.0.s8 %v9929_v13 }
 0x30d   :  { %v10142_v32 = vunpack.c.0.s8 %v9941_v6 }
 0x30e   :  { %v10290_v19 = vpack.c.b16 %v10140_v59, %v10139_v8 }
 0x30f   :  { %v10291_v30 = vpack.c.b16 %v10142_v32, %v10141_v24 }
 0x311   :  { %v10292_v5 = vpack.c.b8 %v10291_v30, %v10290_v19 }
 0x313   :  { %10342 = vst [vmem:[#allocation7 + $0x188] sm:$0xff] %v10292_v5 }
 0x314   :  { %11324 = shalt.err (!%p11321_p6)
}
 0x315   :  { %s11325_s10 = scalar_lea.hbm %s13424_s2, 6400 }
 0x316   :  { %p11326_p7 = scmp.ne.s32.totalorder %s13424_s2, %s11325_s10  ;;  %p11329_p8 = scmp.lt.u32.totalorder %s11325_s10, %s13424_s2 }
 0x318   :  { %p11331_p9 = pnand %p11329_p8, %p11326_p7 }
 0x31a   :  { %11334 = shalt.err (!%p11331_p9)
}
 0x31b   :  { %10352 = dma.vmem_to_hbm [thread:$0]  %s10350_s6, 6400, %s13424_s2, [#allocation4]  }
 0x31c   :  { %11339 = dma.done.wait [#allocation4], 6400  }
 0x31d   :  { %11340 = vsyncadd [#allocation4], 4294960896 }
 0x31e   :  { %10356 = vsyncpa [#allocation3], 1 }
 0x31f   :  { %10357 = vsyncpa [#allocation6], 1 }
 0x320   :  { %10358 = vsyncpa [#allocation4], 1 }

</bundles_post_ra>
